<compile_context>
chip_gen: v5e
topology: v5e:2x2
jax: 0.10.0
libtpu: 0.0.40
codegen_flags: <defaults>
</compile_context>

<pallas_src>
import jax
import jax.numpy as jnp
from jax import lax
from jax.experimental import pallas as pl
from jax.experimental.pallas import tpu as pltpu


# ----------------------------------------------------------------------------
# Fused kernel: all LSTM layers + concat + linear in one body.
# ----------------------------------------------------------------------------
def _make_fused_kernel(num_layers, seq_len, batch, hidden):
    T, B, H = seq_len, batch, hidden
    n_w = 3 * num_layers + 3            # per-layer (w_ih, w_hh, b) + linear

    def kernel(x_ref, *args):
        # args = [w_ih_0, w_hh_0, b_0, ..., w_emb, w_h, b_lin,     (inputs)
        #         out_ref,                                         (output)
        #         gx_ref, hseq_ref]                                (scratch)
        w_refs = args[:n_w]
        out_ref = args[n_w]
        gx_ref, hseq_ref = args[n_w + 1:]

        for layer in range(num_layers):
            wih_ref, whh_ref, b_ref = w_refs[3 * layer:3 * layer + 3]

            # ---- Hoisted input projection: one MXU-shaped bf16 GEMM over all
            #      timesteps (f32 accumulation); bias folded in once.
            layer_in = x_ref[...] if layer == 0 else hseq_ref[...]
            gx_ref[...] = (
                jnp.dot(layer_in.astype(jnp.bfloat16), wih_ref[...],
                        preferred_element_type=jnp.float32)
                + b_ref[...])

            # ---- Serial recurrence: h, c live in vregs as loop carries;
            #      only h @ W_hh (bf16 MXU, f32 acc) + gate math remain.
            def step(t, carry):
                h_prev, c_prev = carry
                row = pl.multiple_of(t * B, B)      # B is a multiple of 8
                gates = (gx_ref[pl.ds(row, B), :]
                         + jnp.dot(h_prev.astype(jnp.bfloat16), whh_ref[...],
                                   preferred_element_type=jnp.float32))
                # Gate columns are pre-permuted to (i, f, o, g).
                sig = jax.nn.sigmoid(gates[:, :3 * H])
                i_g = sig[:, 0 * H:1 * H]
                f_g = sig[:, 1 * H:2 * H]
                o_g = sig[:, 2 * H:3 * H]
                g_g = jnp.tanh(gates[:, 3 * H:])
                c_new = f_g * c_prev + i_g * g_g
                h_new = o_g * jnp.tanh(c_new)
                hseq_ref[pl.ds(row, B), :] = h_new
                return (h_new, c_new)

            zeros = jnp.zeros((B, H), jnp.float32)
            unroll = T if T <= 8 else 2
            lax.fori_loop(0, T, step, (zeros, zeros), unroll=unroll)

        # ---- Fused concat + linear: emb @ W_emb + h @ W_h + b over all T*B
        #      rows in one pass, lane-dense output store.
        w_emb_ref, w_h_ref, b_lin_ref = w_refs[n_w - 3:]
        out_ref[...] = (
            jnp.dot(x_ref[...].astype(jnp.bfloat16), w_emb_ref[...],
                    preferred_element_type=jnp.float32)
            + jnp.dot(hseq_ref[...].astype(jnp.bfloat16), w_h_ref[...],
                      preferred_element_type=jnp.float32)
            + b_lin_ref[...]).astype(out_ref.dtype)

    return kernel


# ----------------------------------------------------------------------------
# Wrapper
# ----------------------------------------------------------------------------
def _reorder_gates(a, H):
    """PyTorch gate columns (i, f, g, o) -> (i, f, o, g) along the last axis."""
    i = a[..., 0 * H:1 * H]
    f = a[..., 1 * H:2 * H]
    g = a[..., 2 * H:3 * H]
    o = a[..., 3 * H:4 * H]
    return jnp.concatenate([i, f, o, g], axis=-1)


@jax.jit
def input_layers_forward(x, params):
    """x: (T, B, in_size) f32 -> (T, B, out_size) f32."""
    T, B, D = x.shape
    lstm_params = params["lstm"]
    num_layers = len(lstm_params)
    H = lstm_params[0][1].shape[0]                  # w_hh: (H, 4H)
    w_lin, b_lin = params["linear"]
    O = w_lin.shape[1]
    if w_lin.shape[0] != D + H:
        raise ValueError(
            "linear fan_in must equal in_size + lstm_hidden "
            f"(got {w_lin.shape[0]} vs {D}+{H}); the bi=False module requires "
            "out_size == 2 * in_size.")

    # Split the linear weight along its input axis -> no lane concat needed.
    # Weights pre-cast to bf16 for the MXU; biases stay f32.
    w_emb = w_lin[:D, :].astype(jnp.bfloat16)
    w_h = w_lin[D:, :].astype(jnp.bfloat16)
    b_lin_f32 = b_lin.astype(jnp.float32)

    # Pad batch to a sublane multiple so every per-step slice is aligned and
    # the (T, B, D) -> (T*B, D) flatten is layout-trivial.
    Bp = max(8, -(-B // 8) * 8)
    if Bp != B:
        x = jnp.pad(x, ((0, 0), (0, Bp - B), (0, 0)))
    x_flat = x.reshape(T * Bp, D)

    flat_w = []
    for (w_ih, w_hh, b) in lstm_params:
        flat_w += [
            _reorder_gates(w_ih, H).astype(jnp.bfloat16),
            _reorder_gates(w_hh, H).astype(jnp.bfloat16),
            _reorder_gates(b, H).astype(jnp.float32),
        ]
    flat_w += [w_emb, w_h, b_lin_f32]

    # VMEM budget from the actual resident footprint (grid-less call, whole
    # arrays resident, no double buffering), 2x headroom, capped at 48 MiB so
    # the same setting is safe on v7x (64 MiB physical).  At realistic sizes
    # on v5e/v6e this could be raised toward ~96-112 MiB.
    w_bytes = 0
    for (w_ih, w_hh, b) in lstm_params:
        w_bytes += (w_ih.size + w_hh.size) * 2 + b.size * 4
    w_bytes += (w_emb.size + w_h.size) * 2 + b_lin.size * 4
    act_bytes = (T * Bp) * (D + O + 4 * H + H) * 4
    vmem_limit = int(min(max(2 * (w_bytes + act_bytes), 4 << 20), 48 << 20))

    kernel = _make_fused_kernel(num_layers, T, Bp, H)
    out_flat = pl.pallas_call(
        kernel,
        out_shape=jax.ShapeDtypeStruct((T * Bp, O), jnp.float32),
        in_specs=[pl.BlockSpec(memory_space=pltpu.MemorySpace.VMEM)]
        * (1 + len(flat_w)),
        out_specs=pl.BlockSpec(memory_space=pltpu.MemorySpace.VMEM),
        scratch_shapes=[
            pltpu.VMEM((T * Bp, 4 * H), jnp.float32),   # x-gates, all steps
            pltpu.VMEM((T * Bp, H), jnp.float32),       # layer h sequence
        ],
        compiler_params=pltpu.CompilerParams(vmem_limit_bytes=vmem_limit),
    )(x_flat, *flat_w)

    out = out_flat.reshape(T, Bp, O)
    return out[:, :B, :]


# ----------------------------------------------------------------------------
# Parameter init (deterministic, PyTorch-style uniform)
# ----------------------------------------------------------------------------
def init_params(key, in_size, out_size, num_layers):
    H = out_size
    params = {"lstm": []}
    for layer in range(num_layers):
        d_in = in_size if layer == 0 else H
        k = 1.0 / jnp.sqrt(H)
        key, k1, k2, k3, k4 = jax.random.split(key, 5)
        w_ih = jax.random.uniform(k1, (d_in, 4 * H), jnp.float32, -k, k)
        w_hh = jax.random.uniform(k2, (H, 4 * H), jnp.float32, -k, k)
        b_ih = jax.random.uniform(k3, (4 * H,), jnp.float32, -k, k)
        b_hh = jax.random.uniform(k4, (4 * H,), jnp.float32, -k, k)
        params["lstm"].append((w_ih, w_hh, (b_ih + b_hh).reshape(1, 4 * H)))
    # Linear(in_size * 3, out_size)  (bi=False branch)
    fan_in = in_size * 3
    k = 1.0 / jnp.sqrt(fan_in)
    key, k1, k2 = jax.random.split(key, 3)
    w_lin = jax.random.uniform(k1, (fan_in, out_size), jnp.float32, -k, k)
    b_lin = jax.random.uniform(k2, (out_size,), jnp.float32, -k, k)
    params["linear"] = (w_lin, b_lin.reshape(1, out_size))
    return params


# ----------------------------------------------------------------------------
# Pure-JAX f32 reference for verification
# ----------------------------------------------------------------------------
def _lstm_layer_ref(x, w_ih, w_hh, b):
    T, B, _ = x.shape
    H = w_hh.shape[0]

    def step(carry, x_t):
        h, c = carry
        gates = x_t @ w_ih + h @ w_hh + b
        i = jax.nn.sigmoid(gates[:, 0 * H:1 * H])
        f = jax.nn.sigmoid(gates[:, 1 * H:2 * H])
        g = jnp.tanh(gates[:, 2 * H:3 * H])
        o = jax.nn.sigmoid(gates[:, 3 * H:4 * H])
        c = f * c + i * g
        h = o * jnp.tanh(c)
        return (h, c), h

    init = (jnp.zeros((B, H), jnp.float32), jnp.zeros((B, H), jnp.float32))
    _, hs = lax.scan(step, init, x)
    return hs


def input_layers_ref(x, params):
    emb = x
    h = x
    for (w_ih, w_hh, b) in params["lstm"]:
        h = _lstm_layer_ref(h, w_ih, w_hh, b)
    w_lin, b_lin = params["linear"]
    cat = jnp.concatenate([emb, h], axis=-1)
    return cat @ w_lin + b_lin


# ----------------------------------------------------------------------------
if __name__ == "__main__":
    # Shapes implied by forward: concat(in_size + out_size) must equal
    # in_size * 3 (bi=False) -> out_size = 2 * in_size.  out_size is chosen
    # as a multiple of 128 so gate slices / output stores are lane-aligned.
    seq_len, batch = 8, 4
    in_size, out_size, num_layers = 64, 128, 2

    key = jax.random.PRNGKey(0)
    key, kx, kp = jax.random.split(key, 3)
    x = jax.random.normal(kx, (seq_len, batch, in_size), jnp.float32)
    params = init_params(kp, in_size, out_size, num_layers)

    out = input_layers_forward(x, params)
    out = jax.block_until_ready(out)

    ref = input_layers_ref(x, params)
    assert out.shape == (seq_len, batch, out_size), out.shape
    # bf16 MXU operands (f32 accumulation / gate math) vs the pure-f32
    # reference -> loosened tolerance per review.
    assert jnp.allclose(out, ref, rtol=2e-2, atol=5e-2), (
        float(jnp.max(jnp.abs(out - ref))))

    print("KERNEL_OK")
</pallas_src>

<mosaic_0001>
module attributes {stable_mosaic.version = 11 : i64} {
  func.func @kernel(%arg0: memref<64x64xf32, #tpu.memory_space<vmem>>, %arg1: memref<64x512xbf16, #tpu.memory_space<vmem>>, %arg2: memref<128x512xbf16, #tpu.memory_space<vmem>>, %arg3: memref<1x512xf32, #tpu.memory_space<vmem>>, %arg4: memref<128x512xbf16, #tpu.memory_space<vmem>>, %arg5: memref<128x512xbf16, #tpu.memory_space<vmem>>, %arg6: memref<1x512xf32, #tpu.memory_space<vmem>>, %arg7: memref<64x128xbf16, #tpu.memory_space<vmem>>, %arg8: memref<128x128xbf16, #tpu.memory_space<vmem>>, %arg9: memref<1x128xf32, #tpu.memory_space<vmem>>, %arg10: memref<64x128xf32, #tpu.memory_space<vmem>>, %arg11: memref<64x512xf32, #tpu.memory_space<vmem>>, %arg12: memref<64x128xf32, #tpu.memory_space<vmem>>) attributes {dimension_semantics = [], scalar_prefetch = 0 : i64, scratch_operands = 2 : i64, tpu.core_type = #tpu.core_type<tc>} {
    %c0 = arith.constant 0 : index
    %c0_0 = arith.constant 0 : index
    %0 = vector.load %arg0[%c0, %c0_0] : memref<64x64xf32, #tpu.memory_space<vmem>>, vector<64x64xf32>
    %1 = arith.truncf %0 : vector<64x64xf32> to vector<64x64xbf16>
    %c0_1 = arith.constant 0 : index
    %c0_2 = arith.constant 0 : index
    %2 = vector.load %arg1[%c0_1, %c0_2] : memref<64x512xbf16, #tpu.memory_space<vmem>>, vector<64x512xbf16>
    %cst = arith.constant dense<0.000000e+00> : vector<64x512xf32>
    %3 = tpu.matmul %1, %2, %cst {dimension_numbers = #tpu.dot_dimension_numbers<[1], [0], [0], [1], [0, 0, 1, 1], [], []>} : vector<64x64xbf16>, vector<64x512xbf16>, vector<64x512xf32> -> vector<64x512xf32>
    %c0_3 = arith.constant 0 : index
    %c0_4 = arith.constant 0 : index
    %4 = vector.load %arg3[%c0_3, %c0_4] : memref<1x512xf32, #tpu.memory_space<vmem>>, vector<1x512xf32>
    %5 = vector.broadcast %4 : vector<1x512xf32> to vector<64x512xf32>
    %6 = arith.addf %3, %5 : vector<64x512xf32>
    %c0_5 = arith.constant 0 : index
    %c0_6 = arith.constant 0 : index
    %7 = vector.load %arg11[%c0_5, %c0_6] : memref<64x512xf32, #tpu.memory_space<vmem>>, vector<64x512xf32>
    tpu.vector_store %arg11[%c0_5, %c0_6], %6 {strides = array<i32>} : memref<64x512xf32, #tpu.memory_space<vmem>>, vector<64x512xf32>,
    %cst_7 = arith.constant 0.000000e+00 : f32
    %8 = vector.broadcast %cst_7 : f32 to vector<8x128xf32>
    %c0_i32 = arith.constant 0 : i32
    %c8_i32 = arith.constant 8 : i32
    %9 = arith.muli %c0_i32, %c8_i32 : i32
    %10 = tpu.assume_multiple %9, 8 : i32
    %11 = arith.index_cast %10 : i32 to index
    %c0_8 = arith.constant 0 : index
    %12 = vector.load %arg11[%11, %c0_8] : memref<64x512xf32, #tpu.memory_space<vmem>>, vector<8x512xf32>
    %13 = arith.truncf %8 : vector<8x128xf32> to vector<8x128xbf16>
    %c0_9 = arith.constant 0 : index
    %c0_10 = arith.constant 0 : index
    %14 = vector.load %arg2[%c0_9, %c0_10] : memref<128x512xbf16, #tpu.memory_space<vmem>>, vector<128x512xbf16>
    %cst_11 = arith.constant dense<0.000000e+00> : vector<8x512xf32>
    %15 = tpu.matmul %13, %14, %cst_11 {dimension_numbers = #tpu.dot_dimension_numbers<[1], [0], [0], [1], [0, 0, 1, 1], [], []>} : vector<8x128xbf16>, vector<128x512xbf16>, vector<8x512xf32> -> vector<8x512xf32>
    %16 = arith.addf %12, %15 : vector<8x512xf32>
    %17 = vector.extract_strided_slice %16 {offsets = [0, 0], sizes = [8, 384], strides = [1, 1]} : vector<8x512xf32> to vector<8x384xf32>
    %18 = arith.negf %17 : vector<8x384xf32>
    %19 = math.exp %18 : vector<8x384xf32>
    %cst_12 = arith.constant 1.000000e+00 : f32
    %20 = vector.broadcast %cst_12 : f32 to vector<8x384xf32>
    %21 = arith.addf %20, %19 : vector<8x384xf32>
    %22 = arith.divf %20, %21 : vector<8x384xf32>
    %23 = vector.extract_strided_slice %22 {offsets = [0, 0], sizes = [8, 128], strides = [1, 1]} : vector<8x384xf32> to vector<8x128xf32>
    %24 = vector.extract_strided_slice %22 {offsets = [0, 128], sizes = [8, 128], strides = [1, 1]} : vector<8x384xf32> to vector<8x128xf32>
    %25 = vector.extract_strided_slice %22 {offsets = [0, 256], sizes = [8, 128], strides = [1, 1]} : vector<8x384xf32> to vector<8x128xf32>
    %26 = vector.extract_strided_slice %16 {offsets = [0, 384], sizes = [8, 128], strides = [1, 1]} : vector<8x512xf32> to vector<8x128xf32>
    %27 = math.tanh %26 : vector<8x128xf32>
    %28 = arith.mulf %24, %8 : vector<8x128xf32>
    %29 = arith.mulf %23, %27 : vector<8x128xf32>
    %30 = arith.addf %28, %29 : vector<8x128xf32>
    %31 = math.tanh %30 : vector<8x128xf32>
    %32 = arith.mulf %25, %31 : vector<8x128xf32>
    %33 = arith.index_cast %10 : i32 to index
    %c0_13 = arith.constant 0 : index
    %34 = vector.load %arg12[%33, %c0_13] : memref<64x128xf32, #tpu.memory_space<vmem>>, vector<8x128xf32>
    tpu.vector_store %arg12[%33, %c0_13], %32 {strides = array<i32>} : memref<64x128xf32, #tpu.memory_space<vmem>>, vector<8x128xf32>,
    %c1_i32 = arith.constant 1 : i32
    %c8_i32_14 = arith.constant 8 : i32
    %35 = arith.muli %c1_i32, %c8_i32_14 : i32
    %36 = tpu.assume_multiple %35, 8 : i32
    %37 = arith.index_cast %36 : i32 to index
    %c0_15 = arith.constant 0 : index
    %38 = vector.load %arg11[%37, %c0_15] : memref<64x512xf32, #tpu.memory_space<vmem>>, vector<8x512xf32>
    %39 = arith.truncf %32 : vector<8x128xf32> to vector<8x128xbf16>
    %c0_16 = arith.constant 0 : index
    %c0_17 = arith.constant 0 : index
    %40 = vector.load %arg2[%c0_16, %c0_17] : memref<128x512xbf16, #tpu.memory_space<vmem>>, vector<128x512xbf16>
    %cst_18 = arith.constant dense<0.000000e+00> : vector<8x512xf32>
    %41 = tpu.matmul %39, %40, %cst_18 {dimension_numbers = #tpu.dot_dimension_numbers<[1], [0], [0], [1], [0, 0, 1, 1], [], []>} : vector<8x128xbf16>, vector<128x512xbf16>, vector<8x512xf32> -> vector<8x512xf32>
    %42 = arith.addf %38, %41 : vector<8x512xf32>
    %43 = vector.extract_strided_slice %42 {offsets = [0, 0], sizes = [8, 384], strides = [1, 1]} : vector<8x512xf32> to vector<8x384xf32>
    %44 = arith.negf %43 : vector<8x384xf32>
    %45 = math.exp %44 : vector<8x384xf32>
    %cst_19 = arith.constant 1.000000e+00 : f32
    %46 = vector.broadcast %cst_19 : f32 to vector<8x384xf32>
    %47 = arith.addf %46, %45 : vector<8x384xf32>
    %48 = arith.divf %46, %47 : vector<8x384xf32>
    %49 = vector.extract_strided_slice %48 {offsets = [0, 0], sizes = [8, 128], strides = [1, 1]} : vector<8x384xf32> to vector<8x128xf32>
    %50 = vector.extract_strided_slice %48 {offsets = [0, 128], sizes = [8, 128], strides = [1, 1]} : vector<8x384xf32> to vector<8x128xf32>
    %51 = vector.extract_strided_slice %48 {offsets = [0, 256], sizes = [8, 128], strides = [1, 1]} : vector<8x384xf32> to vector<8x128xf32>
    %52 = vector.extract_strided_slice %42 {offsets = [0, 384], sizes = [8, 128], strides = [1, 1]} : vector<8x512xf32> to vector<8x128xf32>
    %53 = math.tanh %52 : vector<8x128xf32>
    %54 = arith.mulf %50, %30 : vector<8x128xf32>
    %55 = arith.mulf %49, %53 : vector<8x128xf32>
    %56 = arith.addf %54, %55 : vector<8x128xf32>
    %57 = math.tanh %56 : vector<8x128xf32>
    %58 = arith.mulf %51, %57 : vector<8x128xf32>
    %59 = arith.index_cast %36 : i32 to index
    %c0_20 = arith.constant 0 : index
    %60 = vector.load %arg12[%59, %c0_20] : memref<64x128xf32, #tpu.memory_space<vmem>>, vector<8x128xf32>
    tpu.vector_store %arg12[%59, %c0_20], %58 {strides = array<i32>} : memref<64x128xf32, #tpu.memory_space<vmem>>, vector<8x128xf32>,
    %c2_i32 = arith.constant 2 : i32
    %c8_i32_21 = arith.constant 8 : i32
    %61 = arith.muli %c2_i32, %c8_i32_21 : i32
    %62 = tpu.assume_multiple %61, 8 : i32
    %63 = arith.index_cast %62 : i32 to index
    %c0_22 = arith.constant 0 : index
    %64 = vector.load %arg11[%63, %c0_22] : memref<64x512xf32, #tpu.memory_space<vmem>>, vector<8x512xf32>
    %65 = arith.truncf %58 : vector<8x128xf32> to vector<8x128xbf16>
    %c0_23 = arith.constant 0 : index
    %c0_24 = arith.constant 0 : index
    %66 = vector.load %arg2[%c0_23, %c0_24] : memref<128x512xbf16, #tpu.memory_space<vmem>>, vector<128x512xbf16>
    %cst_25 = arith.constant dense<0.000000e+00> : vector<8x512xf32>
    %67 = tpu.matmul %65, %66, %cst_25 {dimension_numbers = #tpu.dot_dimension_numbers<[1], [0], [0], [1], [0, 0, 1, 1], [], []>} : vector<8x128xbf16>, vector<128x512xbf16>, vector<8x512xf32> -> vector<8x512xf32>
    %68 = arith.addf %64, %67 : vector<8x512xf32>
    %69 = vector.extract_strided_slice %68 {offsets = [0, 0], sizes = [8, 384], strides = [1, 1]} : vector<8x512xf32> to vector<8x384xf32>
    %70 = arith.negf %69 : vector<8x384xf32>
    %71 = math.exp %70 : vector<8x384xf32>
    %cst_26 = arith.constant 1.000000e+00 : f32
    %72 = vector.broadcast %cst_26 : f32 to vector<8x384xf32>
    %73 = arith.addf %72, %71 : vector<8x384xf32>
    %74 = arith.divf %72, %73 : vector<8x384xf32>
    %75 = vector.extract_strided_slice %74 {offsets = [0, 0], sizes = [8, 128], strides = [1, 1]} : vector<8x384xf32> to vector<8x128xf32>
    %76 = vector.extract_strided_slice %74 {offsets = [0, 128], sizes = [8, 128], strides = [1, 1]} : vector<8x384xf32> to vector<8x128xf32>
    %77 = vector.extract_strided_slice %74 {offsets = [0, 256], sizes = [8, 128], strides = [1, 1]} : vector<8x384xf32> to vector<8x128xf32>
    %78 = vector.extract_strided_slice %68 {offsets = [0, 384], sizes = [8, 128], strides = [1, 1]} : vector<8x512xf32> to vector<8x128xf32>
    %79 = math.tanh %78 : vector<8x128xf32>
    %80 = arith.mulf %76, %56 : vector<8x128xf32>
    %81 = arith.mulf %75, %79 : vector<8x128xf32>
    %82 = arith.addf %80, %81 : vector<8x128xf32>
    %83 = math.tanh %82 : vector<8x128xf32>
    %84 = arith.mulf %77, %83 : vector<8x128xf32>
    %85 = arith.index_cast %62 : i32 to index
    %c0_27 = arith.constant 0 : index
    %86 = vector.load %arg12[%85, %c0_27] : memref<64x128xf32, #tpu.memory_space<vmem>>, vector<8x128xf32>
    tpu.vector_store %arg12[%85, %c0_27], %84 {strides = array<i32>} : memref<64x128xf32, #tpu.memory_space<vmem>>, vector<8x128xf32>,
    %c3_i32 = arith.constant 3 : i32
    %c8_i32_28 = arith.constant 8 : i32
    %87 = arith.muli %c3_i32, %c8_i32_28 : i32
    %88 = tpu.assume_multiple %87, 8 : i32
    %89 = arith.index_cast %88 : i32 to index
    %c0_29 = arith.constant 0 : index
    %90 = vector.load %arg11[%89, %c0_29] : memref<64x512xf32, #tpu.memory_space<vmem>>, vector<8x512xf32>
    %91 = arith.truncf %84 : vector<8x128xf32> to vector<8x128xbf16>
    %c0_30 = arith.constant 0 : index
    %c0_31 = arith.constant 0 : index
    %92 = vector.load %arg2[%c0_30, %c0_31] : memref<128x512xbf16, #tpu.memory_space<vmem>>, vector<128x512xbf16>
    %cst_32 = arith.constant dense<0.000000e+00> : vector<8x512xf32>
    %93 = tpu.matmul %91, %92, %cst_32 {dimension_numbers = #tpu.dot_dimension_numbers<[1], [0], [0], [1], [0, 0, 1, 1], [], []>} : vector<8x128xbf16>, vector<128x512xbf16>, vector<8x512xf32> -> vector<8x512xf32>
    %94 = arith.addf %90, %93 : vector<8x512xf32>
    %95 = vector.extract_strided_slice %94 {offsets = [0, 0], sizes = [8, 384], strides = [1, 1]} : vector<8x512xf32> to vector<8x384xf32>
    %96 = arith.negf %95 : vector<8x384xf32>
    %97 = math.exp %96 : vector<8x384xf32>
    %cst_33 = arith.constant 1.000000e+00 : f32
    %98 = vector.broadcast %cst_33 : f32 to vector<8x384xf32>
    %99 = arith.addf %98, %97 : vector<8x384xf32>
    %100 = arith.divf %98, %99 : vector<8x384xf32>
    %101 = vector.extract_strided_slice %100 {offsets = [0, 0], sizes = [8, 128], strides = [1, 1]} : vector<8x384xf32> to vector<8x128xf32>
    %102 = vector.extract_strided_slice %100 {offsets = [0, 128], sizes = [8, 128], strides = [1, 1]} : vector<8x384xf32> to vector<8x128xf32>
    %103 = vector.extract_strided_slice %100 {offsets = [0, 256], sizes = [8, 128], strides = [1, 1]} : vector<8x384xf32> to vector<8x128xf32>
    %104 = vector.extract_strided_slice %94 {offsets = [0, 384], sizes = [8, 128], strides = [1, 1]} : vector<8x512xf32> to vector<8x128xf32>
    %105 = math.tanh %104 : vector<8x128xf32>
    %106 = arith.mulf %102, %82 : vector<8x128xf32>
    %107 = arith.mulf %101, %105 : vector<8x128xf32>
    %108 = arith.addf %106, %107 : vector<8x128xf32>
    %109 = math.tanh %108 : vector<8x128xf32>
    %110 = arith.mulf %103, %109 : vector<8x128xf32>
    %111 = arith.index_cast %88 : i32 to index
    %c0_34 = arith.constant 0 : index
    %112 = vector.load %arg12[%111, %c0_34] : memref<64x128xf32, #tpu.memory_space<vmem>>, vector<8x128xf32>
    tpu.vector_store %arg12[%111, %c0_34], %110 {strides = array<i32>} : memref<64x128xf32, #tpu.memory_space<vmem>>, vector<8x128xf32>,
    %c4_i32 = arith.constant 4 : i32
    %c8_i32_35 = arith.constant 8 : i32
    %113 = arith.muli %c4_i32, %c8_i32_35 : i32
    %114 = tpu.assume_multiple %113, 8 : i32
    %115 = arith.index_cast %114 : i32 to index
    %c0_36 = arith.constant 0 : index
    %116 = vector.load %arg11[%115, %c0_36] : memref<64x512xf32, #tpu.memory_space<vmem>>, vector<8x512xf32>
    %117 = arith.truncf %110 : vector<8x128xf32> to vector<8x128xbf16>
    %c0_37 = arith.constant 0 : index
    %c0_38 = arith.constant 0 : index
    %118 = vector.load %arg2[%c0_37, %c0_38] : memref<128x512xbf16, #tpu.memory_space<vmem>>, vector<128x512xbf16>
    %cst_39 = arith.constant dense<0.000000e+00> : vector<8x512xf32>
    %119 = tpu.matmul %117, %118, %cst_39 {dimension_numbers = #tpu.dot_dimension_numbers<[1], [0], [0], [1], [0, 0, 1, 1], [], []>} : vector<8x128xbf16>, vector<128x512xbf16>, vector<8x512xf32> -> vector<8x512xf32>
    %120 = arith.addf %116, %119 : vector<8x512xf32>
    %121 = vector.extract_strided_slice %120 {offsets = [0, 0], sizes = [8, 384], strides = [1, 1]} : vector<8x512xf32> to vector<8x384xf32>
    %122 = arith.negf %121 : vector<8x384xf32>
    %123 = math.exp %122 : vector<8x384xf32>
    %cst_40 = arith.constant 1.000000e+00 : f32
    %124 = vector.broadcast %cst_40 : f32 to vector<8x384xf32>
    %125 = arith.addf %124, %123 : vector<8x384xf32>
    %126 = arith.divf %124, %125 : vector<8x384xf32>
    %127 = vector.extract_strided_slice %126 {offsets = [0, 0], sizes = [8, 128], strides = [1, 1]} : vector<8x384xf32> to vector<8x128xf32>
    %128 = vector.extract_strided_slice %126 {offsets = [0, 128], sizes = [8, 128], strides = [1, 1]} : vector<8x384xf32> to vector<8x128xf32>
    %129 = vector.extract_strided_slice %126 {offsets = [0, 256], sizes = [8, 128], strides = [1, 1]} : vector<8x384xf32> to vector<8x128xf32>
    %130 = vector.extract_strided_slice %120 {offsets = [0, 384], sizes = [8, 128], strides = [1, 1]} : vector<8x512xf32> to vector<8x128xf32>
    %131 = math.tanh %130 : vector<8x128xf32>
    %132 = arith.mulf %128, %108 : vector<8x128xf32>
    %133 = arith.mulf %127, %131 : vector<8x128xf32>
    %134 = arith.addf %132, %133 : vector<8x128xf32>
    %135 = math.tanh %134 : vector<8x128xf32>
    %136 = arith.mulf %129, %135 : vector<8x128xf32>
    %137 = arith.index_cast %114 : i32 to index
    %c0_41 = arith.constant 0 : index
    %138 = vector.load %arg12[%137, %c0_41] : memref<64x128xf32, #tpu.memory_space<vmem>>, vector<8x128xf32>
    tpu.vector_store %arg12[%137, %c0_41], %136 {strides = array<i32>} : memref<64x128xf32, #tpu.memory_space<vmem>>, vector<8x128xf32>,
    %c5_i32 = arith.constant 5 : i32
    %c8_i32_42 = arith.constant 8 : i32
    %139 = arith.muli %c5_i32, %c8_i32_42 : i32
    %140 = tpu.assume_multiple %139, 8 : i32
    %141 = arith.index_cast %140 : i32 to index
    %c0_43 = arith.constant 0 : index
    %142 = vector.load %arg11[%141, %c0_43] : memref<64x512xf32, #tpu.memory_space<vmem>>, vector<8x512xf32>
    %143 = arith.truncf %136 : vector<8x128xf32> to vector<8x128xbf16>
    %c0_44 = arith.constant 0 : index
    %c0_45 = arith.constant 0 : index
    %144 = vector.load %arg2[%c0_44, %c0_45] : memref<128x512xbf16, #tpu.memory_space<vmem>>, vector<128x512xbf16>
    %cst_46 = arith.constant dense<0.000000e+00> : vector<8x512xf32>
    %145 = tpu.matmul %143, %144, %cst_46 {dimension_numbers = #tpu.dot_dimension_numbers<[1], [0], [0], [1], [0, 0, 1, 1], [], []>} : vector<8x128xbf16>, vector<128x512xbf16>, vector<8x512xf32> -> vector<8x512xf32>
    %146 = arith.addf %142, %145 : vector<8x512xf32>
    %147 = vector.extract_strided_slice %146 {offsets = [0, 0], sizes = [8, 384], strides = [1, 1]} : vector<8x512xf32> to vector<8x384xf32>
    %148 = arith.negf %147 : vector<8x384xf32>
    %149 = math.exp %148 : vector<8x384xf32>
    %cst_47 = arith.constant 1.000000e+00 : f32
    %150 = vector.broadcast %cst_47 : f32 to vector<8x384xf32>
    %151 = arith.addf %150, %149 : vector<8x384xf32>
    %152 = arith.divf %150, %151 : vector<8x384xf32>
    %153 = vector.extract_strided_slice %152 {offsets = [0, 0], sizes = [8, 128], strides = [1, 1]} : vector<8x384xf32> to vector<8x128xf32>
    %154 = vector.extract_strided_slice %152 {offsets = [0, 128], sizes = [8, 128], strides = [1, 1]} : vector<8x384xf32> to vector<8x128xf32>
    %155 = vector.extract_strided_slice %152 {offsets = [0, 256], sizes = [8, 128], strides = [1, 1]} : vector<8x384xf32> to vector<8x128xf32>
    %156 = vector.extract_strided_slice %146 {offsets = [0, 384], sizes = [8, 128], strides = [1, 1]} : vector<8x512xf32> to vector<8x128xf32>
    %157 = math.tanh %156 : vector<8x128xf32>
    %158 = arith.mulf %154, %134 : vector<8x128xf32>
    %159 = arith.mulf %153, %157 : vector<8x128xf32>
    %160 = arith.addf %158, %159 : vector<8x128xf32>
    %161 = math.tanh %160 : vector<8x128xf32>
    %162 = arith.mulf %155, %161 : vector<8x128xf32>
    %163 = arith.index_cast %140 : i32 to index
    %c0_48 = arith.constant 0 : index
    %164 = vector.load %arg12[%163, %c0_48] : memref<64x128xf32, #tpu.memory_space<vmem>>, vector<8x128xf32>
    tpu.vector_store %arg12[%163, %c0_48], %162 {strides = array<i32>} : memref<64x128xf32, #tpu.memory_space<vmem>>, vector<8x128xf32>,
    %c6_i32 = arith.constant 6 : i32
    %c8_i32_49 = arith.constant 8 : i32
    %165 = arith.muli %c6_i32, %c8_i32_49 : i32
    %166 = tpu.assume_multiple %165, 8 : i32
    %167 = arith.index_cast %166 : i32 to index
    %c0_50 = arith.constant 0 : index
    %168 = vector.load %arg11[%167, %c0_50] : memref<64x512xf32, #tpu.memory_space<vmem>>, vector<8x512xf32>
    %169 = arith.truncf %162 : vector<8x128xf32> to vector<8x128xbf16>
    %c0_51 = arith.constant 0 : index
    %c0_52 = arith.constant 0 : index
    %170 = vector.load %arg2[%c0_51, %c0_52] : memref<128x512xbf16, #tpu.memory_space<vmem>>, vector<128x512xbf16>
    %cst_53 = arith.constant dense<0.000000e+00> : vector<8x512xf32>
    %171 = tpu.matmul %169, %170, %cst_53 {dimension_numbers = #tpu.dot_dimension_numbers<[1], [0], [0], [1], [0, 0, 1, 1], [], []>} : vector<8x128xbf16>, vector<128x512xbf16>, vector<8x512xf32> -> vector<8x512xf32>
    %172 = arith.addf %168, %171 : vector<8x512xf32>
    %173 = vector.extract_strided_slice %172 {offsets = [0, 0], sizes = [8, 384], strides = [1, 1]} : vector<8x512xf32> to vector<8x384xf32>
    %174 = arith.negf %173 : vector<8x384xf32>
    %175 = math.exp %174 : vector<8x384xf32>
    %cst_54 = arith.constant 1.000000e+00 : f32
    %176 = vector.broadcast %cst_54 : f32 to vector<8x384xf32>
    %177 = arith.addf %176, %175 : vector<8x384xf32>
    %178 = arith.divf %176, %177 : vector<8x384xf32>
    %179 = vector.extract_strided_slice %178 {offsets = [0, 0], sizes = [8, 128], strides = [1, 1]} : vector<8x384xf32> to vector<8x128xf32>
    %180 = vector.extract_strided_slice %178 {offsets = [0, 128], sizes = [8, 128], strides = [1, 1]} : vector<8x384xf32> to vector<8x128xf32>
    %181 = vector.extract_strided_slice %178 {offsets = [0, 256], sizes = [8, 128], strides = [1, 1]} : vector<8x384xf32> to vector<8x128xf32>
    %182 = vector.extract_strided_slice %172 {offsets = [0, 384], sizes = [8, 128], strides = [1, 1]} : vector<8x512xf32> to vector<8x128xf32>
    %183 = math.tanh %182 : vector<8x128xf32>
    %184 = arith.mulf %180, %160 : vector<8x128xf32>
    %185 = arith.mulf %179, %183 : vector<8x128xf32>
    %186 = arith.addf %184, %185 : vector<8x128xf32>
    %187 = math.tanh %186 : vector<8x128xf32>
    %188 = arith.mulf %181, %187 : vector<8x128xf32>
    %189 = arith.index_cast %166 : i32 to index
    %c0_55 = arith.constant 0 : index
    %190 = vector.load %arg12[%189, %c0_55] : memref<64x128xf32, #tpu.memory_space<vmem>>, vector<8x128xf32>
    tpu.vector_store %arg12[%189, %c0_55], %188 {strides = array<i32>} : memref<64x128xf32, #tpu.memory_space<vmem>>, vector<8x128xf32>,
    %c7_i32 = arith.constant 7 : i32
    %c8_i32_56 = arith.constant 8 : i32
    %191 = arith.muli %c7_i32, %c8_i32_56 : i32
    %192 = tpu.assume_multiple %191, 8 : i32
    %193 = arith.index_cast %192 : i32 to index
    %c0_57 = arith.constant 0 : index
    %194 = vector.load %arg11[%193, %c0_57] : memref<64x512xf32, #tpu.memory_space<vmem>>, vector<8x512xf32>
    %195 = arith.truncf %188 : vector<8x128xf32> to vector<8x128xbf16>
    %c0_58 = arith.constant 0 : index
    %c0_59 = arith.constant 0 : index
    %196 = vector.load %arg2[%c0_58, %c0_59] : memref<128x512xbf16, #tpu.memory_space<vmem>>, vector<128x512xbf16>
    %cst_60 = arith.constant dense<0.000000e+00> : vector<8x512xf32>
    %197 = tpu.matmul %195, %196, %cst_60 {dimension_numbers = #tpu.dot_dimension_numbers<[1], [0], [0], [1], [0, 0, 1, 1], [], []>} : vector<8x128xbf16>, vector<128x512xbf16>, vector<8x512xf32> -> vector<8x512xf32>
    %198 = arith.addf %194, %197 : vector<8x512xf32>
    %199 = vector.extract_strided_slice %198 {offsets = [0, 0], sizes = [8, 384], strides = [1, 1]} : vector<8x512xf32> to vector<8x384xf32>
    %200 = arith.negf %199 : vector<8x384xf32>
    %201 = math.exp %200 : vector<8x384xf32>
    %cst_61 = arith.constant 1.000000e+00 : f32
    %202 = vector.broadcast %cst_61 : f32 to vector<8x384xf32>
    %203 = arith.addf %202, %201 : vector<8x384xf32>
    %204 = arith.divf %202, %203 : vector<8x384xf32>
    %205 = vector.extract_strided_slice %204 {offsets = [0, 0], sizes = [8, 128], strides = [1, 1]} : vector<8x384xf32> to vector<8x128xf32>
    %206 = vector.extract_strided_slice %204 {offsets = [0, 128], sizes = [8, 128], strides = [1, 1]} : vector<8x384xf32> to vector<8x128xf32>
    %207 = vector.extract_strided_slice %204 {offsets = [0, 256], sizes = [8, 128], strides = [1, 1]} : vector<8x384xf32> to vector<8x128xf32>
    %208 = vector.extract_strided_slice %198 {offsets = [0, 384], sizes = [8, 128], strides = [1, 1]} : vector<8x512xf32> to vector<8x128xf32>
    %209 = math.tanh %208 : vector<8x128xf32>
    %210 = arith.mulf %206, %186 : vector<8x128xf32>
    %211 = arith.mulf %205, %209 : vector<8x128xf32>
    %212 = arith.addf %210, %211 : vector<8x128xf32>
    %213 = math.tanh %212 : vector<8x128xf32>
    %214 = arith.mulf %207, %213 : vector<8x128xf32>
    %215 = arith.index_cast %192 : i32 to index
    %c0_62 = arith.constant 0 : index
    %216 = vector.load %arg12[%215, %c0_62] : memref<64x128xf32, #tpu.memory_space<vmem>>, vector<8x128xf32>
    tpu.vector_store %arg12[%215, %c0_62], %214 {strides = array<i32>} : memref<64x128xf32, #tpu.memory_space<vmem>>, vector<8x128xf32>,
    %c8_i32_63 = arith.constant 8 : i32
    %c0_64 = arith.constant 0 : index
    %c0_65 = arith.constant 0 : index
    %217 = vector.load %arg12[%c0_64, %c0_65] : memref<64x128xf32, #tpu.memory_space<vmem>>, vector<64x128xf32>
    %218 = arith.truncf %217 : vector<64x128xf32> to vector<64x128xbf16>
    %c0_66 = arith.constant 0 : index
    %c0_67 = arith.constant 0 : index
    %219 = vector.load %arg4[%c0_66, %c0_67] : memref<128x512xbf16, #tpu.memory_space<vmem>>, vector<128x512xbf16>
    %cst_68 = arith.constant dense<0.000000e+00> : vector<64x512xf32>
    %220 = tpu.matmul %218, %219, %cst_68 {dimension_numbers = #tpu.dot_dimension_numbers<[1], [0], [0], [1], [0, 0, 1, 1], [], []>} : vector<64x128xbf16>, vector<128x512xbf16>, vector<64x512xf32> -> vector<64x512xf32>
    %c0_69 = arith.constant 0 : index
    %c0_70 = arith.constant 0 : index
    %221 = vector.load %arg6[%c0_69, %c0_70] : memref<1x512xf32, #tpu.memory_space<vmem>>, vector<1x512xf32>
    %222 = vector.broadcast %221 : vector<1x512xf32> to vector<64x512xf32>
    %223 = arith.addf %220, %222 : vector<64x512xf32>
    %c0_71 = arith.constant 0 : index
    %c0_72 = arith.constant 0 : index
    %224 = vector.load %arg11[%c0_71, %c0_72] : memref<64x512xf32, #tpu.memory_space<vmem>>, vector<64x512xf32>
    tpu.vector_store %arg11[%c0_71, %c0_72], %223 {strides = array<i32>} : memref<64x512xf32, #tpu.memory_space<vmem>>, vector<64x512xf32>,
    %cst_73 = arith.constant 0.000000e+00 : f32
    %225 = vector.broadcast %cst_73 : f32 to vector<8x128xf32>
    %c0_i32_74 = arith.constant 0 : i32
    %c8_i32_75 = arith.constant 8 : i32
    %226 = arith.muli %c0_i32_74, %c8_i32_75 : i32
    %227 = tpu.assume_multiple %226, 8 : i32
    %228 = arith.index_cast %227 : i32 to index
    %c0_76 = arith.constant 0 : index
    %229 = vector.load %arg11[%228, %c0_76] : memref<64x512xf32, #tpu.memory_space<vmem>>, vector<8x512xf32>
    %230 = arith.truncf %225 : vector<8x128xf32> to vector<8x128xbf16>
    %c0_77 = arith.constant 0 : index
    %c0_78 = arith.constant 0 : index
    %231 = vector.load %arg5[%c0_77, %c0_78] : memref<128x512xbf16, #tpu.memory_space<vmem>>, vector<128x512xbf16>
    %cst_79 = arith.constant dense<0.000000e+00> : vector<8x512xf32>
    %232 = tpu.matmul %230, %231, %cst_79 {dimension_numbers = #tpu.dot_dimension_numbers<[1], [0], [0], [1], [0, 0, 1, 1], [], []>} : vector<8x128xbf16>, vector<128x512xbf16>, vector<8x512xf32> -> vector<8x512xf32>
    %233 = arith.addf %229, %232 : vector<8x512xf32>
    %234 = vector.extract_strided_slice %233 {offsets = [0, 0], sizes = [8, 384], strides = [1, 1]} : vector<8x512xf32> to vector<8x384xf32>
    %235 = arith.negf %234 : vector<8x384xf32>
    %236 = math.exp %235 : vector<8x384xf32>
    %cst_80 = arith.constant 1.000000e+00 : f32
    %237 = vector.broadcast %cst_80 : f32 to vector<8x384xf32>
    %238 = arith.addf %237, %236 : vector<8x384xf32>
    %239 = arith.divf %237, %238 : vector<8x384xf32>
    %240 = vector.extract_strided_slice %239 {offsets = [0, 0], sizes = [8, 128], strides = [1, 1]} : vector<8x384xf32> to vector<8x128xf32>
    %241 = vector.extract_strided_slice %239 {offsets = [0, 128], sizes = [8, 128], strides = [1, 1]} : vector<8x384xf32> to vector<8x128xf32>
    %242 = vector.extract_strided_slice %239 {offsets = [0, 256], sizes = [8, 128], strides = [1, 1]} : vector<8x384xf32> to vector<8x128xf32>
    %243 = vector.extract_strided_slice %233 {offsets = [0, 384], sizes = [8, 128], strides = [1, 1]} : vector<8x512xf32> to vector<8x128xf32>
    %244 = math.tanh %243 : vector<8x128xf32>
    %245 = arith.mulf %241, %225 : vector<8x128xf32>
    %246 = arith.mulf %240, %244 : vector<8x128xf32>
    %247 = arith.addf %245, %246 : vector<8x128xf32>
    %248 = math.tanh %247 : vector<8x128xf32>
    %249 = arith.mulf %242, %248 : vector<8x128xf32>
    %250 = arith.index_cast %227 : i32 to index
    %c0_81 = arith.constant 0 : index
    %251 = vector.load %arg12[%250, %c0_81] : memref<64x128xf32, #tpu.memory_space<vmem>>, vector<8x128xf32>
    tpu.vector_store %arg12[%250, %c0_81], %249 {strides = array<i32>} : memref<64x128xf32, #tpu.memory_space<vmem>>, vector<8x128xf32>,
    %c1_i32_82 = arith.constant 1 : i32
    %c8_i32_83 = arith.constant 8 : i32
    %252 = arith.muli %c1_i32_82, %c8_i32_83 : i32
    %253 = tpu.assume_multiple %252, 8 : i32
    %254 = arith.index_cast %253 : i32 to index
    %c0_84 = arith.constant 0 : index
    %255 = vector.load %arg11[%254, %c0_84] : memref<64x512xf32, #tpu.memory_space<vmem>>, vector<8x512xf32>
    %256 = arith.truncf %249 : vector<8x128xf32> to vector<8x128xbf16>
    %c0_85 = arith.constant 0 : index
    %c0_86 = arith.constant 0 : index
    %257 = vector.load %arg5[%c0_85, %c0_86] : memref<128x512xbf16, #tpu.memory_space<vmem>>, vector<128x512xbf16>
    %cst_87 = arith.constant dense<0.000000e+00> : vector<8x512xf32>
    %258 = tpu.matmul %256, %257, %cst_87 {dimension_numbers = #tpu.dot_dimension_numbers<[1], [0], [0], [1], [0, 0, 1, 1], [], []>} : vector<8x128xbf16>, vector<128x512xbf16>, vector<8x512xf32> -> vector<8x512xf32>
    %259 = arith.addf %255, %258 : vector<8x512xf32>
    %260 = vector.extract_strided_slice %259 {offsets = [0, 0], sizes = [8, 384], strides = [1, 1]} : vector<8x512xf32> to vector<8x384xf32>
    %261 = arith.negf %260 : vector<8x384xf32>
    %262 = math.exp %261 : vector<8x384xf32>
    %cst_88 = arith.constant 1.000000e+00 : f32
    %263 = vector.broadcast %cst_88 : f32 to vector<8x384xf32>
    %264 = arith.addf %263, %262 : vector<8x384xf32>
    %265 = arith.divf %263, %264 : vector<8x384xf32>
    %266 = vector.extract_strided_slice %265 {offsets = [0, 0], sizes = [8, 128], strides = [1, 1]} : vector<8x384xf32> to vector<8x128xf32>
    %267 = vector.extract_strided_slice %265 {offsets = [0, 128], sizes = [8, 128], strides = [1, 1]} : vector<8x384xf32> to vector<8x128xf32>
    %268 = vector.extract_strided_slice %265 {offsets = [0, 256], sizes = [8, 128], strides = [1, 1]} : vector<8x384xf32> to vector<8x128xf32>
    %269 = vector.extract_strided_slice %259 {offsets = [0, 384], sizes = [8, 128], strides = [1, 1]} : vector<8x512xf32> to vector<8x128xf32>
    %270 = math.tanh %269 : vector<8x128xf32>
    %271 = arith.mulf %267, %247 : vector<8x128xf32>
    %272 = arith.mulf %266, %270 : vector<8x128xf32>
    %273 = arith.addf %271, %272 : vector<8x128xf32>
    %274 = math.tanh %273 : vector<8x128xf32>
    %275 = arith.mulf %268, %274 : vector<8x128xf32>
    %276 = arith.index_cast %253 : i32 to index
    %c0_89 = arith.constant 0 : index
    %277 = vector.load %arg12[%276, %c0_89] : memref<64x128xf32, #tpu.memory_space<vmem>>, vector<8x128xf32>
    tpu.vector_store %arg12[%276, %c0_89], %275 {strides = array<i32>} : memref<64x128xf32, #tpu.memory_space<vmem>>, vector<8x128xf32>,
    %c2_i32_90 = arith.constant 2 : i32
    %c8_i32_91 = arith.constant 8 : i32
    %278 = arith.muli %c2_i32_90, %c8_i32_91 : i32
    %279 = tpu.assume_multiple %278, 8 : i32
    %280 = arith.index_cast %279 : i32 to index
    %c0_92 = arith.constant 0 : index
    %281 = vector.load %arg11[%280, %c0_92] : memref<64x512xf32, #tpu.memory_space<vmem>>, vector<8x512xf32>
    %282 = arith.truncf %275 : vector<8x128xf32> to vector<8x128xbf16>
    %c0_93 = arith.constant 0 : index
    %c0_94 = arith.constant 0 : index
    %283 = vector.load %arg5[%c0_93, %c0_94] : memref<128x512xbf16, #tpu.memory_space<vmem>>, vector<128x512xbf16>
    %cst_95 = arith.constant dense<0.000000e+00> : vector<8x512xf32>
    %284 = tpu.matmul %282, %283, %cst_95 {dimension_numbers = #tpu.dot_dimension_numbers<[1], [0], [0], [1], [0, 0, 1, 1], [], []>} : vector<8x128xbf16>, vector<128x512xbf16>, vector<8x512xf32> -> vector<8x512xf32>
    %285 = arith.addf %281, %284 : vector<8x512xf32>
    %286 = vector.extract_strided_slice %285 {offsets = [0, 0], sizes = [8, 384], strides = [1, 1]} : vector<8x512xf32> to vector<8x384xf32>
    %287 = arith.negf %286 : vector<8x384xf32>
    %288 = math.exp %287 : vector<8x384xf32>
    %cst_96 = arith.constant 1.000000e+00 : f32
    %289 = vector.broadcast %cst_96 : f32 to vector<8x384xf32>
    %290 = arith.addf %289, %288 : vector<8x384xf32>
    %291 = arith.divf %289, %290 : vector<8x384xf32>
    %292 = vector.extract_strided_slice %291 {offsets = [0, 0], sizes = [8, 128], strides = [1, 1]} : vector<8x384xf32> to vector<8x128xf32>
    %293 = vector.extract_strided_slice %291 {offsets = [0, 128], sizes = [8, 128], strides = [1, 1]} : vector<8x384xf32> to vector<8x128xf32>
    %294 = vector.extract_strided_slice %291 {offsets = [0, 256], sizes = [8, 128], strides = [1, 1]} : vector<8x384xf32> to vector<8x128xf32>
    %295 = vector.extract_strided_slice %285 {offsets = [0, 384], sizes = [8, 128], strides = [1, 1]} : vector<8x512xf32> to vector<8x128xf32>
    %296 = math.tanh %295 : vector<8x128xf32>
    %297 = arith.mulf %293, %273 : vector<8x128xf32>
    %298 = arith.mulf %292, %296 : vector<8x128xf32>
    %299 = arith.addf %297, %298 : vector<8x128xf32>
    %300 = math.tanh %299 : vector<8x128xf32>
    %301 = arith.mulf %294, %300 : vector<8x128xf32>
    %302 = arith.index_cast %279 : i32 to index
    %c0_97 = arith.constant 0 : index
    %303 = vector.load %arg12[%302, %c0_97] : memref<64x128xf32, #tpu.memory_space<vmem>>, vector<8x128xf32>
    tpu.vector_store %arg12[%302, %c0_97], %301 {strides = array<i32>} : memref<64x128xf32, #tpu.memory_space<vmem>>, vector<8x128xf32>,
    %c3_i32_98 = arith.constant 3 : i32
    %c8_i32_99 = arith.constant 8 : i32
    %304 = arith.muli %c3_i32_98, %c8_i32_99 : i32
    %305 = tpu.assume_multiple %304, 8 : i32
    %306 = arith.index_cast %305 : i32 to index
    %c0_100 = arith.constant 0 : index
    %307 = vector.load %arg11[%306, %c0_100] : memref<64x512xf32, #tpu.memory_space<vmem>>, vector<8x512xf32>
    %308 = arith.truncf %301 : vector<8x128xf32> to vector<8x128xbf16>
    %c0_101 = arith.constant 0 : index
    %c0_102 = arith.constant 0 : index
    %309 = vector.load %arg5[%c0_101, %c0_102] : memref<128x512xbf16, #tpu.memory_space<vmem>>, vector<128x512xbf16>
    %cst_103 = arith.constant dense<0.000000e+00> : vector<8x512xf32>
    %310 = tpu.matmul %308, %309, %cst_103 {dimension_numbers = #tpu.dot_dimension_numbers<[1], [0], [0], [1], [0, 0, 1, 1], [], []>} : vector<8x128xbf16>, vector<128x512xbf16>, vector<8x512xf32> -> vector<8x512xf32>
    %311 = arith.addf %307, %310 : vector<8x512xf32>
    %312 = vector.extract_strided_slice %311 {offsets = [0, 0], sizes = [8, 384], strides = [1, 1]} : vector<8x512xf32> to vector<8x384xf32>
    %313 = arith.negf %312 : vector<8x384xf32>
    %314 = math.exp %313 : vector<8x384xf32>
    %cst_104 = arith.constant 1.000000e+00 : f32
    %315 = vector.broadcast %cst_104 : f32 to vector<8x384xf32>
    %316 = arith.addf %315, %314 : vector<8x384xf32>
    %317 = arith.divf %315, %316 : vector<8x384xf32>
    %318 = vector.extract_strided_slice %317 {offsets = [0, 0], sizes = [8, 128], strides = [1, 1]} : vector<8x384xf32> to vector<8x128xf32>
    %319 = vector.extract_strided_slice %317 {offsets = [0, 128], sizes = [8, 128], strides = [1, 1]} : vector<8x384xf32> to vector<8x128xf32>
    %320 = vector.extract_strided_slice %317 {offsets = [0, 256], sizes = [8, 128], strides = [1, 1]} : vector<8x384xf32> to vector<8x128xf32>
    %321 = vector.extract_strided_slice %311 {offsets = [0, 384], sizes = [8, 128], strides = [1, 1]} : vector<8x512xf32> to vector<8x128xf32>
    %322 = math.tanh %321 : vector<8x128xf32>
    %323 = arith.mulf %319, %299 : vector<8x128xf32>
    %324 = arith.mulf %318, %322 : vector<8x128xf32>
    %325 = arith.addf %323, %324 : vector<8x128xf32>
    %326 = math.tanh %325 : vector<8x128xf32>
    %327 = arith.mulf %320, %326 : vector<8x128xf32>
    %328 = arith.index_cast %305 : i32 to index
    %c0_105 = arith.constant 0 : index
    %329 = vector.load %arg12[%328, %c0_105] : memref<64x128xf32, #tpu.memory_space<vmem>>, vector<8x128xf32>
    tpu.vector_store %arg12[%328, %c0_105], %327 {strides = array<i32>} : memref<64x128xf32, #tpu.memory_space<vmem>>, vector<8x128xf32>,
    %c4_i32_106 = arith.constant 4 : i32
    %c8_i32_107 = arith.constant 8 : i32
    %330 = arith.muli %c4_i32_106, %c8_i32_107 : i32
    %331 = tpu.assume_multiple %330, 8 : i32
    %332 = arith.index_cast %331 : i32 to index
    %c0_108 = arith.constant 0 : index
    %333 = vector.load %arg11[%332, %c0_108] : memref<64x512xf32, #tpu.memory_space<vmem>>, vector<8x512xf32>
    %334 = arith.truncf %327 : vector<8x128xf32> to vector<8x128xbf16>
    %c0_109 = arith.constant 0 : index
    %c0_110 = arith.constant 0 : index
    %335 = vector.load %arg5[%c0_109, %c0_110] : memref<128x512xbf16, #tpu.memory_space<vmem>>, vector<128x512xbf16>
    %cst_111 = arith.constant dense<0.000000e+00> : vector<8x512xf32>
    %336 = tpu.matmul %334, %335, %cst_111 {dimension_numbers = #tpu.dot_dimension_numbers<[1], [0], [0], [1], [0, 0, 1, 1], [], []>} : vector<8x128xbf16>, vector<128x512xbf16>, vector<8x512xf32> -> vector<8x512xf32>
    %337 = arith.addf %333, %336 : vector<8x512xf32>
    %338 = vector.extract_strided_slice %337 {offsets = [0, 0], sizes = [8, 384], strides = [1, 1]} : vector<8x512xf32> to vector<8x384xf32>
    %339 = arith.negf %338 : vector<8x384xf32>
    %340 = math.exp %339 : vector<8x384xf32>
    %cst_112 = arith.constant 1.000000e+00 : f32
    %341 = vector.broadcast %cst_112 : f32 to vector<8x384xf32>
    %342 = arith.addf %341, %340 : vector<8x384xf32>
    %343 = arith.divf %341, %342 : vector<8x384xf32>
    %344 = vector.extract_strided_slice %343 {offsets = [0, 0], sizes = [8, 128], strides = [1, 1]} : vector<8x384xf32> to vector<8x128xf32>
    %345 = vector.extract_strided_slice %343 {offsets = [0, 128], sizes = [8, 128], strides = [1, 1]} : vector<8x384xf32> to vector<8x128xf32>
    %346 = vector.extract_strided_slice %343 {offsets = [0, 256], sizes = [8, 128], strides = [1, 1]} : vector<8x384xf32> to vector<8x128xf32>
    %347 = vector.extract_strided_slice %337 {offsets = [0, 384], sizes = [8, 128], strides = [1, 1]} : vector<8x512xf32> to vector<8x128xf32>
    %348 = math.tanh %347 : vector<8x128xf32>
    %349 = arith.mulf %345, %325 : vector<8x128xf32>
    %350 = arith.mulf %344, %348 : vector<8x128xf32>
    %351 = arith.addf %349, %350 : vector<8x128xf32>
    %352 = math.tanh %351 : vector<8x128xf32>
    %353 = arith.mulf %346, %352 : vector<8x128xf32>
    %354 = arith.index_cast %331 : i32 to index
    %c0_113 = arith.constant 0 : index
    %355 = vector.load %arg12[%354, %c0_113] : memref<64x128xf32, #tpu.memory_space<vmem>>, vector<8x128xf32>
    tpu.vector_store %arg12[%354, %c0_113], %353 {strides = array<i32>} : memref<64x128xf32, #tpu.memory_space<vmem>>, vector<8x128xf32>,
    %c5_i32_114 = arith.constant 5 : i32
    %c8_i32_115 = arith.constant 8 : i32
    %356 = arith.muli %c5_i32_114, %c8_i32_115 : i32
    %357 = tpu.assume_multiple %356, 8 : i32
    %358 = arith.index_cast %357 : i32 to index
    %c0_116 = arith.constant 0 : index
    %359 = vector.load %arg11[%358, %c0_116] : memref<64x512xf32, #tpu.memory_space<vmem>>, vector<8x512xf32>
    %360 = arith.truncf %353 : vector<8x128xf32> to vector<8x128xbf16>
    %c0_117 = arith.constant 0 : index
    %c0_118 = arith.constant 0 : index
    %361 = vector.load %arg5[%c0_117, %c0_118] : memref<128x512xbf16, #tpu.memory_space<vmem>>, vector<128x512xbf16>
    %cst_119 = arith.constant dense<0.000000e+00> : vector<8x512xf32>
    %362 = tpu.matmul %360, %361, %cst_119 {dimension_numbers = #tpu.dot_dimension_numbers<[1], [0], [0], [1], [0, 0, 1, 1], [], []>} : vector<8x128xbf16>, vector<128x512xbf16>, vector<8x512xf32> -> vector<8x512xf32>
    %363 = arith.addf %359, %362 : vector<8x512xf32>
    %364 = vector.extract_strided_slice %363 {offsets = [0, 0], sizes = [8, 384], strides = [1, 1]} : vector<8x512xf32> to vector<8x384xf32>
    %365 = arith.negf %364 : vector<8x384xf32>
    %366 = math.exp %365 : vector<8x384xf32>
    %cst_120 = arith.constant 1.000000e+00 : f32
    %367 = vector.broadcast %cst_120 : f32 to vector<8x384xf32>
    %368 = arith.addf %367, %366 : vector<8x384xf32>
    %369 = arith.divf %367, %368 : vector<8x384xf32>
    %370 = vector.extract_strided_slice %369 {offsets = [0, 0], sizes = [8, 128], strides = [1, 1]} : vector<8x384xf32> to vector<8x128xf32>
    %371 = vector.extract_strided_slice %369 {offsets = [0, 128], sizes = [8, 128], strides = [1, 1]} : vector<8x384xf32> to vector<8x128xf32>
    %372 = vector.extract_strided_slice %369 {offsets = [0, 256], sizes = [8, 128], strides = [1, 1]} : vector<8x384xf32> to vector<8x128xf32>
    %373 = vector.extract_strided_slice %363 {offsets = [0, 384], sizes = [8, 128], strides = [1, 1]} : vector<8x512xf32> to vector<8x128xf32>
    %374 = math.tanh %373 : vector<8x128xf32>
    %375 = arith.mulf %371, %351 : vector<8x128xf32>
    %376 = arith.mulf %370, %374 : vector<8x128xf32>
    %377 = arith.addf %375, %376 : vector<8x128xf32>
    %378 = math.tanh %377 : vector<8x128xf32>
    %379 = arith.mulf %372, %378 : vector<8x128xf32>
    %380 = arith.index_cast %357 : i32 to index
    %c0_121 = arith.constant 0 : index
    %381 = vector.load %arg12[%380, %c0_121] : memref<64x128xf32, #tpu.memory_space<vmem>>, vector<8x128xf32>
    tpu.vector_store %arg12[%380, %c0_121], %379 {strides = array<i32>} : memref<64x128xf32, #tpu.memory_space<vmem>>, vector<8x128xf32>,
    %c6_i32_122 = arith.constant 6 : i32
    %c8_i32_123 = arith.constant 8 : i32
    %382 = arith.muli %c6_i32_122, %c8_i32_123 : i32
    %383 = tpu.assume_multiple %382, 8 : i32
    %384 = arith.index_cast %383 : i32 to index
    %c0_124 = arith.constant 0 : index
    %385 = vector.load %arg11[%384, %c0_124] : memref<64x512xf32, #tpu.memory_space<vmem>>, vector<8x512xf32>
    %386 = arith.truncf %379 : vector<8x128xf32> to vector<8x128xbf16>
    %c0_125 = arith.constant 0 : index
    %c0_126 = arith.constant 0 : index
    %387 = vector.load %arg5[%c0_125, %c0_126] : memref<128x512xbf16, #tpu.memory_space<vmem>>, vector<128x512xbf16>
    %cst_127 = arith.constant dense<0.000000e+00> : vector<8x512xf32>
    %388 = tpu.matmul %386, %387, %cst_127 {dimension_numbers = #tpu.dot_dimension_numbers<[1], [0], [0], [1], [0, 0, 1, 1], [], []>} : vector<8x128xbf16>, vector<128x512xbf16>, vector<8x512xf32> -> vector<8x512xf32>
    %389 = arith.addf %385, %388 : vector<8x512xf32>
    %390 = vector.extract_strided_slice %389 {offsets = [0, 0], sizes = [8, 384], strides = [1, 1]} : vector<8x512xf32> to vector<8x384xf32>
    %391 = arith.negf %390 : vector<8x384xf32>
    %392 = math.exp %391 : vector<8x384xf32>
    %cst_128 = arith.constant 1.000000e+00 : f32
    %393 = vector.broadcast %cst_128 : f32 to vector<8x384xf32>
    %394 = arith.addf %393, %392 : vector<8x384xf32>
    %395 = arith.divf %393, %394 : vector<8x384xf32>
    %396 = vector.extract_strided_slice %395 {offsets = [0, 0], sizes = [8, 128], strides = [1, 1]} : vector<8x384xf32> to vector<8x128xf32>
    %397 = vector.extract_strided_slice %395 {offsets = [0, 128], sizes = [8, 128], strides = [1, 1]} : vector<8x384xf32> to vector<8x128xf32>
    %398 = vector.extract_strided_slice %395 {offsets = [0, 256], sizes = [8, 128], strides = [1, 1]} : vector<8x384xf32> to vector<8x128xf32>
    %399 = vector.extract_strided_slice %389 {offsets = [0, 384], sizes = [8, 128], strides = [1, 1]} : vector<8x512xf32> to vector<8x128xf32>
    %400 = math.tanh %399 : vector<8x128xf32>
    %401 = arith.mulf %397, %377 : vector<8x128xf32>
    %402 = arith.mulf %396, %400 : vector<8x128xf32>
    %403 = arith.addf %401, %402 : vector<8x128xf32>
    %404 = math.tanh %403 : vector<8x128xf32>
    %405 = arith.mulf %398, %404 : vector<8x128xf32>
    %406 = arith.index_cast %383 : i32 to index
    %c0_129 = arith.constant 0 : index
    %407 = vector.load %arg12[%406, %c0_129] : memref<64x128xf32, #tpu.memory_space<vmem>>, vector<8x128xf32>
    tpu.vector_store %arg12[%406, %c0_129], %405 {strides = array<i32>} : memref<64x128xf32, #tpu.memory_space<vmem>>, vector<8x128xf32>,
    %c7_i32_130 = arith.constant 7 : i32
    %c8_i32_131 = arith.constant 8 : i32
    %408 = arith.muli %c7_i32_130, %c8_i32_131 : i32
    %409 = tpu.assume_multiple %408, 8 : i32
    %410 = arith.index_cast %409 : i32 to index
    %c0_132 = arith.constant 0 : index
    %411 = vector.load %arg11[%410, %c0_132] : memref<64x512xf32, #tpu.memory_space<vmem>>, vector<8x512xf32>
    %412 = arith.truncf %405 : vector<8x128xf32> to vector<8x128xbf16>
    %c0_133 = arith.constant 0 : index
    %c0_134 = arith.constant 0 : index
    %413 = vector.load %arg5[%c0_133, %c0_134] : memref<128x512xbf16, #tpu.memory_space<vmem>>, vector<128x512xbf16>
    %cst_135 = arith.constant dense<0.000000e+00> : vector<8x512xf32>
    %414 = tpu.matmul %412, %413, %cst_135 {dimension_numbers = #tpu.dot_dimension_numbers<[1], [0], [0], [1], [0, 0, 1, 1], [], []>} : vector<8x128xbf16>, vector<128x512xbf16>, vector<8x512xf32> -> vector<8x512xf32>
    %415 = arith.addf %411, %414 : vector<8x512xf32>
    %416 = vector.extract_strided_slice %415 {offsets = [0, 0], sizes = [8, 384], strides = [1, 1]} : vector<8x512xf32> to vector<8x384xf32>
    %417 = arith.negf %416 : vector<8x384xf32>
    %418 = math.exp %417 : vector<8x384xf32>
    %cst_136 = arith.constant 1.000000e+00 : f32
    %419 = vector.broadcast %cst_136 : f32 to vector<8x384xf32>
    %420 = arith.addf %419, %418 : vector<8x384xf32>
    %421 = arith.divf %419, %420 : vector<8x384xf32>
    %422 = vector.extract_strided_slice %421 {offsets = [0, 0], sizes = [8, 128], strides = [1, 1]} : vector<8x384xf32> to vector<8x128xf32>
    %423 = vector.extract_strided_slice %421 {offsets = [0, 128], sizes = [8, 128], strides = [1, 1]} : vector<8x384xf32> to vector<8x128xf32>
    %424 = vector.extract_strided_slice %421 {offsets = [0, 256], sizes = [8, 128], strides = [1, 1]} : vector<8x384xf32> to vector<8x128xf32>
    %425 = vector.extract_strided_slice %415 {offsets = [0, 384], sizes = [8, 128], strides = [1, 1]} : vector<8x512xf32> to vector<8x128xf32>
    %426 = math.tanh %425 : vector<8x128xf32>
    %427 = arith.mulf %423, %403 : vector<8x128xf32>
    %428 = arith.mulf %422, %426 : vector<8x128xf32>
    %429 = arith.addf %427, %428 : vector<8x128xf32>
    %430 = math.tanh %429 : vector<8x128xf32>
    %431 = arith.mulf %424, %430 : vector<8x128xf32>
    %432 = arith.index_cast %409 : i32 to index
    %c0_137 = arith.constant 0 : index
    %433 = vector.load %arg12[%432, %c0_137] : memref<64x128xf32, #tpu.memory_space<vmem>>, vector<8x128xf32>
    tpu.vector_store %arg12[%432, %c0_137], %431 {strides = array<i32>} : memref<64x128xf32, #tpu.memory_space<vmem>>, vector<8x128xf32>,
    %c8_i32_138 = arith.constant 8 : i32
    %c0_139 = arith.constant 0 : index
    %c0_140 = arith.constant 0 : index
    %434 = vector.load %arg0[%c0_139, %c0_140] : memref<64x64xf32, #tpu.memory_space<vmem>>, vector<64x64xf32>
    %435 = arith.truncf %434 : vector<64x64xf32> to vector<64x64xbf16>
    %c0_141 = arith.constant 0 : index
    %c0_142 = arith.constant 0 : index
    %436 = vector.load %arg7[%c0_141, %c0_142] : memref<64x128xbf16, #tpu.memory_space<vmem>>, vector<64x128xbf16>
    %cst_143 = arith.constant dense<0.000000e+00> : vector<64x128xf32>
    %437 = tpu.matmul %435, %436, %cst_143 {dimension_numbers = #tpu.dot_dimension_numbers<[1], [0], [0], [1], [0, 0, 1, 1], [], []>} : vector<64x64xbf16>, vector<64x128xbf16>, vector<64x128xf32> -> vector<64x128xf32>
    %c0_144 = arith.constant 0 : index
    %c0_145 = arith.constant 0 : index
    %438 = vector.load %arg12[%c0_144, %c0_145] : memref<64x128xf32, #tpu.memory_space<vmem>>, vector<64x128xf32>
    %439 = arith.truncf %438 : vector<64x128xf32> to vector<64x128xbf16>
    %c0_146 = arith.constant 0 : index
    %c0_147 = arith.constant 0 : index
    %440 = vector.load %arg8[%c0_146, %c0_147] : memref<128x128xbf16, #tpu.memory_space<vmem>>, vector<128x128xbf16>
    %cst_148 = arith.constant dense<0.000000e+00> : vector<64x128xf32>
    %441 = tpu.matmul %439, %440, %cst_148 {dimension_numbers = #tpu.dot_dimension_numbers<[1], [0], [0], [1], [0, 0, 1, 1], [], []>} : vector<64x128xbf16>, vector<128x128xbf16>, vector<64x128xf32> -> vector<64x128xf32>
    %442 = arith.addf %437, %441 : vector<64x128xf32>
    %c0_149 = arith.constant 0 : index
    %c0_150 = arith.constant 0 : index
    %443 = vector.load %arg9[%c0_149, %c0_150] : memref<1x128xf32, #tpu.memory_space<vmem>>, vector<1x128xf32>
    %444 = vector.broadcast %443 : vector<1x128xf32> to vector<64x128xf32>
    %445 = arith.addf %442, %444 : vector<64x128xf32>
    %c0_151 = arith.constant 0 : index
    %c0_152 = arith.constant 0 : index
    %446 = vector.load %arg10[%c0_151, %c0_152] : memref<64x128xf32, #tpu.memory_space<vmem>>, vector<64x128xf32>
    tpu.vector_store %arg10[%c0_151, %c0_152], %445 {strides = array<i32>} : memref<64x128xf32, #tpu.memory_space<vmem>>, vector<64x128xf32>,
    return
  }
}

</mosaic_0001>

<bundles_post_ra>
// kernel: input_layers_forward.1
= control target key start
LH: loop header
LB: loop body
LE: loop exit
PB: predicated region body
PF: predicated region fallthrough
CT: control target
= control target key end

     0   :  { %vm154_vm0 = vcmask 523264   ;;  %s13322_s1 = inlined_call_operand.vmem [shape: bf16[64,512], index: 1, kind: input, shape index: {}]   ;;  %s13323_s0 = inlined_call_operand.vmem [shape: f32[64,64], index: 0, kind: input, shape index: {}]   ;;  %s13324_s2 = inlined_call_operand.vmem [shape: bf16[128,512], index: 2, kind: input, shape index: {}]   ;;  %s13325_s3 = inlined_call_operand.vmem [shape: f32[1,512], index: 3, kind: input, shape index: {}]   ;;  %s13326_s4 = inlined_call_operand.vmem [shape: bf16[128,512], index: 4, kind: input, shape index: {}]   ;;  %s13327_s5 = inlined_call_operand.vmem [shape: bf16[128,512], index: 5, kind: input, shape index: {}]   ;;  %s13328_s6 = inlined_call_operand.vmem [shape: f32[1,512], index: 6, kind: input, shape index: {}]   ;;  %s13329_s8 = inlined_call_operand.vmem [shape: bf16[128,128], index: 8, kind: input, shape index: {}]   ;;  %s13330_s7 = inlined_call_operand.vmem [shape: bf16[64,128], index: 7, kind: input, shape index: {}]   ;;  %s13331_s9 = inlined_call_operand.vmem [shape: f32[1,128], index: 9, kind: input, shape index: {}]   ;;  %s13332_s10 = inlined_call_operand.vmem [shape: f32[64,128], index: 10, kind: output, shape index: {}]  }
   0x1   :  { %v6049_v0 = vld [vmem:[%s13322_s1 + $0x60] sm:$0xf]  ;;  %v8369_v1 = vld [vmem:[%s13322_s1 + $0x6c] sm:$0xf0]  ;;  %v8367_v2 = vld [vmem:[%s13322_s1 + $0x64] sm:$0xf] }
   0x2   :  { %v6050_v3 = vor.u32 %v8369_v1, %v6049_v0  ;;  %v6051_v4 = vld [vmem:[%s13322_s1 + $0x70] sm:$0xf0]  ;;  %v6033_v5 = vld [vmem:[%s13322_s1 + $0x40] sm:$0xf]  ;;  %v8365_v6 = vld [vmem:[%s13322_s1 + $0x4c] sm:$0xf0] }
   0x3   :  { %v6054_v7 = vor.u32 %v8367_v2, %v6051_v4  ;;  %v8363_v8 = vld [vmem:[%s13322_s1 + $0x44] sm:$0xf]  ;;  %v6035_v9 = vld [vmem:[%s13322_s1 + $0x50] sm:$0xf0]  ;;  %v6034_v10 = vor.u32 %v8365_v6, %v6033_v5  ;;  %v6017_v12 = vld [vmem:[%s13322_s1 + $0x20] sm:$0xf] }
   0x4   :  { %8927 = vmatpush.bf16.msra.mxu2 %v6050_v3  ;;  %171 = vmatpush.bf16.msra.mxu0 %v6050_v3  ;;  %v6038_v11 = vor.u32 %v8363_v8, %v6035_v9  ;;  %v8361_v13 = vld [vmem:[%s13322_s1 + $0x2c] sm:$0xf0]  ;;  %v8359_v14 = vld [vmem:[%s13322_s1 + $0x24] sm:$0xf]  ;;  %v6019_v15 = vld [vmem:[%s13322_s1 + $0x30] sm:$0xf0] }
   0x5   :  { %8931 = vmatpush.bf16.msra.mxu3 %v6054_v7  ;;  %200 = vmatpush.bf16.msra.mxu1 %v6054_v7  ;;  %v6018_v16 = vor.u32 %v8361_v13, %v6017_v12  ;;  %v6022_v17 = vor.u32 %v8359_v14, %v6019_v15  ;;  %v6001_v18 = vld [vmem:[%s13322_s1] sm:$0xf]  ;;  %v8357_v19 = vld [vmem:[%s13322_s1 + $0xc] sm:$0xf0]  ;;  %v8355_v20 = vld [vmem:[%s13322_s1 + $0x4] sm:$0xf] }
   0x6   :  { %v6003_v21 = vld [vmem:[%s13322_s1 + $0x10] sm:$0xf0]  ;;  %v6057_v22 = vld [vmem:[%s13322_s1 + $0x68] sm:$0xf]  ;;  %v8370_v23 = vld [vmem:[%s13322_s1 + $0x74] sm:$0xf0]  ;;  %v6002_v27 = vor.u32 %v8357_v19, %v6001_v18 }
   0x7   :  { %v40_v24 = vld [vmem:[%s13323_s0 + $0x20] sm:$0xff]  ;;  %v8368_v25 = vld [vmem:[%s13322_s1 + $0x6c] sm:$0xf]  ;;  %v6059_v26 = vld [vmem:[%s13322_s1 + $0x78] sm:$0xf0]  ;;  %v6006_v31 = vor.u32 %v8355_v20, %v6003_v21  ;;  %v6058_v32 = vor.u32 %v8370_v23, %v6057_v22 }
   0x8   :  { %8928 = vmatpush.bf16.msra.mxu2 %v6034_v10  ;;  %172 = vmatpush.bf16.msra.mxu0 %v6034_v10  ;;  %v41_v28 = vld [vmem:[%s13323_s0 + $0x28] sm:$0xff]  ;;  %v36_v29 = vld [vmem:[%s13323_s0] sm:$0xff]  ;;  %v8401_v34 = vld [vmem:[%s13324_s2 + $0xec] sm:$0xf0]  ;;  %v6062_v37 = vor.u32 %v8368_v25, %v6059_v26 }
   0x9   :  { %8932 = vmatpush.bf16.msra.mxu3 %v6038_v11  ;;  %201 = vmatpush.bf16.msra.mxu1 %v6038_v11  ;;  %v37_v30 = vld [vmem:[%s13323_s0 + $0x8] sm:$0xff]  ;;  %v6193_v33 = vld [vmem:[%s13324_s2 + $0xe0] sm:$0xf]  ;;  %v8366_v36 = vld [vmem:[%s13322_s1 + $0x54] sm:$0xf0]  ;;  %v9336_v39 = vpack.c.bf16 %v41_v28, %v40_v24 }
   0xa   :  { %v6041_v35 = vld [vmem:[%s13322_s1 + $0x48] sm:$0xf]  ;;  %v8399_v38 = vld [vmem:[%s13324_s2 + $0xe4] sm:$0xf]  ;;  %v9338_v40 = vpack.c.bf16 %v37_v30, %v36_v29  ;;  %v6195_v41 = vld [vmem:[%s13324_s2 + $0xf0] sm:$0xf0]  ;;  %v6194_v44 = vor.u32 %v8401_v34, %v6193_v33 }
   0xb   :  { %v8364_v42 = vld [vmem:[%s13322_s1 + $0x4c] sm:$0xf]  ;;  %v6043_v43 = vld [vmem:[%s13322_s1 + $0x58] sm:$0xf0]  ;;  %v6042_v45 = vor.u32 %v8366_v36, %v6041_v35  ;;  %v6177_v46 = vld [vmem:[%s13324_s2 + $0xc0] sm:$0xf]  ;;  %v6198_v50 = vor.u32 %v8399_v38, %v6195_v41 }
   0xc   :  { %8929 = vmatpush.bf16.msra.mxu2 %v6018_v16  ;;  %173 = vmatpush.bf16.msra.mxu0 %v6018_v16  ;;  %v8397_v47 = vld [vmem:[%s13324_s2 + $0xcc] sm:$0xf0]  ;;  %v6025_v48 = vld [vmem:[%s13322_s1 + $0x28] sm:$0xf]  ;;  %v8362_v49 = vld [vmem:[%s13322_s1 + $0x34] sm:$0xf0]  ;;  %v6046_v51 = vor.u32 %v8364_v42, %v6043_v43 }
   0xd   :  { %8933 = vmatpush.bf16.msra.mxu3 %v6022_v17  ;;  %202 = vmatpush.bf16.msra.mxu1 %v6022_v17  ;;  %v8395_v52 = vld [vmem:[%s13324_s2 + $0xc4] sm:$0xf]  ;;  %v6179_v53 = vld [vmem:[%s13324_s2 + $0xd0] sm:$0xf0]  ;;  %v8360_v54 = vld [vmem:[%s13322_s1 + $0x2c] sm:$0xf]  ;;  %v6178_v56 = vor.u32 %v8397_v47, %v6177_v46  ;;  %v6026_v57 = vor.u32 %v8362_v49, %v6025_v48 }
   0xe   :  { %v6027_v55 = vld [vmem:[%s13322_s1 + $0x38] sm:$0xf0]  ;;  %v6161_v58 = vld [vmem:[%s13324_s2 + $0xa0] sm:$0xf]  ;;  %v8393_v59 = vld [vmem:[%s13324_s2 + $0xac] sm:$0xf0]  ;;  %v6182_v60 = vor.u32 %v8395_v52, %v6179_v53 }
   0xf   :  { %v6009_v61 = vld [vmem:[%s13322_s1 + $0x8] sm:$0xf]  ;;  %v8358_v62 = vld [vmem:[%s13322_s1 + $0x14] sm:$0xf0]  ;;  %v6030_v63 = vor.u32 %v8360_v54, %v6027_v55  ;;  %v8391_v0 = vld [vmem:[%s13324_s2 + $0xa4] sm:$0xf]  ;;  %v6162_v4 = vor.u32 %v8393_v59, %v6161_v58 }
  0x10   :  { %8930 = vmatpush.bf16.msra.mxu2 %v6002_v27  ;;  %174 = vmatpush.bf16.msra.mxu0 %v6002_v27  ;;  %v6163_v1 = vld [vmem:[%s13324_s2 + $0xb0] sm:$0xf0]  ;;  %v8356_v2 = vld [vmem:[%s13322_s1 + $0xc] sm:$0xf]  ;;  %v6011_v3 = vld [vmem:[%s13322_s1 + $0x18] sm:$0xf0]  ;;  %v6010_v8 = vor.u32 %v8358_v62, %v6009_v61 }
  0x11   :  { %8934 = vmatpush.bf16.msra.mxu3 %v6006_v31  ;;  %203 = vmatpush.bf16.msra.mxu1 %v6006_v31  ;;  %v6145_v5 = vld [vmem:[%s13324_s2 + $0x80] sm:$0xf]  ;;  %v6201_v6 = vld [vmem:[%s13324_s2 + $0xe8] sm:$0xf]  ;;  %v8402_v7 = vld [vmem:[%s13324_s2 + $0xf4] sm:$0xf0]  ;;  %v6166_v12 = vor.u32 %v8391_v0, %v6163_v1  ;;  %v6014_v13 = vor.u32 %v8356_v2, %v6011_v3 }
  0x12   :  { %v8389_v9 = vld [vmem:[%s13324_s2 + $0x8c] sm:$0xf0]  ;;  %v8400_v10 = vld [vmem:[%s13324_s2 + $0xec] sm:$0xf]  ;;  %v6203_v11 = vld [vmem:[%s13324_s2 + $0xf8] sm:$0xf0]  ;;  %v6202_v17 = vor.u32 %v8402_v7, %v6201_v6 }
  0x13   :  { %6065 = vmatmul.msk.bf16.vlgmr.msra.gmra.mxu2 %vm154_vm0, %v9336_v39  ;;  %6063 = vmatmul.msk.bf16.vlgmr.msra.gmra.mxu0 %vm154_vm0, %v9338_v40  ;;  %v42_v14 = vld [vmem:[%s13323_s0 + $0x30] sm:$0xff]  ;;  %v8387_v15 = vld [vmem:[%s13324_s2 + $0x84] sm:$0xf]  ;;  %v6206_v18 = vor.u32 %v8400_v10, %v6203_v11  ;;  %v43_v19 = vld [vmem:[%s13323_s0 + $0x38] sm:$0xff]  ;;  %v6146_v20 = vor.u32 %v8389_v9, %v6145_v5  ;;  %v9193_v3 = vmov 0  }
  0x14   :  { %229 = vmatpush.bf16.msrb.mxu2 %v6058_v32  ;;  %6069 = vmatmul.msk.bf16.vlgmr.msra.gmra.mxu3 %vm154_vm0, %v9336_v39  ;;  %v6147_v16 = vld [vmem:[%s13324_s2 + $0x90] sm:$0xf0]  ;;  %v39_v22 = vld [vmem:[%s13323_s0 + $0x18] sm:$0xff]  ;;  %v6129_v23 = vld [vmem:[%s13324_s2 + $0x60] sm:$0xf]  ;;  %v9453_v28 = vpack.c.bf16 %v43_v19, %v42_v14 }
  0x15   :  { %258 = vmatpush.bf16.msrb.mxu3 %v6062_v37  ;;  %514 = vmatpush.bf16.msrb.mxu0 %v6194_v44  ;;  %v38_v21 = vld [vmem:[%s13323_s0 + $0x10] sm:$0xff]  ;;  %v6150_v25 = vor.u32 %v8387_v15, %v6147_v16  ;;  %v6185_v26 = vld [vmem:[%s13324_s2 + $0xc8] sm:$0xf]  ;;  %v8398_v27 = vld [vmem:[%s13324_s2 + $0xd4] sm:$0xf0] }
  0x16   :  { %6067 = vmatmul.msk.bf16.vlgmr.msra.gmra.mxu1 %vm154_vm0, %v9338_v40  ;;  %v8385_v24 = vld [vmem:[%s13324_s2 + $0x6c] sm:$0xf0]  ;;  %v9455_v29 = vpack.c.bf16 %v39_v22, %v38_v21  ;;  %v8383_v30 = vld [vmem:[%s13324_s2 + $0x64] sm:$0xf]  ;;  %v6131_v31 = vld [vmem:[%s13324_s2 + $0x70] sm:$0xf0]  ;;  %v6186_v35 = vor.u32 %v8398_v27, %v6185_v26 }
  0x17   :  { %527 = vmatpush.bf16.msrb.mxu1 %v6198_v50  ;;  %v6130_v32 = vor.u32 %v8385_v24, %v6129_v23  ;;  %v6113_v33 = vld [vmem:[%s13324_s2 + $0x40] sm:$0xf]  ;;  %v8381_v34 = vld [vmem:[%s13324_s2 + $0x4c] sm:$0xf0]  ;;  %v6134_v36 = vor.u32 %v8383_v30, %v6131_v31  ;;  %v8379_v37 = vld [vmem:[%s13324_s2 + $0x44] sm:$0xf] }
  0x18   :  { %230 = vmatpush.bf16.msrb.mxu2 %v6042_v45  ;;  %v6115_v38 = vld [vmem:[%s13324_s2 + $0x50] sm:$0xf0]  ;;  %v6097_v41 = vld [vmem:[%s13324_s2 + $0x20] sm:$0xf]  ;;  %v6114_v42 = vor.u32 %v8381_v34, %v6113_v33  ;;  %v6169_v43 = vld [vmem:[%s13324_s2 + $0xa8] sm:$0xf] }
  0x19   :  { %259 = vmatpush.bf16.msrb.mxu3 %v6046_v51  ;;  %515 = vmatpush.bf16.msrb.mxu0 %v6178_v56  ;;  %v8394_v44 = vld [vmem:[%s13324_s2 + $0xb4] sm:$0xf0]  ;;  %v8396_v45 = vld [vmem:[%s13324_s2 + $0xcc] sm:$0xf]  ;;  %v8377_v46 = vld [vmem:[%s13324_s2 + $0x2c] sm:$0xf0]  ;;  %v6118_v50 = vor.u32 %v8379_v37, %v6115_v38 }
  0x1a   :  { %v6170_v47 = vor.u32 %v8394_v44, %v6169_v43  ;;  %v6187_v48 = vld [vmem:[%s13324_s2 + $0xd8] sm:$0xf0]  ;;  %v6153_v49 = vld [vmem:[%s13324_s2 + $0x88] sm:$0xf]  ;;  %v8390_v52 = vld [vmem:[%s13324_s2 + $0x94] sm:$0xf0] }
  0x1b   :  { %528 = vmatpush.bf16.msrb.mxu1 %v6182_v60  ;;  %v6190_v51 = vor.u32 %v8396_v45, %v6187_v48  ;;  %v8392_v53 = vld [vmem:[%s13324_s2 + $0xac] sm:$0xf]  ;;  %v6171_v54 = vld [vmem:[%s13324_s2 + $0xb8] sm:$0xf0]  ;;  %v8375_v55 = vld [vmem:[%s13324_s2 + $0x24] sm:$0xf]  ;;  %v6154_v61 = vor.u32 %v8390_v52, %v6153_v49 }
  0x1c   :  { %231 = vmatpush.bf16.msrb.mxu2 %v6026_v57  ;;  %v6099_v56 = vld [vmem:[%s13324_s2 + $0x30] sm:$0xf0]  ;;  %v6098_v57 = vor.u32 %v8377_v46, %v6097_v41  ;;  %v6174_v58 = vor.u32 %v8392_v53, %v6171_v54  ;;  %v6081_v59 = vld [vmem:[%s13324_s2] sm:$0xf]  ;;  %v8373_v60 = vld [vmem:[%s13324_s2 + $0xc] sm:$0xf0] }
  0x1d   :  { %260 = vmatpush.bf16.msrb.mxu3 %v6030_v63  ;;  %516 = vmatpush.bf16.msrb.mxu0 %v6162_v4  ;;  %v6102_v62 = vor.u32 %v8375_v55, %v6099_v56  ;;  %v8371_v63 = vld [vmem:[%s13324_s2 + $0x4] sm:$0xf]  ;;  %v6083_v0 = vld [vmem:[%s13324_s2 + $0x10] sm:$0xf0]  ;;  %v6082_v1 = vor.u32 %v8373_v60, %v6081_v59  ;;  %v6137_v4 = vld [vmem:[%s13324_s2 + $0x68] sm:$0xf] }
  0x1e   :  { %v6086_v2 = vor.u32 %v8371_v63, %v6083_v0  ;;  %v8386_v5 = vld [vmem:[%s13324_s2 + $0x74] sm:$0xf0]  ;;  %v8388_v6 = vld [vmem:[%s13324_s2 + $0x8c] sm:$0xf]  ;;  %v6105_v15 = vld [vmem:[%s13324_s2 + $0x28] sm:$0xf] }
  0x1f   :  { %529 = vmatpush.bf16.msrb.mxu1 %v6166_v12  ;;  %v6138_v7 = vor.u32 %v8386_v5, %v6137_v4  ;;  %v8382_v9 = vld [vmem:[%s13324_s2 + $0x54] sm:$0xf0]  ;;  %v8384_v11 = vld [vmem:[%s13324_s2 + $0x6c] sm:$0xf]  ;;  %v6139_v12 = vld [vmem:[%s13324_s2 + $0x78] sm:$0xf0] }
  0x20   :  { %232 = vmatpush.bf16.msrb.mxu2 %v6010_v8  ;;  %v6155_v8 = vld [vmem:[%s13324_s2 + $0x98] sm:$0xf0]  ;;  %v6142_v14 = vor.u32 %v8384_v11, %v6139_v12  ;;  %v8378_v16 = vld [vmem:[%s13324_s2 + $0x34] sm:$0xf0]  ;;  %v8376_v23 = vld [vmem:[%s13324_s2 + $0x2c] sm:$0xf] }
  0x21   :  { %261 = vmatpush.bf16.msrb.mxu3 %v6014_v13  ;;  %517 = vmatpush.bf16.msrb.mxu0 %v6146_v20  ;;  %v6158_v10 = vor.u32 %v8388_v6, %v6155_v8  ;;  %v6123_v19 = vld [vmem:[%s13324_s2 + $0x58] sm:$0xf0]  ;;  %v6089_v20 = vld [vmem:[%s13324_s2 + $0x8] sm:$0xf]  ;;  %v8374_v21 = vld [vmem:[%s13324_s2 + $0x14] sm:$0xf0] }
  0x22   :  { %v6107_v24 = vld [vmem:[%s13324_s2 + $0x38] sm:$0xf0]  ;;  %v8372_v27 = vld [vmem:[%s13324_s2 + $0xc] sm:$0xf]  ;;  %v64_v31 = vld [vmem:[%s13325_s3] sm:$0xf] }
  0x23   :  { %530 = vmatpush.bf16.msrb.mxu1 %v6150_v25  ;;  %6066 = vmatmul.msk.bf16.gmra.mxu2 %vm154_vm0, %v9453_v28  ;;  %v6090_v25 = vor.u32 %v8374_v21, %v6089_v20  ;;  %v6110_v26 = vor.u32 %v8376_v23, %v6107_v24  ;;  %v9608_v34 = vperm.slane %v64_v31, 0  ;;  %v9658_v4 = vperm.slane %v64_v31, 3  ;;  %v6324_v20 = vld [vmem:[%s13324_s2 + $0xe0] sm:$0xf]  ;;  %v8433_v21 = vld [vmem:[%s13324_s2 + $0xec] sm:$0xf0] }
  0x24   :  { %540 = vmatpush.bf16.msra.mxu2 %v6202_v17  ;;  %6064 = vmatmul.msk.bf16.gmra.mxu0 %vm154_vm0, %v9455_v29  ;;  %v8380_v17 = vld [vmem:[%s13324_s2 + $0x4c] sm:$0xf]  ;;  %v6325_v23 = vor.u32 %v8433_v21, %v6324_v20  ;;  %v6326_v24 = vld [vmem:[%s13324_s2 + $0xf0] sm:$0xf0] }
  0x25   :  { %553 = vmatpush.bf16.msra.mxu3 %v6206_v18  ;;  %518 = vmatpush.bf16.msrb.mxu0 %v6130_v32  ;;  %v6106_v18 = vor.u32 %v8378_v16, %v6105_v15  ;;  %v6126_v22 = vor.u32 %v8380_v17, %v6123_v19 }
  0x26   :  { %6070 = vmatmul.msk.bf16.gmra.mxu3 %vm154_vm0, %v9453_v28  ;;  %6068 = vmatmul.msk.bf16.gmra.mxu1 %vm154_vm0, %v9455_v29 }
  0x27   :  { %531 = vmatpush.bf16.msrb.mxu1 %v6134_v36 }
  0x28   :  { %541 = vmatpush.bf16.msra.mxu2 %v6186_v35  ;;  %v9610_v35 = vperm.slane %v64_v31, 1 }
  0x29   :  { %519 = vmatpush.bf16.msrb.mxu0 %v6114_v42  ;;  %554 = vmatpush.bf16.msra.mxu3 %v6190_v51 }
  0x2b   :  { %532 = vmatpush.bf16.msrb.mxu1 %v6118_v50 }
  0x2c   :  { %542 = vmatpush.bf16.msra.mxu2 %v6170_v47 }
  0x2d   :  { %520 = vmatpush.bf16.msrb.mxu0 %v6098_v57  ;;  %555 = vmatpush.bf16.msra.mxu3 %v6174_v58 }
  0x2f   :  { %533 = vmatpush.bf16.msrb.mxu1 %v6102_v62 }
  0x30   :  { %543 = vmatpush.bf16.msra.mxu2 %v6154_v61 }
  0x31   :  { %521 = vmatpush.bf16.msrb.mxu0 %v6082_v1  ;;  %556 = vmatpush.bf16.msra.mxu3 %v6158_v10  ;;  %v9655_v1 = vperm.slane %v64_v31, 2  ;;  %v6334_v31 = vld [vmem:[%s13324_s2 + $0xf8] sm:$0xf0] }
  0x33   :  { %534 = vmatpush.bf16.msrb.mxu1 %v6086_v2  ;;  %6071 = vmatmul.msk.bf16.vlgmr.msrb.gmra.mxu2 %vm154_vm0, %v9338_v40 }
  0x34   :  { %522 = vmatmul.bf16.vlgmr.msrb.gmra.mxu0 %v9193_v3  ;;  %544 = vmatpush.bf16.msra.mxu2 %v6138_v7 }
  0x35   :  { %557 = vmatpush.bf16.msra.mxu3 %v6142_v14  ;;  %834 = vmatpush.bf16.msra.mxu0 %v6325_v23  ;;  %v6302_v23 = vld [vmem:[%s13324_s2 + $0xb8] sm:$0xf0] }
  0x36   :  { %6075 = vmatmul.msk.bf16.vlgmr.msrb.gmra.mxu3 %vm154_vm0, %v9338_v40  ;;  %535 = vmatmul.bf16.vlgmr.msrb.gmra.mxu1 %v9193_v3  ;;  %v6121_v40 = vld [vmem:[%s13324_s2 + $0x48] sm:$0xf] }
  0x37   :  { %v6122_v13 = vor.u32 %v8382_v9, %v6121_v40 }
  0x39   :  { %545 = vmatpush.bf16.msra.mxu2 %v6122_v13  ;;  %558 = vmatpush.bf16.msra.mxu3 %v6126_v22  ;;  %v8431_v22 = vld [vmem:[%s13324_s2 + $0xe4] sm:$0xf] }
  0x3d   :  { %546 = vmatpush.bf16.msra.mxu2 %v6106_v18  ;;  %559 = vmatpush.bf16.msra.mxu3 %v6110_v26  ;;  %v8434_v26 = vld [vmem:[%s13324_s2 + $0xf4] sm:$0xf0] }
  0x41   :  { %547 = vmatpush.bf16.msra.mxu2 %v6090_v25  ;;  %v6332_v25 = vld [vmem:[%s13324_s2 + $0xe8] sm:$0xf] }
  0x43   :  { %6072 = vmatmul.msk.bf16.gmra.mxu2 %vm154_vm0, %v9455_v29 }
  0x46   :  { %6076 = vmatmul.msk.bf16.gmra.mxu3 %vm154_vm0, %v9455_v29  ;;  %v6091_v29 = vld [vmem:[%s13324_s2 + $0x18] sm:$0xf0] }
  0x47   :  { %v6094_v30 = vor.u32 %v8372_v27, %v6091_v29  ;;  %v6329_v27 = vor.u32 %v8431_v22, %v6326_v24  ;;  %v6333_v29 = vor.u32 %v8434_v26, %v6332_v25  ;;  %v8424_v22 = vld [vmem:[%s13324_s2 + $0xac] sm:$0xf]  ;;  %v6276_v25 = vld [vmem:[%s13324_s2 + $0x80] sm:$0xf]  ;;  %v8421_v26 = vld [vmem:[%s13324_s2 + $0x8c] sm:$0xf0] }
  0x48   :  { %v6305_v24 = vor.u32 %v8424_v22, %v6302_v23  ;;  %v8416_v23 = vld [vmem:[%s13324_s2 + $0x6c] sm:$0xf] }
  0x49   :  { %560 = vmatpush.bf16.msra.mxu3 %v6094_v30  ;;  %v8432_v30 = vld [vmem:[%s13324_s2 + $0xec] sm:$0xf]  ;;  %847 = vmatpush.bf16.msra.mxu1 %v6329_v27  ;;  %v8419_v27 = vld [vmem:[%s13324_s2 + $0x84] sm:$0xf] }
  0x4a   :  { %860 = vmatpush.bf16.msrb.mxu2 %v6333_v29  ;;  %v6277_v29 = vor.u32 %v8421_v26, %v6276_v25  ;;  %v6244_v26 = vld [vmem:[%s13324_s2 + $0x40] sm:$0xf] }
  0x53   :  { %6073 = vmatmul.msk.bf16.gmra.mxu2 %vm154_vm0, %v9336_v39 }
  0x56   :  { %6077 = vmatmul.msk.bf16.gmra.mxu3 %vm154_vm0, %v9336_v39 }
  0x63   :  { %6074 = vmatmul.msk.bf16.gmra.mxu2 %vm154_vm0, %v9453_v28 }
  0x66   :  { %6078 = vmatmul.msk.bf16.gmra.mxu3 %vm154_vm0, %v9453_v28 }
  0x73   :  { %548 = vmatmul.bf16.vlgmr.msra.gmra.mxu2 %v9193_v3 }
  0x76   :  { %561 = vmatmul.bf16.vlgmr.msra.gmra.mxu3 %v9193_v3 }
  0x90   :  { %v176_v32 = vpop.f32.mrf.mxu0 }
  0x91   :  { %v177_v0 = vadd.f32 %v176_v32, %v9608_v34 }
  0x93   :  { %v205_v33 = vpop.f32.mrf.mxu1 }
  0x94   :  { %v206_v2 = vadd.f32 %v205_v33, %v9610_v35 }
  0x96   :  { %v186_v39 = vpop.f32.mrf.mxu2 }
  0x97   :  { %v9613_v36 = vadd.f32 %v186_v39, %v9608_v34  ;;  %v215_v37 = vpop.f32.mrf.mxu3  ;;  %v6337_v39 = vor.u32 %v8432_v30, %v6334_v31  ;;  %v6278_v30 = vld [vmem:[%s13324_s2 + $0x90] sm:$0xf0]  ;;  %v6284_v31 = vld [vmem:[%s13324_s2 + $0x88] sm:$0xf] }
  0x98   :  { %v9616_v28 = vadd.f32 %v215_v37, %v9610_v35  ;;  %v9618_v38 = vpop.f32.mrf.mxu0  ;;  %v6308_v37 = vld [vmem:[%s13324_s2 + $0xc0] sm:$0xf] }
  0x99   :  { %873 = vmatpush.bf16.msrb.mxu3 %v6337_v39  ;;  %v8422_v39 = vld [vmem:[%s13324_s2 + $0x94] sm:$0xf0] }
  0x9b   :  { %v9620_v41 = vpop.f32.mrf.mxu1 }
  0x9e   :  { %v9622_v42 = vpop.f32.mrf.mxu2 }
  0x9f   :  { %v9624_v43 = vpop.f32.mrf.mxu3 }
  0xa1   :  { %v181_v44 = vpop.f32.mrf.mxu0 }
  0xa2   :  { %v9627_v45 = vadd.f32 %v181_v44, %v9608_v34  ;;  %v8429_v44 = vld [vmem:[%s13324_s2 + $0xcc] sm:$0xf0] }
  0xa3   :  { %v210_v46 = vpop.f32.mrf.mxu1 }
  0xa4   :  { %v9630_v47 = vadd.f32 %v210_v46, %v9610_v35  ;;  %v8427_v46 = vld [vmem:[%s13324_s2 + $0xc4] sm:$0xf] }
  0xa6   :  { %v191_v48 = vpop.f32.mrf.mxu2 }
  0xa7   :  { %v9633_v49 = vadd.f32 %v191_v48, %v9608_v34  ;;  %v6309_v48 = vor.u32 %v8429_v44, %v6308_v37 }
  0xa9   :  { %v220_v50 = vpop.f32.mrf.mxu3  ;;  %v9638_v52 = vpop.f32.mrf.mxu0  ;;  %835 = vmatpush.bf16.msra.mxu0 %v6309_v48  ;;  %v6285_v48 = vor.u32 %v8422_v39, %v6284_v31  ;;  %v6246_v31 = vld [vmem:[%s13324_s2 + $0x50] sm:$0xf0]  ;;  %v6252_v39 = vld [vmem:[%s13324_s2 + $0x48] sm:$0xf] }
  0xaa   :  { %v9636_v51 = vadd.f32 %v220_v50, %v9610_v35  ;;  %v6310_v50 = vld [vmem:[%s13324_s2 + $0xd0] sm:$0xf0] }
  0xab   :  { %v9640_v53 = vpop.f32.mrf.mxu1 }
  0xae   :  { %v9642_v54 = vpop.f32.mrf.mxu2 }
  0xb1   :  { %v9644_v55 = vpop.f32.mrf.mxu3  ;;  %v523_v56 = vpop.f32.mrf.mxu0 }
  0xb2   :  { %v566_v40 = vadd.f32 %v523_v56, %v177_v0  ;;  %v6316_v56 = vld [vmem:[%s13324_s2 + $0xc8] sm:$0xf] }
  0xb3   :  { %v536_v57 = vpop.f32.mrf.mxu1 }
  0xb4   :  { %v567_v9 = vadd.f32 %v536_v57, %v206_v2  ;;  %v6207_v10 = vmul.f32 -1.442695, %v566_v40  ;;  %v8430_v57 = vld [vmem:[%s13324_s2 + $0xd4] sm:$0xf0]  ;;  %v8428_v2 = vld [vmem:[%s13324_s2 + $0xcc] sm:$0xf] }
  0xb5   :  { %v6317_v0 = vor.u32 %v8430_v57, %v6316_v56  ;;  %v6286_v56 = vld [vmem:[%s13324_s2 + $0x98] sm:$0xf0] }
  0xb6   :  { %v9646_v58 = vpop.f32.mrf.mxu2  ;;  %v6208_v11 = vmul.f32 -1.442695, %v567_v9  ;;  %8937 = vpow2.f32 %v6207_v10  ;;  %v6292_v9 = vld [vmem:[%s13324_s2 + $0xa0] sm:$0xf]  ;;  %v8425_v10 = vld [vmem:[%s13324_s2 + $0xac] sm:$0xf0] }
  0xb7   :  { %861 = vmatpush.bf16.msrb.mxu2 %v6317_v0 }
  0xb8   :  { %8939 = vpow2.f32 %v6208_v11  ;;  %v8423_v11 = vld [vmem:[%s13324_s2 + $0xa4] sm:$0xf] }
  0xb9   :  { %v9648_v59 = vpop.f32.mrf.mxu3  ;;  %v525_v60 = vpop.f32.mrf.mxu0 }
  0xbb   :  { %v538_v61 = vpop.f32.mrf.mxu1 }
  0xbc   :  { %v8938_v15 = vpop.eup %8937  ;;  %v6313_v61 = vor.u32 %v8427_v46, %v6310_v50  ;;  %v6281_v46 = vor.u32 %v8419_v27, %v6278_v30  ;;  %v8420_v50 = vld [vmem:[%s13324_s2 + $0x8c] sm:$0xf]  ;;  %v8413_v27 = vld [vmem:[%s13324_s2 + $0x4c] sm:$0xf0] }
  0xbd   :  { %v9700_v32 = vadd.f32 1.0, %v8938_v15  ;;  %v6294_v15 = vld [vmem:[%s13324_s2 + $0xb0] sm:$0xf0]  ;;  %v6245_v30 = vor.u32 %v8413_v27, %v6244_v26  ;;  %v6212_v26 = vld [vmem:[%s13324_s2] sm:$0xf] }
  0xbe   :  { %v9650_v62 = vpop.f32.mrf.mxu2  ;;  %v8940_v18 = vpop.eup %8939  ;;  %848 = vmatpush.bf16.msra.mxu1 %v6313_v61  ;;  %v6297_v20 = vor.u32 %v8423_v11, %v6294_v15  ;;  %v6268_v15 = vld [vmem:[%s13324_s2 + $0x68] sm:$0xf] }
  0xbf   :  { %v9702_v33 = vadd.f32 1.0, %v8940_v18  ;;  %8941 = vrcp.f32 %v9700_v32  ;;  %v8426_v18 = vld [vmem:[%s13324_s2 + $0xb4] sm:$0xf0]  ;;  %vm587_vm3 = vweird.f32 %v9700_v32 }
  0xc1   :  { %v9652_v63 = vpop.f32.mrf.mxu3  ;;  %8943 = vrcp.f32 %v9702_v33  ;;  %vm602_vm1 = vweird.f32 %v9702_v33 }
  0xc2   :  { %849 = vmatpush.bf16.msra.mxu1 %v6297_v20 }
  0xc5   :  { %v9776_v37 = vpop.eup %8941 }
  0xc6   :  { %v239_v5 = vpop.f32.mrf.mxu2  ;;  %850 = vmatpush.bf16.msra.mxu1 %v6281_v46  ;;  %vm588_vm4 = vweird.f32 %v9776_v37 }
  0xc7   :  { %v9661_v6 = vadd.f32 %v239_v5, %v9655_v1  ;;  %v6318_v5 = vld [vmem:[%s13324_s2 + $0xd8] sm:$0xf0]  ;;  %v9784_v57 = vpop.eup %8943  ;;  %vm589_vm6 = vmor %vm587_vm3, %vm588_vm4 }
  0xc8   :  { %v6321_v40 = vor.u32 %v8428_v2, %v6318_v5  ;;  %v6289_v2 = vor.u32 %v8420_v50, %v6286_v56  ;;  %v598_v20 = vmul.f32 %v9784_v57, %v9702_v33  ;;  %vm603_vm2 = vweird.f32 %v9784_v57 }
  0xc9   :  { %v268_v7 = vpop.f32.mrf.mxu3  ;;  %vm9914_vm5 = vmor %vm602_vm1, %vm603_vm2 }
  0xca   :  { %v9664_v8 = vadd.f32 %v268_v7, %v9658_v4  ;;  %874 = vmatpush.bf16.msrb.mxu3 %v6321_v40  ;;  %v6260_v40 = vld [vmem:[%s13324_s2 + $0x60] sm:$0xf] }
  0xce   :  { %v9666_v12 = vpop.f32.mrf.mxu2  ;;  %875 = vmatpush.bf16.msrb.mxu3 %v6305_v24  ;;  %v6270_v24 = vld [vmem:[%s13324_s2 + $0x78] sm:$0xf0] }
  0xcf   :  { %v6273_v25 = vor.u32 %v8416_v23, %v6270_v24  ;;  %v8408_v24 = vld [vmem:[%s13324_s2 + $0x2c] sm:$0xf] }
  0xd1   :  { %v9668_v13 = vpop.f32.mrf.mxu3 }
  0xd2   :  { %876 = vmatpush.bf16.msrb.mxu3 %v6289_v2  ;;  %v8412_v2 = vld [vmem:[%s13324_s2 + $0x4c] sm:$0xf] }
  0xd6   :  { %v244_v14 = vpop.f32.mrf.mxu2  ;;  %877 = vmatpush.bf16.msrb.mxu3 %v6273_v25  ;;  %v6238_v25 = vld [vmem:[%s13324_s2 + $0x38] sm:$0xf0] }
  0xd7   :  { %v9671_v16 = vadd.f32 %v244_v14, %v9655_v1  ;;  %v6293_v14 = vor.u32 %v8425_v10, %v6292_v9  ;;  %v8417_v9 = vld [vmem:[%s13324_s2 + $0x6c] sm:$0xf0]  ;;  %v8415_v10 = vld [vmem:[%s13324_s2 + $0x64] sm:$0xf]  ;;  %v6241_v27 = vor.u32 %v8408_v24, %v6238_v25  ;;  %v593_v24 = vand.u32 2147483648, %v9700_v32 }
  0xd8   :  { %v6261_v11 = vor.u32 %v8417_v9, %v6260_v40  ;;  %v6254_v40 = vld [vmem:[%s13324_s2 + $0x58] sm:$0xf0] }
  0xd9   :  { %v273_v17 = vpop.f32.mrf.mxu3  ;;  %836 = vmatpush.bf16.msra.mxu0 %v6293_v14  ;;  %v6262_v14 = vld [vmem:[%s13324_s2 + $0x70] sm:$0xf0] }
  0xda   :  { %v9674_v19 = vadd.f32 %v273_v17, %v9658_v4  ;;  %v6300_v17 = vld [vmem:[%s13324_s2 + $0xa8] sm:$0xf] }
  0xdb   :  { %v6301_v21 = vor.u32 %v8426_v18, %v6300_v17  ;;  %v8418_v17 = vld [vmem:[%s13324_s2 + $0x74] sm:$0xf0]  ;;  %v583_v18 = vmul.f32 %v9776_v37, %v9700_v32 }
  0xdc   :  { %v6269_v22 = vor.u32 %v8418_v17, %v6268_v15  ;;  %v8407_v15 = vld [vmem:[%s13324_s2 + $0x24] sm:$0xf] }
  0xdd   :  { %862 = vmatpush.bf16.msrb.mxu2 %v6301_v21  ;;  %837 = vmatpush.bf16.msra.mxu0 %v6277_v29  ;;  %v6265_v21 = vor.u32 %v8415_v10, %v6262_v14  ;;  %v8411_v29 = vld [vmem:[%s13324_s2 + $0x44] sm:$0xf]  ;;  %v584_v46 = vsub.f32 1.0, %v583_v18  ;;  %v6257_v10 = vor.u32 %v8412_v2, %v6254_v40  ;;  %v8409_v14 = vld [vmem:[%s13324_s2 + $0x2c] sm:$0xf0]  ;;  %v235_v40 = vadd.f32 %v9646_v58, %v9655_v1 }
  0xde   :  { %v9722_v60 = vpop.f32.mrf.mxu2  ;;  %v6249_v56 = vor.u32 %v8411_v29, %v6246_v31  ;;  %v6230_v18 = vld [vmem:[%s13324_s2 + $0x30] sm:$0xf0]  ;;  %v8405_v29 = vld [vmem:[%s13324_s2 + $0xc] sm:$0xf0]  ;;  %v8404_v2 = vld [vmem:[%s13324_s2 + $0xc] sm:$0xf] }
  0xdf   :  { %851 = vmatpush.bf16.msra.mxu1 %v6265_v21  ;;  %v8410_v21 = vld [vmem:[%s13324_s2 + $0x34] sm:$0xf0]  ;;  %878 = vmatpush.bf16.msrb.mxu3 %v6257_v10  ;;  %v6214_v31 = vld [vmem:[%s13324_s2 + $0x10] sm:$0xf0]  ;;  %v608_v58 = vand.u32 2147483648, %v9702_v33 }
  0xe1   :  { %v9730_v7 = vpop.f32.mrf.mxu3  ;;  %863 = vmatpush.bf16.msrb.mxu2 %v6285_v48  ;;  %838 = vmatpush.bf16.msra.mxu0 %v6261_v11  ;;  %v599_v48 = vsub.f32 1.0, %v598_v20  ;;  %v6228_v11 = vld [vmem:[%s13324_s2 + $0x20] sm:$0xf]  ;;  %v6236_v20 = vld [vmem:[%s13324_s2 + $0x28] sm:$0xf] }
  0xe2   :  { %v6229_v17 = vor.u32 %v8409_v14, %v6228_v11  ;;  %v6237_v23 = vor.u32 %v8410_v21, %v6236_v20  ;;  %v6222_v11 = vld [vmem:[%s13324_s2 + $0x18] sm:$0xf0]  ;;  %v585_v14 = vmul.f32 %v9776_v37, %v584_v46  ;;  %v606_v46 = vand.u32 2147483647, %v9702_v33 }
  0xe3   :  { %852 = vmatpush.bf16.msra.mxu1 %v6249_v56  ;;  %v6220_v56 = vld [vmem:[%s13324_s2 + $0x8] sm:$0xf]  ;;  %879 = vmatpush.bf16.msrb.mxu3 %v6241_v27  ;;  %v591_v27 = vand.u32 2147483647, %v9700_v32 }
  0xe4   :  { %vm607_vm7 = vcmp.eq.f32.partialorder %v606_v46, 8.507059e+37 }
  0xe5   :  { %864 = vmatpush.bf16.msrb.mxu2 %v6269_v22  ;;  %839 = vmatpush.bf16.msra.mxu0 %v6245_v30  ;;  %v6233_v22 = vor.u32 %v8407_v15, %v6230_v18  ;;  %v8403_v30 = vld [vmem:[%s13324_s2 + $0x4] sm:$0xf]  ;;  %v6225_v15 = vor.u32 %v8404_v2, %v6222_v11  ;;  %vm592_vm8 = vcmp.eq.f32.partialorder %v591_v27, 8.507059e+37 }
  0xe6   :  { %v249_v44 = vpop.f32.mrf.mxu2 }
  0xe7   :  { %v9787_v61 = vadd.f32 %v249_v44, %v9655_v1  ;;  %v8414_v44 = vld [vmem:[%s13324_s2 + $0x54] sm:$0xf0]  ;;  %853 = vmatpush.bf16.msra.mxu1 %v6233_v22  ;;  %880 = vmatpush.bf16.msrb.mxu3 %v6225_v15 }
  0xe9   :  { %v278_v0 = vpop.f32.mrf.mxu3  ;;  %840 = vmatpush.bf16.msra.mxu0 %v6229_v17  ;;  %v264_v17 = vadd.f32 %v9648_v59, %v9658_v4  ;;  %v6455_v59 = vld [vmem:[%s13324_s2 + $0xe0] sm:$0xf] }
  0xea   :  { %v9790_v5 = vadd.f32 %v278_v0, %v9658_v4  ;;  %v6253_v0 = vor.u32 %v8414_v44, %v6252_v39  ;;  %v600_v39 = vmul.f32 %v9784_v57, %v599_v48  ;;  %v6213_v44 = vor.u32 %v8405_v29, %v6212_v26 }
  0xeb   :  { %v6217_v48 = vor.u32 %v8403_v30, %v6214_v31  ;;  %v586_v26 = vadd.f32 %v9776_v37, %v585_v14  ;;  %v609_v29 = vor.u32 1.1754944e-38, %v608_v58  ;;  %v594_v30 = vor.u32 1.1754944e-38, %v593_v24 }
  0xec   :  { %865 = vmatpush.bf16.msrb.mxu2 %v6253_v0  ;;  %v8406_v0 = vld [vmem:[%s13324_s2 + $0x14] sm:$0xf0]  ;;  %v601_v22 = vadd.f32 %v9784_v57, %v600_v39 }
  0xed   :  { %v6221_v10 = vor.u32 %v8406_v0, %v6220_v56  ;;  %841 = vmatpush.bf16.msra.mxu0 %v6213_v44  ;;  %854 = vmatpush.bf16.msra.mxu1 %v6217_v48  ;;  %v590_v31 = vsel %vm589_vm6, %v9776_v37, %v586_v26  ;;  %v8463_v26 = vld [vmem:[%s13324_s2 + $0xe4] sm:$0xf] }
  0xee   :  { %v9838_v50 = vpop.f32.mrf.mxu2  ;;  %v605_v33 = vsel %vm9914_vm5, %v9784_v57, %v601_v22  ;;  %v595_v2 = vsel %vm592_vm8, %v594_v30, %v590_v31  ;;  %v8466_v30 = vld [vmem:[%s13324_s2 + $0xf4] sm:$0xf0] }
  0xef   :  { %v610_v39 = vsel %vm607_vm7, %v609_v29, %v605_v33  ;;  %v6457_v29 = vld [vmem:[%s13324_s2 + $0xf0] sm:$0xf0]  ;;  %v6463_v33 = vld [vmem:[%s13324_s2 + $0xe8] sm:$0xf] }
  0xf0   :  { %866 = vmatpush.bf16.msrb.mxu2 %v6237_v23  ;;  %v628_v48 = vmul.f32 0.0, %v610_v39  ;;  %v6460_v31 = vor.u32 %v8463_v26, %v6457_v29  ;;  %v6464_v39 = vor.u32 %v8466_v30, %v6463_v33  ;;  %v8456_v29 = vld [vmem:[%s13324_s2 + $0xac] sm:$0xf]  ;;  %v6433_v33 = vld [vmem:[%s13324_s2 + $0xb8] sm:$0xf0] }
  0xf1   :  { %v9846_v9 = vpop.f32.mrf.mxu3  ;;  %v6436_v30 = vor.u32 %v8456_v29, %v6433_v33 }
  0xf2   :  { %1168 = vmatpush.bf16.msrb.mxu1 %v6460_v31  ;;  %v6407_v31 = vld [vmem:[%s13324_s2 + $0x80] sm:$0xf] }
  0xf4   :  { %867 = vmatpush.bf16.msrb.mxu2 %v6221_v10 }
  0xf6   :  { %v549_v18 = vpop.f32.mrf.mxu2 }
  0xf7   :  { %v568_v20 = vadd.f32 %v549_v18, %v235_v40 }
  0xf8   :  { %1181 = vmatpush.bf16.msra.mxu2 %v6464_v39  ;;  %v8453_v39 = vld [vmem:[%s13324_s2 + $0x8c] sm:$0xf0] }
  0xf9   :  { %v562_v21 = vpop.f32.mrf.mxu3  ;;  %v6209_v25 = vmul.f32 -1.442695, %v568_v20 }
  0xfa   :  { %v569_v23 = vadd.f32 %v562_v21, %v264_v17 }
  0xfc   :  { %8945 = vtanh.f32 %v569_v23 }
  0xfd   :  { %8947 = vpow2.f32 %v6209_v25  ;;  %v8465_v25 = vld [vmem:[%s13324_s2 + $0xec] sm:$0xf0] }
  0xfe   :  { %v551_v44 = vpop.f32.mrf.mxu2  ;;  %v6456_v27 = vor.u32 %v8465_v25, %v6455_v59  ;;  %v6431_v59 = vld [vmem:[%s13324_s2 + $0xa8] sm:$0xf]  ;;  %v8458_v25 = vld [vmem:[%s13324_s2 + $0xb4] sm:$0xf0] }
  0xff   :  { %v8464_v44 = vld [vmem:[%s13324_s2 + $0xec] sm:$0xf] }
 0x100   :  { %1155 = vmatpush.bf16.msrb.mxu0 %v6456_v27  ;;  %v6432_v27 = vor.u32 %v8458_v25, %v6431_v59  ;;  %v8448_v25 = vld [vmem:[%s13324_s2 + $0x6c] sm:$0xf] }
 0x101   :  { %v564_v56 = vpop.f32.mrf.mxu3 }
 0x102   :  { %v8946_v0 = vpop.eup %8945  ;;  %v6465_v56 = vld [vmem:[%s13324_s2 + $0xf8] sm:$0xf0] }
 0x103   :  { %v8948_v40 = vpop.eup %8947  ;;  %v629_v32 = vmul.f32 %v8946_v0, %v595_v2  ;;  %v6468_v0 = vor.u32 %v8464_v44, %v6465_v56  ;;  %v6439_v2 = vld [vmem:[%s13324_s2 + $0xc0] sm:$0xf]  ;;  %v8451_v44 = vld [vmem:[%s13324_s2 + $0x84] sm:$0xf]  ;;  %v6408_v56 = vor.u32 %v8453_v39, %v6407_v31 }
 0x104   :  { %v581_v10 = vadd.f32 1.0, %v8948_v40  ;;  %v8461_v40 = vld [vmem:[%s13324_s2 + $0xcc] sm:$0xf0]  ;;  %v8443_v39 = vld [vmem:[%s13324_s2 + $0x44] sm:$0xf] }
 0x105   :  { %v9926_v11 = vadd.f32 %v629_v32, %v628_v48  ;;  %v8459_v48 = vld [vmem:[%s13324_s2 + $0xc4] sm:$0xf]  ;;  %1194 = vmatpush.bf16.msra.mxu3 %v6468_v0  ;;  %v6440_v32 = vor.u32 %v8461_v40, %v6439_v2  ;;  %v6409_v0 = vld [vmem:[%s13324_s2 + $0x90] sm:$0xf0]  ;;  %v6415_v2 = vld [vmem:[%s13324_s2 + $0x88] sm:$0xf] }
 0x106   :  { %8949 = vrcp.f32 %v581_v10  ;;  %v623_v17 = vand.u32 2147483648, %v581_v10  ;;  %v621_v58 = vand.u32 2147483647, %v581_v10  ;;  %vm617_vm10 = vweird.f32 %v581_v10  ;;  %v8454_v40 = vld [vmem:[%s13324_s2 + $0x94] sm:$0xf0] }
 0x107   :  { %8951 = vtanh.f32 %v9926_v11  ;;  %1156 = vmatpush.bf16.msrb.mxu0 %v6440_v32  ;;  %v6416_v32 = vor.u32 %v8454_v40, %v6415_v2  ;;  %v8446_v2 = vld [vmem:[%s13324_s2 + $0x54] sm:$0xf0] }
 0x108   :  { %v624_v20 = vor.u32 1.1754944e-38, %v623_v17  ;;  %vm622_vm12 = vcmp.eq.f32.partialorder %v621_v58, 8.507059e+37  ;;  %v6449_v58 = vld [vmem:[%s13324_s2 + $0xd8] sm:$0xf0] }
 0x10c   :  { %v8950_v14 = vpop.eup %8949 }
 0x10d   :  { %v613_v15 = vmul.f32 %v8950_v14, %v581_v10  ;;  %vm618_vm9 = vweird.f32 %v8950_v14  ;;  %v8952_v22 = vpop.eup %8951  ;;  %v6441_v10 = vld [vmem:[%s13324_s2 + $0xd0] sm:$0xf0] }
 0x10e   :  { %vm619_vm11 = vmor %vm617_vm10, %vm618_vm9 }
 0x10f   :  { %v614_v57 = vsub.f32 1.0, %v613_v15  ;;  %v8462_v15 = vld [vmem:[%s13324_s2 + $0xd4] sm:$0xf0] }
 0x111   :  { %v615_v37 = vmul.f32 %v8950_v14, %v614_v57  ;;  %v6444_v57 = vor.u32 %v8459_v48, %v6441_v10  ;;  %v6412_v48 = vor.u32 %v8451_v44, %v6409_v0  ;;  %v8452_v10 = vld [vmem:[%s13324_s2 + $0x8c] sm:$0xf]  ;;  %v6383_v0 = vld [vmem:[%s13324_s2 + $0x48] sm:$0xf] }
 0x113   :  { %v616_v18 = vadd.f32 %v8950_v14, %v615_v37  ;;  %v8460_v37 = vld [vmem:[%s13324_s2 + $0xcc] sm:$0xf]  ;;  %1169 = vmatpush.bf16.msrb.mxu1 %v6444_v57  ;;  %v6391_v57 = vld [vmem:[%s13324_s2 + $0x60] sm:$0xf] }
 0x115   :  { %v620_v21 = vsel %vm619_vm11, %v8950_v14, %v616_v18  ;;  %v6447_v14 = vld [vmem:[%s13324_s2 + $0xc8] sm:$0xf]  ;;  %v6452_v18 = vor.u32 %v8460_v37, %v6449_v58  ;;  %v8447_v37 = vld [vmem:[%s13324_s2 + $0x64] sm:$0xf] }
 0x116   :  { %v625_v46 = vsel %vm622_vm12, %v624_v20, %v620_v21  ;;  %v6448_v17 = vor.u32 %v8462_v15, %v6447_v14  ;;  %v6423_v20 = vld [vmem:[%s13324_s2 + $0xa0] sm:$0xf]  ;;  %v8457_v21 = vld [vmem:[%s13324_s2 + $0xac] sm:$0xf0]  ;;  %v6417_v14 = vld [vmem:[%s13324_s2 + $0x98] sm:$0xf0] }
 0x117   :  { %v9929_v23 = vmul.f32 %v8952_v22, %v625_v46  ;;  %v8455_v22 = vld [vmem:[%s13324_s2 + $0xa4] sm:$0xf]  ;;  %1195 = vmatpush.bf16.msra.mxu3 %v6452_v18  ;;  %v6424_v46 = vor.u32 %v8457_v21, %v6423_v20  ;;  %v6420_v15 = vor.u32 %v8452_v10, %v6417_v14  ;;  %v6393_v18 = vld [vmem:[%s13324_s2 + $0x70] sm:$0xf0]  ;;  %v6399_v20 = vld [vmem:[%s13324_s2 + $0x68] sm:$0xf]  ;;  %v6384_v10 = vor.u32 %v8446_v2, %v6383_v0 }
 0x118   :  { %1182 = vmatpush.bf16.msra.mxu2 %v6448_v17  ;;  %v8449_v17 = vld [vmem:[%s13324_s2 + $0x6c] sm:$0xf0]  ;;  %v8450_v21 = vld [vmem:[%s13324_s2 + $0x74] sm:$0xf0]  ;;  %v8444_v14 = vld [vmem:[%s13324_s2 + $0x4c] sm:$0xf] }
 0x119   :  { %v641_v24 = vpack.c.bf16 %v9929_v23, %v9929_v23  ;;  %1157 = vmatpush.bf16.msrb.mxu0 %v6424_v46  ;;  %v6392_v58 = vor.u32 %v8449_v17, %v6391_v57  ;;  %v208_v46 = vadd.f32 %v9620_v41, %v9610_v35  ;;  %v6400_v59 = vor.u32 %v8450_v21, %v6399_v20  ;;  %v8445_v41 = vld [vmem:[%s13324_s2 + $0x4c] sm:$0xf0]  ;;  %v6359_v57 = vld [vmem:[%s13324_s2 + $0x20] sm:$0xf]  ;;  %v6361_v20 = vld [vmem:[%s13324_s2 + $0x30] sm:$0xf0] }
 0x11a   :  { %v8441_v17 = vld [vmem:[%s13324_s2 + $0x2c] sm:$0xf0]  ;;  %v6367_v21 = vld [vmem:[%s13324_s2 + $0x28] sm:$0xf]  ;;  %v8438_v2 = vld [vmem:[%s13324_s2 + $0x14] sm:$0xf0] }
 0x11b   :  { %842 = vmatmul.bf16.vlgmr.msra.gmra.mxu0 %v641_v24  ;;  %855 = vmatmul.bf16.vlgmr.msra.gmra.mxu1 %v641_v24  ;;  %v6351_v0 = vld [vmem:[%s13324_s2 + $0x8] sm:$0xf] }
 0x11c   :  { %868 = vmatmul.bf16.vlgmr.msrb.gmra.mxu2 %v641_v24  ;;  %881 = vmatmul.bf16.vlgmr.msrb.gmra.mxu3 %v641_v24  ;;  %v6425_v24 = vld [vmem:[%s13324_s2 + $0xb0] sm:$0xf0] }
 0x11d   :  { %v6428_v26 = vor.u32 %v8455_v22, %v6425_v24  ;;  %1183 = vmatpush.bf16.msra.mxu2 %v6432_v27  ;;  %1196 = vmatpush.bf16.msra.mxu3 %v6436_v30  ;;  %v179_v22 = vadd.f32 %v9618_v38, %v9608_v34  ;;  %v6396_v24 = vor.u32 %v8447_v37, %v6393_v18  ;;  %v6375_v38 = vld [vmem:[%s13324_s2 + $0x40] sm:$0xf]  ;;  %v8439_v18 = vld [vmem:[%s13324_s2 + $0x24] sm:$0xf] }
 0x11e   :  { %1158 = vmatpush.bf16.msrb.mxu0 %v6408_v56  ;;  %v6376_v44 = vor.u32 %v8445_v41, %v6375_v38  ;;  %v6377_v56 = vld [vmem:[%s13324_s2 + $0x50] sm:$0xf0] }
 0x11f   :  { %1170 = vmatpush.bf16.msrb.mxu1 %v6428_v26  ;;  %v6401_v26 = vld [vmem:[%s13324_s2 + $0x78] sm:$0xf0] }
 0x120   :  { %v6404_v33 = vor.u32 %v8448_v25, %v6401_v26  ;;  %v6369_v25 = vld [vmem:[%s13324_s2 + $0x38] sm:$0xf0] }
 0x121   :  { %1184 = vmatpush.bf16.msra.mxu2 %v6416_v32  ;;  %1197 = vmatpush.bf16.msra.mxu3 %v6420_v15  ;;  %v6380_v32 = vor.u32 %v8443_v39, %v6377_v56  ;;  %v6385_v15 = vld [vmem:[%s13324_s2 + $0x58] sm:$0xf0]  ;;  %v6345_v56 = vld [vmem:[%s13324_s2 + $0x10] sm:$0xf0] }
 0x122   :  { %1159 = vmatpush.bf16.msrb.mxu0 %v6392_v58  ;;  %v6388_v37 = vor.u32 %v8444_v14, %v6385_v15  ;;  %v6360_v58 = vor.u32 %v8441_v17, %v6359_v57 }
 0x123   :  { %1171 = vmatpush.bf16.msrb.mxu1 %v6412_v48 }
 0x125   :  { %1185 = vmatpush.bf16.msra.mxu2 %v6400_v59  ;;  %1198 = vmatpush.bf16.msra.mxu3 %v6404_v33  ;;  %v8440_v59 = vld [vmem:[%s13324_s2 + $0x2c] sm:$0xf] }
 0x126   :  { %1160 = vmatpush.bf16.msrb.mxu0 %v6376_v44  ;;  %v6372_v33 = vor.u32 %v8440_v59, %v6369_v25 }
 0x127   :  { %1172 = vmatpush.bf16.msrb.mxu1 %v6396_v24  ;;  %v8442_v24 = vld [vmem:[%s13324_s2 + $0x34] sm:$0xf0] }
 0x129   :  { %1186 = vmatpush.bf16.msra.mxu2 %v6384_v10  ;;  %1199 = vmatpush.bf16.msra.mxu3 %v6388_v37  ;;  %v6353_v10 = vld [vmem:[%s13324_s2 + $0x18] sm:$0xf0] }
 0x12a   :  { %1161 = vmatpush.bf16.msrb.mxu0 %v6360_v58 }
 0x12b   :  { %1173 = vmatpush.bf16.msrb.mxu1 %v6380_v32  ;;  %v8436_v32 = vld [vmem:[%s13324_s2 + $0xc] sm:$0xf] }
 0x12c   :  { %v6356_v57 = vor.u32 %v8436_v32, %v6353_v10 }
 0x12d   :  { %1200 = vmatpush.bf16.msra.mxu3 %v6372_v33 }
 0x131   :  { %1201 = vmatpush.bf16.msra.mxu3 %v6356_v57 }
 0x198   :  { %v843_v27 = vpop.f32.mrf.mxu0  ;;  %v856_v29 = vpop.f32.mrf.mxu1 }
 0x199   :  { %v886_v30 = vadd.f32 %v843_v27, %v179_v22  ;;  %v887_v31 = vadd.f32 %v856_v29, %v208_v46  ;;  %v237_v22 = vadd.f32 %v9650_v62, %v9655_v1  ;;  %v6364_v46 = vor.u32 %v8439_v18, %v6361_v20  ;;  %v6343_v62 = vld [vmem:[%s13324_s2] sm:$0xf] }
 0x19a   :  { %v6368_v29 = vor.u32 %v8442_v24, %v6367_v21 }
 0x19b   :  { %v6338_v40 = vmul.f32 -1.442695, %v886_v30  ;;  %v6339_v48 = vmul.f32 -1.442695, %v887_v31  ;;  %v8437_v30 = vld [vmem:[%s13324_s2 + $0xc] sm:$0xf0]  ;;  %1174 = vmatpush.bf16.msrb.mxu1 %v6364_v46 }
 0x19c   :  { %v8435_v31 = vld [vmem:[%s13324_s2 + $0x4] sm:$0xf]  ;;  %v6344_v44 = vor.u32 %v8437_v30, %v6343_v62  ;;  %1187 = vmatpush.bf16.msra.mxu2 %v6368_v29 }
 0x19d   :  { %8953 = vpow2.f32 %v6338_v40  ;;  %v6348_v40 = vor.u32 %v8435_v31, %v6345_v56 }
 0x19e   :  { %8955 = vpow2.f32 %v6339_v48  ;;  %v6352_v48 = vor.u32 %v8438_v2, %v6351_v0  ;;  %1162 = vmatpush.bf16.msrb.mxu0 %v6344_v44 }
 0x19f   :  { %v869_v26 = vpop.f32.mrf.mxu2  ;;  %v882_v27 = vpop.f32.mrf.mxu3  ;;  %1175 = vmatpush.bf16.msrb.mxu1 %v6348_v40 }
 0x1a0   :  { %v888_v38 = vadd.f32 %v869_v26, %v237_v22  ;;  %v845_v41 = vpop.f32.mrf.mxu0  ;;  %v858_v39 = vpop.f32.mrf.mxu1  ;;  %1188 = vmatpush.bf16.msra.mxu2 %v6352_v48  ;;  %v266_v22 = vadd.f32 %v9652_v63, %v9658_v4 }
 0x1a2   :  { %v6340_v14 = vmul.f32 -1.442695, %v888_v38  ;;  %v889_v59 = vadd.f32 %v882_v27, %v266_v22 }
 0x1a3   :  { %v8954_v15 = vpop.eup %8953 }
 0x1a4   :  { %v8956_v17 = vpop.eup %8955  ;;  %v899_v37 = vadd.f32 1.0, %v8954_v15  ;;  %8957 = vpow2.f32 %v6340_v14 }
 0x1a5   :  { %v900_v58 = vadd.f32 1.0, %v8956_v17 }
 0x1a6   :  { %8959 = vrcp.f32 %v899_v37  ;;  %v913_v30 = vand.u32 2147483648, %v899_v37  ;;  %v911_v41 = vand.u32 2147483647, %v899_v37  ;;  %vm907_vm15 = vweird.f32 %v899_v37 }
 0x1a7   :  { %8961 = vrcp.f32 %v900_v58  ;;  %v871_v18 = vpop.f32.mrf.mxu2  ;;  %v884_v20 = vpop.f32.mrf.mxu3  ;;  %v928_v31 = vand.u32 2147483648, %v900_v58  ;;  %v926_v44 = vand.u32 2147483647, %v900_v58  ;;  %vm922_vm1 = vweird.f32 %v900_v58 }
 0x1a8   :  { %v914_v0 = vor.u32 1.1754944e-38, %v913_v30  ;;  %vm912_vm4 = vcmp.eq.f32.partialorder %v911_v41, 8.507059e+37  ;;  %v8498_v41 = vld [vmem:[%s13324_s2 + $0xf4] sm:$0xf0] }
 0x1a9   :  { %v929_v40 = vor.u32 1.1754944e-38, %v928_v31  ;;  %vm927_vm5 = vcmp.eq.f32.partialorder %v926_v44, 8.507059e+37  ;;  %v6588_v31 = vld [vmem:[%s13324_s2 + $0xf0] sm:$0xf0] }
 0x1aa   :  { %v8958_v21 = vpop.eup %8957 }
 0x1ab   :  { %v901_v46 = vadd.f32 1.0, %v8958_v21 }
 0x1ac   :  { %v8960_v24 = vpop.eup %8959 }
 0x1ad   :  { %v8962_v25 = vpop.eup %8961  ;;  %v903_v26 = vmul.f32 %v8960_v24, %v899_v37  ;;  %8963 = vrcp.f32 %v901_v46  ;;  %vm908_vm13 = vweird.f32 %v8960_v24  ;;  %v943_v21 = vand.u32 2147483648, %v901_v46 }
 0x1ae   :  { %v918_v29 = vmul.f32 %v8962_v25, %v900_v58  ;;  %8965 = vtanh.f32 %v889_v59  ;;  %vm923_vm14 = vweird.f32 %v8962_v25  ;;  %vm909_vm2 = vmor %vm907_vm15, %vm908_vm13  ;;  %vm937_vm7 = vweird.f32 %v901_v46 }
 0x1af   :  { %v904_v33 = vsub.f32 1.0, %v903_v26  ;;  %vm924_vm3 = vmor %vm922_vm1, %vm923_vm14  ;;  %v941_v22 = vand.u32 2147483647, %v901_v46  ;;  %v944_v59 = vor.u32 1.1754944e-38, %v943_v21  ;;  %v8489_v21 = vld [vmem:[%s13324_s2 + $0xac] sm:$0xf0] }
 0x1b0   :  { %v919_v62 = vsub.f32 1.0, %v918_v29 }
 0x1b1   :  { %v905_v38 = vmul.f32 %v8960_v24, %v904_v33  ;;  %vm942_vm9 = vcmp.eq.f32.partialorder %v941_v22, 8.507059e+37  ;;  %v6586_v33 = vld [vmem:[%s13324_s2 + $0xe0] sm:$0xf]  ;;  %v8487_v22 = vld [vmem:[%s13324_s2 + $0xa4] sm:$0xf] }
 0x1b2   :  { %v920_v39 = vmul.f32 %v8962_v25, %v919_v62  ;;  %v8495_v62 = vld [vmem:[%s13324_s2 + $0xe4] sm:$0xf] }
 0x1b3   :  { %v8964_v56 = vpop.eup %8963  ;;  %v906_v63 = vadd.f32 %v8960_v24, %v905_v38  ;;  %v6594_v38 = vld [vmem:[%s13324_s2 + $0xe8] sm:$0xf] }
 0x1b4   :  { %v933_v27 = vmul.f32 %v8964_v56, %v901_v46  ;;  %v921_v2 = vadd.f32 %v8962_v25, %v920_v39  ;;  %v8966_v32 = vpop.eup %8965  ;;  %vm938_vm6 = vweird.f32 %v8964_v56  ;;  %v8497_v46 = vld [vmem:[%s13324_s2 + $0xec] sm:$0xf0]  ;;  %v6591_v39 = vor.u32 %v8495_v62, %v6588_v31  ;;  %v6564_v62 = vld [vmem:[%s13324_s2 + $0xb8] sm:$0xf0]  ;;  %v6538_v31 = vld [vmem:[%s13324_s2 + $0x80] sm:$0xf] }
 0x1b5   :  { %v910_v48 = vsel %vm909_vm2, %v8960_v24, %v906_v63  ;;  %vm939_vm8 = vmor %vm937_vm7, %vm938_vm6  ;;  %v6587_v30 = vor.u32 %v8497_v46, %v6586_v33  ;;  %v6595_v44 = vor.u32 %v8498_v41, %v6594_v38  ;;  %v6596_v63 = vld [vmem:[%s13324_s2 + $0xf8] sm:$0xf0]  ;;  %v8488_v46 = vld [vmem:[%s13324_s2 + $0xac] sm:$0xf] }
 0x1b6   :  { %v934_v10 = vsub.f32 1.0, %v933_v27  ;;  %v915_v14 = vsel %vm912_vm4, %v914_v0, %v910_v48  ;;  %v925_v15 = vsel %vm924_vm3, %v8962_v25, %v921_v2  ;;  %1489 = vmatpush.bf16.msra.mxu1 %v6591_v39  ;;  %v6570_v0 = vld [vmem:[%s13324_s2 + $0xc0] sm:$0xf]  ;;  %v8493_v2 = vld [vmem:[%s13324_s2 + $0xcc] sm:$0xf0] }
 0x1b7   :  { %v930_v57 = vsel %vm927_vm5, %v929_v40, %v925_v15  ;;  %v949_v17 = vmul.f32 %v8966_v32, %v915_v14  ;;  %1476 = vmatpush.bf16.msra.mxu0 %v6587_v30  ;;  %1502 = vmatpush.bf16.msrb.mxu2 %v6595_v44  ;;  %v8491_v40 = vld [vmem:[%s13324_s2 + $0xc4] sm:$0xf]  ;;  %v6571_v48 = vor.u32 %v8493_v2, %v6570_v0  ;;  %v6572_v32 = vld [vmem:[%s13324_s2 + $0xd0] sm:$0xf0]  ;;  %v8494_v14 = vld [vmem:[%s13324_s2 + $0xd4] sm:$0xf0] }
 0x1b8   :  { %v935_v18 = vmul.f32 %v8964_v56, %v934_v10  ;;  %v948_v20 = vmul.f32 %v930_v57, %v9926_v11  ;;  %v6578_v10 = vld [vmem:[%s13324_s2 + $0xc8] sm:$0xf]  ;;  %v6575_v15 = vor.u32 %v8491_v40, %v6572_v32  ;;  %v6567_v30 = vor.u32 %v8488_v46, %v6564_v62  ;;  %v8485_v38 = vld [vmem:[%s13324_s2 + $0x8c] sm:$0xf0]  ;;  %v8483_v41 = vld [vmem:[%s13324_s2 + $0x84] sm:$0xf] }
 0x1b9   :  { %v6579_v57 = vor.u32 %v8494_v14, %v6578_v10  ;;  %v6539_v39 = vor.u32 %v8485_v38, %v6538_v31  ;;  %v6540_v44 = vld [vmem:[%s13324_s2 + $0x90] sm:$0xf0]  ;;  %v8484_v2 = vld [vmem:[%s13324_s2 + $0x8c] sm:$0xf]  ;;  %v6548_v40 = vld [vmem:[%s13324_s2 + $0x98] sm:$0xf0] }
 0x1ba   :  { %v10134_v37 = vadd.f32 %v949_v17, %v948_v20  ;;  %v936_v58 = vadd.f32 %v8964_v56, %v935_v18  ;;  %v8492_v17 = vld [vmem:[%s13324_s2 + $0xcc] sm:$0xf]  ;;  %v6580_v18 = vld [vmem:[%s13324_s2 + $0xd8] sm:$0xf0]  ;;  %1490 = vmatpush.bf16.msra.mxu1 %v6575_v15  ;;  %v6522_v32 = vld [vmem:[%s13324_s2 + $0x60] sm:$0xf] }
 0x1bb   :  { %1477 = vmatpush.bf16.msra.mxu0 %v6571_v48  ;;  %v6583_v20 = vor.u32 %v8492_v17, %v6580_v18  ;;  %1503 = vmatpush.bf16.msrb.mxu2 %v6579_v57  ;;  %v6551_v48 = vor.u32 %v8484_v2, %v6548_v40  ;;  %v8481_v10 = vld [vmem:[%s13324_s2 + $0x6c] sm:$0xf0]  ;;  %v8479_v14 = vld [vmem:[%s13324_s2 + $0x64] sm:$0xf]  ;;  %v6524_v57 = vld [vmem:[%s13324_s2 + $0x70] sm:$0xf0] }
 0x1bc   :  { %8967 = vtanh.f32 %v10134_v37  ;;  %v940_v24 = vsel %vm939_vm8, %v8964_v56, %v936_v58  ;;  %v8496_v56 = vld [vmem:[%s13324_s2 + $0xec] sm:$0xf]  ;;  %v6554_v58 = vld [vmem:[%s13324_s2 + $0xa0] sm:$0xf]  ;;  %v6523_v15 = vor.u32 %v8481_v10, %v6522_v32  ;;  %v6530_v17 = vld [vmem:[%s13324_s2 + $0x68] sm:$0xf] }
 0x1bd   :  { %v945_v26 = vsel %vm942_vm9, %v944_v59, %v940_v24  ;;  %v6599_v27 = vor.u32 %v8496_v56, %v6596_v63  ;;  %v6555_v24 = vor.u32 %v8489_v21, %v6554_v58  ;;  %v6556_v59 = vld [vmem:[%s13324_s2 + $0xb0] sm:$0xf0]  ;;  %v6546_v56 = vld [vmem:[%s13324_s2 + $0x88] sm:$0xf]  ;;  %v8486_v63 = vld [vmem:[%s13324_s2 + $0x94] sm:$0xf0] }
 0x1be   :  { %v6547_v0 = vor.u32 %v8486_v63, %v6546_v56  ;;  %v8482_v18 = vld [vmem:[%s13324_s2 + $0x74] sm:$0xf0]  ;;  %v8480_v21 = vld [vmem:[%s13324_s2 + $0x6c] sm:$0xf]  ;;  %v8477_v46 = vld [vmem:[%s13324_s2 + $0x4c] sm:$0xf0] }
 0x1bf   :  { %1515 = vmatpush.bf16.msrb.mxu3 %v6599_v27  ;;  %1478 = vmatpush.bf16.msra.mxu0 %v6555_v24  ;;  %v6543_v27 = vor.u32 %v8483_v41, %v6540_v44  ;;  %v6531_v58 = vor.u32 %v8482_v18, %v6530_v17  ;;  %v8475_v62 = vld [vmem:[%s13324_s2 + $0x44] sm:$0xf]  ;;  %v8478_v31 = vld [vmem:[%s13324_s2 + $0x54] sm:$0xf0]  ;;  %v8476_v56 = vld [vmem:[%s13324_s2 + $0x4c] sm:$0xf] }
 0x1c0   :  { %v6516_v63 = vld [vmem:[%s13324_s2 + $0x58] sm:$0xf0]  ;;  %v6492_v32 = vld [vmem:[%s13324_s2 + $0x30] sm:$0xf0]  ;;  %v6498_v10 = vld [vmem:[%s13324_s2 + $0x28] sm:$0xf] }
 0x1c1   :  { %v6519_v2 = vor.u32 %v8476_v56, %v6516_v63  ;;  %v6500_v17 = vld [vmem:[%s13324_s2 + $0x38] sm:$0xf0] }
 0x1c2   :  { %v8968_v25 = vpop.eup %8967 }
 0x1c3   :  { %v10137_v29 = vmul.f32 %v8968_v25, %v945_v26  ;;  %1516 = vmatpush.bf16.msrb.mxu3 %v6583_v20  ;;  %v6562_v25 = vld [vmem:[%s13324_s2 + $0xa8] sm:$0xf]  ;;  %v8490_v26 = vld [vmem:[%s13324_s2 + $0xb4] sm:$0xf0]  ;;  %1479 = vmatpush.bf16.msra.mxu0 %v6539_v39  ;;  %v6527_v20 = vor.u32 %v8479_v14, %v6524_v57  ;;  %v8472_v57 = vld [vmem:[%s13324_s2 + $0x2c] sm:$0xf] }
 0x1c4   :  { %v6563_v33 = vor.u32 %v8490_v26, %v6562_v25 }
 0x1c5   :  { %v962_v11 = vpack.c.bf16 %v10137_v29, %v10137_v29 }
 0x1c6   :  { %1504 = vmatpush.bf16.msrb.mxu2 %v6563_v33  ;;  %v6506_v33 = vld [vmem:[%s13324_s2 + $0x40] sm:$0xf] }
 0x1c7   :  { %1163 = vmatmul.bf16.vlgmr.msrb.gmra.mxu0 %v962_v11  ;;  %1176 = vmatmul.bf16.vlgmr.msrb.gmra.mxu1 %v962_v11 }
 0x1c8   :  { %1189 = vmatmul.bf16.vlgmr.msra.gmra.mxu2 %v962_v11  ;;  %1202 = vmatmul.bf16.vlgmr.msra.gmra.mxu3 %v962_v11  ;;  %v6559_v11 = vor.u32 %v8487_v22, %v6556_v59  ;;  %v6532_v22 = vld [vmem:[%s13324_s2 + $0x78] sm:$0xf0] }
 0x1c9   :  { %1517 = vmatpush.bf16.msrb.mxu3 %v6567_v30  ;;  %1480 = vmatpush.bf16.msra.mxu0 %v6523_v15  ;;  %v6535_v25 = vor.u32 %v8480_v21, %v6532_v22  ;;  %v6507_v30 = vor.u32 %v8477_v46, %v6506_v33  ;;  %v8474_v15 = vld [vmem:[%s13324_s2 + $0x34] sm:$0xf0]  ;;  %v6503_v21 = vor.u32 %v8472_v57, %v6500_v17  ;;  %v6474_v22 = vld [vmem:[%s13324_s2] sm:$0xf]  ;;  %v6476_v46 = vld [vmem:[%s13324_s2 + $0x10] sm:$0xf0] }
 0x1ca   :  { %1491 = vmatpush.bf16.msra.mxu1 %v6559_v11  ;;  %1505 = vmatpush.bf16.msrb.mxu2 %v6547_v0  ;;  %v8473_v0 = vld [vmem:[%s13324_s2 + $0x2c] sm:$0xf0] }
 0x1cd   :  { %1518 = vmatpush.bf16.msrb.mxu3 %v6551_v48  ;;  %1481 = vmatpush.bf16.msra.mxu0 %v6507_v30  ;;  %v8471_v48 = vld [vmem:[%s13324_s2 + $0x24] sm:$0xf]  ;;  %v8470_v30 = vld [vmem:[%s13324_s2 + $0x14] sm:$0xf0] }
 0x1ce   :  { %1492 = vmatpush.bf16.msra.mxu1 %v6543_v27  ;;  %1506 = vmatpush.bf16.msrb.mxu2 %v6531_v58  ;;  %v6490_v27 = vld [vmem:[%s13324_s2 + $0x20] sm:$0xf]  ;;  %v6495_v14 = vor.u32 %v8471_v48, %v6492_v32  ;;  %v6499_v58 = vor.u32 %v8474_v15, %v6498_v10 }
 0x1cf   :  { %v6491_v40 = vor.u32 %v8473_v0, %v6490_v27 }
 0x1d1   :  { %1519 = vmatpush.bf16.msrb.mxu3 %v6535_v25  ;;  %1482 = vmatpush.bf16.msra.mxu0 %v6491_v40 }
 0x1d2   :  { %1493 = vmatpush.bf16.msra.mxu1 %v6527_v20 }
 0x1d5   :  { %1520 = vmatpush.bf16.msrb.mxu3 %v6519_v2 }
 0x1d9   :  { %1521 = vmatpush.bf16.msrb.mxu3 %v6503_v21 }
 0x244   :  { %v1164_v24 = vpop.f32.mrf.mxu0  ;;  %v1177_v59 = vpop.f32.mrf.mxu1 }
 0x245   :  { %v1207_v26 = vadd.f32 %v1164_v24, %v9627_v45  ;;  %v1208_v11 = vadd.f32 %v1177_v59, %v9630_v47  ;;  %v6508_v45 = vld [vmem:[%s13324_s2 + $0x50] sm:$0xf0]  ;;  %v6514_v47 = vld [vmem:[%s13324_s2 + $0x48] sm:$0xf]  ;;  %v8469_v24 = vld [vmem:[%s13324_s2 + $0xc] sm:$0xf0] }
 0x246   :  { %v6511_v39 = vor.u32 %v8475_v62, %v6508_v45  ;;  %v6515_v44 = vor.u32 %v8478_v31, %v6514_v47  ;;  %v8467_v59 = vld [vmem:[%s13324_s2 + $0x4] sm:$0xf]  ;;  %v6475_v33 = vor.u32 %v8469_v24, %v6474_v22  ;;  %v6482_v62 = vld [vmem:[%s13324_s2 + $0x8] sm:$0xf]  ;;  %v8468_v47 = vld [vmem:[%s13324_s2 + $0xc] sm:$0xf] }
 0x247   :  { %v6469_v38 = vmul.f32 -1.442695, %v1207_v26  ;;  %v6470_v41 = vmul.f32 -1.442695, %v1208_v11  ;;  %v6479_v45 = vor.u32 %v8467_v59, %v6476_v46  ;;  %v6484_v31 = vld [vmem:[%s13324_s2 + $0x18] sm:$0xf0] }
 0x248   :  { %1494 = vmatpush.bf16.msra.mxu1 %v6511_v39  ;;  %1507 = vmatpush.bf16.msrb.mxu2 %v6515_v44  ;;  %v6487_v39 = vor.u32 %v8468_v47, %v6484_v31 }
 0x249   :  { %8969 = vpow2.f32 %v6469_v38  ;;  %1483 = vmatpush.bf16.msra.mxu0 %v6475_v33 }
 0x24a   :  { %8971 = vpow2.f32 %v6470_v41  ;;  %1522 = vmatpush.bf16.msrb.mxu3 %v6487_v39 }
 0x24b   :  { %v1190_v18 = vpop.f32.mrf.mxu2  ;;  %v1203_v20 = vpop.f32.mrf.mxu3 }
 0x24c   :  { %v1209_v25 = vadd.f32 %v1190_v18, %v9661_v6  ;;  %v1166_v26 = vpop.f32.mrf.mxu0  ;;  %v1179_v11 = vpop.f32.mrf.mxu1  ;;  %1495 = vmatpush.bf16.msra.mxu1 %v6495_v14  ;;  %1508 = vmatpush.bf16.msrb.mxu2 %v6499_v58  ;;  %v6483_v6 = vor.u32 %v8470_v30, %v6482_v62  ;;  %v1210_v32 = vadd.f32 %v1203_v20, %v9664_v8 }
 0x24e   :  { %v6471_v38 = vmul.f32 -1.442695, %v1209_v25 }
 0x24f   :  { %v8970_v41 = vpop.eup %8969 }
 0x250   :  { %v8972_v44 = vpop.eup %8971  ;;  %v1220_v56 = vadd.f32 1.0, %v8970_v41  ;;  %8973 = vpow2.f32 %v6471_v38  ;;  %1496 = vmatpush.bf16.msra.mxu1 %v6479_v45  ;;  %1509 = vmatpush.bf16.msrb.mxu2 %v6483_v6 }
 0x251   :  { %v1221_v63 = vadd.f32 1.0, %v8972_v44 }
 0x252   :  { %8975 = vrcp.f32 %v1220_v56  ;;  %v1234_v18 = vand.u32 2147483648, %v1220_v56  ;;  %v1232_v22 = vand.u32 2147483647, %v1220_v56  ;;  %vm1228_vm12 = vweird.f32 %v1220_v56 }
 0x253   :  { %8977 = vrcp.f32 %v1221_v63  ;;  %v1192_v27 = vpop.f32.mrf.mxu2  ;;  %v1205_v0 = vpop.f32.mrf.mxu3  ;;  %v1249_v58 = vand.u32 2147483648, %v1221_v63  ;;  %v1247_v59 = vand.u32 2147483647, %v1221_v63  ;;  %vm1243_vm13 = vweird.f32 %v1221_v63 }
 0x254   :  { %v1235_v20 = vor.u32 1.1754944e-38, %v1234_v18  ;;  %vm1233_vm1 = vcmp.eq.f32.partialorder %v1232_v22, 8.507059e+37  ;;  %v8530_v18 = vld [vmem:[%s13324_s2 + $0xf4] sm:$0xf0]  ;;  %v8528_v22 = vld [vmem:[%s13324_s2 + $0xec] sm:$0xf] }
 0x255   :  { %v1250_v33 = vor.u32 1.1754944e-38, %v1249_v58  ;;  %vm1248_vm2 = vcmp.eq.f32.partialorder %v1247_v59, 8.507059e+37 }
 0x256   :  { %v8974_v2 = vpop.eup %8973 }
 0x257   :  { %v1222_v40 = vadd.f32 1.0, %v8974_v2 }
 0x258   :  { %v8976_v48 = vpop.eup %8975 }
 0x259   :  { %v8978_v10 = vpop.eup %8977  ;;  %v1224_v14 = vmul.f32 %v8976_v48, %v1220_v56  ;;  %8979 = vrcp.f32 %v1222_v40  ;;  %vm1229_vm10 = vweird.f32 %v8976_v48  ;;  %v1264_v56 = vand.u32 2147483648, %v1222_v40 }
 0x25a   :  { %v1239_v15 = vmul.f32 %v8978_v10, %v1221_v63  ;;  %8981 = vtanh.f32 %v1210_v32  ;;  %vm1244_vm11 = vweird.f32 %v8978_v10  ;;  %vm1230_vm14 = vmor %vm1228_vm12, %vm1229_vm10  ;;  %vm1258_vm4 = vweird.f32 %v1222_v40 }
 0x25b   :  { %v1225_v57 = vsub.f32 1.0, %v1224_v14  ;;  %vm1245_vm15 = vmor %vm1243_vm13, %vm1244_vm11  ;;  %v1262_v63 = vand.u32 2147483647, %v1222_v40  ;;  %v1265_v0 = vor.u32 1.1754944e-38, %v1264_v56  ;;  %v8527_v14 = vld [vmem:[%s13324_s2 + $0xe4] sm:$0xf] }
 0x25c   :  { %v1240_v17 = vsub.f32 1.0, %v1239_v15  ;;  %v6687_v56 = vld [vmem:[%s13324_s2 + $0xb0] sm:$0xf0] }
 0x25d   :  { %v1226_v21 = vmul.f32 %v8976_v48, %v1225_v57  ;;  %vm1263_vm6 = vcmp.eq.f32.partialorder %v1262_v63, 8.507059e+37  ;;  %v6719_v57 = vld [vmem:[%s13324_s2 + $0xf0] sm:$0xf0]  ;;  %v6693_v63 = vld [vmem:[%s13324_s2 + $0xa8] sm:$0xf] }
 0x25e   :  { %v1241_v24 = vmul.f32 %v8978_v10, %v1240_v17  ;;  %v6725_v17 = vld [vmem:[%s13324_s2 + $0xe8] sm:$0xf]  ;;  %v6722_v58 = vor.u32 %v8527_v14, %v6719_v57  ;;  %v8517_v14 = vld [vmem:[%s13324_s2 + $0x8c] sm:$0xf0] }
 0x25f   :  { %v8980_v25 = vpop.eup %8979  ;;  %v1227_v26 = vadd.f32 %v8976_v48, %v1226_v21  ;;  %v6726_v21 = vor.u32 %v8530_v18, %v6725_v17  ;;  %v6671_v17 = vld [vmem:[%s13324_s2 + $0x90] sm:$0xf0]  ;;  %v6677_v18 = vld [vmem:[%s13324_s2 + $0x88] sm:$0xf] }
 0x260   :  { %v1254_v8 = vmul.f32 %v8980_v25, %v1222_v40  ;;  %v1242_v11 = vadd.f32 %v8978_v10, %v1241_v24  ;;  %v8982_v62 = vpop.eup %8981  ;;  %vm1259_vm3 = vweird.f32 %v8980_v25  ;;  %v8529_v40 = vld [vmem:[%s13324_s2 + $0xec] sm:$0xf0]  ;;  %v6727_v24 = vld [vmem:[%s13324_s2 + $0xf8] sm:$0xf0]  ;;  %1810 = vmatpush.bf16.msrb.mxu1 %v6722_v58  ;;  %v8518_v58 = vld [vmem:[%s13324_s2 + $0x94] sm:$0xf0] }
 0x261   :  { %v1231_v46 = vsel %vm1230_vm14, %v8976_v48, %v1227_v26  ;;  %vm1260_vm5 = vmor %vm1258_vm4, %vm1259_vm3  ;;  %v6730_v59 = vor.u32 %v8528_v22, %v6727_v24  ;;  %1823 = vmatpush.bf16.msra.mxu2 %v6726_v21  ;;  %v8525_v26 = vld [vmem:[%s13324_s2 + $0xcc] sm:$0xf0]  ;;  %v6678_v22 = vor.u32 %v8518_v58, %v6677_v18  ;;  %v8516_v24 = vld [vmem:[%s13324_s2 + $0x8c] sm:$0xf] }
 0x262   :  { %v1255_v30 = vsub.f32 1.0, %v1254_v8  ;;  %v1236_v45 = vsel %vm1233_vm1, %v1235_v20, %v1231_v46  ;;  %v1246_v6 = vsel %vm1245_vm15, %v8978_v10, %v1242_v11  ;;  %v6717_v10 = vld [vmem:[%s13324_s2 + $0xe0] sm:$0xf]  ;;  %v8523_v8 = vld [vmem:[%s13324_s2 + $0xc4] sm:$0xf] }
 0x263   :  { %v1251_v47 = vsel %vm1248_vm2, %v1250_v33, %v1246_v6  ;;  %v1270_v31 = vmul.f32 %v8982_v62, %v1236_v45  ;;  %v6718_v15 = vor.u32 %v8529_v40, %v6717_v10  ;;  %1836 = vmatpush.bf16.msra.mxu3 %v6730_v59  ;;  %v6703_v11 = vld [vmem:[%s13324_s2 + $0xd0] sm:$0xf0]  ;;  %v6709_v33 = vld [vmem:[%s13324_s2 + $0xc8] sm:$0xf]  ;;  %v8526_v46 = vld [vmem:[%s13324_s2 + $0xd4] sm:$0xf0] }
 0x264   :  { %v1256_v38 = vmul.f32 %v8980_v25, %v1255_v30  ;;  %v1269_v41 = vmul.f32 %v1251_v47, %v10134_v37  ;;  %v6706_v62 = vor.u32 %v8523_v8, %v6703_v11  ;;  %v6710_v30 = vor.u32 %v8526_v46, %v6709_v33  ;;  %v8524_v45 = vld [vmem:[%s13324_s2 + $0xcc] sm:$0xf]  ;;  %v6711_v6 = vld [vmem:[%s13324_s2 + $0xd8] sm:$0xf0]  ;;  %v6669_v40 = vld [vmem:[%s13324_s2 + $0x80] sm:$0xf] }
 0x265   :  { %1797 = vmatpush.bf16.msrb.mxu0 %v6718_v15  ;;  %v6714_v47 = vor.u32 %v8524_v45, %v6711_v6  ;;  %v8515_v15 = vld [vmem:[%s13324_s2 + $0x84] sm:$0xf]  ;;  %v6670_v57 = vor.u32 %v8517_v14, %v6669_v40  ;;  %v6679_v59 = vld [vmem:[%s13324_s2 + $0x98] sm:$0xf0]  ;;  %v8513_v8 = vld [vmem:[%s13324_s2 + $0x6c] sm:$0xf0]  ;;  %v213_v45 = vadd.f32 %v9640_v53, %v9610_v35 }
 0x266   :  { %v10338_v39 = vadd.f32 %v1270_v31, %v1269_v41  ;;  %v1257_v44 = vadd.f32 %v8980_v25, %v1256_v38  ;;  %1811 = vmatpush.bf16.msrb.mxu1 %v6706_v62  ;;  %1824 = vmatpush.bf16.msra.mxu2 %v6710_v30  ;;  %v6685_v31 = vld [vmem:[%s13324_s2 + $0xa0] sm:$0xf]  ;;  %v8521_v38 = vld [vmem:[%s13324_s2 + $0xac] sm:$0xf0]  ;;  %v8519_v41 = vld [vmem:[%s13324_s2 + $0xa4] sm:$0xf]  ;;  %v6674_v21 = vor.u32 %v8515_v15, %v6671_v17 }
 0x267   :  { %1837 = vmatpush.bf16.msra.mxu3 %v6714_v47  ;;  %v6655_v33 = vld [vmem:[%s13324_s2 + $0x70] sm:$0xf0]  ;;  %v6661_v46 = vld [vmem:[%s13324_s2 + $0x68] sm:$0xf]  ;;  %v8514_v62 = vld [vmem:[%s13324_s2 + $0x74] sm:$0xf0]  ;;  %v184_v30 = vadd.f32 %v9638_v52, %v9608_v34 }
 0x268   :  { %8983 = vtanh.f32 %v10338_v39  ;;  %v1261_v27 = vsel %vm1260_vm5, %v8980_v25, %v1257_v44  ;;  %v6701_v25 = vld [vmem:[%s13324_s2 + $0xc0] sm:$0xf]  ;;  %v6686_v44 = vor.u32 %v8521_v38, %v6685_v31  ;;  %v6662_v47 = vor.u32 %v8514_v62, %v6661_v46  ;;  %v8512_v31 = vld [vmem:[%s13324_s2 + $0x6c] sm:$0xf]  ;;  %v6663_v38 = vld [vmem:[%s13324_s2 + $0x78] sm:$0xf0] }
 0x269   :  { %v1266_v48 = vsel %vm1263_vm6, %v1265_v0, %v1261_v27  ;;  %v6702_v20 = vor.u32 %v8525_v26, %v6701_v25  ;;  %v8522_v27 = vld [vmem:[%s13324_s2 + $0xb4] sm:$0xf0]  ;;  %v6690_v0 = vor.u32 %v8519_v41, %v6687_v56  ;;  %v6682_v25 = vor.u32 %v8516_v24, %v6679_v59  ;;  %v6653_v26 = vld [vmem:[%s13324_s2 + $0x60] sm:$0xf]  ;;  %v8509_v53 = vld [vmem:[%s13324_s2 + $0x4c] sm:$0xf0] }
 0x26a   :  { %v6654_v11 = vor.u32 %v8513_v8, %v6653_v26  ;;  %v6666_v56 = vor.u32 %v8512_v31, %v6663_v38  ;;  %v6637_v52 = vld [vmem:[%s13324_s2 + $0x40] sm:$0xf]  ;;  %v8508_v17 = vld [vmem:[%s13324_s2 + $0x4c] sm:$0xf]  ;;  %v6647_v18 = vld [vmem:[%s13324_s2 + $0x58] sm:$0xf0]  ;;  %v242_v8 = vadd.f32 %v9666_v12, %v9655_v1 }
 0x26b   :  { %1798 = vmatpush.bf16.msrb.mxu0 %v6702_v20  ;;  %1812 = vmatpush.bf16.msrb.mxu1 %v6690_v0  ;;  %v8511_v20 = vld [vmem:[%s13324_s2 + $0x64] sm:$0xf]  ;;  %v6621_v58 = vld [vmem:[%s13324_s2 + $0x20] sm:$0xf]  ;;  %v6629_v26 = vld [vmem:[%s13324_s2 + $0x28] sm:$0xf] }
 0x26c   :  { %v6658_v6 = vor.u32 %v8511_v20, %v6655_v33  ;;  %v8507_v0 = vld [vmem:[%s13324_s2 + $0x44] sm:$0xf]  ;;  %v8504_v33 = vld [vmem:[%s13324_s2 + $0x2c] sm:$0xf]  ;;  %v6631_v46 = vld [vmem:[%s13324_s2 + $0x38] sm:$0xf0] }
 0x26d   :  { %v8503_v59 = vld [vmem:[%s13324_s2 + $0x24] sm:$0xf]  ;;  %v6605_v12 = vld [vmem:[%s13324_s2] sm:$0xf] }
 0x26e   :  { %v8984_v2 = vpop.eup %8983  ;;  %v8499_v31 = vld [vmem:[%s13324_s2 + $0x4] sm:$0xf] }
 0x26f   :  { %v10341_v32 = vmul.f32 %v8984_v2, %v1266_v48  ;;  %v6694_v2 = vor.u32 %v8522_v27, %v6693_v63  ;;  %v8520_v48 = vld [vmem:[%s13324_s2 + $0xac] sm:$0xf]  ;;  %1799 = vmatpush.bf16.msrb.mxu0 %v6686_v44  ;;  %1813 = vmatpush.bf16.msrb.mxu1 %v6674_v21  ;;  %v8505_v21 = vld [vmem:[%s13324_s2 + $0x2c] sm:$0xf0] }
 0x270   :  { %v6622_v24 = vor.u32 %v8505_v21, %v6621_v58  ;;  %v271_v21 = vadd.f32 %v9668_v13, %v9658_v4 }
 0x271   :  { %v1283_v37 = vpack.c.bf16 %v10341_v32, %v10341_v32  ;;  %1825 = vmatpush.bf16.msra.mxu2 %v6694_v2  ;;  %v6638_v2 = vor.u32 %v8509_v53, %v6637_v52  ;;  %v8502_v52 = vld [vmem:[%s13324_s2 + $0x14] sm:$0xf0] }
 0x273   :  { %1484 = vmatmul.bf16.vlgmr.msra.gmra.mxu0 %v1283_v37  ;;  %1497 = vmatmul.bf16.vlgmr.msra.gmra.mxu1 %v1283_v37 }
 0x274   :  { %1510 = vmatmul.bf16.vlgmr.msrb.gmra.mxu2 %v1283_v37  ;;  %1523 = vmatmul.bf16.vlgmr.msrb.gmra.mxu3 %v1283_v37  ;;  %v6695_v37 = vld [vmem:[%s13324_s2 + $0xb8] sm:$0xf0] }
 0x275   :  { %v6698_v10 = vor.u32 %v8520_v48, %v6695_v37  ;;  %1800 = vmatpush.bf16.msrb.mxu0 %v6670_v57  ;;  %1826 = vmatpush.bf16.msra.mxu2 %v6678_v22  ;;  %v6639_v48 = vld [vmem:[%s13324_s2 + $0x50] sm:$0xf0]  ;;  %v6645_v37 = vld [vmem:[%s13324_s2 + $0x48] sm:$0xf]  ;;  %v6650_v22 = vor.u32 %v8508_v17, %v6647_v18 }
 0x276   :  { %1814 = vmatpush.bf16.msrb.mxu1 %v6658_v6  ;;  %v6642_v15 = vor.u32 %v8507_v0, %v6639_v48  ;;  %v6634_v6 = vor.u32 %v8504_v33, %v6631_v46  ;;  %v6615_v48 = vld [vmem:[%s13324_s2 + $0x18] sm:$0xf0] }
 0x277   :  { %1838 = vmatpush.bf16.msra.mxu3 %v6698_v10  ;;  %v8510_v10 = vld [vmem:[%s13324_s2 + $0x54] sm:$0xf0] }
 0x278   :  { %v6646_v57 = vor.u32 %v8510_v10, %v6645_v37 }
 0x279   :  { %1801 = vmatpush.bf16.msrb.mxu0 %v6654_v11  ;;  %1827 = vmatpush.bf16.msra.mxu2 %v6662_v47  ;;  %v8506_v11 = vld [vmem:[%s13324_s2 + $0x34] sm:$0xf0]  ;;  %v8501_v47 = vld [vmem:[%s13324_s2 + $0xc] sm:$0xf0] }
 0x27a   :  { %1815 = vmatpush.bf16.msrb.mxu1 %v6642_v15 }
 0x27b   :  { %1839 = vmatpush.bf16.msra.mxu3 %v6682_v25  ;;  %v6623_v25 = vld [vmem:[%s13324_s2 + $0x30] sm:$0xf0] }
 0x27c   :  { %v6626_v20 = vor.u32 %v8503_v59, %v6623_v25 }
 0x27d   :  { %1802 = vmatpush.bf16.msrb.mxu0 %v6638_v2  ;;  %1828 = vmatpush.bf16.msra.mxu2 %v6646_v57  ;;  %v8500_v2 = vld [vmem:[%s13324_s2 + $0xc] sm:$0xf] }
 0x27e   :  { %1816 = vmatpush.bf16.msrb.mxu1 %v6626_v20 }
 0x27f   :  { %1840 = vmatpush.bf16.msra.mxu3 %v6666_v56  ;;  %v6606_v56 = vor.u32 %v8501_v47, %v6605_v12 }
 0x281   :  { %1803 = vmatpush.bf16.msrb.mxu0 %v6622_v24 }
 0x283   :  { %1841 = vmatpush.bf16.msra.mxu3 %v6650_v22 }
 0x285   :  { %1804 = vmatpush.bf16.msrb.mxu0 %v6606_v56 }
 0x287   :  { %1842 = vmatpush.bf16.msra.mxu3 %v6634_v6 }
 0x2f0   :  { %v1485_v41 = vpop.f32.mrf.mxu0  ;;  %v1498_v44 = vpop.f32.mrf.mxu1 }
 0x2f1   :  { %v1528_v63 = vadd.f32 %v1485_v41, %v184_v30  ;;  %v1529_v27 = vadd.f32 %v1498_v44, %v213_v45  ;;  %v6630_v45 = vor.u32 %v8506_v11, %v6629_v26 }
 0x2f3   :  { %v6600_v40 = vmul.f32 -1.442695, %v1528_v63  ;;  %v6601_v14 = vmul.f32 -1.442695, %v1529_v27  ;;  %v6607_v63 = vld [vmem:[%s13324_s2 + $0x10] sm:$0xf0]  ;;  %1829 = vmatpush.bf16.msra.mxu2 %v6630_v45 }
 0x2f4   :  { %v6613_v27 = vld [vmem:[%s13324_s2 + $0x8] sm:$0xf]  ;;  %v6610_v53 = vor.u32 %v8499_v31, %v6607_v63 }
 0x2f5   :  { %8985 = vpow2.f32 %v6600_v40  ;;  %v6614_v0 = vor.u32 %v8502_v52, %v6613_v27  ;;  %v6618_v40 = vor.u32 %v8500_v2, %v6615_v48 }
 0x2f6   :  { %8987 = vpow2.f32 %v6601_v14  ;;  %1817 = vmatpush.bf16.msrb.mxu1 %v6610_v53 }
 0x2f7   :  { %v1511_v62 = vpop.f32.mrf.mxu2  ;;  %v1524_v30 = vpop.f32.mrf.mxu3  ;;  %1830 = vmatpush.bf16.msra.mxu2 %v6614_v0  ;;  %1843 = vmatpush.bf16.msra.mxu3 %v6618_v40 }
 0x2f8   :  { %v1530_v38 = vadd.f32 %v1511_v62, %v242_v8  ;;  %v1487_v41 = vpop.f32.mrf.mxu0  ;;  %v1500_v44 = vpop.f32.mrf.mxu1  ;;  %v1531_v59 = vadd.f32 %v1524_v30, %v271_v21  ;;  %v6848_v21 = vld [vmem:[%s13324_s2 + $0xe0] sm:$0xf] }
 0x2fa   :  { %v6602_v37 = vmul.f32 -1.442695, %v1530_v38 }
 0x2fb   :  { %v8986_v10 = vpop.eup %8985 }
 0x2fc   :  { %v8988_v14 = vpop.eup %8987  ;;  %v1541_v15 = vadd.f32 1.0, %v8986_v10  ;;  %8989 = vpow2.f32 %v6602_v37 }
 0x2fd   :  { %v1542_v57 = vadd.f32 1.0, %v8988_v14 }
 0x2fe   :  { %8991 = vrcp.f32 %v1541_v15  ;;  %v1555_v33 = vand.u32 2147483648, %v1541_v15  ;;  %v1553_v45 = vand.u32 2147483647, %v1541_v15  ;;  %vm1549_vm9 = vweird.f32 %v1541_v15 }
 0x2ff   :  { %8993 = vrcp.f32 %v1542_v57  ;;  %v1513_v17 = vpop.f32.mrf.mxu2  ;;  %v1526_v18 = vpop.f32.mrf.mxu3  ;;  %v1570_v46 = vand.u32 2147483648, %v1542_v57  ;;  %v1568_v12 = vand.u32 2147483647, %v1542_v57  ;;  %vm1564_vm10 = vweird.f32 %v1542_v57 }
 0x300   :  { %v1556_v31 = vor.u32 1.1754944e-38, %v1555_v33  ;;  %vm1554_vm13 = vcmp.eq.f32.partialorder %v1553_v45, 8.507059e+37  ;;  %v8560_v33 = vld [vmem:[%s13324_s2 + $0xec] sm:$0xf]  ;;  %v6832_v45 = vld [vmem:[%s13324_s2 + $0xc0] sm:$0xf] }
 0x301   :  { %v1571_v41 = vor.u32 1.1754944e-38, %v1570_v46  ;;  %vm1569_vm14 = vcmp.eq.f32.partialorder %v1568_v12, 8.507059e+37  ;;  %v6858_v46 = vld [vmem:[%s13324_s2 + $0xf8] sm:$0xf0]  ;;  %v8555_v12 = vld [vmem:[%s13324_s2 + $0xc4] sm:$0xf] }
 0x302   :  { %v8990_v58 = vpop.eup %8989 }
 0x303   :  { %v1543_v22 = vadd.f32 1.0, %v8990_v58 }
 0x304   :  { %v8992_v24 = vpop.eup %8991 }
 0x305   :  { %v8994_v25 = vpop.eup %8993  ;;  %v1545_v26 = vmul.f32 %v8992_v24, %v1541_v15  ;;  %8995 = vrcp.f32 %v1543_v22  ;;  %vm1550_vm7 = vweird.f32 %v8992_v24  ;;  %v1585_v40 = vand.u32 2147483648, %v1543_v22 }
 0x306   :  { %v1560_v8 = vmul.f32 %v8994_v25, %v1542_v57  ;;  %8997 = vtanh.f32 %v1531_v59  ;;  %vm1565_vm8 = vweird.f32 %v8994_v25  ;;  %vm1551_vm11 = vmor %vm1549_vm9, %vm1550_vm7  ;;  %vm1579_vm1 = vweird.f32 %v1543_v22 }
 0x307   :  { %v1546_v20 = vsub.f32 1.0, %v1545_v26  ;;  %vm1566_vm12 = vmor %vm1564_vm10, %vm1565_vm8  ;;  %v1583_v14 = vand.u32 2147483647, %v1543_v22  ;;  %v1586_v57 = vor.u32 1.1754944e-38, %v1585_v40  ;;  %v6856_v26 = vld [vmem:[%s13324_s2 + $0xe8] sm:$0xf] }
 0x308   :  { %v1561_v11 = vsub.f32 1.0, %v1560_v8  ;;  %v8562_v8 = vld [vmem:[%s13324_s2 + $0xf4] sm:$0xf0] }
 0x309   :  { %v1547_v62 = vmul.f32 %v8992_v24, %v1546_v20  ;;  %vm1584_vm3 = vcmp.eq.f32.partialorder %v1583_v14, 8.507059e+37 }
 0x30a   :  { %v1562_v6 = vmul.f32 %v8994_v25, %v1561_v11  ;;  %v6857_v11 = vor.u32 %v8562_v8, %v6856_v26 }
 0x30b   :  { %v8996_v47 = vpop.eup %8995  ;;  %v1548_v13 = vadd.f32 %v8992_v24, %v1547_v62  ;;  %v6861_v62 = vor.u32 %v8560_v33, %v6858_v46  ;;  %v6784_v46 = vld [vmem:[%s13324_s2 + $0x60] sm:$0xf] }
 0x30c   :  { %v1575_v30 = vmul.f32 %v8996_v47, %v1543_v22  ;;  %v1563_v38 = vadd.f32 %v8994_v25, %v1562_v6  ;;  %v8998_v56 = vpop.eup %8997  ;;  %vm1580_vm15 = vweird.f32 %v8996_v47  ;;  %v8561_v22 = vld [vmem:[%s13324_s2 + $0xec] sm:$0xf0]  ;;  %2144 = vmatpush.bf16.msrb.mxu2 %v6857_v11  ;;  %v6810_v11 = vld [vmem:[%s13324_s2 + $0x98] sm:$0xf0] }
 0x30d   :  { %v1552_v44 = vsel %vm1551_vm11, %v8992_v24, %v1548_v13  ;;  %vm1581_vm2 = vmor %vm1579_vm1, %vm1580_vm15  ;;  %v8559_v24 = vld [vmem:[%s13324_s2 + $0xe4] sm:$0xf]  ;;  %v6849_v59 = vor.u32 %v8561_v22, %v6848_v21  ;;  %v8557_v6 = vld [vmem:[%s13324_s2 + $0xcc] sm:$0xf0]  ;;  %2157 = vmatpush.bf16.msrb.mxu3 %v6861_v62 }
 0x30e   :  { %v1576_v63 = vsub.f32 1.0, %v1575_v30  ;;  %v1557_v27 = vsel %vm1554_vm13, %v1556_v31, %v1552_v44  ;;  %v1567_v52 = vsel %vm1566_vm12, %v8994_v25, %v1563_v38  ;;  %v6850_v25 = vld [vmem:[%s13324_s2 + $0xf0] sm:$0xf0]  ;;  %v6840_v30 = vld [vmem:[%s13324_s2 + $0xc8] sm:$0xf] }
 0x30f   :  { %v1572_v53 = vsel %vm1569_vm14, %v1571_v41, %v1567_v52  ;;  %v1591_v0 = vmul.f32 %v8998_v56, %v1557_v27  ;;  %v6853_v20 = vor.u32 %v8559_v24, %v6850_v25  ;;  %2118 = vmatpush.bf16.msra.mxu0 %v6849_v59  ;;  %v6834_v13 = vld [vmem:[%s13324_s2 + $0xd0] sm:$0xf0]  ;;  %v8558_v31 = vld [vmem:[%s13324_s2 + $0xd4] sm:$0xf0]  ;;  %v8556_v44 = vld [vmem:[%s13324_s2 + $0xcc] sm:$0xf] }
 0x310   :  { %v1577_v2 = vmul.f32 %v8996_v47, %v1576_v63  ;;  %v1590_v48 = vmul.f32 %v1572_v53, %v10338_v39  ;;  %v6837_v38 = vor.u32 %v8555_v12, %v6834_v13  ;;  %v6841_v41 = vor.u32 %v8558_v31, %v6840_v30  ;;  %v6842_v56 = vld [vmem:[%s13324_s2 + $0xd8] sm:$0xf0]  ;;  %v6816_v27 = vld [vmem:[%s13324_s2 + $0xa0] sm:$0xf]  ;;  %v8553_v52 = vld [vmem:[%s13324_s2 + $0xac] sm:$0xf0] }
 0x311   :  { %2131 = vmatpush.bf16.msra.mxu1 %v6853_v20  ;;  %v6845_v63 = vor.u32 %v8556_v44, %v6842_v56  ;;  %v8551_v53 = vld [vmem:[%s13324_s2 + $0xa4] sm:$0xf]  ;;  %v6802_v24 = vld [vmem:[%s13324_s2 + $0x90] sm:$0xf0]  ;;  %v6808_v59 = vld [vmem:[%s13324_s2 + $0x88] sm:$0xf] }
 0x312   :  { %v10546_v37 = vadd.f32 %v1591_v0, %v1590_v48  ;;  %v1578_v10 = vadd.f32 %v8996_v47, %v1577_v2  ;;  %2145 = vmatpush.bf16.msrb.mxu2 %v6841_v41  ;;  %v6817_v0 = vor.u32 %v8553_v52, %v6816_v27  ;;  %v6818_v2 = vld [vmem:[%s13324_s2 + $0xb0] sm:$0xf0]  ;;  %v6824_v48 = vld [vmem:[%s13324_s2 + $0xa8] sm:$0xf]  ;;  %v8547_v21 = vld [vmem:[%s13324_s2 + $0x84] sm:$0xf] }
 0x313   :  { %2158 = vmatpush.bf16.msrb.mxu3 %v6845_v63  ;;  %v6821_v40 = vor.u32 %v8551_v53, %v6818_v2  ;;  %v8550_v25 = vld [vmem:[%s13324_s2 + $0x94] sm:$0xf0]  ;;  %v6805_v26 = vor.u32 %v8547_v21, %v6802_v24  ;;  %v8548_v20 = vld [vmem:[%s13324_s2 + $0x8c] sm:$0xf]  ;;  %v8545_v62 = vld [vmem:[%s13324_s2 + $0x6c] sm:$0xf0] }
 0x314   :  { %8999 = vtanh.f32 %v10546_v37  ;;  %v1582_v15 = vsel %vm1581_vm2, %v8996_v47, %v1578_v10  ;;  %v6833_v47 = vor.u32 %v8557_v6, %v6832_v45  ;;  %v8554_v10 = vld [vmem:[%s13324_s2 + $0xb4] sm:$0xf0]  ;;  %v6809_v8 = vor.u32 %v8550_v25, %v6808_v59  ;;  %v8543_v45 = vld [vmem:[%s13324_s2 + $0x64] sm:$0xf]  ;;  %v6786_v12 = vld [vmem:[%s13324_s2 + $0x70] sm:$0xf0] }
 0x315   :  { %v1587_v18 = vsel %vm1584_vm3, %v1586_v57, %v1582_v15  ;;  %2132 = vmatpush.bf16.msra.mxu1 %v6837_v38  ;;  %v6825_v14 = vor.u32 %v8554_v10, %v6824_v48  ;;  %v8552_v15 = vld [vmem:[%s13324_s2 + $0xac] sm:$0xf]  ;;  %v6826_v57 = vld [vmem:[%s13324_s2 + $0xb8] sm:$0xf0]  ;;  %v6813_v33 = vor.u32 %v8548_v20, %v6810_v11  ;;  %v6785_v6 = vor.u32 %v8545_v62, %v6784_v46  ;;  %v8546_v13 = vld [vmem:[%s13324_s2 + $0x74] sm:$0xf0] }
 0x316   :  { %2119 = vmatpush.bf16.msra.mxu0 %v6833_v47  ;;  %v6792_v47 = vld [vmem:[%s13324_s2 + $0x68] sm:$0xf]  ;;  %v6789_v30 = vor.u32 %v8543_v45, %v6786_v12  ;;  %v8544_v38 = vld [vmem:[%s13324_s2 + $0x6c] sm:$0xf]  ;;  %v6794_v41 = vld [vmem:[%s13324_s2 + $0x78] sm:$0xf0] }
 0x317   :  { %2146 = vmatpush.bf16.msrb.mxu2 %v6825_v14  ;;  %v6793_v31 = vor.u32 %v8546_v13, %v6792_v47  ;;  %v6797_v63 = vor.u32 %v8544_v38, %v6794_v41  ;;  %v6768_v53 = vld [vmem:[%s13324_s2 + $0x40] sm:$0xf]  ;;  %v8539_v2 = vld [vmem:[%s13324_s2 + $0x44] sm:$0xf]  ;;  %v8542_v10 = vld [vmem:[%s13324_s2 + $0x54] sm:$0xf0] }
 0x318   :  { %v8537_v21 = vld [vmem:[%s13324_s2 + $0x2c] sm:$0xf0]  ;;  %v8535_v59 = vld [vmem:[%s13324_s2 + $0x24] sm:$0xf]  ;;  %v6754_v25 = vld [vmem:[%s13324_s2 + $0x30] sm:$0xf0] }
 0x319   :  { %2133 = vmatpush.bf16.msra.mxu1 %v6821_v40  ;;  %v8538_v20 = vld [vmem:[%s13324_s2 + $0x34] sm:$0xf0]  ;;  %v8536_v11 = vld [vmem:[%s13324_s2 + $0x2c] sm:$0xf]  ;;  %v6736_v12 = vld [vmem:[%s13324_s2] sm:$0xf] }
 0x31a   :  { %v9000_v17 = vpop.eup %8999  ;;  %2120 = vmatpush.bf16.msra.mxu0 %v6817_v0  ;;  %v8541_v0 = vld [vmem:[%s13324_s2 + $0x4c] sm:$0xf0]  ;;  %v8531_v13 = vld [vmem:[%s13324_s2 + $0x4] sm:$0xf] }
 0x31b   :  { %v10549_v58 = vmul.f32 %v9000_v17, %v1587_v18  ;;  %v6829_v17 = vor.u32 %v8552_v15, %v6826_v57  ;;  %v6800_v18 = vld [vmem:[%s13324_s2 + $0x80] sm:$0xf]  ;;  %2147 = vmatpush.bf16.msrb.mxu2 %v6809_v8  ;;  %v6769_v48 = vor.u32 %v8541_v0, %v6768_v53  ;;  %v6757_v8 = vor.u32 %v8535_v59, %v6754_v25  ;;  %v8533_v47 = vld [vmem:[%s13324_s2 + $0xc] sm:$0xf0]  ;;  %v6746_v53 = vld [vmem:[%s13324_s2 + $0x18] sm:$0xf0] }
 0x31c   :  { %v6737_v41 = vor.u32 %v8533_v47, %v6736_v12 }
 0x31d   :  { %v1604_v39 = vpack.c.bf16 %v10549_v58, %v10549_v58  ;;  %2159 = vmatpush.bf16.msrb.mxu3 %v6829_v17  ;;  %2134 = vmatpush.bf16.msra.mxu1 %v6805_v26  ;;  %v8540_v17 = vld [vmem:[%s13324_s2 + $0x4c] sm:$0xf]  ;;  %v6760_v26 = vld [vmem:[%s13324_s2 + $0x28] sm:$0xf] }
 0x31e   :  { %v6761_v45 = vor.u32 %v8538_v20, %v6760_v26 }
 0x31f   :  { %1805 = vmatmul.bf16.vlgmr.msrb.gmra.mxu0 %v1604_v39  ;;  %1818 = vmatmul.bf16.vlgmr.msrb.gmra.mxu1 %v1604_v39 }
 0x320   :  { %1831 = vmatmul.bf16.vlgmr.msra.gmra.mxu2 %v1604_v39  ;;  %1844 = vmatmul.bf16.vlgmr.msra.gmra.mxu3 %v1604_v39  ;;  %v8549_v39 = vld [vmem:[%s13324_s2 + $0x8c] sm:$0xf0] }
 0x321   :  { %v6801_v22 = vor.u32 %v8549_v39, %v6800_v18  ;;  %2160 = vmatpush.bf16.msrb.mxu3 %v6813_v33  ;;  %2135 = vmatpush.bf16.msra.mxu1 %v6789_v30  ;;  %v6778_v18 = vld [vmem:[%s13324_s2 + $0x58] sm:$0xf0]  ;;  %v6752_v39 = vld [vmem:[%s13324_s2 + $0x20] sm:$0xf] }
 0x322   :  { %2148 = vmatpush.bf16.msrb.mxu2 %v6793_v31  ;;  %v6753_v24 = vor.u32 %v8537_v21, %v6752_v39  ;;  %v6762_v33 = vld [vmem:[%s13324_s2 + $0x38] sm:$0xf0] }
 0x323   :  { %2121 = vmatpush.bf16.msra.mxu0 %v6801_v22  ;;  %v6781_v22 = vor.u32 %v8540_v17, %v6778_v18 }
 0x325   :  { %2161 = vmatpush.bf16.msrb.mxu3 %v6797_v63  ;;  %v8534_v63 = vld [vmem:[%s13324_s2 + $0x14] sm:$0xf0] }
 0x327   :  { %2122 = vmatpush.bf16.msra.mxu0 %v6785_v6  ;;  %v6765_v6 = vor.u32 %v8536_v11, %v6762_v33 }
 0x329   :  { %2162 = vmatpush.bf16.msrb.mxu3 %v6781_v22 }
 0x32b   :  { %2123 = vmatpush.bf16.msra.mxu0 %v6769_v48 }
 0x32d   :  { %2163 = vmatpush.bf16.msrb.mxu3 %v6765_v6 }
 0x32f   :  { %2124 = vmatpush.bf16.msra.mxu0 %v6753_v24 }
 0x333   :  { %2125 = vmatpush.bf16.msra.mxu0 %v6737_v41 }
 0x39c   :  { %v1806_v44 = vpop.f32.mrf.mxu0  ;;  %v1819_v56 = vpop.f32.mrf.mxu1 }
 0x39d   :  { %v1849_v27 = vadd.f32 %v1806_v44, %v9613_v36  ;;  %v1850_v52 = vadd.f32 %v1819_v56, %v9616_v28  ;;  %v6770_v36 = vld [vmem:[%s13324_s2 + $0x50] sm:$0xf0]  ;;  %v6776_v28 = vld [vmem:[%s13324_s2 + $0x48] sm:$0xf] }
 0x39e   :  { %v6773_v15 = vor.u32 %v8539_v2, %v6770_v36  ;;  %v6777_v57 = vor.u32 %v8542_v10, %v6776_v28  ;;  %v6738_v44 = vld [vmem:[%s13324_s2 + $0x10] sm:$0xf0]  ;;  %v6744_v56 = vld [vmem:[%s13324_s2 + $0x8] sm:$0xf] }
 0x39f   :  { %v6731_v40 = vmul.f32 -1.442695, %v1849_v27  ;;  %v6732_v14 = vmul.f32 -1.442695, %v1850_v52  ;;  %v6741_v27 = vor.u32 %v8531_v13, %v6738_v44  ;;  %v8532_v52 = vld [vmem:[%s13324_s2 + $0xc] sm:$0xf] }
 0x3a0   :  { %2136 = vmatpush.bf16.msra.mxu1 %v6773_v15  ;;  %2149 = vmatpush.bf16.msrb.mxu2 %v6777_v57  ;;  %v6749_v48 = vor.u32 %v8532_v52, %v6746_v53 }
 0x3a1   :  { %9001 = vpow2.f32 %v6731_v40 }
 0x3a2   :  { %9003 = vpow2.f32 %v6732_v14  ;;  %2164 = vmatpush.bf16.msrb.mxu3 %v6749_v48 }
 0x3a3   :  { %v1832_v46 = vpop.f32.mrf.mxu2  ;;  %v1845_v62 = vpop.f32.mrf.mxu3 }
 0x3a4   :  { %v1851_v30 = vadd.f32 %v1832_v46, %v9671_v16  ;;  %v1808_v31 = vpop.f32.mrf.mxu0  ;;  %v1821_v38 = vpop.f32.mrf.mxu1  ;;  %2137 = vmatpush.bf16.msra.mxu1 %v6757_v8  ;;  %2150 = vmatpush.bf16.msrb.mxu2 %v6761_v45  ;;  %v6745_v16 = vor.u32 %v8534_v63, %v6744_v56  ;;  %v1852_v18 = vadd.f32 %v1845_v62, %v9674_v19 }
 0x3a6   :  { %v6733_v0 = vmul.f32 -1.442695, %v1851_v30 }
 0x3a7   :  { %v9002_v2 = vpop.eup %9001 }
 0x3a8   :  { %v9004_v36 = vpop.eup %9003  ;;  %v1862_v28 = vadd.f32 1.0, %v9002_v2  ;;  %9005 = vpow2.f32 %v6733_v0  ;;  %2138 = vmatpush.bf16.msra.mxu1 %v6741_v27  ;;  %2151 = vmatpush.bf16.msrb.mxu2 %v6745_v16 }
 0x3a9   :  { %v1863_v10 = vadd.f32 1.0, %v9004_v36 }
 0x3aa   :  { %9007 = vrcp.f32 %v1862_v28  ;;  %v1876_v25 = vand.u32 2147483648, %v1862_v28  ;;  %v1874_v20 = vand.u32 2147483647, %v1862_v28  ;;  %vm1870_vm6 = vweird.f32 %v1862_v28 }
 0x3ab   :  { %9009 = vrcp.f32 %v1863_v10  ;;  %v1834_v40 = vpop.f32.mrf.mxu2  ;;  %v1847_v14 = vpop.f32.mrf.mxu3  ;;  %v1891_v26 = vand.u32 2147483648, %v1863_v10  ;;  %v1889_v33 = vand.u32 2147483647, %v1863_v10  ;;  %vm1885_vm7 = vweird.f32 %v1863_v10 }
 0x3ac   :  { %v1877_v62 = vor.u32 1.1754944e-38, %v1876_v25  ;;  %vm1875_vm10 = vcmp.eq.f32.partialorder %v1874_v20, 8.507059e+37  ;;  %v8593_v40 = vld [vmem:[%s13324_s2 + $0xec] sm:$0xf0]  ;;  %v8591_v14 = vld [vmem:[%s13324_s2 + $0xe4] sm:$0xf] }
 0x3ad   :  { %v1892_v12 = vor.u32 1.1754944e-38, %v1891_v26  ;;  %vm1890_vm11 = vcmp.eq.f32.partialorder %v1889_v33, 8.507059e+37  ;;  %v6963_v25 = vld [vmem:[%s13324_s2 + $0xc0] sm:$0xf]  ;;  %v8589_v26 = vld [vmem:[%s13324_s2 + $0xcc] sm:$0xf0] }
 0x3ae   :  { %v9006_v15 = vpop.eup %9005  ;;  %v6964_v20 = vor.u32 %v8589_v26, %v6963_v25  ;;  %v6971_v33 = vld [vmem:[%s13324_s2 + $0xc8] sm:$0xf]  ;;  %v8578_v26 = vld [vmem:[%s13324_s2 + $0x74] sm:$0xf0] }
 0x3af   :  { %v1864_v57 = vadd.f32 1.0, %v9006_v15  ;;  %v6923_v25 = vld [vmem:[%s13324_s2 + $0x68] sm:$0xf] }
 0x3b0   :  { %v9008_v17 = vpop.eup %9007 }
 0x3b1   :  { %v9010_v39 = vpop.eup %9009  ;;  %v1866_v21 = vmul.f32 %v9008_v17, %v1862_v28  ;;  %9011 = vrcp.f32 %v1864_v57  ;;  %vm1871_vm4 = vweird.f32 %v9008_v17  ;;  %v1906_v52 = vand.u32 2147483648, %v1864_v57 }
 0x3b2   :  { %v1881_v22 = vmul.f32 %v9010_v39, %v1863_v10  ;;  %9013 = vtanh.f32 %v1852_v18  ;;  %vm1886_vm5 = vweird.f32 %v9010_v39  ;;  %vm1872_vm8 = vmor %vm1870_vm6, %vm1871_vm4  ;;  %vm1900_vm13 = vweird.f32 %v1864_v57  ;;  %v6979_v10 = vld [vmem:[%s13324_s2 + $0xe0] sm:$0xf]  ;;  %v8594_v18 = vld [vmem:[%s13324_s2 + $0xf4] sm:$0xf0] }
 0x3b3   :  { %v1867_v24 = vsub.f32 1.0, %v1866_v21  ;;  %vm1887_vm9 = vmor %vm1885_vm7, %vm1886_vm5  ;;  %v1904_v53 = vand.u32 2147483647, %v1864_v57  ;;  %v1907_v2 = vor.u32 1.1754944e-38, %v1906_v52  ;;  %v6980_v15 = vor.u32 %v8593_v40, %v6979_v10  ;;  %v6957_v52 = vld [vmem:[%s13324_s2 + $0xb8] sm:$0xf0] }
 0x3b4   :  { %v1882_v59 = vsub.f32 1.0, %v1881_v22  ;;  %v8592_v22 = vld [vmem:[%s13324_s2 + $0xec] sm:$0xf]  ;;  %v6939_v10 = vld [vmem:[%s13324_s2 + $0x88] sm:$0xf] }
 0x3b5   :  { %v1868_v8 = vmul.f32 %v9008_v17, %v1867_v24  ;;  %vm1905_vm15 = vcmp.eq.f32.partialorder %v1904_v53, 8.507059e+37  ;;  %v6989_v24 = vld [vmem:[%s13324_s2 + $0xf8] sm:$0xf0]  ;;  %2439 = vmatpush.bf16.msrb.mxu0 %v6980_v15  ;;  %v8582_v40 = vld [vmem:[%s13324_s2 + $0x94] sm:$0xf0] }
 0x3b6   :  { %v1883_v11 = vmul.f32 %v9010_v39, %v1882_v59  ;;  %v6992_v59 = vor.u32 %v8592_v22, %v6989_v24  ;;  %v6940_v15 = vor.u32 %v8582_v40, %v6939_v10  ;;  %v8575_v22 = vld [vmem:[%s13324_s2 + $0x64] sm:$0xf]  ;;  %v6885_v10 = vld [vmem:[%s13324_s2 + $0x30] sm:$0xf0]  ;;  %v6891_v40 = vld [vmem:[%s13324_s2 + $0x28] sm:$0xf] }
 0x3b7   :  { %v9012_v46 = vpop.eup %9011  ;;  %v1869_v45 = vadd.f32 %v9008_v17, %v1868_v8  ;;  %v8587_v8 = vld [vmem:[%s13324_s2 + $0xc4] sm:$0xf] }
 0x3b8   :  { %v1896_v19 = vmul.f32 %v9012_v46, %v1864_v57  ;;  %v1884_v6 = vadd.f32 %v9010_v39, %v1883_v11  ;;  %v9014_v13 = vpop.eup %9013  ;;  %vm1901_vm12 = vweird.f32 %v9012_v46  ;;  %v6981_v57 = vld [vmem:[%s13324_s2 + $0xf0] sm:$0xf0]  ;;  %2478 = vmatpush.bf16.msra.mxu3 %v6992_v59 }
 0x3b9   :  { %v1873_v47 = vsel %vm1872_vm8, %v9008_v17, %v1869_v45  ;;  %vm1902_vm14 = vmor %vm1900_vm13, %vm1901_vm12  ;;  %v6987_v17 = vld [vmem:[%s13324_s2 + $0xe8] sm:$0xf]  ;;  %v6965_v11 = vld [vmem:[%s13324_s2 + $0xd0] sm:$0xf0]  ;;  %2440 = vmatpush.bf16.msrb.mxu0 %v6964_v20  ;;  %v218_v20 = vadd.f32 %v9624_v43, %v9610_v35 }
 0x3ba   :  { %v1897_v30 = vsub.f32 1.0, %v1896_v19  ;;  %v1878_v31 = vsel %vm1875_vm10, %v1877_v62, %v1873_v47  ;;  %v1888_v38 = vsel %vm1887_vm9, %v9010_v39, %v1884_v6  ;;  %v6984_v39 = vor.u32 %v8591_v14, %v6981_v57  ;;  %v8588_v62 = vld [vmem:[%s13324_s2 + $0xcc] sm:$0xf]  ;;  %v6973_v6 = vld [vmem:[%s13324_s2 + $0xd8] sm:$0xf0] }
 0x3bb   :  { %v1893_v41 = vsel %vm1890_vm11, %v1892_v12, %v1888_v38  ;;  %v1912_v44 = vmul.f32 %v9014_v13, %v1878_v31  ;;  %v6988_v21 = vor.u32 %v8594_v18, %v6987_v17  ;;  %v6968_v45 = vor.u32 %v8587_v8, %v6965_v11  ;;  %v6947_v47 = vld [vmem:[%s13324_s2 + $0xa0] sm:$0xf]  ;;  %v8585_v13 = vld [vmem:[%s13324_s2 + $0xac] sm:$0xf0]  ;;  %v6949_v38 = vld [vmem:[%s13324_s2 + $0xb0] sm:$0xf0] }
 0x3bc   :  { %v1898_v56 = vmul.f32 %v9012_v46, %v1897_v30  ;;  %v1911_v63 = vmul.f32 %v1893_v41, %v10546_v37  ;;  %2452 = vmatpush.bf16.msrb.mxu1 %v6984_v39  ;;  %v6976_v12 = vor.u32 %v8588_v62, %v6973_v6  ;;  %v8583_v30 = vld [vmem:[%s13324_s2 + $0xa4] sm:$0xf]  ;;  %v6948_v31 = vor.u32 %v8585_v13, %v6947_v47  ;;  %v6955_v41 = vld [vmem:[%s13324_s2 + $0xa8] sm:$0xf]  ;;  %v8580_v57 = vld [vmem:[%s13324_s2 + $0x8c] sm:$0xf] }
 0x3bd   :  { %2465 = vmatpush.bf16.msra.mxu2 %v6988_v21  ;;  %v6941_v17 = vld [vmem:[%s13324_s2 + $0x98] sm:$0xf0]  ;;  %v6915_v39 = vld [vmem:[%s13324_s2 + $0x60] sm:$0xf]  ;;  %v8577_v21 = vld [vmem:[%s13324_s2 + $0x6c] sm:$0xf0]  ;;  %v189_v8 = vadd.f32 %v9622_v42, %v9608_v34 }
 0x3be   :  { %v10750_v27 = vadd.f32 %v1912_v44, %v1911_v63  ;;  %v1899_v16 = vadd.f32 %v9012_v46, %v1898_v56  ;;  %2479 = vmatpush.bf16.msra.mxu3 %v6976_v12  ;;  %v8586_v44 = vld [vmem:[%s13324_s2 + $0xb4] sm:$0xf0]  ;;  %v6952_v56 = vor.u32 %v8583_v30, %v6949_v38  ;;  %2441 = vmatpush.bf16.msrb.mxu0 %v6948_v31  ;;  %v6917_v59 = vld [vmem:[%s13324_s2 + $0x70] sm:$0xf0]  ;;  %v6899_v42 = vld [vmem:[%s13324_s2 + $0x40] sm:$0xf] }
 0x3bf   :  { %v6956_v63 = vor.u32 %v8586_v44, %v6955_v41  ;;  %v6944_v18 = vor.u32 %v8580_v57, %v6941_v17  ;;  %v6916_v24 = vor.u32 %v8577_v21, %v6915_v39  ;;  %v6920_v11 = vor.u32 %v8575_v22, %v6917_v59  ;;  %v8573_v43 = vld [vmem:[%s13324_s2 + $0x4c] sm:$0xf0]  ;;  %v8571_v13 = vld [vmem:[%s13324_s2 + $0x44] sm:$0xf]  ;;  %v6901_v31 = vld [vmem:[%s13324_s2 + $0x50] sm:$0xf0] }
 0x3c0   :  { %9015 = vtanh.f32 %v10750_v27  ;;  %v1903_v0 = vsel %vm1902_vm14, %v9012_v46, %v1899_v16  ;;  %v8590_v46 = vld [vmem:[%s13324_s2 + $0xd4] sm:$0xf0]  ;;  %2453 = vmatpush.bf16.msrb.mxu1 %v6968_v45  ;;  %v8584_v16 = vld [vmem:[%s13324_s2 + $0xac] sm:$0xf]  ;;  %v6925_v45 = vld [vmem:[%s13324_s2 + $0x78] sm:$0xf0]  ;;  %v6900_v30 = vor.u32 %v8573_v43, %v6899_v42 }
 0x3c1   :  { %v1908_v36 = vsel %vm1905_vm15, %v1907_v2, %v1903_v0  ;;  %v6972_v19 = vor.u32 %v8590_v46, %v6971_v33  ;;  %v6960_v53 = vor.u32 %v8584_v16, %v6957_v52  ;;  %v6931_v0 = vld [vmem:[%s13324_s2 + $0x80] sm:$0xf]  ;;  %v8581_v2 = vld [vmem:[%s13324_s2 + $0x8c] sm:$0xf0]  ;;  %v6924_v33 = vor.u32 %v8578_v26, %v6923_v25  ;;  %v8576_v46 = vld [vmem:[%s13324_s2 + $0x6c] sm:$0xf] }
 0x3c2   :  { %v6928_v6 = vor.u32 %v8576_v46, %v6925_v45  ;;  %v6907_v38 = vld [vmem:[%s13324_s2 + $0x48] sm:$0xf]  ;;  %v8574_v41 = vld [vmem:[%s13324_s2 + $0x54] sm:$0xf0]  ;;  %v8572_v52 = vld [vmem:[%s13324_s2 + $0x4c] sm:$0xf] }
 0x3c3   :  { %2466 = vmatpush.bf16.msra.mxu2 %v6972_v19  ;;  %2480 = vmatpush.bf16.msra.mxu3 %v6960_v53  ;;  %v6908_v16 = vor.u32 %v8574_v41, %v6907_v38  ;;  %v6909_v53 = vld [vmem:[%s13324_s2 + $0x58] sm:$0xf0]  ;;  %v8570_v57 = vld [vmem:[%s13324_s2 + $0x34] sm:$0xf0]  ;;  %v8568_v17 = vld [vmem:[%s13324_s2 + $0x2c] sm:$0xf] }
 0x3c4   :  { %2454 = vmatpush.bf16.msrb.mxu1 %v6952_v56  ;;  %v6892_v22 = vor.u32 %v8570_v57, %v6891_v40  ;;  %v8565_v59 = vld [vmem:[%s13324_s2 + $0xc] sm:$0xf0]  ;;  %v8563_v25 = vld [vmem:[%s13324_s2 + $0x4] sm:$0xf]  ;;  %v6875_v46 = vld [vmem:[%s13324_s2 + $0x8] sm:$0xf] }
 0x3c5   :  { %v8566_v45 = vld [vmem:[%s13324_s2 + $0x14] sm:$0xf0] }
 0x3c6   :  { %v9016_v48 = vpop.eup %9015 }
 0x3c7   :  { %v10753_v28 = vmul.f32 %v9016_v48, %v1908_v36  ;;  %2467 = vmatpush.bf16.msra.mxu2 %v6956_v63  ;;  %v8579_v48 = vld [vmem:[%s13324_s2 + $0x84] sm:$0xf]  ;;  %v6932_v36 = vor.u32 %v8581_v2, %v6931_v0  ;;  %2481 = vmatpush.bf16.msra.mxu3 %v6944_v18  ;;  %v6904_v63 = vor.u32 %v8571_v13, %v6901_v31  ;;  %v6883_v0 = vld [vmem:[%s13324_s2 + $0x20] sm:$0xf]  ;;  %v8569_v2 = vld [vmem:[%s13324_s2 + $0x2c] sm:$0xf0] }
 0x3c8   :  { %v6893_v18 = vld [vmem:[%s13324_s2 + $0x38] sm:$0xf0] }
 0x3c9   :  { %v1925_v37 = vpack.c.bf16 %v10753_v28, %v10753_v28  ;;  %2442 = vmatpush.bf16.msrb.mxu0 %v6932_v36  ;;  %v6884_v36 = vor.u32 %v8569_v2, %v6883_v0 }
 0x3cb   :  { %2126 = vmatmul.bf16.vlgmr.msra.gmra.mxu0 %v1925_v37  ;;  %2139 = vmatmul.bf16.vlgmr.msra.gmra.mxu1 %v1925_v37 }
 0x3cc   :  { %2152 = vmatmul.bf16.vlgmr.msrb.gmra.mxu2 %v1925_v37  ;;  %2165 = vmatmul.bf16.vlgmr.msrb.gmra.mxu3 %v1925_v37  ;;  %v6933_v37 = vld [vmem:[%s13324_s2 + $0x90] sm:$0xf0] }
 0x3cd   :  { %v6936_v14 = vor.u32 %v8579_v48, %v6933_v37  ;;  %2468 = vmatpush.bf16.msra.mxu2 %v6940_v15  ;;  %2443 = vmatpush.bf16.msrb.mxu0 %v6916_v24  ;;  %v6912_v48 = vor.u32 %v8572_v52, %v6909_v53  ;;  %v8567_v37 = vld [vmem:[%s13324_s2 + $0x24] sm:$0xf]  ;;  %v6896_v24 = vor.u32 %v8568_v17, %v6893_v18 }
 0x3ce   :  { %2482 = vmatpush.bf16.msra.mxu3 %v6928_v6  ;;  %v6888_v15 = vor.u32 %v8567_v37, %v6885_v10  ;;  %v8564_v6 = vld [vmem:[%s13324_s2 + $0xc] sm:$0xf] }
 0x3cf   :  { %2455 = vmatpush.bf16.msrb.mxu1 %v6936_v14  ;;  %v247_v14 = vadd.f32 %v9722_v60, %v9655_v1  ;;  %v6867_v60 = vld [vmem:[%s13324_s2] sm:$0xf] }
 0x3d1   :  { %2469 = vmatpush.bf16.msra.mxu2 %v6924_v33  ;;  %2444 = vmatpush.bf16.msrb.mxu0 %v6900_v30  ;;  %v6869_v33 = vld [vmem:[%s13324_s2 + $0x10] sm:$0xf0] }
 0x3d2   :  { %2483 = vmatpush.bf16.msra.mxu3 %v6912_v48 }
 0x3d3   :  { %2456 = vmatpush.bf16.msrb.mxu1 %v6920_v11  ;;  %v6868_v11 = vor.u32 %v8565_v59, %v6867_v60 }
 0x3d5   :  { %2470 = vmatpush.bf16.msra.mxu2 %v6908_v16  ;;  %2445 = vmatpush.bf16.msrb.mxu0 %v6884_v36 }
 0x3d6   :  { %2484 = vmatpush.bf16.msra.mxu3 %v6896_v24 }
 0x3d7   :  { %2457 = vmatpush.bf16.msrb.mxu1 %v6904_v63 }
 0x3d9   :  { %2471 = vmatpush.bf16.msra.mxu2 %v6892_v22  ;;  %2446 = vmatpush.bf16.msrb.mxu0 %v6868_v11 }
 0x3db   :  { %2458 = vmatpush.bf16.msrb.mxu1 %v6888_v15 }
 0x448   :  { %v2127_v19 = vpop.f32.mrf.mxu0  ;;  %v2140_v62 = vpop.f32.mrf.mxu1 }
 0x449   :  { %v2170_v12 = vadd.f32 %v2127_v19, %v189_v8  ;;  %v2171_v47 = vadd.f32 %v2140_v62, %v218_v20  ;;  %v6872_v19 = vor.u32 %v8563_v25, %v6869_v33  ;;  %v6876_v62 = vor.u32 %v8566_v45, %v6875_v46 }
 0x44b   :  { %v6862_v44 = vmul.f32 -1.442695, %v2170_v12  ;;  %v6863_v56 = vmul.f32 -1.442695, %v2171_v47  ;;  %v6877_v12 = vld [vmem:[%s13324_s2 + $0x18] sm:$0xf0]  ;;  %2459 = vmatpush.bf16.msrb.mxu1 %v6872_v19  ;;  %2472 = vmatpush.bf16.msra.mxu2 %v6876_v62 }
 0x44c   :  { %v6880_v43 = vor.u32 %v8564_v6, %v6877_v12 }
 0x44d   :  { %9017 = vpow2.f32 %v6862_v44 }
 0x44e   :  { %9019 = vpow2.f32 %v6863_v56  ;;  %2485 = vmatpush.bf16.msra.mxu3 %v6880_v43  ;;  %v276_v56 = vadd.f32 %v9730_v7, %v9658_v4 }
 0x44f   :  { %v2153_v39 = vpop.f32.mrf.mxu2  ;;  %v2166_v21 = vpop.f32.mrf.mxu3 }
 0x450   :  { %v2172_v26 = vadd.f32 %v2153_v39, %v247_v14  ;;  %v2129_v8 = vpop.f32.mrf.mxu0  ;;  %v2142_v20 = vpop.f32.mrf.mxu1  ;;  %v2173_v52 = vadd.f32 %v2166_v21, %v276_v56  ;;  %v8626_v56 = vld [vmem:[%s13324_s2 + $0xf4] sm:$0xf0] }
 0x452   :  { %v6864_v47 = vmul.f32 -1.442695, %v2172_v26 }
 0x453   :  { %v9018_v42 = vpop.eup %9017 }
 0x454   :  { %v9020_v13 = vpop.eup %9019  ;;  %v2183_v30 = vadd.f32 1.0, %v9018_v42  ;;  %9021 = vpow2.f32 %v6864_v47 }
 0x455   :  { %v2184_v31 = vadd.f32 1.0, %v9020_v13  ;;  %v7110_v13 = vld [vmem:[%s13324_s2 + $0xe0] sm:$0xf] }
 0x456   :  { %9023 = vrcp.f32 %v2183_v30  ;;  %v2197_v37 = vand.u32 2147483648, %v2183_v30  ;;  %v2195_v14 = vand.u32 2147483647, %v2183_v30  ;;  %vm2191_vm3 = vweird.f32 %v2183_v30 }
 0x457   :  { %9025 = vrcp.f32 %v2184_v31  ;;  %v2155_v38 = vpop.f32.mrf.mxu2  ;;  %v2168_v41 = vpop.f32.mrf.mxu3  ;;  %v2212_v10 = vand.u32 2147483648, %v2184_v31  ;;  %v2210_v57 = vand.u32 2147483647, %v2184_v31  ;;  %vm2206_vm4 = vweird.f32 %v2184_v31 }
 0x458   :  { %v2198_v39 = vor.u32 1.1754944e-38, %v2197_v37  ;;  %vm2196_vm7 = vcmp.eq.f32.partialorder %v2195_v14, 8.507059e+37  ;;  %v7112_v41 = vld [vmem:[%s13324_s2 + $0xf0] sm:$0xf0]  ;;  %v8622_v14 = vld [vmem:[%s13324_s2 + $0xd4] sm:$0xf0] }
 0x459   :  { %v2213_v22 = vor.u32 1.1754944e-38, %v2212_v10  ;;  %vm2211_vm8 = vcmp.eq.f32.partialorder %v2210_v57, 8.507059e+37  ;;  %v7096_v10 = vld [vmem:[%s13324_s2 + $0xd0] sm:$0xf0] }
 0x45a   :  { %v9022_v44 = vpop.eup %9021 }
 0x45b   :  { %v2185_v63 = vadd.f32 1.0, %v9022_v44  ;;  %v7118_v44 = vld [vmem:[%s13324_s2 + $0xe8] sm:$0xf] }
 0x45c   :  { %v9024_v16 = vpop.eup %9023 }
 0x45d   :  { %v9026_v53 = vpop.eup %9025  ;;  %v2187_v0 = vmul.f32 %v9024_v16, %v2183_v30  ;;  %9027 = vrcp.f32 %v2185_v63  ;;  %vm2192_vm1 = vweird.f32 %v9024_v16  ;;  %v2227_v19 = vand.u32 2147483648, %v2185_v63  ;;  %v8625_v30 = vld [vmem:[%s13324_s2 + $0xec] sm:$0xf0] }
 0x45e   :  { %v2202_v2 = vmul.f32 %v9026_v53, %v2184_v31  ;;  %9029 = vtanh.f32 %v2173_v52  ;;  %vm2207_vm2 = vweird.f32 %v9026_v53  ;;  %vm2193_vm5 = vmor %vm2191_vm3, %vm2192_vm1  ;;  %vm2221_vm10 = vweird.f32 %v2185_v63  ;;  %v8623_v31 = vld [vmem:[%s13324_s2 + $0xe4] sm:$0xf]  ;;  %v8624_v52 = vld [vmem:[%s13324_s2 + $0xec] sm:$0xf] }
 0x45f   :  { %v2188_v48 = vsub.f32 1.0, %v2187_v0  ;;  %vm2208_vm6 = vmor %vm2206_vm4, %vm2207_vm2  ;;  %v2225_v62 = vand.u32 2147483647, %v2185_v63  ;;  %v2228_v12 = vor.u32 1.1754944e-38, %v2227_v19  ;;  %v7111_v38 = vor.u32 %v8625_v30, %v7110_v13  ;;  %v8613_v19 = vld [vmem:[%s13324_s2 + $0x8c] sm:$0xf0] }
 0x460   :  { %v2203_v36 = vsub.f32 1.0, %v2202_v2  ;;  %v7094_v2 = vld [vmem:[%s13324_s2 + $0xc0] sm:$0xf]  ;;  %v8612_v30 = vld [vmem:[%s13324_s2 + $0x8c] sm:$0xf] }
 0x461   :  { %v2189_v40 = vmul.f32 %v9024_v16, %v2188_v48  ;;  %vm2226_vm12 = vcmp.eq.f32.partialorder %v2225_v62, 8.507059e+37  ;;  %2760 = vmatpush.bf16.msra.mxu0 %v7111_v38  ;;  %v8621_v48 = vld [vmem:[%s13324_s2 + $0xcc] sm:$0xf0]  ;;  %v8611_v62 = vld [vmem:[%s13324_s2 + $0x84] sm:$0xf] }
 0x462   :  { %v2204_v15 = vmul.f32 %v9026_v53, %v2203_v36  ;;  %v8619_v36 = vld [vmem:[%s13324_s2 + $0xc4] sm:$0xf]  ;;  %v7095_v37 = vor.u32 %v8621_v48, %v7094_v2  ;;  %v8608_v48 = vld [vmem:[%s13324_s2 + $0x6c] sm:$0xf] }
 0x463   :  { %v9028_v17 = vpop.eup %9027  ;;  %v2190_v7 = vadd.f32 %v9024_v16, %v2189_v40  ;;  %v7102_v40 = vld [vmem:[%s13324_s2 + $0xc8] sm:$0xf] }
 0x464   :  { %v2217_v18 = vmul.f32 %v9028_v17, %v2185_v63  ;;  %v2205_v21 = vadd.f32 %v9026_v53, %v2204_v15  ;;  %v9030_v60 = vpop.eup %9029  ;;  %vm2222_vm9 = vweird.f32 %v9028_v17  ;;  %v7115_v63 = vor.u32 %v8623_v31, %v7112_v41  ;;  %v7072_v31 = vld [vmem:[%s13324_s2 + $0x98] sm:$0xf0]  ;;  %v7046_v41 = vld [vmem:[%s13324_s2 + $0x60] sm:$0xf] }
 0x465   :  { %v2194_v24 = vsel %vm2193_vm5, %v9024_v16, %v2190_v7  ;;  %vm2223_vm11 = vmor %vm2221_vm10, %vm2222_vm9  ;;  %v7119_v16 = vor.u32 %v8626_v56, %v7118_v44  ;;  %v7099_v15 = vor.u32 %v8619_v36, %v7096_v10  ;;  %v7103_v57 = vor.u32 %v8622_v14, %v7102_v40  ;;  %v7104_v7 = vld [vmem:[%s13324_s2 + $0xd8] sm:$0xf0]  ;;  %2761 = vmatpush.bf16.msra.mxu0 %v7095_v37  ;;  %v8609_v44 = vld [vmem:[%s13324_s2 + $0x6c] sm:$0xf0] }
 0x466   :  { %v2218_v59 = vsub.f32 1.0, %v2217_v18  ;;  %v2199_v25 = vsel %vm2196_vm7, %v2198_v39, %v2194_v24  ;;  %v2209_v26 = vsel %vm2208_vm6, %v9026_v53, %v2205_v21  ;;  %v7120_v53 = vld [vmem:[%s13324_s2 + $0xf8] sm:$0xf0]  ;;  %2773 = vmatpush.bf16.msra.mxu1 %v7115_v63  ;;  %v7078_v39 = vld [vmem:[%s13324_s2 + $0xa0] sm:$0xf]  ;;  %v7075_v38 = vor.u32 %v8612_v30, %v7072_v31 }
 0x467   :  { %v2214_v8 = vsel %vm2211_vm8, %v2213_v22, %v2209_v26  ;;  %v2233_v20 = vmul.f32 %v9030_v60, %v2199_v25  ;;  %v7123_v0 = vor.u32 %v8624_v52, %v7120_v53  ;;  %2786 = vmatpush.bf16.msrb.mxu2 %v7119_v16  ;;  %v8617_v21 = vld [vmem:[%s13324_s2 + $0xac] sm:$0xf0]  ;;  %v8615_v22 = vld [vmem:[%s13324_s2 + $0xa4] sm:$0xf]  ;;  %v7080_v60 = vld [vmem:[%s13324_s2 + $0xb0] sm:$0xf0]  ;;  %v7047_v63 = vor.u32 %v8609_v44, %v7046_v41 }
 0x468   :  { %v2219_v11 = vmul.f32 %v9028_v17, %v2218_v59  ;;  %v2232_v33 = vmul.f32 %v2214_v8, %v10750_v27  ;;  %v7079_v24 = vor.u32 %v8617_v21, %v7078_v39  ;;  %v7086_v59 = vld [vmem:[%s13324_s2 + $0xa8] sm:$0xf]  ;;  %v8618_v25 = vld [vmem:[%s13324_s2 + $0xb4] sm:$0xf0]  ;;  %v7083_v26 = vor.u32 %v8615_v22, %v7080_v60  ;;  %v8607_v56 = vld [vmem:[%s13324_s2 + $0x64] sm:$0xf] }
 0x469   :  { %2799 = vmatpush.bf16.msrb.mxu3 %v7123_v0  ;;  %v7087_v8 = vor.u32 %v8618_v25, %v7086_v59  ;;  %v7048_v16 = vld [vmem:[%s13324_s2 + $0x70] sm:$0xf0]  ;;  %v7054_v52 = vld [vmem:[%s13324_s2 + $0x68] sm:$0xf]  ;;  %v8610_v53 = vld [vmem:[%s13324_s2 + $0x74] sm:$0xf0] }
 0x46a   :  { %v10958_v46 = vadd.f32 %v2233_v20, %v2232_v33  ;;  %v2220_v45 = vadd.f32 %v9028_v17, %v2219_v11  ;;  %2774 = vmatpush.bf16.msra.mxu1 %v7099_v15  ;;  %v8616_v20 = vld [vmem:[%s13324_s2 + $0xac] sm:$0xf]  ;;  %v7088_v11 = vld [vmem:[%s13324_s2 + $0xb8] sm:$0xf0]  ;;  %2762 = vmatpush.bf16.msra.mxu0 %v7079_v24  ;;  %v7051_v0 = vor.u32 %v8607_v56, %v7048_v16  ;;  %v7030_v10 = vld [vmem:[%s13324_s2 + $0x40] sm:$0xf] }
 0x46b   :  { %2787 = vmatpush.bf16.msrb.mxu2 %v7103_v57  ;;  %v7091_v33 = vor.u32 %v8616_v20, %v7088_v11  ;;  %v7055_v2 = vor.u32 %v8610_v53, %v7054_v52  ;;  %v7056_v36 = vld [vmem:[%s13324_s2 + $0x78] sm:$0xf0]  ;;  %v8605_v40 = vld [vmem:[%s13324_s2 + $0x4c] sm:$0xf0]  ;;  %v8603_v14 = vld [vmem:[%s13324_s2 + $0x44] sm:$0xf] }
 0x46c   :  { %9031 = vtanh.f32 %v10958_v46  ;;  %v2224_v6 = vsel %vm2223_vm11, %v9028_v17, %v2220_v45  ;;  %v8620_v17 = vld [vmem:[%s13324_s2 + $0xcc] sm:$0xf]  ;;  %v7062_v45 = vld [vmem:[%s13324_s2 + $0x80] sm:$0xf]  ;;  %v7059_v37 = vor.u32 %v8608_v48, %v7056_v36  ;;  %v7031_v15 = vor.u32 %v8605_v40, %v7030_v10  ;;  %v7032_v57 = vld [vmem:[%s13324_s2 + $0x50] sm:$0xf0] }
 0x46d   :  { %v2229_v42 = vsel %vm2226_vm12, %v2228_v12, %v2224_v6  ;;  %v7107_v18 = vor.u32 %v8620_v17, %v7104_v7  ;;  %v7063_v6 = vor.u32 %v8613_v19, %v7062_v45  ;;  %v7064_v12 = vld [vmem:[%s13324_s2 + $0x90] sm:$0xf0]  ;;  %v7038_v17 = vld [vmem:[%s13324_s2 + $0x48] sm:$0xf]  ;;  %v8606_v7 = vld [vmem:[%s13324_s2 + $0x54] sm:$0xf0] }
 0x46e   :  { %2775 = vmatpush.bf16.msra.mxu1 %v7083_v26  ;;  %v7039_v39 = vor.u32 %v8606_v7, %v7038_v17  ;;  %v8604_v21 = vld [vmem:[%s13324_s2 + $0x4c] sm:$0xf]  ;;  %v7040_v22 = vld [vmem:[%s13324_s2 + $0x58] sm:$0xf0]  ;;  %v7014_v60 = vld [vmem:[%s13324_s2 + $0x20] sm:$0xf] }
 0x46f   :  { %2800 = vmatpush.bf16.msrb.mxu3 %v7107_v18  ;;  %2788 = vmatpush.bf16.msrb.mxu2 %v7087_v8  ;;  %v7035_v18 = vor.u32 %v8603_v14, %v7032_v57  ;;  %v7043_v24 = vor.u32 %v8604_v21, %v7040_v22  ;;  %v8601_v59 = vld [vmem:[%s13324_s2 + $0x2c] sm:$0xf0]  ;;  %v8599_v25 = vld [vmem:[%s13324_s2 + $0x24] sm:$0xf]  ;;  %v7016_v8 = vld [vmem:[%s13324_s2 + $0x30] sm:$0xf0] }
 0x470   :  { %2763 = vmatpush.bf16.msra.mxu0 %v7063_v6  ;;  %v7015_v26 = vor.u32 %v8601_v59, %v7014_v60  ;;  %v7022_v20 = vld [vmem:[%s13324_s2 + $0x28] sm:$0xf]  ;;  %v8602_v11 = vld [vmem:[%s13324_s2 + $0x34] sm:$0xf0]  ;;  %v8600_v19 = vld [vmem:[%s13324_s2 + $0x2c] sm:$0xf] }
 0x471   :  { %v7023_v45 = vor.u32 %v8602_v11, %v7022_v20  ;;  %v7006_v30 = vld [vmem:[%s13324_s2 + $0x8] sm:$0xf]  ;;  %v8598_v31 = vld [vmem:[%s13324_s2 + $0x14] sm:$0xf0]  ;;  %v8596_v44 = vld [vmem:[%s13324_s2 + $0xc] sm:$0xf] }
 0x472   :  { %v9032_v47 = vpop.eup %9031  ;;  %v7007_v41 = vor.u32 %v8598_v31, %v7006_v30  ;;  %v7008_v56 = vld [vmem:[%s13324_s2 + $0x18] sm:$0xf0]  ;;  %v8657_v52 = vld [vmem:[%s13326_s4 + $0xec] sm:$0xf0]  ;;  %v8655_v53 = vld [vmem:[%s13326_s4 + $0xe4] sm:$0xf] }
 0x473   :  { %v10961_v43 = vmul.f32 %v9032_v47, %v2229_v42  ;;  %2801 = vmatpush.bf16.msrb.mxu3 %v7091_v33  ;;  %v7070_v47 = vld [vmem:[%s13324_s2 + $0x88] sm:$0xf]  ;;  %v8614_v42 = vld [vmem:[%s13324_s2 + $0x94] sm:$0xf0]  ;;  %v7019_v33 = vor.u32 %v8599_v25, %v7016_v8  ;;  %v7011_v16 = vor.u32 %v8596_v44, %v7008_v56  ;;  %v8656_v14 = vld [vmem:[%s13326_s4 + $0xec] sm:$0xf] }
 0x474   :  { %v7071_v13 = vor.u32 %v8614_v42, %v7070_v47  ;;  %2764 = vmatpush.bf16.msra.mxu0 %v7047_v63  ;;  %v8597_v47 = vld [vmem:[%s13324_s2 + $0xc] sm:$0xf0]  ;;  %v8595_v42 = vld [vmem:[%s13324_s2 + $0x4] sm:$0xf]  ;;  %v7241_v63 = vld [vmem:[%s13326_s4 + $0xe0] sm:$0xf] }
 0x475   :  { %v2246_v27 = vpack.c.bf16 %v10961_v43, %v10961_v43  ;;  %v7242_v36 = vor.u32 %v8657_v52, %v7241_v63  ;;  %v7249_v10 = vld [vmem:[%s13326_s4 + $0xe8] sm:$0xf]  ;;  %v8658_v40 = vld [vmem:[%s13326_s4 + $0xf4] sm:$0xf0]  ;;  %v7251_v7 = vld [vmem:[%s13326_s4 + $0xf8] sm:$0xf0] }
 0x476   :  { %2789 = vmatpush.bf16.msrb.mxu2 %v7071_v13  ;;  %v7000_v13 = vld [vmem:[%s13324_s2 + $0x10] sm:$0xf0]  ;;  %v7250_v17 = vor.u32 %v8658_v40, %v7249_v10  ;;  %v7254_v21 = vor.u32 %v8656_v14, %v7251_v7  ;;  %v8652_v20 = vld [vmem:[%s13326_s4 + $0xcc] sm:$0xf]  ;;  %v7235_v11 = vld [vmem:[%s13326_s4 + $0xd8] sm:$0xf0] }
 0x477   :  { %2447 = vmatmul.bf16.vlgmr.msrb.gmra.mxu0 %v2246_v27  ;;  %2460 = vmatmul.bf16.vlgmr.msrb.gmra.mxu1 %v2246_v27  ;;  %v7227_v22 = vld [vmem:[%s13326_s4 + $0xd0] sm:$0xf0]  ;;  %v7193_v44 = vld [vmem:[%s13326_s4 + $0x80] sm:$0xf]  ;;  %v8645_v56 = vld [vmem:[%s13326_s4 + $0x8c] sm:$0xf0] }
 0x478   :  { %2473 = vmatmul.bf16.vlgmr.msra.gmra.mxu2 %v2246_v27  ;;  %2486 = vmatmul.bf16.vlgmr.msra.gmra.mxu3 %v2246_v27  ;;  %v7067_v27 = vor.u32 %v8611_v62, %v7064_v12  ;;  %v7024_v62 = vld [vmem:[%s13324_s2 + $0x38] sm:$0xf0]  ;;  %v6998_v12 = vld [vmem:[%s13324_s2] sm:$0xf]  ;;  %v7194_v40 = vor.u32 %v8645_v56, %v7193_v44  ;;  %v8636_v56 = vld [vmem:[%s13326_s4 + $0x4c] sm:$0xf] }
 0x479   :  { %2802 = vmatpush.bf16.msrb.mxu3 %v7075_v38  ;;  %2765 = vmatpush.bf16.msra.mxu0 %v7031_v15  ;;  %v7027_v6 = vor.u32 %v8600_v19, %v7024_v62  ;;  %v7003_v38 = vor.u32 %v8595_v42, %v7000_v13  ;;  %v8649_v19 = vld [vmem:[%s13326_s4 + $0xac] sm:$0xf0]  ;;  %v8647_v62 = vld [vmem:[%s13326_s4 + $0xa4] sm:$0xf]  ;;  %v7217_v42 = vld [vmem:[%s13326_s4 + $0xa8] sm:$0xf] }
 0x47a   :  { %2776 = vmatpush.bf16.msra.mxu1 %v7067_v27  ;;  %2790 = vmatpush.bf16.msrb.mxu2 %v7055_v2  ;;  %v6999_v27 = vor.u32 %v8597_v47, %v6998_v12  ;;  %v8648_v13 = vld [vmem:[%s13326_s4 + $0xac] sm:$0xf] }
 0x47d   :  { %2803 = vmatpush.bf16.msrb.mxu3 %v7059_v37  ;;  %2766 = vmatpush.bf16.msra.mxu0 %v7015_v26  ;;  %v8654_v26 = vld [vmem:[%s13326_s4 + $0xd4] sm:$0xf0] }
 0x47e   :  { %2777 = vmatpush.bf16.msra.mxu1 %v7051_v0  ;;  %2791 = vmatpush.bf16.msrb.mxu2 %v7039_v39  ;;  %v7243_v0 = vld [vmem:[%s13326_s4 + $0xf0] sm:$0xf0]  ;;  %v8653_v39 = vld [vmem:[%s13326_s4 + $0xcc] sm:$0xf0] }
 0x47f   :  { %v7246_v37 = vor.u32 %v8655_v53, %v7243_v0  ;;  %v8643_v0 = vld [vmem:[%s13326_s4 + $0x84] sm:$0xf] }
 0x481   :  { %2804 = vmatpush.bf16.msrb.mxu3 %v7043_v24  ;;  %2767 = vmatpush.bf16.msra.mxu0 %v6999_v27  ;;  %v7233_v24 = vld [vmem:[%s13326_s4 + $0xc8] sm:$0xf]  ;;  %v8650_v27 = vld [vmem:[%s13326_s4 + $0xb4] sm:$0xf0] }
 0x482   :  { %2778 = vmatpush.bf16.msra.mxu1 %v7035_v18  ;;  %2792 = vmatpush.bf16.msrb.mxu2 %v7023_v45  ;;  %v7225_v18 = vld [vmem:[%s13326_s4 + $0xc0] sm:$0xf]  ;;  %v7234_v8 = vor.u32 %v8654_v26, %v7233_v24  ;;  %v7238_v45 = vor.u32 %v8652_v20, %v7235_v11  ;;  %v8642_v20 = vld [vmem:[%s13326_s4 + $0x74] sm:$0xf0] }
 0x485   :  { %2805 = vmatpush.bf16.msrb.mxu3 %v7027_v6  ;;  %3095 = vmatpush.bf16.msrb.mxu0 %v7242_v36  ;;  %v7211_v6 = vld [vmem:[%s13326_s4 + $0xb0] sm:$0xf0]  ;;  %v8644_v36 = vld [vmem:[%s13326_s4 + $0x8c] sm:$0xf] }
 0x486   :  { %2779 = vmatpush.bf16.msra.mxu1 %v7019_v33  ;;  %2793 = vmatpush.bf16.msrb.mxu2 %v7007_v41  ;;  %v7209_v33 = vld [vmem:[%s13326_s4 + $0xa0] sm:$0xf]  ;;  %v7214_v47 = vor.u32 %v8647_v62, %v7211_v6  ;;  %v7219_v41 = vld [vmem:[%s13326_s4 + $0xb8] sm:$0xf0] }
 0x487   :  { %v7210_v12 = vor.u32 %v8649_v19, %v7209_v33  ;;  %v7222_v53 = vor.u32 %v8648_v13, %v7219_v41  ;;  %v8640_v19 = vld [vmem:[%s13326_s4 + $0x6c] sm:$0xf]  ;;  %v7187_v62 = vld [vmem:[%s13326_s4 + $0x78] sm:$0xf0]  ;;  %v7161_v6 = vld [vmem:[%s13326_s4 + $0x40] sm:$0xf] }
 0x489   :  { %2806 = vmatpush.bf16.msrb.mxu3 %v7011_v16 }
 0x48a   :  { %2780 = vmatpush.bf16.msra.mxu1 %v7003_v38  ;;  %3153 = vmatpush.bf16.msra.mxu2 %v7250_v17  ;;  %v7218_v38 = vor.u32 %v8650_v27, %v7217_v42  ;;  %v8635_v42 = vld [vmem:[%s13326_s4 + $0x44] sm:$0xf] }
 0x48d   :  { %3182 = vmatpush.bf16.msra.mxu3 %v7254_v21  ;;  %v7177_v21 = vld [vmem:[%s13326_s4 + $0x60] sm:$0xf] }
 0x48e   :  { %3124 = vmatpush.bf16.msrb.mxu1 %v7246_v37  ;;  %3154 = vmatpush.bf16.msra.mxu2 %v7234_v8  ;;  %v7203_v37 = vld [vmem:[%s13326_s4 + $0x98] sm:$0xf0]  ;;  %v7185_v8 = vld [vmem:[%s13326_s4 + $0x68] sm:$0xf] }
 0x491   :  { %3183 = vmatpush.bf16.msra.mxu3 %v7238_v45  ;;  %v7186_v45 = vor.u32 %v8642_v20, %v7185_v8  ;;  %v8629_v8 = vld [vmem:[%s13326_s4 + $0xc] sm:$0xf0]  ;;  %v8627_v20 = vld [vmem:[%s13326_s4 + $0x4] sm:$0xf] }
 0x492   :  { %3155 = vmatpush.bf16.msra.mxu2 %v7218_v38  ;;  %v8638_v38 = vld [vmem:[%s13326_s4 + $0x54] sm:$0xf0] }
 0x495   :  { %3184 = vmatpush.bf16.msra.mxu3 %v7222_v53 }
 0x4f4   :  { %v2448_v2 = vpop.f32.mrf.mxu0  ;;  %v2461_v48 = vpop.f32.mrf.mxu1 }
 0x4f5   :  { %v2491_v15 = vadd.f32 %v2448_v2, %v9633_v49  ;;  %v2492_v57 = vadd.f32 %v2461_v48, %v9636_v51  ;;  %v7226_v49 = vor.u32 %v8653_v39, %v7225_v18  ;;  %v8651_v51 = vld [vmem:[%s13326_s4 + $0xc4] sm:$0xf]  ;;  %v7195_v2 = vld [vmem:[%s13326_s4 + $0x90] sm:$0xf0]  ;;  %v7201_v48 = vld [vmem:[%s13326_s4 + $0x88] sm:$0xf]  ;;  %v7206_v18 = vor.u32 %v8644_v36, %v7203_v37 }
 0x4f6   :  { %v7230_v25 = vor.u32 %v8651_v51, %v7227_v22  ;;  %v7198_v14 = vor.u32 %v8643_v0, %v7195_v2  ;;  %v8641_v22 = vld [vmem:[%s13326_s4 + $0x6c] sm:$0xf0] }
 0x4f7   :  { %v6993_v60 = vmul.f32 -1.442695, %v2491_v15  ;;  %v6994_v59 = vmul.f32 -1.442695, %v2492_v57  ;;  %3096 = vmatpush.bf16.msrb.mxu0 %v7226_v49  ;;  %3185 = vmatpush.bf16.msra.mxu3 %v7206_v18  ;;  %v7178_v24 = vor.u32 %v8641_v22, %v7177_v21  ;;  %v8633_v2 = vld [vmem:[%s13326_s4 + $0x2c] sm:$0xf0] }
 0x4f8   :  { %3125 = vmatpush.bf16.msrb.mxu1 %v7230_v25  ;;  %v7153_v18 = vld [vmem:[%s13326_s4 + $0x28] sm:$0xf]  ;;  %v8632_v22 = vld [vmem:[%s13326_s4 + $0x2c] sm:$0xf] }
 0x4f9   :  { %9033 = vpow2.f32 %v6993_v60  ;;  %v8639_v60 = vld [vmem:[%s13326_s4 + $0x64] sm:$0xf] }
 0x4fa   :  { %9035 = vpow2.f32 %v6994_v59  ;;  %v7179_v59 = vld [vmem:[%s13326_s4 + $0x70] sm:$0xf0] }
 0x4fb   :  { %v2474_v30 = vpop.f32.mrf.mxu2  ;;  %v2487_v31 = vpop.f32.mrf.mxu3  ;;  %3097 = vmatpush.bf16.msrb.mxu0 %v7210_v12  ;;  %v7182_v26 = vor.u32 %v8639_v60, %v7179_v59 }
 0x4fc   :  { %v2493_v63 = vadd.f32 %v2474_v30, %v9787_v61  ;;  %v2450_v16 = vpop.f32.mrf.mxu0  ;;  %v2463_v52 = vpop.f32.mrf.mxu1  ;;  %v8646_v61 = vld [vmem:[%s13326_s4 + $0x94] sm:$0xf0]  ;;  %3126 = vmatpush.bf16.msrb.mxu1 %v7214_v47  ;;  %v2494_v33 = vadd.f32 %v2487_v31, %v9790_v5  ;;  %v7190_v47 = vor.u32 %v8640_v19, %v7187_v62  ;;  %v8637_v5 = vld [vmem:[%s13326_s4 + $0x4c] sm:$0xf0]  ;;  %v7163_v30 = vld [vmem:[%s13326_s4 + $0x50] sm:$0xf0] }
 0x4fd   :  { %v7202_v57 = vor.u32 %v8646_v61, %v7201_v48  ;;  %v7162_v13 = vor.u32 %v8637_v5, %v7161_v6  ;;  %v7169_v31 = vld [vmem:[%s13326_s4 + $0x48] sm:$0xf]  ;;  %v7145_v16 = vld [vmem:[%s13326_s4 + $0x20] sm:$0xf]  ;;  %v7166_v61 = vor.u32 %v8635_v42, %v7163_v30  ;;  %v7131_v19 = vld [vmem:[%s13326_s4 + $0x10] sm:$0xf0] }
 0x4fe   :  { %v6995_v10 = vmul.f32 -1.442695, %v2493_v63  ;;  %3186 = vmatpush.bf16.msra.mxu3 %v7190_v47  ;;  %v7171_v63 = vld [vmem:[%s13326_s4 + $0x58] sm:$0xf0]  ;;  %v7170_v36 = vor.u32 %v8638_v38, %v7169_v31  ;;  %v7137_v62 = vld [vmem:[%s13326_s4 + $0x8] sm:$0xf] }
 0x4ff   :  { %v9034_v15 = vpop.eup %9033  ;;  %3098 = vmatpush.bf16.msrb.mxu0 %v7194_v40  ;;  %3156 = vmatpush.bf16.msra.mxu2 %v7202_v57  ;;  %v7174_v37 = vor.u32 %v8636_v56, %v7171_v63  ;;  %v7147_v40 = vld [vmem:[%s13326_s4 + $0x30] sm:$0xf0]  ;;  %v8630_v6 = vld [vmem:[%s13326_s4 + $0x14] sm:$0xf0]  ;;  %v8628_v30 = vld [vmem:[%s13326_s4 + $0xc] sm:$0xf] }
 0x500   :  { %v9036_v17 = vpop.eup %9035  ;;  %v11256_v7 = vadd.f32 1.0, %v9034_v15  ;;  %9037 = vpow2.f32 %v6995_v10  ;;  %3127 = vmatpush.bf16.msrb.mxu1 %v7198_v14  ;;  %v8631_v10 = vld [vmem:[%s13326_s4 + $0x24] sm:$0xf]  ;;  %v7139_v31 = vld [vmem:[%s13326_s4 + $0x18] sm:$0xf0]  ;;  %v7138_v56 = vor.u32 %v8630_v6, %v7137_v62 }
 0x501   :  { %v11258_v39 = vadd.f32 1.0, %v9036_v17  ;;  %v7146_v17 = vor.u32 %v8633_v2, %v7145_v16 }
 0x502   :  { %9039 = vrcp.f32 %v11256_v7  ;;  %v2516_v25 = vand.u32 2147483647, %v11256_v7  ;;  %v2518_v0 = vand.u32 2147483648, %v11256_v7  ;;  %3187 = vmatpush.bf16.msra.mxu3 %v7174_v37  ;;  %vm2512_vm2 = vweird.f32 %v11256_v7 }
 0x503   :  { %9041 = vrcp.f32 %v11258_v39  ;;  %v2476_v49 = vpop.f32.mrf.mxu2  ;;  %v2489_v51 = vpop.f32.mrf.mxu3  ;;  %3099 = vmatpush.bf16.msrb.mxu0 %v7178_v24  ;;  %3157 = vmatpush.bf16.msra.mxu2 %v7186_v45  ;;  %v2533_v53 = vand.u32 2147483648, %v11258_v39  ;;  %v2531_v57 = vand.u32 2147483647, %v11258_v39  ;;  %v7155_v24 = vld [vmem:[%s13326_s4 + $0x38] sm:$0xf0]  ;;  %vm2527_vm1 = vweird.f32 %v11258_v39 }
 0x504   :  { %3128 = vmatpush.bf16.msrb.mxu1 %v7182_v26  ;;  %vm11337_vm13 = vcmp.eq.f32.partialorder %v2516_v25, 8.507059e+37  ;;  %v7150_v49 = vor.u32 %v8631_v10, %v7147_v40  ;;  %v8634_v51 = vld [vmem:[%s13326_s4 + $0x34] sm:$0xf0]  ;;  %v7158_v25 = vor.u32 %v8632_v22, %v7155_v24  ;;  %v7129_v26 = vld [vmem:[%s13326_s4] sm:$0xf] }
 0x505   :  { %v7154_v59 = vor.u32 %v8634_v51, %v7153_v18  ;;  %v7130_v45 = vor.u32 %v8629_v8, %v7129_v26  ;;  %v2534_v5 = vor.u32 1.1754944e-38, %v2533_v53  ;;  %vm2532_vm5 = vcmp.eq.f32.partialorder %v2531_v57, 8.507059e+37  ;;  %v8687_v18 = vld [vmem:[%s13327_s5 + $0xe4] sm:$0xf]  ;;  %v7377_v22 = vld [vmem:[%s13327_s5 + $0xe8] sm:$0xf] }
 0x506   :  { %v9038_v11 = vpop.eup %9037  ;;  %3188 = vmatpush.bf16.msra.mxu3 %v7158_v25  ;;  %v7142_v53 = vor.u32 %v8628_v30, %v7139_v31  ;;  %v2889_v57 = vpack.c.bf16 %v10137_v29, %v9929_v23  ;;  %v7371_v23 = vld [vmem:[%s13327_s5 + $0xf0] sm:$0xf0]  ;;  %v2891_v51 = vpack.c.bf16 %v10961_v43, %v10753_v28  ;;  %v8690_v24 = vld [vmem:[%s13327_s5 + $0xf4] sm:$0xf0]  ;;  %v7379_v28 = vld [vmem:[%s13327_s5 + $0xf8] sm:$0xf0] }
 0x507   :  { %v11291_v12 = vadd.f32 1.0, %v9038_v11  ;;  %3100 = vmatpush.bf16.msrb.mxu0 %v7162_v13  ;;  %3158 = vmatpush.bf16.msra.mxu2 %v7170_v36  ;;  %v7374_v29 = vor.u32 %v8687_v18, %v7371_v23  ;;  %v7339_v31 = vld [vmem:[%s13327_s5 + $0xb0] sm:$0xf0]  ;;  %v8673_v18 = vld [vmem:[%s13327_s5 + $0x6c] sm:$0xf0] }
 0x508   :  { %v11299_v27 = vpop.eup %9039  ;;  %3129 = vmatpush.bf16.msrb.mxu1 %v7166_v61 }
 0x509   :  { %v11310_v41 = vpop.eup %9041  ;;  %v2508_v44 = vmul.f32 %v11299_v27, %v11256_v7  ;;  %9043 = vrcp.f32 %v11291_v12  ;;  %vm2513_vm14 = vweird.f32 %v11299_v27  ;;  %v2519_v7 = vor.u32 1.1754944e-38, %v2518_v0 }
 0x50a   :  { %v2523_v52 = vmul.f32 %v11310_v41, %v11258_v39  ;;  %9045 = vtanh.f32 %v2494_v33  ;;  %vm2528_vm15 = vweird.f32 %v11310_v41  ;;  %vm2514_vm3 = vmor %vm2512_vm2, %vm2513_vm14  ;;  %3189 = vmatpush.bf16.msra.mxu3 %v7142_v53  ;;  %v2548_v36 = vand.u32 2147483648, %v11291_v12  ;;  %v7321_v53 = vld [vmem:[%s13327_s5 + $0x80] sm:$0xf] }
 0x50b   :  { %v2509_v48 = vsub.f32 1.0, %v2508_v44  ;;  %3101 = vmatpush.bf16.msrb.mxu0 %v7146_v17  ;;  %vm2529_vm4 = vmor %vm2527_vm1, %vm2528_vm15  ;;  %3159 = vmatpush.bf16.msra.mxu2 %v7154_v59  ;;  %v7134_v44 = vor.u32 %v8627_v20, %v7131_v19  ;;  %vm2542_vm7 = vweird.f32 %v11291_v12  ;;  %v8689_v17 = vld [vmem:[%s13327_s5 + $0xec] sm:$0xf0]  ;;  %v223_v59 = vadd.f32 %v9644_v55, %v9610_v35  ;;  %v7355_v35 = vld [vmem:[%s13327_s5 + $0xd0] sm:$0xf0] }
 0x50c   :  { %v2524_v14 = vsub.f32 1.0, %v2523_v52  ;;  %3130 = vmatpush.bf16.msrb.mxu1 %v7150_v49  ;;  %v2549_v10 = vor.u32 1.1754944e-38, %v2548_v36  ;;  %v2890_v49 = vpack.c.bf16 %v10549_v58, %v10341_v32  ;;  %v7378_v32 = vor.u32 %v8690_v24, %v7377_v22  ;;  %v8688_v58 = vld [vmem:[%s13327_s5 + $0xec] sm:$0xf]  ;;  %v7361_v55 = vld [vmem:[%s13327_s5 + $0xc8] sm:$0xf] }
 0x50d   :  { %v2510_v21 = vmul.f32 %v11299_v27, %v2509_v48  ;;  %v7382_v43 = vor.u32 %v8688_v58, %v7379_v28  ;;  %v8674_v24 = vld [vmem:[%s13327_s5 + $0x74] sm:$0xf0]  ;;  %v7331_v58 = vld [vmem:[%s13327_s5 + $0x98] sm:$0xf0] }
 0x50e   :  { %v2525_v60 = vmul.f32 %v11310_v41, %v2524_v14 }
 0x50f   :  { %v9044_v11 = vpop.eup %9043  ;;  %v2511_v33 = vadd.f32 %v11299_v27, %v2510_v21  ;;  %3102 = vmatpush.bf16.msrb.mxu0 %v7130_v45  ;;  %3160 = vmatpush.bf16.msra.mxu2 %v7138_v56  ;;  %v8686_v45 = vld [vmem:[%s13327_s5 + $0xd4] sm:$0xf0]  ;;  %v252_v56 = vadd.f32 %v9838_v50, %v9655_v1  ;;  %v8675_v1 = vld [vmem:[%s13327_s5 + $0x84] sm:$0xf]  ;;  %v7323_v50 = vld [vmem:[%s13327_s5 + $0x90] sm:$0xf0] }
 0x510   :  { %v9046_v47 = vpop.eup %9045  ;;  %v2538_v42 = vmul.f32 %v9044_v11, %v11291_v12  ;;  %v2526_v13 = vadd.f32 %v11310_v41, %v2525_v60  ;;  %3131 = vmatpush.bf16.msrb.mxu1 %v7134_v44  ;;  %vm2543_vm6 = vweird.f32 %v9044_v11  ;;  %v194_v60 = vadd.f32 %v9642_v54, %v9608_v34  ;;  %v8683_v34 = vld [vmem:[%s13327_s5 + $0xc4] sm:$0xf]  ;;  %v8682_v44 = vld [vmem:[%s13327_s5 + $0xb4] sm:$0xf0] }
 0x511   :  { %v2515_v38 = vsel %vm2514_vm3, %v11299_v27, %v2511_v33  ;;  %vm2544_vm8 = vmor %vm2542_vm7, %vm2543_vm6  ;;  %v8685_v33 = vld [vmem:[%s13327_s5 + $0xcc] sm:$0xf0]  ;;  %v7358_v6 = vor.u32 %v8683_v34, %v7355_v35  ;;  %v7291_v34 = vld [vmem:[%s13327_s5 + $0x50] sm:$0xf0] }
 0x512   :  { %v2539_v63 = vsub.f32 1.0, %v2538_v42  ;;  %v2520_v16 = vsel %vm11337_vm13, %v2519_v7, %v2515_v38  ;;  %v2530_v52 = vsel %vm2529_vm4, %v11310_v41, %v2526_v13  ;;  %v2546_v41 = vand.u32 2147483647, %v11291_v12  ;;  %v7369_v12 = vld [vmem:[%s13327_s5 + $0xe0] sm:$0xf] }
 0x513   :  { %v2535_v0 = vsel %vm2532_vm5, %v2534_v5, %v2530_v52  ;;  %v2554_v2 = vmul.f32 %v9046_v47, %v2520_v16  ;;  %v7370_v21 = vor.u32 %v8689_v17, %v7369_v12  ;;  %v7362_v47 = vor.u32 %v8686_v45, %v7361_v55  ;;  %v8684_v5 = vld [vmem:[%s13327_s5 + $0xcc] sm:$0xf]  ;;  %v7337_v42 = vld [vmem:[%s13327_s5 + $0xa0] sm:$0xf]  ;;  %v8681_v7 = vld [vmem:[%s13327_s5 + $0xac] sm:$0xf0] }
 0x514   :  { %v2540_v39 = vmul.f32 %v9044_v11, %v2539_v63  ;;  %v2553_v48 = vmul.f32 %v2535_v0, %v10958_v46  ;;  %vm2547_vm9 = vcmp.eq.f32.partialorder %v2546_v41, 8.507059e+37  ;;  %v8679_v13 = vld [vmem:[%s13327_s5 + $0xa4] sm:$0xf]  ;;  %v7338_v30 = vor.u32 %v8681_v7, %v7337_v42  ;;  %v7345_v38 = vld [vmem:[%s13327_s5 + $0xa8] sm:$0xf] }
 0x515   :  { %v7342_v63 = vor.u32 %v8679_v13, %v7339_v31  ;;  %v7346_v16 = vor.u32 %v8682_v44, %v7345_v38  ;;  %v7363_v52 = vld [vmem:[%s13327_s5 + $0xd8] sm:$0xf0]  ;;  %v8677_v0 = vld [vmem:[%s13327_s5 + $0x8c] sm:$0xf0]  ;;  %v7305_v17 = vld [vmem:[%s13327_s5 + $0x60] sm:$0xf] }
 0x516   :  { %v11398_v27 = vadd.f32 %v2554_v2, %v2553_v48  ;;  %v2541_v61 = vadd.f32 %v9044_v11, %v2540_v39  ;;  %v7366_v48 = vor.u32 %v8684_v5, %v7363_v52  ;;  %v8670_v45 = vld [vmem:[%s13327_s5 + $0x54] sm:$0xf0]  ;;  %v7273_v42 = vld [vmem:[%s13327_s5 + $0x20] sm:$0xf]  ;;  %v8665_v7 = vld [vmem:[%s13327_s5 + $0x2c] sm:$0xf0] }
 0x517   :  { %v8663_v38 = vld [vmem:[%s13327_s5 + $0x24] sm:$0xf]  ;;  %v7275_v44 = vld [vmem:[%s13327_s5 + $0x30] sm:$0xf0]  ;;  %v7274_v52 = vor.u32 %v8665_v7, %v7273_v42 }
 0x518   :  { %9047 = vtanh.f32 %v11398_v27  ;;  %v2545_v37 = vsel %vm2544_vm8, %v9044_v11, %v2541_v61  ;;  %v7353_v11 = vld [vmem:[%s13327_s5 + $0xc0] sm:$0xf]  ;;  %v7329_v61 = vld [vmem:[%s13327_s5 + $0x88] sm:$0xf] }
 0x519   :  { %v2550_v40 = vsel %vm2547_vm9, %v2549_v10, %v2545_v37  ;;  %v7354_v54 = vor.u32 %v8685_v33, %v7353_v11  ;;  %v7322_v10 = vor.u32 %v8677_v0, %v7321_v53  ;;  %v8667_v33 = vld [vmem:[%s13327_s5 + $0x44] sm:$0xf]  ;;  %v8668_v53 = vld [vmem:[%s13327_s5 + $0x4c] sm:$0xf]  ;;  %v7299_v0 = vld [vmem:[%s13327_s5 + $0x58] sm:$0xf0] }
 0x51e   :  { %v9048_v46 = vpop.eup %9047 }
 0x51f   :  { %v11404_v14 = vmul.f32 %v9048_v46, %v2550_v40  ;;  %v8678_v46 = vld [vmem:[%s13327_s5 + $0x94] sm:$0xf0]  ;;  %v8680_v40 = vld [vmem:[%s13327_s5 + $0xac] sm:$0xf] }
 0x520   :  { %v7330_v12 = vor.u32 %v8678_v46, %v7329_v61  ;;  %v7283_v46 = vld [vmem:[%s13327_s5 + $0x38] sm:$0xf0] }
 0x521   :  { %v2567_v15 = vpack.c.bf16 %v11404_v14, %v11404_v14 }
 0x523   :  { %2768 = vmatmul.bf16.vlgmr.msra.gmra.mxu0 %v2567_v15  ;;  %2781 = vmatmul.bf16.vlgmr.msra.gmra.mxu1 %v2567_v15 }
 0x524   :  { %2794 = vmatmul.bf16.vlgmr.msrb.gmra.mxu2 %v2567_v15  ;;  %2807 = vmatmul.bf16.vlgmr.msrb.gmra.mxu3 %v2567_v15  ;;  %v7347_v15 = vld [vmem:[%s13327_s5 + $0xb8] sm:$0xf0] }
 0x525   :  { %3439 = vmatpush.bf16.msra.mxu0 %v7370_v21  ;;  %3452 = vmatpush.bf16.msra.mxu1 %v7374_v29  ;;  %v8671_v21 = vld [vmem:[%s13327_s5 + $0x64] sm:$0xf]  ;;  %v7350_v29 = vor.u32 %v8680_v40, %v7347_v15 }
 0x526   :  { %3465 = vmatpush.bf16.msrb.mxu2 %v7378_v32  ;;  %3478 = vmatpush.bf16.msrb.mxu3 %v7382_v43  ;;  %v8676_v32 = vld [vmem:[%s13327_s5 + $0x8c] sm:$0xf] }
 0x527   :  { %v7334_v11 = vor.u32 %v8676_v32, %v7331_v58  ;;  %v8662_v32 = vld [vmem:[%s13327_s5 + $0x14] sm:$0xf0] }
 0x529   :  { %3440 = vmatpush.bf16.msra.mxu0 %v7354_v54  ;;  %3453 = vmatpush.bf16.msra.mxu1 %v7358_v6  ;;  %v7297_v54 = vld [vmem:[%s13327_s5 + $0x48] sm:$0xf]  ;;  %v7315_v6 = vld [vmem:[%s13327_s5 + $0x78] sm:$0xf0] }
 0x52a   :  { %3466 = vmatpush.bf16.msrb.mxu2 %v7362_v47  ;;  %3479 = vmatpush.bf16.msrb.mxu3 %v7366_v48  ;;  %v7294_v47 = vor.u32 %v8667_v33, %v7291_v34  ;;  %v7298_v5 = vor.u32 %v8670_v45, %v7297_v54 }
 0x52d   :  { %3441 = vmatpush.bf16.msra.mxu0 %v7338_v30  ;;  %3454 = vmatpush.bf16.msra.mxu1 %v7342_v63  ;;  %v281_v30 = vadd.f32 %v9846_v9, %v9658_v4  ;;  %v8666_v4 = vld [vmem:[%s13327_s5 + $0x34] sm:$0xf0] }
 0x52e   :  { %3467 = vmatpush.bf16.msrb.mxu2 %v7346_v16  ;;  %3480 = vmatpush.bf16.msrb.mxu3 %v7350_v29 }
 0x531   :  { %3442 = vmatpush.bf16.msra.mxu0 %v7322_v10  ;;  %v8664_v10 = vld [vmem:[%s13327_s5 + $0x2c] sm:$0xf] }
 0x532   :  { %3468 = vmatpush.bf16.msrb.mxu2 %v7330_v12  ;;  %3481 = vmatpush.bf16.msrb.mxu3 %v7334_v11  ;;  %v8661_v12 = vld [vmem:[%s13327_s5 + $0xc] sm:$0xf0] }
 0x533   :  { %3103 = vmatmul.bf16.vlgmr.msrb.gmra.mxu0 %v2889_v57  ;;  %3132 = vmatmul.bf16.vlgmr.msrb.gmra.mxu1 %v2889_v57 }
 0x534   :  { %3161 = vmatmul.bf16.vlgmr.msra.gmra.mxu2 %v2889_v57  ;;  %3190 = vmatmul.bf16.vlgmr.msra.gmra.mxu3 %v2889_v57  ;;  %v7326_v57 = vor.u32 %v8675_v1, %v7323_v50 }
 0x536   :  { %3455 = vmatpush.bf16.msra.mxu1 %v7326_v57  ;;  %v7257_v57 = vld [vmem:[%s13327_s5] sm:$0xf] }
 0x543   :  { %3108 = vmatmul.bf16.gmra.mxu0 %v2890_v49  ;;  %3137 = vmatmul.bf16.gmra.mxu1 %v2890_v49 }
 0x544   :  { %3166 = vmatmul.bf16.gmra.mxu2 %v2890_v49  ;;  %3195 = vmatmul.bf16.gmra.mxu3 %v2890_v49  ;;  %v7307_v49 = vld [vmem:[%s13327_s5 + $0x70] sm:$0xf0] }
 0x553   :  { %3113 = vmatmul.bf16.gmra.mxu0 %v2891_v51  ;;  %3142 = vmatmul.bf16.gmra.mxu1 %v2891_v51 }
 0x554   :  { %3171 = vmatmul.bf16.gmra.mxu2 %v2891_v51  ;;  %3200 = vmatmul.bf16.gmra.mxu3 %v2891_v51  ;;  %v7313_v51 = vld [vmem:[%s13327_s5 + $0x68] sm:$0xf] }
 0x5a0   :  { %v2769_v25 = vpop.f32.mrf.mxu0  ;;  %v2782_v26 = vpop.f32.mrf.mxu1 }
 0x5a1   :  { %v2812_v8 = vadd.f32 %v2769_v25, %v194_v60  ;;  %v2813_v20 = vadd.f32 %v2782_v26, %v223_v59  ;;  %v7306_v60 = vor.u32 %v8673_v18, %v7305_v17  ;;  %v7310_v25 = vor.u32 %v8671_v21, %v7307_v49  ;;  %v8659_v21 = vld [vmem:[%s13327_s5 + $0x4] sm:$0xf] }
 0x5a2   :  { %v7314_v26 = vor.u32 %v8674_v24, %v7313_v51  ;;  %v7258_v49 = vor.u32 %v8661_v12, %v7257_v57  ;;  %v7265_v24 = vld [vmem:[%s13327_s5 + $0x8] sm:$0xf]  ;;  %v8721_v57 = vld [vmem:[%s13327_s5 + $0xec] sm:$0xf0]  ;;  %v8719_v12 = vld [vmem:[%s13327_s5 + $0xe4] sm:$0xf] }
 0x5a3   :  { %v7124_v19 = vmul.f32 -1.442695, %v2812_v8  ;;  %v7125_v62 = vmul.f32 -1.442695, %v2813_v20  ;;  %v7289_v8 = vld [vmem:[%s13327_s5 + $0x40] sm:$0xf]  ;;  %3443 = vmatpush.bf16.msra.mxu0 %v7306_v60  ;;  %3456 = vmatpush.bf16.msra.mxu1 %v7310_v25  ;;  %v7266_v60 = vor.u32 %v8662_v32, %v7265_v24 }
 0x5a4   :  { %v8669_v20 = vld [vmem:[%s13327_s5 + $0x4c] sm:$0xf0]  ;;  %3469 = vmatpush.bf16.msrb.mxu2 %v7314_v26  ;;  %v8660_v25 = vld [vmem:[%s13327_s5 + $0xc] sm:$0xf]  ;;  %v7267_v26 = vld [vmem:[%s13327_s5 + $0x18] sm:$0xf0] }
 0x5a5   :  { %9049 = vpow2.f32 %v7124_v19  ;;  %v7290_v19 = vor.u32 %v8669_v20, %v7289_v8 }
 0x5a6   :  { %9051 = vpow2.f32 %v7125_v62  ;;  %v8672_v62 = vld [vmem:[%s13327_s5 + $0x6c] sm:$0xf] }
 0x5a7   :  { %v2795_v2 = vpop.f32.mrf.mxu2  ;;  %v11492_v39 = vpop.f32.mrf.mxu3  ;;  %v7318_v31 = vor.u32 %v8672_v62, %v7315_v6  ;;  %3444 = vmatpush.bf16.msra.mxu0 %v7290_v19  ;;  %3457 = vmatpush.bf16.msra.mxu1 %v7294_v47 }
 0x5a8   :  { %v2814_v36 = vadd.f32 %v2795_v2, %v252_v56  ;;  %v2771_v41 = vpop.f32.mrf.mxu0  ;;  %v2784_v37 = vpop.f32.mrf.mxu1  ;;  %v7281_v56 = vld [vmem:[%s13327_s5 + $0x28] sm:$0xf]  ;;  %v2815_v16 = vadd.f32 %v11492_v39, %v281_v30  ;;  %3470 = vmatpush.bf16.msrb.mxu2 %v7298_v5  ;;  %v7278_v39 = vor.u32 %v8663_v38, %v7275_v44 }
 0x5a9   :  { %v7282_v1 = vor.u32 %v8666_v4, %v7281_v56  ;;  %3482 = vmatpush.bf16.msrb.mxu3 %v7318_v31  ;;  %v7302_v37 = vor.u32 %v8668_v53, %v7299_v0 }
 0x5aa   :  { %v7126_v23 = vmul.f32 -1.442695, %v2814_v36 }
 0x5ab   :  { %v9050_v22 = vpop.eup %9049  ;;  %3445 = vmatpush.bf16.msra.mxu0 %v7274_v52  ;;  %3458 = vmatpush.bf16.msra.mxu1 %v7278_v39 }
 0x5ac   :  { %v9052_v28 = vpop.eup %9051  ;;  %v11536_v43 = vadd.f32 1.0, %v9050_v22  ;;  %9053 = vpow2.f32 %v7126_v23  ;;  %3471 = vmatpush.bf16.msrb.mxu2 %v7282_v1  ;;  %v7259_v23 = vld [vmem:[%s13327_s5 + $0x10] sm:$0xf0]  ;;  %v7286_v22 = vor.u32 %v8664_v10, %v7283_v46 }
 0x5ad   :  { %v11538_v59 = vadd.f32 1.0, %v9052_v28  ;;  %3483 = vmatpush.bf16.msrb.mxu3 %v7302_v37  ;;  %v7262_v51 = vor.u32 %v8659_v21, %v7259_v23  ;;  %v7502_v23 = vld [vmem:[%s13327_s5 + $0xf0] sm:$0xf0] }
 0x5ae   :  { %9055 = vrcp.f32 %v11536_v43  ;;  %v2837_v61 = vand.u32 2147483647, %v11536_v43  ;;  %v2839_v41 = vand.u32 2147483648, %v11536_v43  ;;  %vm2833_vm12 = vweird.f32 %v11536_v43 }
 0x5af   :  { %9057 = vrcp.f32 %v11538_v59  ;;  %v2797_v35 = vpop.f32.mrf.mxu2  ;;  %v2810_v55 = vpop.f32.mrf.mxu3  ;;  %v2854_v15 = vand.u32 2147483648, %v11538_v59  ;;  %v2852_v18 = vand.u32 2147483647, %v11538_v59  ;;  %vm2848_vm13 = vweird.f32 %v11538_v59  ;;  %3446 = vmatpush.bf16.msra.mxu0 %v7258_v49  ;;  %3459 = vmatpush.bf16.msra.mxu1 %v7262_v51  ;;  %v8722_v49 = vld [vmem:[%s13327_s5 + $0xf4] sm:$0xf0] }
 0x5b0   :  { %v2840_v20 = vor.u32 1.1754944e-38, %v2839_v41  ;;  %vm2838_vm1 = vcmp.eq.f32.partialorder %v2837_v61, 8.507059e+37  ;;  %3472 = vmatpush.bf16.msrb.mxu2 %v7266_v60  ;;  %v7270_v55 = vor.u32 %v8660_v25, %v7267_v26  ;;  %v11662_v56 = vpop.f32.mrf.mxu0  ;;  %v7505_v24 = vor.u32 %v8719_v12, %v7502_v23  ;;  %v7484_v25 = vld [vmem:[%s13327_s5 + $0xc0] sm:$0xf]  ;;  %v8717_v26 = vld [vmem:[%s13327_s5 + $0xcc] sm:$0xf0] }
 0x5b1   :  { %vm2853_vm2 = vcmp.eq.f32.partialorder %v2852_v18, 8.507059e+37  ;;  %3484 = vmatpush.bf16.msrb.mxu3 %v7286_v22 }
 0x5b2   :  { %v9054_v13 = vpop.eup %9053 }
 0x5b3   :  { %v11583_v63 = vadd.f32 1.0, %v9054_v13  ;;  %3769 = vmatpush.bf16.msrb.mxu1 %v7505_v24  ;;  %v8707_v24 = vld [vmem:[%s13327_s5 + $0x84] sm:$0xf] }
 0x5b4   :  { %v11588_v9 = vpop.eup %9055 }
 0x5b5   :  { %v11597_v2 = vpop.eup %9057  ;;  %v2829_v48 = vmul.f32 %v11588_v9, %v11536_v43  ;;  %9059 = vrcp.f32 %v11583_v63  ;;  %vm2834_vm11 = vweird.f32 %v11588_v9  ;;  %v2855_v43 = vor.u32 1.1754944e-38, %v2854_v15  ;;  %3485 = vmatpush.bf16.msrb.mxu3 %v7270_v55  ;;  %v7500_v15 = vld [vmem:[%s13327_s5 + $0xe0] sm:$0xf] }
 0x5b6   :  { %v2844_v50 = vmul.f32 %v11597_v2, %v11538_v59  ;;  %9061 = vtanh.f32 %v2815_v16  ;;  %vm2849_vm10 = vweird.f32 %v11597_v2  ;;  %vm2835_vm14 = vmor %vm2833_vm12, %vm2834_vm11  ;;  %v2869_v42 = vand.u32 2147483648, %v11583_v63  ;;  %v11765_v55 = vld [vmem:[%s13328_s6] sm:$0xf] }
 0x5b7   :  { %v2830_v36 = vsub.f32 1.0, %v2829_v48  ;;  %vm2850_vm15 = vmor %vm2848_vm13, %vm2849_vm10  ;;  %vm2863_vm4 = vweird.f32 %v11583_v63  ;;  %v2867_v7 = vand.u32 2147483647, %v11583_v63  ;;  %v11666_v4 = vpop.f32.mrf.mxu2  ;;  %v7501_v21 = vor.u32 %v8721_v57, %v7500_v15  ;;  %v8712_v15 = vld [vmem:[%s13327_s5 + $0xac] sm:$0xf] }
 0x5b8   :  { %v2845_v40 = vsub.f32 1.0, %v2844_v50  ;;  %v2870_v30 = vor.u32 1.1754944e-38, %v2869_v42  ;;  %v7478_v57 = vld [vmem:[%s13327_s5 + $0xb8] sm:$0xf0]  ;;  %v11800_v12 = vperm.slane %v11765_v55, 0 }
 0x5b9   :  { %v2831_v17 = vmul.f32 %v11588_v9, %v2830_v36  ;;  %vm2868_vm6 = vcmp.eq.f32.partialorder %v2867_v7, 8.507059e+37  ;;  %3756 = vmatpush.bf16.msrb.mxu0 %v7501_v21  ;;  %v7470_v7 = vld [vmem:[%s13327_s5 + $0xb0] sm:$0xf0]  ;;  %v11803_v21 = vperm.slane %v11765_v55, 1  ;;  %v7481_v23 = vor.u32 %v8712_v15, %v7478_v57 }
 0x5ba   :  { %v2846_v29 = vmul.f32 %v11597_v2, %v2845_v40 }
 0x5bb   :  { %v9060_v58 = vpop.eup %9059  ;;  %v2832_v28 = vadd.f32 %v11588_v9, %v2831_v17 }
 0x5bc   :  { %v2859_v8 = vmul.f32 %v9060_v58, %v11583_v63  ;;  %v2847_v11 = vadd.f32 %v11597_v2, %v2846_v29  ;;  %v9062_v59 = vpop.eup %9061  ;;  %vm2864_vm3 = vweird.f32 %v9060_v58  ;;  %v11664_v63 = vpop.f32.mrf.mxu1  ;;  %v7508_v29 = vld [vmem:[%s13327_s5 + $0xe8] sm:$0xf] }
 0x5bd   :  { %v2836_v33 = vsel %vm2835_vm14, %v11588_v9, %v2832_v28  ;;  %vm2865_vm5 = vmor %vm2863_vm4, %vm2864_vm3  ;;  %v11668_v9 = vpop.f32.mrf.mxu3  ;;  %v7509_v32 = vor.u32 %v8722_v49, %v7508_v29  ;;  %v7510_v28 = vld [vmem:[%s13327_s5 + $0xf8] sm:$0xf0]  ;;  %v7452_v29 = vld [vmem:[%s13327_s5 + $0x80] sm:$0xf] }
 0x5be   :  { %v2860_v34 = vsub.f32 1.0, %v2859_v8  ;;  %v2841_v54 = vsel %vm2838_vm1, %v2840_v20, %v2836_v33  ;;  %v2851_v35 = vsel %vm2850_vm15, %v11597_v2, %v2847_v11  ;;  %v8715_v8 = vld [vmem:[%s13327_s5 + $0xc4] sm:$0xf]  ;;  %v7485_v20 = vor.u32 %v8717_v26, %v7484_v25  ;;  %v7486_v11 = vld [vmem:[%s13327_s5 + $0xd0] sm:$0xf0] }
 0x5bf   :  { %v2856_v45 = vsel %vm2853_vm2, %v2855_v43, %v2851_v35  ;;  %v2875_v19 = vmul.f32 %v9062_v59, %v2841_v54  ;;  %v11674_v52 = vpop.f32.mrf.mxu2  ;;  %3782 = vmatpush.bf16.msra.mxu2 %v7509_v32  ;;  %v7492_v43 = vld [vmem:[%s13327_s5 + $0xc8] sm:$0xf]  ;;  %v8718_v33 = vld [vmem:[%s13327_s5 + $0xd4] sm:$0xf0]  ;;  %v7489_v59 = vor.u32 %v8715_v8, %v7486_v11  ;;  %v8716_v54 = vld [vmem:[%s13327_s5 + $0xcc] sm:$0xf] }
 0x5c0   :  { %v2861_v62 = vmul.f32 %v9060_v58, %v2860_v34  ;;  %v2874_v6 = vmul.f32 %v2856_v45, %v11398_v27  ;;  %v7493_v34 = vor.u32 %v8718_v33, %v7492_v43  ;;  %v7494_v35 = vld [vmem:[%s13327_s5 + $0xd8] sm:$0xf0]  ;;  %3757 = vmatpush.bf16.msrb.mxu0 %v7485_v20  ;;  %v8709_v49 = vld [vmem:[%s13327_s5 + $0x8c] sm:$0xf0]  ;;  %v8708_v8 = vld [vmem:[%s13327_s5 + $0x8c] sm:$0xf] }
 0x5c1   :  { %v7497_v45 = vor.u32 %v8716_v54, %v7494_v35  ;;  %3770 = vmatpush.bf16.msrb.mxu1 %v7489_v59  ;;  %v7453_v32 = vor.u32 %v8709_v49, %v7452_v29  ;;  %v7462_v20 = vld [vmem:[%s13327_s5 + $0x98] sm:$0xf0]  ;;  %v7436_v43 = vld [vmem:[%s13327_s5 + $0x60] sm:$0xf]  ;;  %v8705_v33 = vld [vmem:[%s13327_s5 + $0x6c] sm:$0xf0]  ;;  %v3134_v54 = vadd.f32 %v11664_v63, %v11803_v21 }
 0x5c2   :  { %v2876_v47 = vadd.f32 %v2875_v19, %v2874_v6  ;;  %v2862_v5 = vadd.f32 %v9060_v58, %v2861_v62  ;;  %v7468_v19 = vld [vmem:[%s13327_s5 + $0xa0] sm:$0xf]  ;;  %v8713_v62 = vld [vmem:[%s13327_s5 + $0xac] sm:$0xf0]  ;;  %v8711_v6 = vld [vmem:[%s13327_s5 + $0xa4] sm:$0xf]  ;;  %v7465_v11 = vor.u32 %v8708_v8, %v7462_v20 }
 0x5c3   :  { %3783 = vmatpush.bf16.msra.mxu2 %v7493_v34  ;;  %v7469_v42 = vor.u32 %v8713_v62, %v7468_v19  ;;  %v8703_v59 = vld [vmem:[%s13327_s5 + $0x64] sm:$0xf]  ;;  %v3105_v34 = vadd.f32 %v11662_v56, %v11800_v12  ;;  %v7437_v19 = vor.u32 %v8705_v33, %v7436_v43  ;;  %v7438_v62 = vld [vmem:[%s13327_s5 + $0x70] sm:$0xf0]  ;;  %v8706_v56 = vld [vmem:[%s13327_s5 + $0x74] sm:$0xf0] }
 0x5c4   :  { %9063 = vtanh.f32 %v2876_v47  ;;  %v2866_v13 = vsel %vm2865_vm5, %v9060_v58, %v2862_v5  ;;  %v11672_v16 = vpop.f32.mrf.mxu1  ;;  %v8720_v58 = vld [vmem:[%s13327_s5 + $0xec] sm:$0xf]  ;;  %v7420_v29 = vld [vmem:[%s13327_s5 + $0x40] sm:$0xf]  ;;  %v8701_v49 = vld [vmem:[%s13327_s5 + $0x4c] sm:$0xf0] }
 0x5c5   :  { %v2871_v38 = vsel %vm2868_vm6, %v2870_v30, %v2866_v13  ;;  %v11676_v53 = vpop.f32.mrf.mxu3  ;;  %v7513_v60 = vor.u32 %v8720_v58, %v7510_v28  ;;  %v7476_v13 = vld [vmem:[%s13327_s5 + $0xa8] sm:$0xf]  ;;  %v8714_v30 = vld [vmem:[%s13327_s5 + $0xb4] sm:$0xf0]  ;;  %3758 = vmatpush.bf16.msrb.mxu0 %v7469_v42  ;;  %v7454_v58 = vld [vmem:[%s13327_s5 + $0x90] sm:$0xf0] }
 0x5c6   :  { %v7460_v28 = vld [vmem:[%s13327_s5 + $0x88] sm:$0xf]  ;;  %v7457_v25 = vor.u32 %v8707_v24, %v7454_v58  ;;  %v8699_v24 = vld [vmem:[%s13327_s5 + $0x44] sm:$0xf]  ;;  %v8702_v8 = vld [vmem:[%s13327_s5 + $0x54] sm:$0xf0] }
 0x5c7   :  { %3795 = vmatpush.bf16.msra.mxu3 %v7513_v60  ;;  %v8710_v60 = vld [vmem:[%s13327_s5 + $0x94] sm:$0xf0]  ;;  %v8700_v20 = vld [vmem:[%s13327_s5 + $0x4c] sm:$0xf]  ;;  %v7430_v43 = vld [vmem:[%s13327_s5 + $0x58] sm:$0xf0] }
 0x5c8   :  { %v7461_v26 = vor.u32 %v8710_v60, %v7460_v28  ;;  %v7421_v28 = vor.u32 %v8701_v49, %v7420_v29  ;;  %v7422_v60 = vld [vmem:[%s13327_s5 + $0x50] sm:$0xf0]  ;;  %v7404_v33 = vld [vmem:[%s13327_s5 + $0x20] sm:$0xf] }
 0x5c9   :  { %3759 = vmatpush.bf16.msrb.mxu0 %v7453_v32  ;;  %v7388_v49 = vld [vmem:[%s13327_s5] sm:$0xf] }
 0x5ca   :  { %v9064_v31 = vpop.eup %9063 }
 0x5cb   :  { %v2878_v44 = vmul.f32 %v9064_v31, %v2871_v38  ;;  %3796 = vmatpush.bf16.msra.mxu3 %v7497_v45 }
 0x5cc   :  { %v11680_v2 = vpop.f32.mrf.mxu1 }
 0x5cd   :  { %v2892_v27 = vpack.c.bf16 %v2878_v44, %v11404_v14  ;;  %v11670_v14 = vpop.f32.mrf.mxu0  ;;  %v11684_v48 = vpop.f32.mrf.mxu3  ;;  %v7473_v44 = vor.u32 %v8711_v6, %v7470_v7  ;;  %v7444_v6 = vld [vmem:[%s13327_s5 + $0x68] sm:$0xf]  ;;  %v7441_v7 = vor.u32 %v8703_v59, %v7438_v62  ;;  %3760 = vmatpush.bf16.msrb.mxu0 %v7437_v19  ;;  %v8697_v59 = vld [vmem:[%s13327_s5 + $0x2c] sm:$0xf0]  ;;  %v8695_v62 = vld [vmem:[%s13327_s5 + $0x24] sm:$0xf] }
 0x5ce   :  { %v7405_v19 = vor.u32 %v8697_v59, %v7404_v33 }
 0x5cf   :  { %3118 = vmatmul.bf16.gmra.mxu0 %v2892_v27  ;;  %3147 = vmatmul.bf16.gmra.mxu1 %v2892_v27 }
 0x5d0   :  { %3176 = vmatmul.bf16.gmra.mxu2 %v2892_v27  ;;  %3205 = vmatmul.bf16.gmra.mxu3 %v2892_v27  ;;  %v7477_v27 = vor.u32 %v8714_v30, %v7476_v13  ;;  %v7445_v13 = vor.u32 %v8706_v56, %v7444_v6  ;;  %v8704_v30 = vld [vmem:[%s13327_s5 + $0x6c] sm:$0xf]  ;;  %v7406_v6 = vld [vmem:[%s13327_s5 + $0x30] sm:$0xf0]  ;;  %v7412_v56 = vld [vmem:[%s13327_s5 + $0x28] sm:$0xf] }
 0x5d1   :  { %3771 = vmatpush.bf16.msrb.mxu1 %v7473_v44  ;;  %3797 = vmatpush.bf16.msra.mxu3 %v7481_v23  ;;  %v7446_v44 = vld [vmem:[%s13327_s5 + $0x78] sm:$0xf0] }
 0x5d2   :  { %3784 = vmatpush.bf16.msra.mxu2 %v7477_v27  ;;  %v11862_v27 = vperm.slane %v11765_v55, 2  ;;  %v7449_v23 = vor.u32 %v8704_v30, %v7446_v44  ;;  %3761 = vmatpush.bf16.msrb.mxu0 %v7421_v28  ;;  %v7414_v30 = vld [vmem:[%s13327_s5 + $0x38] sm:$0xf0]  ;;  %v7390_v28 = vld [vmem:[%s13327_s5 + $0x10] sm:$0xf0] }
 0x5d4   :  { %v11688_v1 = vpop.f32.mrf.mxu1 }
 0x5d5   :  { %v11678_v0 = vpop.f32.mrf.mxu0  ;;  %v11692_v61 = vpop.f32.mrf.mxu3  ;;  %3772 = vmatpush.bf16.msrb.mxu1 %v7457_v25  ;;  %3798 = vmatpush.bf16.msra.mxu3 %v7465_v11  ;;  %v7425_v25 = vor.u32 %v8699_v24, %v7422_v60  ;;  %v8693_v24 = vld [vmem:[%s13327_s5 + $0xc] sm:$0xf0]  ;;  %v7396_v60 = vld [vmem:[%s13327_s5 + $0x8] sm:$0xf] }
 0x5d6   :  { %3785 = vmatpush.bf16.msra.mxu2 %v7461_v26  ;;  %v7428_v26 = vld [vmem:[%s13327_s5 + $0x48] sm:$0xf]  ;;  %3762 = vmatpush.bf16.msrb.mxu0 %v7405_v19 }
 0x5d7   :  { %v7429_v11 = vor.u32 %v8702_v8, %v7428_v26 }
 0x5d9   :  { %3773 = vmatpush.bf16.msrb.mxu1 %v7441_v7  ;;  %3799 = vmatpush.bf16.msra.mxu3 %v7449_v23  ;;  %v8698_v7 = vld [vmem:[%s13327_s5 + $0x34] sm:$0xf0] }
 0x5da   :  { %3786 = vmatpush.bf16.msra.mxu2 %v7445_v13  ;;  %v8696_v13 = vld [vmem:[%s13327_s5 + $0x2c] sm:$0xf]  ;;  %v7413_v23 = vor.u32 %v8698_v7, %v7412_v56 }
 0x5db   :  { %v7417_v29 = vor.u32 %v8696_v13, %v7414_v30 }
 0x5dc   :  { %v11696_v41 = vpop.f32.mrf.mxu1 }
 0x5dd   :  { %v11686_v39 = vpop.f32.mrf.mxu0  ;;  %v11700_v10 = vpop.f32.mrf.mxu3  ;;  %3774 = vmatpush.bf16.msrb.mxu1 %v7425_v25  ;;  %v8694_v25 = vld [vmem:[%s13327_s5 + $0x14] sm:$0xf0] }
 0x5de   :  { %3787 = vmatpush.bf16.msra.mxu2 %v7429_v11  ;;  %v7398_v11 = vld [vmem:[%s13327_s5 + $0x18] sm:$0xf0]  ;;  %v7397_v33 = vor.u32 %v8694_v25, %v7396_v60 }
 0x5df   :  { %3447 = vmatmul.bf16.vlgmr.msra.gmra.mxu0 %v9193_v3  ;;  %3460 = vmatmul.bf16.vlgmr.msra.gmra.mxu1 %v9193_v3 }
 0x5e0   :  { %3473 = vmatmul.bf16.vlgmr.msrb.gmra.mxu2 %v9193_v3  ;;  %3486 = vmatmul.bf16.vlgmr.msrb.gmra.mxu3 %v9193_v3  ;;  %v11682_v3 = vpop.f32.mrf.mxu2 }
 0x5e2   :  { %3788 = vmatpush.bf16.msra.mxu2 %v7413_v23 }
 0x5e4   :  { %v11704_v40 = vpop.f32.mrf.mxu1 }
 0x5e5   :  { %v11694_v36 = vpop.f32.mrf.mxu0  ;;  %v11717_v18 = vpop.f32.mrf.mxu3 }
 0x5e6   :  { %3789 = vmatpush.bf16.msra.mxu2 %v7397_v33 }
 0x5e8   :  { %v11690_v50 = vpop.f32.mrf.mxu2 }
 0x5ed   :  { %v11702_v46 = vpop.f32.mrf.mxu0 }
 0x5f0   :  { %v11698_v37 = vpop.f32.mrf.mxu2 }
 0x5f8   :  { %v11715_v17 = vpop.f32.mrf.mxu2 }
 0x64c   :  { %v11728_v51 = vpop.f32.mrf.mxu0  ;;  %v11730_v22 = vpop.f32.mrf.mxu1 }
 0x653   :  { %v11776_v47 = vpop.f32.mrf.mxu2  ;;  %v11778_v5 = vpop.f32.mrf.mxu3 }
 0x654   :  { %v11789_v31 = vpop.f32.mrf.mxu0  ;;  %v11791_v38 = vpop.f32.mrf.mxu1 }
 0x65b   :  { %v11842_v35 = vpop.f32.mrf.mxu2  ;;  %v11844_v45 = vpop.f32.mrf.mxu3 }
 0x65c   :  { %v3448_v42 = vpop.f32.mrf.mxu0  ;;  %v3461_v63 = vpop.f32.mrf.mxu1 }
 0x65d   :  { %v3491_v15 = vadd.f32 %v3448_v42, %v3105_v34  ;;  %v3492_v57 = vadd.f32 %v3461_v63, %v3134_v54  ;;  %v3163_v34 = vadd.f32 %v11666_v4, %v11862_v27  ;;  %v7433_v54 = vor.u32 %v8700_v20, %v7430_v43  ;;  %v8692_v20 = vld [vmem:[%s13327_s5 + $0xc] sm:$0xf] }
 0x65e   :  { %v7409_v4 = vor.u32 %v8695_v62, %v7406_v6  ;;  %v11939_v62 = vperm.slane %v11765_v55, 3 }
 0x65f   :  { %v7383_v32 = vmul.f32 -1.442695, %v3491_v15  ;;  %v7384_v58 = vmul.f32 -1.442695, %v3492_v57  ;;  %3800 = vmatpush.bf16.msra.mxu3 %v7433_v54  ;;  %v7401_v54 = vor.u32 %v8692_v20, %v7398_v11 }
 0x660   :  { %3775 = vmatpush.bf16.msrb.mxu1 %v7409_v4  ;;  %v3192_v4 = vadd.f32 %v11668_v9, %v11939_v62 }
 0x661   :  { %9065 = vpow2.f32 %v7383_v32  ;;  %v8691_v32 = vld [vmem:[%s13327_s5 + $0x4] sm:$0xf] }
 0x662   :  { %9067 = vpow2.f32 %v7384_v58  ;;  %v7389_v58 = vor.u32 %v8693_v24, %v7388_v49  ;;  %v7393_v8 = vor.u32 %v8691_v32, %v7390_v28 }
 0x663   :  { %v3474_v42 = vpop.f32.mrf.mxu2  ;;  %v3487_v63 = vpop.f32.mrf.mxu3  ;;  %3801 = vmatpush.bf16.msra.mxu3 %v7417_v29 }
 0x664   :  { %v3493_v44 = vadd.f32 %v3474_v42, %v3163_v34  ;;  %v3450_v15 = vpop.f32.mrf.mxu0  ;;  %v3463_v57 = vpop.f32.mrf.mxu1  ;;  %3763 = vmatpush.bf16.msrb.mxu0 %v7389_v58  ;;  %3776 = vmatpush.bf16.msrb.mxu1 %v7393_v8  ;;  %v3494_v30 = vadd.f32 %v3487_v63, %v3192_v4 }
 0x666   :  { %v7385_v26 = vmul.f32 -1.442695, %v3493_v44 }
 0x667   :  { %v9066_v43 = vpop.eup %9065  ;;  %3802 = vmatpush.bf16.msra.mxu3 %v7401_v54 }
 0x668   :  { %v9068_v59 = vpop.eup %9067  ;;  %v3504_v34 = vadd.f32 1.0, %v9066_v43  ;;  %9069 = vpow2.f32 %v7385_v26 }
 0x669   :  { %v3505_v19 = vadd.f32 1.0, %v9068_v59 }
 0x66a   :  { %9071 = vrcp.f32 %v3504_v34  ;;  %v3518_v29 = vand.u32 2147483648, %v3504_v34  ;;  %v3516_v32 = vand.u32 2147483647, %v3504_v34  ;;  %vm3512_vm9 = vweird.f32 %v3504_v34 }
 0x66b   :  { %9073 = vrcp.f32 %v3505_v19  ;;  %v3476_v6 = vpop.f32.mrf.mxu2  ;;  %v3489_v56 = vpop.f32.mrf.mxu3  ;;  %v3533_v49 = vand.u32 2147483648, %v3505_v19  ;;  %v3531_v28 = vand.u32 2147483647, %v3505_v19  ;;  %vm3527_vm10 = vweird.f32 %v3505_v19 }
 0x66c   :  { %v3519_v25 = vor.u32 1.1754944e-38, %v3518_v29  ;;  %vm3517_vm12 = vcmp.eq.f32.partialorder %v3516_v32, 8.507059e+37  ;;  %v7631_v29 = vld [vmem:[%s13327_s5 + $0xe0] sm:$0xf]  ;;  %v7633_v32 = vld [vmem:[%s13327_s5 + $0xf0] sm:$0xf0] }
 0x66d   :  { %v3534_v8 = vor.u32 1.1754944e-38, %v3533_v49  ;;  %vm3532_vm14 = vcmp.eq.f32.partialorder %v3531_v28, 8.507059e+37  ;;  %v8751_v49 = vld [vmem:[%s13327_s5 + $0xe4] sm:$0xf]  ;;  %v8754_v28 = vld [vmem:[%s13327_s5 + $0xf4] sm:$0xf0] }
 0x66e   :  { %v9070_v42 = vpop.eup %9069 }
 0x66f   :  { %v3506_v7 = vadd.f32 1.0, %v9070_v42 }
 0x670   :  { %v9072_v13 = vpop.eup %9071 }
 0x671   :  { %v9074_v44 = vpop.eup %9073  ;;  %v3508_v15 = vmul.f32 %v9072_v13, %v3504_v34  ;;  %9075 = vrcp.f32 %v3506_v7  ;;  %vm3513_vm7 = vweird.f32 %v9072_v13  ;;  %vm3542_vm1 = vweird.f32 %v3506_v7 }
 0x672   :  { %v3523_v57 = vmul.f32 %v9074_v44, %v3505_v19  ;;  %9077 = vtanh.f32 %v3494_v30  ;;  %vm3528_vm8 = vweird.f32 %v9074_v44  ;;  %vm3514_vm11 = vmor %vm3512_vm9, %vm3513_vm7  ;;  %v3548_v19 = vand.u32 2147483648, %v3506_v7 }
 0x673   :  { %v3509_v55 = vsub.f32 1.0, %v3508_v15  ;;  %vm3529_vm13 = vmor %vm3527_vm10, %vm3528_vm8 }
 0x674   :  { %v3524_v23 = vsub.f32 1.0, %v3523_v57  ;;  %v3549_v15 = vor.u32 1.1754944e-38, %v3548_v19 }
 0x675   :  { %v3510_v24 = vmul.f32 %v9072_v13, %v3509_v55 }
 0x676   :  { %v3525_v58 = vmul.f32 %v9074_v44, %v3524_v23 }
 0x677   :  { %v9076_v60 = vpop.eup %9075  ;;  %v3511_v9 = vadd.f32 %v9072_v13, %v3510_v24 }
 0x678   :  { %v3538_v63 = vmul.f32 %v9076_v60, %v3506_v7  ;;  %v3526_v26 = vadd.f32 %v9074_v44, %v3525_v58  ;;  %v9078_v11 = vpop.eup %9077  ;;  %vm3543_vm15 = vweird.f32 %v9076_v60  ;;  %v7639_v58 = vld [vmem:[%s13327_s5 + $0xe8] sm:$0xf] }
 0x679   :  { %v3515_v20 = vsel %vm3514_vm11, %v9072_v13, %v3511_v9  ;;  %v3546_v13 = vand.u32 2147483647, %v3506_v7  ;;  %vm3544_vm2 = vmor %vm3542_vm1, %vm3543_vm15  ;;  %v8753_v7 = vld [vmem:[%s13327_s5 + $0xec] sm:$0xf0]  ;;  %v7640_v9 = vor.u32 %v8754_v28, %v7639_v58  ;;  %v7583_v28 = vld [vmem:[%s13327_s5 + $0x80] sm:$0xf] }
 0x67a   :  { %v3539_v43 = vsub.f32 1.0, %v3538_v63  ;;  %v3520_v33 = vsel %vm3517_vm12, %v3519_v25, %v3515_v20  ;;  %v3530_v59 = vsel %vm3529_vm13, %v9074_v44, %v3526_v26  ;;  %v7632_v24 = vor.u32 %v8753_v7, %v7631_v29  ;;  %v8752_v63 = vld [vmem:[%s13327_s5 + $0xec] sm:$0xf]  ;;  %v7641_v25 = vld [vmem:[%s13327_s5 + $0xf8] sm:$0xf0] }
 0x67b   :  { %v3535_v54 = vsel %vm3532_vm14, %v3534_v8, %v3530_v59  ;;  %v3554_v6 = vmul.f32 %v9078_v11, %v3520_v33  ;;  %vm3547_vm3 = vcmp.eq.f32.partialorder %v3546_v13, 8.507059e+37  ;;  %v7644_v26 = vor.u32 %v8752_v63, %v7641_v25  ;;  %4099 = vmatpush.bf16.msrb.mxu2 %v7640_v9  ;;  %v7615_v8 = vld [vmem:[%s13327_s5 + $0xc0] sm:$0xf]  ;;  %v8749_v20 = vld [vmem:[%s13327_s5 + $0xcc] sm:$0xf0] }
 0x67c   :  { %v3540_v56 = vmul.f32 %v9076_v60, %v3539_v43  ;;  %v3553_v42 = vmul.f32 0.0, %v3535_v54  ;;  %4073 = vmatpush.bf16.msra.mxu0 %v7632_v24  ;;  %v8747_v11 = vld [vmem:[%s13327_s5 + $0xc4] sm:$0xf]  ;;  %v7616_v43 = vor.u32 %v8749_v20, %v7615_v8  ;;  %v7617_v33 = vld [vmem:[%s13327_s5 + $0xd0] sm:$0xf0] }
 0x67d   :  { %4112 = vmatpush.bf16.msrb.mxu3 %v7644_v26  ;;  %v7623_v59 = vld [vmem:[%s13327_s5 + $0xc8] sm:$0xf]  ;;  %v8750_v54 = vld [vmem:[%s13327_s5 + $0xd4] sm:$0xf0]  ;;  %v7599_v13 = vld [vmem:[%s13327_s5 + $0xa0] sm:$0xf] }
 0x67e   :  { %v11943_v4 = vadd.f32 %v3554_v6, %v3553_v42  ;;  %v3541_v34 = vadd.f32 %v9076_v60, %v3540_v56  ;;  %v7620_v6 = vor.u32 %v8747_v11, %v7617_v33  ;;  %v7624_v56 = vor.u32 %v8750_v54, %v7623_v59  ;;  %v8748_v42 = vld [vmem:[%s13327_s5 + $0xcc] sm:$0xf]  ;;  %v8746_v29 = vld [vmem:[%s13327_s5 + $0xb4] sm:$0xf0]  ;;  %v8739_v9 = vld [vmem:[%s13327_s5 + $0x84] sm:$0xf] }
 0x67f   :  { %v8744_v24 = vld [vmem:[%s13327_s5 + $0xac] sm:$0xf]  ;;  %v7585_v25 = vld [vmem:[%s13327_s5 + $0x90] sm:$0xf0]  ;;  %v7591_v26 = vld [vmem:[%s13327_s5 + $0x88] sm:$0xf] }
 0x680   :  { %9079 = vtanh.f32 %v11943_v4  ;;  %v3545_v30 = vsel %vm3544_vm2, %v9076_v60, %v3541_v34  ;;  %v7636_v60 = vor.u32 %v8751_v49, %v7633_v32  ;;  %v7625_v34 = vld [vmem:[%s13327_s5 + $0xd8] sm:$0xf0]  ;;  %4074 = vmatpush.bf16.msra.mxu0 %v7616_v43  ;;  %4100 = vmatpush.bf16.msrb.mxu2 %v7624_v56  ;;  %v8742_v8 = vld [vmem:[%s13327_s5 + $0x94] sm:$0xf0]  ;;  %v7588_v20 = vor.u32 %v8739_v9, %v7585_v25  ;;  %v8740_v43 = vld [vmem:[%s13327_s5 + $0x8c] sm:$0xf] }
 0x681   :  { %v3550_v44 = vsel %vm3547_vm3, %v3549_v15, %v3545_v30  ;;  %v7628_v19 = vor.u32 %v8748_v42, %v7625_v34  ;;  %v8745_v30 = vld [vmem:[%s13327_s5 + $0xac] sm:$0xf0]  ;;  %v8743_v15 = vld [vmem:[%s13327_s5 + $0xa4] sm:$0xf]  ;;  %v7609_v32 = vld [vmem:[%s13327_s5 + $0xb8] sm:$0xf0]  ;;  %v7592_v11 = vor.u32 %v8742_v8, %v7591_v26  ;;  %v3107_v42 = vadd.f32 %v11670_v14, %v11800_v12 }
 0x682   :  { %4086 = vmatpush.bf16.msra.mxu1 %v7636_v60  ;;  %v7612_v58 = vor.u32 %v8744_v24, %v7609_v32  ;;  %v8741_v60 = vld [vmem:[%s13327_s5 + $0x8c] sm:$0xf0]  ;;  %v7593_v33 = vld [vmem:[%s13327_s5 + $0x98] sm:$0xf0]  ;;  %v7567_v54 = vld [vmem:[%s13327_s5 + $0x60] sm:$0xf]  ;;  %v3136_v34 = vadd.f32 %v11672_v16, %v11803_v21 }
 0x683   :  { %4113 = vmatpush.bf16.msrb.mxu3 %v7628_v19  ;;  %v7584_v63 = vor.u32 %v8741_v60, %v7583_v28  ;;  %v7596_v59 = vor.u32 %v8740_v43, %v7593_v33  ;;  %v8735_v56 = vld [vmem:[%s13327_s5 + $0x64] sm:$0xf]  ;;  %v8736_v16 = vld [vmem:[%s13327_s5 + $0x6c] sm:$0xf]  ;;  %v7551_v32 = vld [vmem:[%s13327_s5 + $0x40] sm:$0xf] }
 0x684   :  { %v8731_v28 = vld [vmem:[%s13327_s5 + $0x44] sm:$0xf]  ;;  %v7553_v25 = vld [vmem:[%s13327_s5 + $0x50] sm:$0xf0]  ;;  %v7559_v8 = vld [vmem:[%s13327_s5 + $0x48] sm:$0xf] }
 0x685   :  { %v7556_v26 = vor.u32 %v8731_v28, %v7553_v25  ;;  %v7561_v33 = vld [vmem:[%s13327_s5 + $0x58] sm:$0xf0] }
 0x686   :  { %v9080_v57 = vpop.eup %9079  ;;  %4087 = vmatpush.bf16.msra.mxu1 %v7620_v6  ;;  %v8737_v6 = vld [vmem:[%s13327_s5 + $0x6c] sm:$0xf0] }
 0x687   :  { %v11946_v55 = vmul.f32 %v9080_v57, %v3550_v44  ;;  %v7600_v57 = vor.u32 %v8745_v30, %v7599_v13  ;;  %v7601_v44 = vld [vmem:[%s13327_s5 + $0xb0] sm:$0xf0]  ;;  %4114 = vmatpush.bf16.msrb.mxu3 %v7612_v58  ;;  %v7568_v19 = vor.u32 %v8737_v6, %v7567_v54  ;;  %v7575_v30 = vld [vmem:[%s13327_s5 + $0x68] sm:$0xf]  ;;  %v8733_v58 = vld [vmem:[%s13327_s5 + $0x4c] sm:$0xf0]  ;;  %v3165_v6 = vadd.f32 %v11674_v52, %v11862_v27 }
 0x688   :  { %v7604_v7 = vor.u32 %v8743_v15, %v7601_v44  ;;  %v7569_v13 = vld [vmem:[%s13327_s5 + $0x70] sm:$0xf0]  ;;  %v8738_v15 = vld [vmem:[%s13327_s5 + $0x74] sm:$0xf0]  ;;  %v8729_v54 = vld [vmem:[%s13327_s5 + $0x2c] sm:$0xf0] }
 0x689   :  { %v3563_v23 = vpack.c.bf16 %v11946_v55, %v11946_v55  ;;  %4075 = vmatpush.bf16.msra.mxu0 %v7600_v57  ;;  %v7572_v14 = vor.u32 %v8735_v56, %v7569_v13  ;;  %v7543_v13 = vld [vmem:[%s13327_s5 + $0x28] sm:$0xf] }
 0x68a   :  { %4088 = vmatpush.bf16.msra.mxu1 %v7604_v7 }
 0x68b   :  { %3764 = vmatmul.bf16.vlgmr.msrb.gmra.mxu0 %v3563_v23  ;;  %3777 = vmatmul.bf16.vlgmr.msrb.gmra.mxu1 %v3563_v23 }
 0x68c   :  { %3790 = vmatmul.bf16.vlgmr.msra.gmra.mxu2 %v3563_v23  ;;  %3803 = vmatmul.bf16.vlgmr.msra.gmra.mxu3 %v3563_v23  ;;  %v7607_v23 = vld [vmem:[%s13327_s5 + $0xa8] sm:$0xf] }
 0x68d   :  { %v7608_v49 = vor.u32 %v8746_v29, %v7607_v23  ;;  %4076 = vmatpush.bf16.msra.mxu0 %v7584_v63  ;;  %4115 = vmatpush.bf16.msrb.mxu3 %v7596_v59  ;;  %v7576_v23 = vor.u32 %v8738_v15, %v7575_v30  ;;  %v7577_v29 = vld [vmem:[%s13327_s5 + $0x78] sm:$0xf0]  ;;  %v7552_v63 = vor.u32 %v8733_v58, %v7551_v32  ;;  %v7535_v59 = vld [vmem:[%s13327_s5 + $0x20] sm:$0xf]  ;;  %v8725_v32 = vld [vmem:[%s13327_s5 + $0xc] sm:$0xf0] }
 0x68e   :  { %4089 = vmatpush.bf16.msra.mxu1 %v7588_v20  ;;  %v7580_v24 = vor.u32 %v8736_v16, %v7577_v29  ;;  %v8734_v20 = vld [vmem:[%s13327_s5 + $0x54] sm:$0xf0]  ;;  %v8723_v58 = vld [vmem:[%s13327_s5 + $0x4] sm:$0xf] }
 0x68f   :  { %4101 = vmatpush.bf16.msrb.mxu2 %v7608_v49  ;;  %v7560_v43 = vor.u32 %v8734_v20, %v7559_v8  ;;  %v8724_v8 = vld [vmem:[%s13327_s5 + $0xc] sm:$0xf]  ;;  %v7529_v20 = vld [vmem:[%s13327_s5 + $0x18] sm:$0xf0] }
 0x691   :  { %4077 = vmatpush.bf16.msra.mxu0 %v7568_v19  ;;  %4116 = vmatpush.bf16.msrb.mxu3 %v7580_v24  ;;  %v7537_v19 = vld [vmem:[%s13327_s5 + $0x30] sm:$0xf0]  ;;  %v7519_v24 = vld [vmem:[%s13327_s5] sm:$0xf] }
 0x692   :  { %4090 = vmatpush.bf16.msra.mxu1 %v7572_v14  ;;  %v7545_v14 = vld [vmem:[%s13327_s5 + $0x38] sm:$0xf0]  ;;  %v7520_v28 = vor.u32 %v8725_v32, %v7519_v24 }
 0x693   :  { %4102 = vmatpush.bf16.msrb.mxu2 %v7592_v11  ;;  %v8732_v11 = vld [vmem:[%s13327_s5 + $0x4c] sm:$0xf] }
 0x694   :  { %v7564_v56 = vor.u32 %v8732_v11, %v7561_v33 }
 0x695   :  { %4078 = vmatpush.bf16.msra.mxu0 %v7552_v63  ;;  %v8726_v63 = vld [vmem:[%s13327_s5 + $0x14] sm:$0xf0] }
 0x696   :  { %4091 = vmatpush.bf16.msra.mxu1 %v7556_v26  ;;  %4117 = vmatpush.bf16.msrb.mxu3 %v7564_v56 }
 0x697   :  { %4103 = vmatpush.bf16.msrb.mxu2 %v7576_v23 }
 0x69b   :  { %4104 = vmatpush.bf16.msrb.mxu2 %v7560_v43 }
 0x708   :  { %v3765_v57 = vpop.f32.mrf.mxu0  ;;  %v3778_v44 = vpop.f32.mrf.mxu1 }
 0x709   :  { %v3808_v7 = vadd.f32 %v3765_v57, %v3107_v42  ;;  %v3809_v49 = vadd.f32 %v3778_v44, %v3136_v34  ;;  %v7536_v42 = vor.u32 %v8729_v54, %v7535_v59  ;;  %v8727_v34 = vld [vmem:[%s13327_s5 + $0x24] sm:$0xf]  ;;  %v8730_v57 = vld [vmem:[%s13327_s5 + $0x34] sm:$0xf0]  ;;  %v8728_v44 = vld [vmem:[%s13327_s5 + $0x2c] sm:$0xf]  ;;  %v7532_v54 = vor.u32 %v8724_v8, %v7529_v20 }
 0x70a   :  { %v7540_v52 = vor.u32 %v8727_v34, %v7537_v19  ;;  %v3194_v19 = vadd.f32 %v11676_v53, %v11939_v62 }
 0x70b   :  { %v7514_v60 = vmul.f32 -1.442695, %v3808_v7  ;;  %v7515_v9 = vmul.f32 -1.442695, %v3809_v49  ;;  %v7544_v7 = vor.u32 %v8730_v57, %v7543_v13  ;;  %v7548_v49 = vor.u32 %v8728_v44, %v7545_v14  ;;  %4079 = vmatpush.bf16.msra.mxu0 %v7536_v42 }
 0x70c   :  { %4092 = vmatpush.bf16.msra.mxu1 %v7540_v52 }
 0x70d   :  { %9081 = vpow2.f32 %v7514_v60  ;;  %v7521_v60 = vld [vmem:[%s13327_s5 + $0x10] sm:$0xf0]  ;;  %4105 = vmatpush.bf16.msrb.mxu2 %v7544_v7  ;;  %4118 = vmatpush.bf16.msrb.mxu3 %v7548_v49 }
 0x70e   :  { %9083 = vpow2.f32 %v7515_v9  ;;  %v7527_v9 = vld [vmem:[%s13327_s5 + $0x8] sm:$0xf]  ;;  %v7524_v26 = vor.u32 %v8723_v58, %v7521_v60 }
 0x70f   :  { %v3791_v30 = vpop.f32.mrf.mxu2  ;;  %v3804_v15 = vpop.f32.mrf.mxu3  ;;  %v7528_v43 = vor.u32 %v8726_v63, %v7527_v9  ;;  %4080 = vmatpush.bf16.msra.mxu0 %v7520_v28 }
 0x710   :  { %v3810_v23 = vadd.f32 %v3791_v30, %v3165_v6  ;;  %v3767_v16 = vpop.f32.mrf.mxu0  ;;  %v3780_v29 = vpop.f32.mrf.mxu1  ;;  %4093 = vmatpush.bf16.msra.mxu1 %v7524_v26  ;;  %v3811_v52 = vadd.f32 %v3804_v15, %v3194_v19 }
 0x711   :  { %4106 = vmatpush.bf16.msrb.mxu2 %v7528_v43  ;;  %4119 = vmatpush.bf16.msrb.mxu3 %v7532_v54 }
 0x712   :  { %v7516_v25 = vmul.f32 -1.442695, %v3810_v23 }
 0x713   :  { %v9082_v11 = vpop.eup %9081 }
 0x714   :  { %v9084_v33 = vpop.eup %9083  ;;  %v3821_v59 = vadd.f32 1.0, %v9082_v11  ;;  %9085 = vpow2.f32 %v7516_v25 }
 0x715   :  { %v3822_v6 = vadd.f32 1.0, %v9084_v33 }
 0x716   :  { %9087 = vrcp.f32 %v3821_v59  ;;  %v3835_v29 = vand.u32 2147483648, %v3821_v59  ;;  %v3833_v24 = vand.u32 2147483647, %v3821_v59  ;;  %vm3829_vm6 = vweird.f32 %v3821_v59 }
 0x717   :  { %9089 = vrcp.f32 %v3822_v6  ;;  %v3793_v56 = vpop.f32.mrf.mxu2  ;;  %v3806_v42 = vpop.f32.mrf.mxu3  ;;  %v3850_v7 = vand.u32 2147483648, %v3822_v6  ;;  %v3848_v58 = vand.u32 2147483647, %v3822_v6  ;;  %vm3844_vm7 = vweird.f32 %v3822_v6 }
 0x718   :  { %v3836_v60 = vor.u32 1.1754944e-38, %v3835_v29  ;;  %vm3834_vm10 = vcmp.eq.f32.partialorder %v3833_v24, 8.507059e+37  ;;  %v7764_v29 = vld [vmem:[%s13327_s5 + $0xf0] sm:$0xf0] }
 0x719   :  { %v3851_v63 = vor.u32 1.1754944e-38, %v3850_v7  ;;  %vm3849_vm11 = vcmp.eq.f32.partialorder %v3848_v58, 8.507059e+37  ;;  %v7770_v7 = vld [vmem:[%s13327_s5 + $0xe8] sm:$0xf]  ;;  %v8784_v58 = vld [vmem:[%s13327_s5 + $0xec] sm:$0xf] }
 0x71a   :  { %v9086_v34 = vpop.eup %9085 }
 0x71b   :  { %v3823_v13 = vadd.f32 1.0, %v9086_v34 }
 0x71c   :  { %v9088_v30 = vpop.eup %9087 }
 0x71d   :  { %v9090_v57 = vpop.eup %9089  ;;  %v3825_v44 = vmul.f32 %v9088_v30, %v3821_v59  ;;  %9091 = vrcp.f32 %v3823_v13  ;;  %vm3830_vm4 = vweird.f32 %v9088_v30  ;;  %v3865_v42 = vand.u32 2147483648, %v3823_v13 }
 0x71e   :  { %v3840_v14 = vmul.f32 %v9090_v57, %v3822_v6  ;;  %9093 = vtanh.f32 %v3811_v52  ;;  %vm3845_vm5 = vweird.f32 %v9090_v57  ;;  %vm3831_vm8 = vmor %vm3829_vm6, %vm3830_vm4  ;;  %vm3859_vm13 = vweird.f32 %v3823_v13 }
 0x71f   :  { %v3826_v23 = vsub.f32 1.0, %v3825_v44  ;;  %vm3846_vm9 = vmor %vm3844_vm7, %vm3845_vm5  ;;  %v3863_v34 = vand.u32 2147483647, %v3823_v13 }
 0x720   :  { %v3841_v16 = vsub.f32 1.0, %v3840_v14  ;;  %v7762_v14 = vld [vmem:[%s13327_s5 + $0xe0] sm:$0xf] }
 0x721   :  { %v3827_v49 = vmul.f32 %v9088_v30, %v3826_v23  ;;  %vm3864_vm15 = vcmp.eq.f32.partialorder %v3863_v34, 8.507059e+37  ;;  %v8783_v23 = vld [vmem:[%s13327_s5 + $0xe4] sm:$0xf] }
 0x722   :  { %v3842_v32 = vmul.f32 %v9090_v57, %v3841_v16  ;;  %v7767_v24 = vor.u32 %v8783_v23, %v7764_v29  ;;  %v8773_v29 = vld [vmem:[%s13327_s5 + $0x8c] sm:$0xf0] }
 0x723   :  { %v9092_v28 = vpop.eup %9091  ;;  %v3828_v53 = vadd.f32 %v9088_v30, %v3827_v49  ;;  %v8786_v49 = vld [vmem:[%s13327_s5 + $0xf4] sm:$0xf0] }
 0x724   :  { %v3855_v15 = vmul.f32 %v9092_v28, %v3823_v13  ;;  %v3843_v9 = vadd.f32 %v9090_v57, %v3842_v32  ;;  %v9094_v26 = vpop.eup %9093  ;;  %vm3860_vm12 = vweird.f32 %v9092_v28  ;;  %v8785_v13 = vld [vmem:[%s13327_s5 + $0xec] sm:$0xf0]  ;;  %v7771_v32 = vor.u32 %v8786_v49, %v7770_v7  ;;  %4403 = vmatpush.bf16.msrb.mxu1 %v7767_v24  ;;  %v8771_v7 = vld [vmem:[%s13327_s5 + $0x84] sm:$0xf]  ;;  %v7716_v24 = vld [vmem:[%s13327_s5 + $0x90] sm:$0xf0] }
 0x725   :  { %v3832_v25 = vsel %vm3831_vm8, %v9088_v30, %v3828_v53  ;;  %vm3861_vm14 = vmor %vm3859_vm13, %vm3860_vm12  ;;  %v3866_v30 = vor.u32 1.1754944e-38, %v3865_v42  ;;  %v7763_v16 = vor.u32 %v8785_v13, %v7762_v14  ;;  %v8775_v42 = vld [vmem:[%s13327_s5 + $0xa4] sm:$0xf]  ;;  %v8776_v14 = vld [vmem:[%s13327_s5 + $0xac] sm:$0xf] }
 0x726   :  { %v3856_v8 = vsub.f32 1.0, %v3855_v15  ;;  %v3837_v20 = vsel %vm3834_vm10, %v3836_v60, %v3832_v25  ;;  %v3847_v11 = vsel %vm3846_vm9, %v9090_v57, %v3843_v9  ;;  %4416 = vmatpush.bf16.msra.mxu2 %v7771_v32  ;;  %v7746_v15 = vld [vmem:[%s13327_s5 + $0xc0] sm:$0xf]  ;;  %v8781_v60 = vld [vmem:[%s13327_s5 + $0xcc] sm:$0xf0] }
 0x727   :  { %v3852_v43 = vsel %vm3849_vm11, %v3851_v63, %v3847_v11  ;;  %v3871_v33 = vmul.f32 %v9094_v26, %v3837_v20  ;;  %4390 = vmatpush.bf16.msrb.mxu0 %v7763_v16  ;;  %v8779_v9 = vld [vmem:[%s13327_s5 + $0xc4] sm:$0xf]  ;;  %v7747_v63 = vor.u32 %v8781_v60, %v7746_v15  ;;  %v7748_v25 = vld [vmem:[%s13327_s5 + $0xd0] sm:$0xf0]  ;;  %v7754_v26 = vld [vmem:[%s13327_s5 + $0xc8] sm:$0xf] }
 0x728   :  { %v3857_v54 = vmul.f32 %v9092_v28, %v3856_v8  ;;  %v3870_v56 = vmul.f32 %v3852_v43, %v11943_v4  ;;  %v8782_v8 = vld [vmem:[%s13327_s5 + $0xd4] sm:$0xf0]  ;;  %v7751_v20 = vor.u32 %v8779_v9, %v7748_v25  ;;  %v8780_v43 = vld [vmem:[%s13327_s5 + $0xcc] sm:$0xf]  ;;  %v7740_v13 = vld [vmem:[%s13327_s5 + $0xb8] sm:$0xf0] }
 0x729   :  { %v7755_v11 = vor.u32 %v8782_v8, %v7754_v26  ;;  %v7743_v23 = vor.u32 %v8776_v14, %v7740_v13  ;;  %v7714_v16 = vld [vmem:[%s13327_s5 + $0x80] sm:$0xf]  ;;  %v7722_v32 = vld [vmem:[%s13327_s5 + $0x88] sm:$0xf]  ;;  %v8772_v15 = vld [vmem:[%s13327_s5 + $0x8c] sm:$0xf]  ;;  %v3110_v8 = vadd.f32 %v11678_v0, %v11800_v12 }
 0x72a   :  { %v12151_v59 = vadd.f32 %v3871_v33, %v3870_v56  ;;  %v3858_v6 = vadd.f32 %v9092_v28, %v3857_v54  ;;  %v7756_v33 = vld [vmem:[%s13327_s5 + $0xd8] sm:$0xf0]  ;;  %4404 = vmatpush.bf16.msrb.mxu1 %v7751_v20  ;;  %v7730_v56 = vld [vmem:[%s13327_s5 + $0xa0] sm:$0xf]  ;;  %v7715_v49 = vor.u32 %v8773_v29, %v7714_v16  ;;  %v8769_v25 = vld [vmem:[%s13327_s5 + $0x6c] sm:$0xf0]  ;;  %v3139_v20 = vadd.f32 %v11680_v2, %v11803_v21 }
 0x72b   :  { %4391 = vmatpush.bf16.msrb.mxu0 %v7747_v63  ;;  %v7759_v54 = vor.u32 %v8780_v43, %v7756_v33  ;;  %4417 = vmatpush.bf16.msra.mxu2 %v7755_v11  ;;  %v7724_v60 = vld [vmem:[%s13327_s5 + $0x98] sm:$0xf0]  ;;  %v7698_v63 = vld [vmem:[%s13327_s5 + $0x60] sm:$0xf]  ;;  %v8767_v26 = vld [vmem:[%s13327_s5 + $0x64] sm:$0xf] }
 0x72c   :  { %9095 = vtanh.f32 %v12151_v59  ;;  %v3862_v19 = vsel %vm3861_vm14, %v9092_v28, %v3858_v6  ;;  %v7772_v28 = vld [vmem:[%s13327_s5 + $0xf8] sm:$0xf0]  ;;  %v8777_v6 = vld [vmem:[%s13327_s5 + $0xac] sm:$0xf0]  ;;  %v7727_v9 = vor.u32 %v8772_v15, %v7724_v60  ;;  %v7699_v11 = vor.u32 %v8769_v25, %v7698_v63  ;;  %v7700_v43 = vld [vmem:[%s13327_s5 + $0x70] sm:$0xf0] }
 0x72d   :  { %v3867_v57 = vsel %vm3864_vm15, %v3866_v30, %v3862_v19  ;;  %v7775_v53 = vor.u32 %v8784_v58, %v7772_v28  ;;  %v7731_v34 = vor.u32 %v8777_v6, %v7730_v56  ;;  %v7732_v19 = vld [vmem:[%s13327_s5 + $0xb0] sm:$0xf0]  ;;  %v7738_v30 = vld [vmem:[%s13327_s5 + $0xa8] sm:$0xf]  ;;  %v8774_v58 = vld [vmem:[%s13327_s5 + $0x94] sm:$0xf0]  ;;  %v7719_v28 = vor.u32 %v8771_v7, %v7716_v24 }
 0x72e   :  { %v7706_v33 = vld [vmem:[%s13327_s5 + $0x68] sm:$0xf]  ;;  %v7703_v0 = vor.u32 %v8767_v26, %v7700_v43  ;;  %v8768_v2 = vld [vmem:[%s13327_s5 + $0x6c] sm:$0xf]  ;;  %v8763_v14 = vld [vmem:[%s13327_s5 + $0x44] sm:$0xf]  ;;  %v3168_v60 = vadd.f32 %v11682_v3, %v11862_v27 }
 0x72f   :  { %4429 = vmatpush.bf16.msra.mxu3 %v7775_v53  ;;  %4392 = vmatpush.bf16.msrb.mxu0 %v7731_v34  ;;  %v7723_v53 = vor.u32 %v8774_v58, %v7722_v32  ;;  %v7708_v34 = vld [vmem:[%s13327_s5 + $0x78] sm:$0xf0]  ;;  %v7684_v29 = vld [vmem:[%s13327_s5 + $0x50] sm:$0xf0]  ;;  %v8766_v24 = vld [vmem:[%s13327_s5 + $0x54] sm:$0xf0] }
 0x730   :  { %v7687_v7 = vor.u32 %v8763_v14, %v7684_v29  ;;  %v8764_v32 = vld [vmem:[%s13327_s5 + $0x4c] sm:$0xf]  ;;  %v8761_v15 = vld [vmem:[%s13327_s5 + $0x2c] sm:$0xf0]  ;;  %v8759_v25 = vld [vmem:[%s13327_s5 + $0x24] sm:$0xf] }
 0x731   :  { %v7668_v26 = vld [vmem:[%s13327_s5 + $0x30] sm:$0xf0]  ;;  %v8762_v43 = vld [vmem:[%s13327_s5 + $0x34] sm:$0xf0]  ;;  %v7660_v29 = vld [vmem:[%s13327_s5 + $0x18] sm:$0xf0] }
 0x732   :  { %v9096_v52 = vpop.eup %9095  ;;  %v7671_v3 = vor.u32 %v8759_v25, %v7668_v26  ;;  %v8758_v14 = vld [vmem:[%s13327_s5 + $0x14] sm:$0xf0] }
 0x733   :  { %v12154_v44 = vmul.f32 %v9096_v52, %v3867_v57  ;;  %4430 = vmatpush.bf16.msra.mxu3 %v7759_v54  ;;  %v8778_v52 = vld [vmem:[%s13327_s5 + $0xb4] sm:$0xf0]  ;;  %v7735_v57 = vor.u32 %v8775_v42, %v7732_v19  ;;  %4393 = vmatpush.bf16.msrb.mxu0 %v7715_v49  ;;  %v7690_v49 = vld [vmem:[%s13327_s5 + $0x48] sm:$0xf] }
 0x734   :  { %v8770_v54 = vld [vmem:[%s13327_s5 + $0x74] sm:$0xf0]  ;;  %v7691_v58 = vor.u32 %v8766_v24, %v7690_v49 }
 0x735   :  { %v3880_v4 = vpack.c.bf16 %v12154_v44, %v12154_v44  ;;  %4405 = vmatpush.bf16.msrb.mxu1 %v7735_v57  ;;  %v7707_v42 = vor.u32 %v8770_v54, %v7706_v33  ;;  %v7682_v57 = vld [vmem:[%s13327_s5 + $0x40] sm:$0xf]  ;;  %v8760_v33 = vld [vmem:[%s13327_s5 + $0x2c] sm:$0xf]  ;;  %v7676_v54 = vld [vmem:[%s13327_s5 + $0x38] sm:$0xf0] }
 0x737   :  { %4081 = vmatmul.bf16.vlgmr.msra.gmra.mxu0 %v3880_v4  ;;  %4094 = vmatmul.bf16.vlgmr.msra.gmra.mxu1 %v3880_v4 }
 0x738   :  { %4107 = vmatmul.bf16.vlgmr.msrb.gmra.mxu2 %v3880_v4  ;;  %4120 = vmatmul.bf16.vlgmr.msrb.gmra.mxu3 %v3880_v4  ;;  %v7739_v4 = vor.u32 %v8778_v52, %v7738_v30  ;;  %v7711_v52 = vor.u32 %v8768_v2, %v7708_v34  ;;  %v7679_v2 = vor.u32 %v8760_v33, %v7676_v54  ;;  %v7650_v34 = vld [vmem:[%s13327_s5] sm:$0xf] }
 0x739   :  { %4431 = vmatpush.bf16.msra.mxu3 %v7743_v23  ;;  %4406 = vmatpush.bf16.msrb.mxu1 %v7719_v28  ;;  %v7692_v28 = vld [vmem:[%s13327_s5 + $0x58] sm:$0xf0] }
 0x73a   :  { %4418 = vmatpush.bf16.msra.mxu2 %v7739_v4  ;;  %4394 = vmatpush.bf16.msrb.mxu0 %v7699_v11  ;;  %v8765_v4 = vld [vmem:[%s13327_s5 + $0x4c] sm:$0xf0] }
 0x73b   :  { %v7683_v16 = vor.u32 %v8765_v4, %v7682_v57  ;;  %v7652_v57 = vld [vmem:[%s13327_s5 + $0x10] sm:$0xf0]  ;;  %v7658_v4 = vld [vmem:[%s13327_s5 + $0x8] sm:$0xf] }
 0x73c   :  { %v7659_v49 = vor.u32 %v8758_v14, %v7658_v4 }
 0x73d   :  { %4432 = vmatpush.bf16.msra.mxu3 %v7727_v9  ;;  %4407 = vmatpush.bf16.msrb.mxu1 %v7703_v0  ;;  %v7695_v9 = vor.u32 %v8764_v32, %v7692_v28 }
 0x73e   :  { %4419 = vmatpush.bf16.msra.mxu2 %v7723_v53  ;;  %4395 = vmatpush.bf16.msrb.mxu0 %v7683_v16  ;;  %v7666_v53 = vld [vmem:[%s13327_s5 + $0x20] sm:$0xf]  ;;  %v8756_v16 = vld [vmem:[%s13327_s5 + $0xc] sm:$0xf] }
 0x73f   :  { %v7667_v63 = vor.u32 %v8761_v15, %v7666_v53 }
 0x741   :  { %4433 = vmatpush.bf16.msra.mxu3 %v7711_v52  ;;  %4408 = vmatpush.bf16.msrb.mxu1 %v7687_v7 }
 0x742   :  { %4420 = vmatpush.bf16.msra.mxu2 %v7707_v42  ;;  %4396 = vmatpush.bf16.msrb.mxu0 %v7667_v63 }
 0x745   :  { %4434 = vmatpush.bf16.msra.mxu3 %v7695_v9  ;;  %4409 = vmatpush.bf16.msrb.mxu1 %v7671_v3  ;;  %v3197_v9 = vadd.f32 %v11684_v48, %v11939_v62 }
 0x746   :  { %4421 = vmatpush.bf16.msra.mxu2 %v7691_v58  ;;  %v7663_v58 = vor.u32 %v8756_v16, %v7660_v29 }
 0x749   :  { %4435 = vmatpush.bf16.msra.mxu3 %v7679_v2 }
 0x74d   :  { %4436 = vmatpush.bf16.msra.mxu3 %v7663_v58 }
 0x7b4   :  { %v4082_v56 = vpop.f32.mrf.mxu0  ;;  %v4095_v6 = vpop.f32.mrf.mxu1 }
 0x7b5   :  { %v4125_v19 = vadd.f32 %v4082_v56, %v3110_v8  ;;  %v4126_v30 = vadd.f32 %v4095_v6, %v3139_v20  ;;  %v7674_v8 = vld [vmem:[%s13327_s5 + $0x28] sm:$0xf] }
 0x7b6   :  { %v7675_v42 = vor.u32 %v8762_v43, %v7674_v8 }
 0x7b7   :  { %v7645_v13 = vmul.f32 -1.442695, %v4125_v19  ;;  %v7646_v23 = vmul.f32 -1.442695, %v4126_v30  ;;  %v8757_v19 = vld [vmem:[%s13327_s5 + $0xc] sm:$0xf0] }
 0x7b8   :  { %v8755_v30 = vld [vmem:[%s13327_s5 + $0x4] sm:$0xf]  ;;  %v7651_v52 = vor.u32 %v8757_v19, %v7650_v34  ;;  %4422 = vmatpush.bf16.msra.mxu2 %v7675_v42 }
 0x7b9   :  { %9097 = vpow2.f32 %v7645_v13 }
 0x7ba   :  { %9099 = vpow2.f32 %v7646_v23  ;;  %v7655_v23 = vor.u32 %v8755_v30, %v7652_v57  ;;  %4397 = vmatpush.bf16.msrb.mxu0 %v7651_v52 }
 0x7bb   :  { %v4108_v20 = vpop.f32.mrf.mxu2  ;;  %v4121_v11 = vpop.f32.mrf.mxu3 }
 0x7bc   :  { %v4127_v56 = vadd.f32 %v4108_v20, %v3168_v60  ;;  %v4084_v6 = vpop.f32.mrf.mxu0  ;;  %v4097_v0 = vpop.f32.mrf.mxu1  ;;  %4410 = vmatpush.bf16.msrb.mxu1 %v7655_v23  ;;  %4423 = vmatpush.bf16.msra.mxu2 %v7659_v49  ;;  %v4128_v26 = vadd.f32 %v4121_v11, %v3197_v9 }
 0x7be   :  { %v7647_v13 = vmul.f32 -1.442695, %v4127_v56 }
 0x7bf   :  { %v9098_v7 = vpop.eup %9097 }
 0x7c0   :  { %v9100_v24 = vpop.eup %9099  ;;  %v4138_v32 = vadd.f32 1.0, %v9098_v7  ;;  %9101 = vpow2.f32 %v7647_v13 }
 0x7c1   :  { %v4139_v28 = vadd.f32 1.0, %v9100_v24 }
 0x7c2   :  { %9103 = vrcp.f32 %v4138_v32  ;;  %v4152_v54 = vand.u32 2147483648, %v4138_v32  ;;  %v4150_v0 = vand.u32 2147483647, %v4138_v32  ;;  %vm4146_vm3 = vweird.f32 %v4138_v32 }
 0x7c3   :  { %9105 = vrcp.f32 %v4139_v28  ;;  %v4110_v53 = vpop.f32.mrf.mxu2  ;;  %v4123_v15 = vpop.f32.mrf.mxu3  ;;  %v4167_v56 = vand.u32 2147483648, %v4139_v28  ;;  %v4165_v2 = vand.u32 2147483647, %v4139_v28  ;;  %vm4161_vm4 = vweird.f32 %v4139_v28 }
 0x7c4   :  { %v4153_v19 = vor.u32 1.1754944e-38, %v4152_v54  ;;  %vm4151_vm7 = vcmp.eq.f32.partialorder %v4150_v0, 8.507059e+37  ;;  %v7903_v0 = vld [vmem:[%s13327_s5 + $0xf8] sm:$0xf0] }
 0x7c5   :  { %v4168_v52 = vor.u32 1.1754944e-38, %v4167_v56  ;;  %vm4166_vm8 = vcmp.eq.f32.partialorder %v4165_v2, 8.507059e+37  ;;  %v7877_v2 = vld [vmem:[%s13327_s5 + $0xc0] sm:$0xf] }
 0x7c6   :  { %v9102_v60 = vpop.eup %9101 }
 0x7c7   :  { %v4140_v63 = vadd.f32 1.0, %v9102_v60 }
 0x7c8   :  { %v9104_v25 = vpop.eup %9103 }
 0x7c9   :  { %v9106_v8 = vpop.eup %9105  ;;  %v4142_v20 = vmul.f32 %v9104_v25, %v4138_v32  ;;  %9107 = vrcp.f32 %v4140_v63  ;;  %vm4147_vm1 = vweird.f32 %v9104_v25  ;;  %v4182_v58 = vand.u32 2147483648, %v4140_v63 }
 0x7ca   :  { %v4157_v3 = vmul.f32 %v9106_v8, %v4139_v28  ;;  %9109 = vtanh.f32 %v4128_v26  ;;  %vm4162_vm2 = vweird.f32 %v9106_v8  ;;  %vm4148_vm5 = vmor %vm4146_vm3, %vm4147_vm1  ;;  %vm4176_vm10 = vweird.f32 %v4140_v63  ;;  %v7893_v26 = vld [vmem:[%s13327_s5 + $0xe0] sm:$0xf] }
 0x7cb   :  { %v4143_v43 = vsub.f32 1.0, %v4142_v20  ;;  %vm4163_vm6 = vmor %vm4161_vm4, %vm4162_vm2  ;;  %v4180_v28 = vand.u32 2147483647, %v4140_v63  ;;  %v4183_v15 = vor.u32 1.1754944e-38, %v4182_v58  ;;  %v7869_v58 = vld [vmem:[%s13327_s5 + $0xa8] sm:$0xf] }
 0x7cc   :  { %v4158_v33 = vsub.f32 1.0, %v4157_v3  ;;  %v7895_v3 = vld [vmem:[%s13327_s5 + $0xf0] sm:$0xf0] }
 0x7cd   :  { %v4144_v6 = vmul.f32 %v9104_v25, %v4143_v43  ;;  %vm4181_vm12 = vcmp.eq.f32.partialorder %v4180_v28, 8.507059e+37  ;;  %v7901_v43 = vld [vmem:[%s13327_s5 + $0xe8] sm:$0xf]  ;;  %v8810_v28 = vld [vmem:[%s13327_s5 + $0xb4] sm:$0xf0] }
 0x7ce   :  { %v4159_v42 = vmul.f32 %v9106_v8, %v4158_v33  ;;  %v8818_v33 = vld [vmem:[%s13327_s5 + $0xf4] sm:$0xf0] }
 0x7cf   :  { %v9108_v34 = vpop.eup %9107  ;;  %v4145_v48 = vadd.f32 %v9104_v25, %v4144_v6  ;;  %v7902_v56 = vor.u32 %v8818_v33, %v7901_v43  ;;  %v8816_v6 = vld [vmem:[%s13327_s5 + $0xec] sm:$0xf]  ;;  %v7853_v43 = vld [vmem:[%s13327_s5 + $0x88] sm:$0xf]  ;;  %v8806_v33 = vld [vmem:[%s13327_s5 + $0x94] sm:$0xf0] }
 0x7d0   :  { %v4172_v11 = vmul.f32 %v9108_v34, %v4140_v63  ;;  %v4160_v30 = vadd.f32 %v9106_v8, %v4159_v42  ;;  %v9110_v4 = vpop.eup %9109  ;;  %vm4177_vm9 = vweird.f32 %v9108_v34  ;;  %v8817_v63 = vld [vmem:[%s13327_s5 + $0xec] sm:$0xf0]  ;;  %v7906_v42 = vor.u32 %v8816_v6, %v7903_v0  ;;  %v8804_v6 = vld [vmem:[%s13327_s5 + $0x8c] sm:$0xf]  ;;  %v7855_v0 = vld [vmem:[%s13327_s5 + $0x98] sm:$0xf0] }
 0x7d1   :  { %v4149_v57 = vsel %vm4148_vm5, %v9104_v25, %v4145_v48  ;;  %vm4178_vm11 = vmor %vm4176_vm10, %vm4177_vm9  ;;  %v7894_v20 = vor.u32 %v8817_v63, %v7893_v26  ;;  %4733 = vmatpush.bf16.msrb.mxu2 %v7902_v56  ;;  %v8811_v48 = vld [vmem:[%s13327_s5 + $0xc4] sm:$0xf]  ;;  %v7845_v26 = vld [vmem:[%s13327_s5 + $0x80] sm:$0xf]  ;;  %v7854_v56 = vor.u32 %v8806_v33, %v7853_v43 }
 0x7d2   :  { %v4173_v14 = vsub.f32 1.0, %v4172_v11  ;;  %v4154_v13 = vsel %vm4151_vm7, %v4153_v19, %v4149_v57  ;;  %v4164_v23 = vsel %vm4163_vm6, %v9106_v8, %v4160_v30  ;;  %v8815_v8 = vld [vmem:[%s13327_s5 + $0xe4] sm:$0xf]  ;;  %4746 = vmatpush.bf16.msrb.mxu3 %v7906_v42  ;;  %v7879_v19 = vld [vmem:[%s13327_s5 + $0xd0] sm:$0xf0]  ;;  %v7858_v42 = vor.u32 %v8804_v6, %v7855_v0 }
 0x7d3   :  { %v4169_v16 = vsel %vm4166_vm8, %v4168_v52, %v4164_v23  ;;  %v4188_v29 = vmul.f32 %v9110_v4, %v4154_v13  ;;  %v7898_v54 = vor.u32 %v8815_v8, %v7895_v3  ;;  %4707 = vmatpush.bf16.msra.mxu0 %v7894_v20  ;;  %v7885_v30 = vld [vmem:[%s13327_s5 + $0xc8] sm:$0xf]  ;;  %v8814_v52 = vld [vmem:[%s13327_s5 + $0xd4] sm:$0xf0]  ;;  %v7882_v57 = vor.u32 %v8811_v48, %v7879_v19  ;;  %v7887_v13 = vld [vmem:[%s13327_s5 + $0xd8] sm:$0xf0] }
 0x7d4   :  { %v4174_v7 = vmul.f32 %v9108_v34, %v4173_v14  ;;  %v4187_v49 = vmul.f32 %v4169_v16, %v12151_v59  ;;  %v7886_v4 = vor.u32 %v8814_v52, %v7885_v30  ;;  %v8812_v14 = vld [vmem:[%s13327_s5 + $0xcc] sm:$0xf]  ;;  %v7861_v16 = vld [vmem:[%s13327_s5 + $0xa0] sm:$0xf]  ;;  %v8805_v63 = vld [vmem:[%s13327_s5 + $0x8c] sm:$0xf0]  ;;  %v3141_v19 = vadd.f32 %v11688_v1, %v11803_v21 }
 0x7d5   :  { %4720 = vmatpush.bf16.msra.mxu1 %v7898_v54  ;;  %v7890_v23 = vor.u32 %v8812_v14, %v7887_v13  ;;  %v8803_v8 = vld [vmem:[%s13327_s5 + $0x84] sm:$0xf]  ;;  %v7846_v20 = vor.u32 %v8805_v63, %v7845_v26  ;;  %v7847_v3 = vld [vmem:[%s13327_s5 + $0x90] sm:$0xf0]  ;;  %v8800_v1 = vld [vmem:[%s13327_s5 + $0x6c] sm:$0xf] }
 0x7d6   :  { %v12359_v24 = vadd.f32 %v4188_v29, %v4187_v49  ;;  %v4175_v32 = vadd.f32 %v9108_v34, %v4174_v7  ;;  %4734 = vmatpush.bf16.msrb.mxu2 %v7886_v4  ;;  %v8809_v29 = vld [vmem:[%s13327_s5 + $0xac] sm:$0xf0]  ;;  %v8807_v7 = vld [vmem:[%s13327_s5 + $0xa4] sm:$0xf]  ;;  %v7850_v54 = vor.u32 %v8803_v8, %v7847_v3  ;;  %v7831_v52 = vld [vmem:[%s13327_s5 + $0x70] sm:$0xf0] }
 0x7d7   :  { %4747 = vmatpush.bf16.msrb.mxu3 %v7890_v23  ;;  %v7862_v49 = vor.u32 %v8809_v29, %v7861_v16  ;;  %v8799_v48 = vld [vmem:[%s13327_s5 + $0x64] sm:$0xf]  ;;  %v8802_v4 = vld [vmem:[%s13327_s5 + $0x74] sm:$0xf0]  ;;  %v7839_v16 = vld [vmem:[%s13327_s5 + $0x78] sm:$0xf0] }
 0x7d8   :  { %9111 = vtanh.f32 %v12359_v24  ;;  %v4179_v53 = vsel %vm4178_vm11, %v9108_v34, %v4175_v32  ;;  %v8813_v34 = vld [vmem:[%s13327_s5 + $0xcc] sm:$0xf0]  ;;  %v7863_v32 = vld [vmem:[%s13327_s5 + $0xb0] sm:$0xf0]  ;;  %v7821_v26 = vld [vmem:[%s13327_s5 + $0x48] sm:$0xf] }
 0x7d9   :  { %v4184_v9 = vsel %vm4181_vm12, %v4183_v15, %v4179_v53  ;;  %v7878_v11 = vor.u32 %v8813_v34, %v7877_v2  ;;  %4721 = vmatpush.bf16.msra.mxu1 %v7882_v57  ;;  %v7866_v53 = vor.u32 %v8807_v7, %v7863_v32  ;;  %v7870_v15 = vor.u32 %v8810_v28, %v7869_v58  ;;  %v7829_v2 = vld [vmem:[%s13327_s5 + $0x60] sm:$0xf]  ;;  %v8801_v34 = vld [vmem:[%s13327_s5 + $0x6c] sm:$0xf0]  ;;  %v7837_v57 = vld [vmem:[%s13327_s5 + $0x68] sm:$0xf] }
 0x7da   :  { %v7830_v30 = vor.u32 %v8801_v34, %v7829_v2  ;;  %v7838_v23 = vor.u32 %v8802_v4, %v7837_v57  ;;  %v7813_v32 = vld [vmem:[%s13327_s5 + $0x40] sm:$0xf]  ;;  %v8797_v58 = vld [vmem:[%s13327_s5 + $0x4c] sm:$0xf0]  ;;  %v8795_v28 = vld [vmem:[%s13327_s5 + $0x44] sm:$0xf] }
 0x7db   :  { %4708 = vmatpush.bf16.msra.mxu0 %v7878_v11  ;;  %4735 = vmatpush.bf16.msrb.mxu2 %v7870_v15  ;;  %v3112_v11 = vadd.f32 %v11686_v39, %v11800_v12  ;;  %v7834_v39 = vor.u32 %v8799_v48, %v7831_v52  ;;  %v8798_v63 = vld [vmem:[%s13327_s5 + $0x54] sm:$0xf0]  ;;  %v8796_v8 = vld [vmem:[%s13327_s5 + $0x4c] sm:$0xf]  ;;  %v7823_v3 = vld [vmem:[%s13327_s5 + $0x58] sm:$0xf0] }
 0x7dc   :  { %v7797_v43 = vld [vmem:[%s13327_s5 + $0x20] sm:$0xf]  ;;  %v8793_v33 = vld [vmem:[%s13327_s5 + $0x2c] sm:$0xf0]  ;;  %v8791_v0 = vld [vmem:[%s13327_s5 + $0x24] sm:$0xf] }
 0x7dd   :  { %4722 = vmatpush.bf16.msra.mxu1 %v7866_v53  ;;  %v7798_v6 = vor.u32 %v8793_v33, %v7797_v43  ;;  %v7805_v2 = vld [vmem:[%s13327_s5 + $0x28] sm:$0xf]  ;;  %v3199_v43 = vadd.f32 %v11692_v61, %v11939_v62 }
 0x7de   :  { %v9112_v60 = vpop.eup %9111 }
 0x7df   :  { %v12362_v25 = vmul.f32 %v9112_v60, %v4184_v9  ;;  %v8808_v60 = vld [vmem:[%s13327_s5 + $0xac] sm:$0xf]  ;;  %v7871_v9 = vld [vmem:[%s13327_s5 + $0xb8] sm:$0xf0]  ;;  %4709 = vmatpush.bf16.msra.mxu0 %v7862_v49  ;;  %4736 = vmatpush.bf16.msrb.mxu2 %v7854_v56  ;;  %v7842_v49 = vor.u32 %v8800_v1, %v7839_v16  ;;  %v7826_v56 = vor.u32 %v8796_v8, %v7823_v3  ;;  %v8787_v1 = vld [vmem:[%s13327_s5 + $0x4] sm:$0xf] }
 0x7e1   :  { %v4197_v59 = vpack.c.bf16 %v12362_v25, %v12362_v25  ;;  %4723 = vmatpush.bf16.msra.mxu1 %v7850_v54  ;;  %v3170_v54 = vadd.f32 %v11690_v50, %v11862_v27 }
 0x7e3   :  { %4398 = vmatmul.bf16.vlgmr.msrb.gmra.mxu0 %v4197_v59  ;;  %4411 = vmatmul.bf16.vlgmr.msrb.gmra.mxu1 %v4197_v59 }
 0x7e4   :  { %4424 = vmatmul.bf16.vlgmr.msra.gmra.mxu2 %v4197_v59  ;;  %4437 = vmatmul.bf16.vlgmr.msra.gmra.mxu3 %v4197_v59  ;;  %v7874_v59 = vor.u32 %v8808_v60, %v7871_v9  ;;  %v7814_v60 = vor.u32 %v8797_v58, %v7813_v32  ;;  %v7815_v9 = vld [vmem:[%s13327_s5 + $0x50] sm:$0xf0] }
 0x7e5   :  { %4710 = vmatpush.bf16.msra.mxu0 %v7846_v20  ;;  %4724 = vmatpush.bf16.msra.mxu1 %v7834_v39  ;;  %v7822_v20 = vor.u32 %v8798_v63, %v7821_v26  ;;  %v7781_v39 = vld [vmem:[%s13327_s5] sm:$0xf] }
 0x7e6   :  { %4748 = vmatpush.bf16.msrb.mxu3 %v7874_v59  ;;  %4737 = vmatpush.bf16.msrb.mxu2 %v7838_v23  ;;  %v7818_v59 = vor.u32 %v8795_v28, %v7815_v9  ;;  %v8789_v23 = vld [vmem:[%s13327_s5 + $0xc] sm:$0xf0]  ;;  %v8788_v28 = vld [vmem:[%s13327_s5 + $0xc] sm:$0xf] }
 0x7e7   :  { %v7782_v16 = vor.u32 %v8789_v23, %v7781_v39 }
 0x7e9   :  { %4711 = vmatpush.bf16.msra.mxu0 %v7830_v30  ;;  %4725 = vmatpush.bf16.msra.mxu1 %v7818_v59  ;;  %v7807_v30 = vld [vmem:[%s13327_s5 + $0x38] sm:$0xf0] }
 0x7ea   :  { %4749 = vmatpush.bf16.msrb.mxu3 %v7858_v42  ;;  %v7799_v42 = vld [vmem:[%s13327_s5 + $0x30] sm:$0xf0]  ;;  %4738 = vmatpush.bf16.msrb.mxu2 %v7822_v20 }
 0x7eb   :  { %v7802_v50 = vor.u32 %v8791_v0, %v7799_v42 }
 0x7ed   :  { %4712 = vmatpush.bf16.msra.mxu0 %v7814_v60  ;;  %4726 = vmatpush.bf16.msra.mxu1 %v7802_v50 }
 0x7ee   :  { %4750 = vmatpush.bf16.msrb.mxu3 %v7842_v49  ;;  %v8790_v49 = vld [vmem:[%s13327_s5 + $0x14] sm:$0xf0] }
 0x7f1   :  { %4713 = vmatpush.bf16.msra.mxu0 %v7798_v6 }
 0x7f2   :  { %4751 = vmatpush.bf16.msrb.mxu3 %v7826_v56 }
 0x7f5   :  { %4714 = vmatpush.bf16.msra.mxu0 %v7782_v16 }
 0x860   :  { %v4399_v14 = vpop.f32.mrf.mxu0  ;;  %v4412_v13 = vpop.f32.mrf.mxu1 }
 0x861   :  { %v4442_v29 = vadd.f32 %v4399_v14, %v3112_v11  ;;  %v4443_v7 = vadd.f32 %v4412_v13, %v3141_v19  ;;  %v8794_v11 = vld [vmem:[%s13327_s5 + $0x34] sm:$0xf0]  ;;  %v8792_v19 = vld [vmem:[%s13327_s5 + $0x2c] sm:$0xf] }
 0x862   :  { %v7806_v14 = vor.u32 %v8794_v11, %v7805_v2  ;;  %v7810_v13 = vor.u32 %v8792_v19, %v7807_v30 }
 0x863   :  { %v7776_v53 = vmul.f32 -1.442695, %v4442_v29  ;;  %v7777_v15 = vmul.f32 -1.442695, %v4443_v7  ;;  %v7783_v29 = vld [vmem:[%s13327_s5 + $0x10] sm:$0xf0] }
 0x864   :  { %v7789_v7 = vld [vmem:[%s13327_s5 + $0x8] sm:$0xf]  ;;  %v7786_v58 = vor.u32 %v8787_v1, %v7783_v29  ;;  %4739 = vmatpush.bf16.msrb.mxu2 %v7806_v14  ;;  %4752 = vmatpush.bf16.msrb.mxu3 %v7810_v13 }
 0x865   :  { %9113 = vpow2.f32 %v7776_v53  ;;  %v7791_v53 = vld [vmem:[%s13327_s5 + $0x18] sm:$0xf0]  ;;  %v7790_v60 = vor.u32 %v8790_v49, %v7789_v7 }
 0x866   :  { %9115 = vpow2.f32 %v7777_v15  ;;  %v7794_v26 = vor.u32 %v8788_v28, %v7791_v53  ;;  %4727 = vmatpush.bf16.msra.mxu1 %v7786_v58 }
 0x867   :  { %v4425_v34 = vpop.f32.mrf.mxu2  ;;  %v4438_v48 = vpop.f32.mrf.mxu3 }
 0x868   :  { %v4444_v52 = vadd.f32 %v4425_v34, %v3170_v54  ;;  %v4401_v57 = vpop.f32.mrf.mxu0  ;;  %v4414_v4 = vpop.f32.mrf.mxu1  ;;  %4740 = vmatpush.bf16.msrb.mxu2 %v7790_v60  ;;  %4753 = vmatpush.bf16.msrb.mxu3 %v7794_v26  ;;  %v4445_v56 = vadd.f32 %v4438_v48, %v3199_v43  ;;  %v8849_v43 = vld [vmem:[%s13327_s5 + $0xec] sm:$0xf0] }
 0x86a   :  { %v7778_v32 = vmul.f32 -1.442695, %v4444_v52 }
 0x86b   :  { %v9114_v15 = vpop.eup %9113 }
 0x86c   :  { %v9116_v9 = vpop.eup %9115  ;;  %v4455_v59 = vadd.f32 1.0, %v9114_v15  ;;  %9117 = vpow2.f32 %v7778_v32 }
 0x86d   :  { %v4456_v63 = vadd.f32 1.0, %v9116_v9 }
 0x86e   :  { %9119 = vrcp.f32 %v4455_v59  ;;  %v4469_v50 = vand.u32 2147483648, %v4455_v59  ;;  %v4467_v30 = vand.u32 2147483647, %v4455_v59  ;;  %vm4463_vm15 = vweird.f32 %v4455_v59 }
 0x86f   :  { %9121 = vrcp.f32 %v4456_v63  ;;  %v4427_v8 = vpop.f32.mrf.mxu2  ;;  %v4440_v20 = vpop.f32.mrf.mxu3  ;;  %v4484_v11 = vand.u32 2147483648, %v4456_v63  ;;  %v4482_v57 = vand.u32 2147483647, %v4456_v63  ;;  %vm4478_vm1 = vweird.f32 %v4456_v63 }
 0x870   :  { %v4470_v14 = vor.u32 1.1754944e-38, %v4469_v50  ;;  %vm4468_vm4 = vcmp.eq.f32.partialorder %v4467_v30, 8.507059e+37  ;;  %v8034_v50 = vld [vmem:[%s13327_s5 + $0xf8] sm:$0xf0]  ;;  %v8845_v30 = vld [vmem:[%s13327_s5 + $0xcc] sm:$0xf0] }
 0x871   :  { %v4485_v39 = vor.u32 1.1754944e-38, %v4484_v11  ;;  %vm4483_vm5 = vcmp.eq.f32.partialorder %v4482_v57, 8.507059e+37 }
 0x872   :  { %v9118_v3 = vpop.eup %9117 }
 0x873   :  { %v4457_v33 = vadd.f32 1.0, %v9118_v3  ;;  %v8024_v3 = vld [vmem:[%s13327_s5 + $0xe0] sm:$0xf] }
 0x874   :  { %v9120_v54 = vpop.eup %9119 }
 0x875   :  { %v9122_v6 = vpop.eup %9121  ;;  %v4459_v0 = vmul.f32 %v9120_v54, %v4455_v59  ;;  %9123 = vrcp.f32 %v4457_v33  ;;  %vm4464_vm13 = vweird.f32 %v9120_v54  ;;  %v4499_v60 = vand.u32 2147483648, %v4457_v33 }
 0x876   :  { %v4474_v42 = vmul.f32 %v9122_v6, %v4456_v63  ;;  %9125 = vtanh.f32 %v4445_v56  ;;  %vm4479_vm14 = vweird.f32 %v9122_v6  ;;  %vm4465_vm2 = vmor %vm4463_vm15, %vm4464_vm13  ;;  %vm4493_vm7 = vweird.f32 %v4457_v33  ;;  %v8026_v56 = vld [vmem:[%s13327_s5 + $0xf0] sm:$0xf0] }
 0x877   :  { %v4460_v2 = vsub.f32 1.0, %v4459_v0  ;;  %vm4480_vm3 = vmor %vm4478_vm1, %vm4479_vm14  ;;  %v4497_v9 = vand.u32 2147483647, %v4457_v33  ;;  %v4500_v26 = vor.u32 1.1754944e-38, %v4499_v60  ;;  %v8850_v0 = vld [vmem:[%s13327_s5 + $0xf4] sm:$0xf0] }
 0x878   :  { %v4475_v34 = vsub.f32 1.0, %v4474_v42 }
 0x879   :  { %v4461_v19 = vmul.f32 %v9120_v54, %v4460_v2  ;;  %vm4498_vm9 = vcmp.eq.f32.partialorder %v4497_v9, 8.507059e+37  ;;  %v8840_v9 = vld [vmem:[%s13327_s5 + $0xac] sm:$0xf] }
 0x87a   :  { %v4476_v52 = vmul.f32 %v9122_v6, %v4475_v34  ;;  %v8848_v34 = vld [vmem:[%s13327_s5 + $0xec] sm:$0xf] }
 0x87b   :  { %v9124_v4 = vpop.eup %9123  ;;  %v4462_v61 = vadd.f32 %v9120_v54, %v4461_v19  ;;  %v8037_v11 = vor.u32 %v8848_v34, %v8034_v50  ;;  %v8008_v19 = vld [vmem:[%s13327_s5 + $0xc0] sm:$0xf]  ;;  %v8833_v50 = vld [vmem:[%s13327_s5 + $0x6c] sm:$0xf0] }
 0x87c   :  { %v4489_v48 = vmul.f32 %v9124_v4, %v4457_v33  ;;  %v4477_v13 = vadd.f32 %v9122_v6, %v4476_v52  ;;  %v9126_v1 = vpop.eup %9125  ;;  %vm4494_vm6 = vweird.f32 %v9124_v4  ;;  %v8847_v33 = vld [vmem:[%s13327_s5 + $0xe4] sm:$0xf]  ;;  %v8009_v57 = vor.u32 %v8845_v30, %v8008_v19  ;;  %v7960_v34 = vld [vmem:[%s13327_s5 + $0x60] sm:$0xf] }
 0x87d   :  { %v4466_v23 = vsel %vm4465_vm2, %v9120_v54, %v4462_v61  ;;  %vm4495_vm8 = vmor %vm4493_vm7, %vm4494_vm6  ;;  %v8025_v54 = vor.u32 %v8849_v43, %v8024_v3  ;;  %v8029_v42 = vor.u32 %v8847_v33, %v8026_v56  ;;  %v8843_v52 = vld [vmem:[%s13327_s5 + $0xc4] sm:$0xf]  ;;  %5063 = vmatpush.bf16.msra.mxu3 %v8037_v11  ;;  %v8016_v61 = vld [vmem:[%s13327_s5 + $0xc8] sm:$0xf]  ;;  %v3115_v19 = vadd.f32 %v11694_v36, %v11800_v12 }
 0x87e   :  { %v4490_v16 = vsub.f32 1.0, %v4489_v48  ;;  %v4471_v29 = vsel %vm4468_vm4, %v4470_v14, %v4466_v23  ;;  %v4481_v7 = vsel %vm4480_vm3, %v9122_v6, %v4477_v13  ;;  %v8032_v6 = vld [vmem:[%s13327_s5 + $0xe8] sm:$0xf]  ;;  %v8846_v48 = vld [vmem:[%s13327_s5 + $0xd4] sm:$0xf0]  ;;  %v3144_v30 = vadd.f32 %v11696_v41, %v11803_v21 }
 0x87f   :  { %v4486_v49 = vsel %vm4483_vm5, %v4485_v39, %v4481_v7  ;;  %v4505_v32 = vmul.f32 %v9126_v1, %v4471_v29  ;;  %v8033_v2 = vor.u32 %v8850_v0, %v8032_v6  ;;  %5024 = vmatpush.bf16.msrb.mxu0 %v8025_v54  ;;  %5037 = vmatpush.bf16.msrb.mxu1 %v8029_v42  ;;  %v8844_v39 = vld [vmem:[%s13327_s5 + $0xcc] sm:$0xf]  ;;  %v8018_v23 = vld [vmem:[%s13327_s5 + $0xd8] sm:$0xf0]  ;;  %v8841_v29 = vld [vmem:[%s13327_s5 + $0xac] sm:$0xf0] }
 0x880   :  { %v4491_v58 = vmul.f32 %v9124_v4, %v4490_v16  ;;  %v4504_v28 = vmul.f32 %v4486_v49, %v12359_v24  ;;  %v8017_v13 = vor.u32 %v8846_v48, %v8016_v61  ;;  %v8021_v1 = vor.u32 %v8844_v39, %v8018_v23  ;;  %v7992_v16 = vld [vmem:[%s13327_s5 + $0xa0] sm:$0xf]  ;;  %v8839_v7 = vld [vmem:[%s13327_s5 + $0xa4] sm:$0xf]  ;;  %v7978_v43 = vld [vmem:[%s13327_s5 + $0x90] sm:$0xf0] }
 0x881   :  { %5050 = vmatpush.bf16.msra.mxu2 %v8033_v2  ;;  %v7993_v49 = vor.u32 %v8841_v29, %v7992_v16  ;;  %v7984_v33 = vld [vmem:[%s13327_s5 + $0x88] sm:$0xf]  ;;  %v8838_v54 = vld [vmem:[%s13327_s5 + $0x94] sm:$0xf0]  ;;  %v8836_v0 = vld [vmem:[%s13327_s5 + $0x8c] sm:$0xf] }
 0x882   :  { %v12567_v53 = vadd.f32 %v4505_v32, %v4504_v28  ;;  %v4492_v15 = vadd.f32 %v9124_v4, %v4491_v58  ;;  %5064 = vmatpush.bf16.msra.mxu3 %v8021_v1  ;;  %v7994_v32 = vld [vmem:[%s13327_s5 + $0xb0] sm:$0xf0]  ;;  %v8000_v58 = vld [vmem:[%s13327_s5 + $0xa8] sm:$0xf]  ;;  %v8842_v28 = vld [vmem:[%s13327_s5 + $0xb4] sm:$0xf0]  ;;  %v7985_v6 = vor.u32 %v8838_v54, %v7984_v33 }
 0x883   :  { %5025 = vmatpush.bf16.msrb.mxu0 %v8009_v57  ;;  %v8001_v60 = vor.u32 %v8842_v28, %v8000_v58  ;;  %v7986_v42 = vld [vmem:[%s13327_s5 + $0x98] sm:$0xf0]  ;;  %v8831_v11 = vld [vmem:[%s13327_s5 + $0x64] sm:$0xf]  ;;  %v7962_v57 = vld [vmem:[%s13327_s5 + $0x70] sm:$0xf0] }
 0x884   :  { %9127 = vtanh.f32 %v12567_v53  ;;  %v4496_v59 = vsel %vm4495_vm8, %v9124_v4, %v4492_v15  ;;  %v8010_v4 = vld [vmem:[%s13327_s5 + $0xd0] sm:$0xf0]  ;;  %v7997_v15 = vor.u32 %v8839_v7, %v7994_v32  ;;  %v7989_v2 = vor.u32 %v8836_v0, %v7986_v42  ;;  %v8834_v61 = vld [vmem:[%s13327_s5 + $0x74] sm:$0xf0]  ;;  %v8832_v41 = vld [vmem:[%s13327_s5 + $0x6c] sm:$0xf] }
 0x885   :  { %v4501_v8 = vsel %vm4498_vm9, %v4500_v26, %v4496_v59  ;;  %v8013_v14 = vor.u32 %v8843_v52, %v8010_v4  ;;  %5051 = vmatpush.bf16.msra.mxu2 %v8017_v13  ;;  %v8002_v59 = vld [vmem:[%s13327_s5 + $0xb8] sm:$0xf0]  ;;  %v7961_v52 = vor.u32 %v8833_v50, %v7960_v34  ;;  %v7968_v4 = vld [vmem:[%s13327_s5 + $0x68] sm:$0xf]  ;;  %v7965_v36 = vor.u32 %v8831_v11, %v7962_v57  ;;  %v7944_v29 = vld [vmem:[%s13327_s5 + $0x40] sm:$0xf] }
 0x886   :  { %v8005_v26 = vor.u32 %v8840_v9, %v8002_v59  ;;  %v7969_v13 = vor.u32 %v8834_v61, %v7968_v4  ;;  %v7970_v39 = vld [vmem:[%s13327_s5 + $0x78] sm:$0xf0]  ;;  %v8829_v7 = vld [vmem:[%s13327_s5 + $0x4c] sm:$0xf0]  ;;  %v7952_v9 = vld [vmem:[%s13327_s5 + $0x48] sm:$0xf] }
 0x887   :  { %5038 = vmatpush.bf16.msrb.mxu1 %v8013_v14  ;;  %5026 = vmatpush.bf16.msrb.mxu0 %v7993_v49  ;;  %v7973_v16 = vor.u32 %v8832_v41, %v7970_v39  ;;  %v8827_v49 = vld [vmem:[%s13327_s5 + $0x44] sm:$0xf]  ;;  %v7945_v28 = vor.u32 %v8829_v7, %v7944_v29  ;;  %v8830_v59 = vld [vmem:[%s13327_s5 + $0x54] sm:$0xf0]  ;;  %v7936_v0 = vld [vmem:[%s13327_s5 + $0x28] sm:$0xf] }
 0x888   :  { %5065 = vmatpush.bf16.msra.mxu3 %v8005_v26  ;;  %v8828_v26 = vld [vmem:[%s13327_s5 + $0x4c] sm:$0xf]  ;;  %v8826_v34 = vld [vmem:[%s13327_s5 + $0x34] sm:$0xf0]  ;;  %v7938_v11 = vld [vmem:[%s13327_s5 + $0x38] sm:$0xf0] }
 0x889   :  { %5052 = vmatpush.bf16.msra.mxu2 %v8001_v60  ;;  %v8824_v50 = vld [vmem:[%s13327_s5 + $0x2c] sm:$0xf]  ;;  %v7937_v57 = vor.u32 %v8826_v34, %v7936_v0  ;;  %v7912_v61 = vld [vmem:[%s13327_s5] sm:$0xf]  ;;  %v7920_v41 = vld [vmem:[%s13327_s5 + $0x8] sm:$0xf] }
 0x88a   :  { %v9128_v63 = vpop.eup %9127  ;;  %v7941_v4 = vor.u32 %v8824_v50, %v7938_v11  ;;  %v8822_v39 = vld [vmem:[%s13327_s5 + $0x14] sm:$0xf0]  ;;  %v7922_v29 = vld [vmem:[%s13327_s5 + $0x18] sm:$0xf0] }
 0x88b   :  { %v12570_v20 = vmul.f32 %v9128_v63, %v4501_v8  ;;  %5039 = vmatpush.bf16.msrb.mxu1 %v7997_v15  ;;  %v7976_v63 = vld [vmem:[%s13327_s5 + $0x80] sm:$0xf]  ;;  %v8837_v8 = vld [vmem:[%s13327_s5 + $0x8c] sm:$0xf0]  ;;  %v7946_v15 = vld [vmem:[%s13327_s5 + $0x50] sm:$0xf0] }
 0x88c   :  { %v7977_v3 = vor.u32 %v8837_v8, %v7976_v63  ;;  %5066 = vmatpush.bf16.msra.mxu3 %v7989_v2  ;;  %v7949_v60 = vor.u32 %v8827_v49, %v7946_v15  ;;  %v7953_v63 = vor.u32 %v8830_v59, %v7952_v9  ;;  %v7954_v8 = vld [vmem:[%s13327_s5 + $0x58] sm:$0xf0]  ;;  %v7921_v49 = vor.u32 %v8822_v39, %v7920_v41 }
 0x88d   :  { %v4514_v24 = vpack.c.bf16 %v12570_v20, %v12570_v20  ;;  %5053 = vmatpush.bf16.msra.mxu2 %v7985_v6  ;;  %v7957_v33 = vor.u32 %v8828_v26, %v7954_v8  ;;  %v7930_v6 = vld [vmem:[%s13327_s5 + $0x30] sm:$0xf0]  ;;  %v3202_v26 = vadd.f32 %v11700_v10, %v11939_v62 }
 0x88e   :  { %5027 = vmatpush.bf16.msrb.mxu0 %v7977_v3  ;;  %v8825_v3 = vld [vmem:[%s13327_s5 + $0x2c] sm:$0xf0] }
 0x88f   :  { %4715 = vmatmul.bf16.vlgmr.msra.gmra.mxu0 %v4514_v24  ;;  %4728 = vmatmul.bf16.vlgmr.msra.gmra.mxu1 %v4514_v24 }
 0x890   :  { %4741 = vmatmul.bf16.vlgmr.msrb.gmra.mxu2 %v4514_v24  ;;  %4754 = vmatmul.bf16.vlgmr.msrb.gmra.mxu3 %v4514_v24  ;;  %v8835_v24 = vld [vmem:[%s13327_s5 + $0x84] sm:$0xf] }
 0x891   :  { %v7981_v56 = vor.u32 %v8835_v24, %v7978_v43  ;;  %5054 = vmatpush.bf16.msra.mxu2 %v7969_v13  ;;  %5067 = vmatpush.bf16.msra.mxu3 %v7973_v16  ;;  %v7928_v24 = vld [vmem:[%s13327_s5 + $0x20] sm:$0xf]  ;;  %v3173_v43 = vadd.f32 %v11698_v37, %v11862_v27  ;;  %v7914_v13 = vld [vmem:[%s13327_s5 + $0x10] sm:$0xf0]  ;;  %v8820_v16 = vld [vmem:[%s13327_s5 + $0xc] sm:$0xf] }
 0x892   :  { %5028 = vmatpush.bf16.msrb.mxu0 %v7961_v52  ;;  %v7929_v54 = vor.u32 %v8825_v3, %v7928_v24 }
 0x893   :  { %5040 = vmatpush.bf16.msrb.mxu1 %v7981_v56  ;;  %v8823_v56 = vld [vmem:[%s13327_s5 + $0x24] sm:$0xf] }
 0x894   :  { %v7933_v37 = vor.u32 %v8823_v56, %v7930_v6 }
 0x895   :  { %5055 = vmatpush.bf16.msra.mxu2 %v7953_v63  ;;  %5068 = vmatpush.bf16.msra.mxu3 %v7957_v33 }
 0x896   :  { %5029 = vmatpush.bf16.msrb.mxu0 %v7945_v28  ;;  %v7925_v28 = vor.u32 %v8820_v16, %v7922_v29 }
 0x897   :  { %5041 = vmatpush.bf16.msrb.mxu1 %v7965_v36 }
 0x899   :  { %5056 = vmatpush.bf16.msra.mxu2 %v7937_v57  ;;  %5069 = vmatpush.bf16.msra.mxu3 %v7941_v4 }
 0x89a   :  { %5030 = vmatpush.bf16.msrb.mxu0 %v7929_v54 }
 0x89b   :  { %5042 = vmatpush.bf16.msrb.mxu1 %v7949_v60 }
 0x89d   :  { %5057 = vmatpush.bf16.msra.mxu2 %v7921_v49  ;;  %5070 = vmatpush.bf16.msra.mxu3 %v7925_v28 }
 0x89f   :  { %5043 = vmatpush.bf16.msrb.mxu1 %v7933_v37 }
 0x90c   :  { %v4716_v48 = vpop.f32.mrf.mxu0  ;;  %v4729_v14 = vpop.f32.mrf.mxu1 }
 0x90d   :  { %v4759_v23 = vadd.f32 %v4716_v48, %v3115_v19  ;;  %v4760_v1 = vadd.f32 %v4729_v14, %v3144_v30  ;;  %v8821_v48 = vld [vmem:[%s13327_s5 + $0xc] sm:$0xf0]  ;;  %v8819_v14 = vld [vmem:[%s13327_s5 + $0x4] sm:$0xf] }
 0x90e   :  { %v7913_v36 = vor.u32 %v8821_v48, %v7912_v61 }
 0x90f   :  { %v7907_v32 = vmul.f32 -1.442695, %v4759_v23  ;;  %v7908_v58 = vmul.f32 -1.442695, %v4760_v1  ;;  %v7917_v1 = vor.u32 %v8819_v14, %v7914_v13 }
 0x910   :  { %5031 = vmatpush.bf16.msrb.mxu0 %v7913_v36 }
 0x911   :  { %9129 = vpow2.f32 %v7907_v32  ;;  %5044 = vmatpush.bf16.msrb.mxu1 %v7917_v1 }
 0x912   :  { %9131 = vpow2.f32 %v7908_v58 }
 0x913   :  { %v4742_v42 = vpop.f32.mrf.mxu2  ;;  %v4755_v2 = vpop.f32.mrf.mxu3 }
 0x914   :  { %v4761_v19 = vadd.f32 %v4742_v42, %v3173_v43  ;;  %v4718_v30 = vpop.f32.mrf.mxu0  ;;  %v4731_v52 = vpop.f32.mrf.mxu1  ;;  %v4762_v24 = vadd.f32 %v4755_v2, %v3202_v26  ;;  %v8157_v26 = vld [vmem:[%s13327_s5 + $0xf0] sm:$0xf0] }
 0x916   :  { %v7909_v23 = vmul.f32 -1.442695, %v4761_v19 }
 0x917   :  { %v9130_v7 = vpop.eup %9129 }
 0x918   :  { %v9132_v32 = vpop.eup %9131  ;;  %v4772_v58 = vadd.f32 1.0, %v9130_v7  ;;  %9133 = vpow2.f32 %v7909_v23 }
 0x919   :  { %v4773_v15 = vadd.f32 1.0, %v9132_v32 }
 0x91a   :  { %9135 = vrcp.f32 %v4772_v58  ;;  %v4786_v6 = vand.u32 2147483648, %v4772_v58  ;;  %v4784_v37 = vand.u32 2147483647, %v4772_v58  ;;  %vm4780_vm12 = vweird.f32 %v4772_v58 }
 0x91b   :  { %9137 = vrcp.f32 %v4773_v15  ;;  %v4744_v60 = vpop.f32.mrf.mxu2  ;;  %v4757_v9 = vpop.f32.mrf.mxu3  ;;  %v4801_v0 = vand.u32 2147483648, %v4773_v15  ;;  %v4799_v50 = vand.u32 2147483647, %v4773_v15  ;;  %vm4795_vm13 = vweird.f32 %v4773_v15 }
 0x91c   :  { %v4787_v19 = vor.u32 1.1754944e-38, %v4786_v6  ;;  %vm4785_vm1 = vcmp.eq.f32.partialorder %v4784_v37, 8.507059e+37  ;;  %v8881_v60 = vld [vmem:[%s13327_s5 + $0xec] sm:$0xf0]  ;;  %v8879_v9 = vld [vmem:[%s13327_s5 + $0xe4] sm:$0xf] }
 0x91d   :  { %v4802_v52 = vor.u32 1.1754944e-38, %v4801_v0  ;;  %vm4800_vm2 = vcmp.eq.f32.partialorder %v4799_v50, 8.507059e+37  ;;  %v8877_v6 = vld [vmem:[%s13327_s5 + $0xcc] sm:$0xf0]  ;;  %v8875_v0 = vld [vmem:[%s13327_s5 + $0xc4] sm:$0xf] }
 0x91e   :  { %v9134_v59 = vpop.eup %9133  ;;  %v8141_v37 = vld [vmem:[%s13327_s5 + $0xd0] sm:$0xf0]  ;;  %v8878_v50 = vld [vmem:[%s13327_s5 + $0xd4] sm:$0xf0] }
 0x91f   :  { %v4774_v63 = vadd.f32 1.0, %v9134_v59 }
 0x920   :  { %v9136_v8 = vpop.eup %9135 }
 0x921   :  { %v9138_v3 = vpop.eup %9137  ;;  %v4776_v43 = vmul.f32 %v9136_v8, %v4772_v58  ;;  %9139 = vrcp.f32 %v4774_v63  ;;  %vm4781_vm10 = vweird.f32 %v9136_v8  ;;  %v4816_v16 = vand.u32 2147483648, %v4774_v63 }
 0x922   :  { %v4791_v33 = vmul.f32 %v9138_v3, %v4773_v15  ;;  %9141 = vtanh.f32 %v4762_v24  ;;  %vm4796_vm11 = vweird.f32 %v9138_v3  ;;  %vm4782_vm14 = vmor %vm4780_vm12, %vm4781_vm10  ;;  %vm4810_vm4 = vweird.f32 %v4774_v63  ;;  %v8155_v15 = vld [vmem:[%s13327_s5 + $0xe0] sm:$0xf] }
 0x923   :  { %v4777_v54 = vsub.f32 1.0, %v4776_v43  ;;  %vm4797_vm15 = vmor %vm4795_vm13, %vm4796_vm11  ;;  %v4814_v29 = vand.u32 2147483647, %v4774_v63  ;;  %v4817_v49 = vor.u32 1.1754944e-38, %v4816_v16  ;;  %v8156_v59 = vor.u32 %v8881_v60, %v8155_v15  ;;  %v8880_v43 = vld [vmem:[%s13327_s5 + $0xec] sm:$0xf] }
 0x924   :  { %v4792_v56 = vsub.f32 1.0, %v4791_v33  ;;  %v8160_v24 = vor.u32 %v8879_v9, %v8157_v26  ;;  %v8165_v33 = vld [vmem:[%s13327_s5 + $0xf8] sm:$0xf0]  ;;  %v8870_v15 = vld [vmem:[%s13327_s5 + $0x94] sm:$0xf0] }
 0x925   :  { %v4778_v42 = vmul.f32 %v9136_v8, %v4777_v54  ;;  %vm4815_vm6 = vcmp.eq.f32.partialorder %v4814_v29, 8.507059e+37  ;;  %5341 = vmatpush.bf16.msra.mxu0 %v8156_v59  ;;  %v8168_v54 = vor.u32 %v8880_v43, %v8165_v33  ;;  %v8107_v29 = vld [vmem:[%s13327_s5 + $0x80] sm:$0xf]  ;;  %v8868_v59 = vld [vmem:[%s13327_s5 + $0x8c] sm:$0xf]  ;;  %v3117_v43 = vadd.f32 %v11702_v46, %v11800_v12 }
 0x926   :  { %v4793_v34 = vmul.f32 %v9138_v3, %v4792_v56  ;;  %5354 = vmatpush.bf16.msra.mxu1 %v8160_v24  ;;  %v8139_v56 = vld [vmem:[%s13327_s5 + $0xc0] sm:$0xf]  ;;  %v8117_v26 = vld [vmem:[%s13327_s5 + $0x98] sm:$0xf0]  ;;  %v8865_v24 = vld [vmem:[%s13327_s5 + $0x6c] sm:$0xf0]  ;;  %v3146_v33 = vadd.f32 %v11704_v40, %v11803_v21 }
 0x927   :  { %v9140_v11 = vpop.eup %9139  ;;  %v4779_v10 = vadd.f32 %v9136_v8, %v4778_v42  ;;  %5380 = vmatpush.bf16.msrb.mxu3 %v8168_v54  ;;  %v8140_v42 = vor.u32 %v8877_v6, %v8139_v56  ;;  %v8093_v56 = vld [vmem:[%s13327_s5 + $0x70] sm:$0xf0]  ;;  %v8099_v6 = vld [vmem:[%s13327_s5 + $0x68] sm:$0xf]  ;;  %v8864_v40 = vld [vmem:[%s13327_s5 + $0x6c] sm:$0xf] }
 0x928   :  { %v4806_v2 = vmul.f32 %v9140_v11, %v4774_v63  ;;  %v4794_v30 = vadd.f32 %v9138_v3, %v4793_v34  ;;  %v9142_v4 = vpop.eup %9141  ;;  %vm4811_vm3 = vweird.f32 %v9140_v11  ;;  %v8163_v63 = vld [vmem:[%s13327_s5 + $0xe8] sm:$0xf] }
 0x929   :  { %v4783_v57 = vsel %vm4782_vm14, %v9136_v8, %v4779_v10  ;;  %vm4812_vm5 = vmor %vm4810_vm4, %vm4811_vm3  ;;  %v8882_v8 = vld [vmem:[%s13327_s5 + $0xf4] sm:$0xf0]  ;;  %v8147_v34 = vld [vmem:[%s13327_s5 + $0xc8] sm:$0xf]  ;;  %5342 = vmatpush.bf16.msra.mxu0 %v8140_v42 }
 0x92a   :  { %v4807_v61 = vsub.f32 1.0, %v4806_v2  ;;  %v4788_v48 = vsel %vm4785_vm1, %v4787_v19, %v4783_v57  ;;  %v4798_v14 = vsel %vm4797_vm15, %v9138_v3, %v4794_v30  ;;  %v8164_v3 = vor.u32 %v8882_v8, %v8163_v63  ;;  %v8876_v2 = vld [vmem:[%s13327_s5 + $0xcc] sm:$0xf]  ;;  %v8149_v19 = vld [vmem:[%s13327_s5 + $0xd8] sm:$0xf0] }
 0x92b   :  { %v4803_v36 = vsel %vm4800_vm2, %v4802_v52, %v4798_v14  ;;  %v4822_v13 = vmul.f32 %v9142_v4, %v4788_v48  ;;  %v8148_v10 = vor.u32 %v8878_v50, %v8147_v34  ;;  %v8152_v30 = vor.u32 %v8876_v2, %v8149_v19  ;;  %v8123_v52 = vld [vmem:[%s13327_s5 + $0xa0] sm:$0xf]  ;;  %v8873_v57 = vld [vmem:[%s13327_s5 + $0xac] sm:$0xf0]  ;;  %v8871_v4 = vld [vmem:[%s13327_s5 + $0xa4] sm:$0xf] }
 0x92c   :  { %v4808_v41 = vmul.f32 %v9140_v11, %v4807_v61  ;;  %v4821_v39 = vmul.f32 %v4803_v36, %v12567_v53  ;;  %5367 = vmatpush.bf16.msrb.mxu2 %v8164_v3  ;;  %v8124_v61 = vor.u32 %v8873_v57, %v8123_v52  ;;  %v8125_v48 = vld [vmem:[%s13327_s5 + $0xb0] sm:$0xf0]  ;;  %v8131_v14 = vld [vmem:[%s13327_s5 + $0xa8] sm:$0xf]  ;;  %v8874_v36 = vld [vmem:[%s13327_s5 + $0xb4] sm:$0xf0]  ;;  %v8120_v63 = vor.u32 %v8868_v59, %v8117_v26 }
 0x92d   :  { %5381 = vmatpush.bf16.msrb.mxu3 %v8152_v30  ;;  %v8091_v8 = vld [vmem:[%s13327_s5 + $0x60] sm:$0xf]  ;;  %v8863_v3 = vld [vmem:[%s13327_s5 + $0x64] sm:$0xf]  ;;  %v8101_v50 = vld [vmem:[%s13327_s5 + $0x78] sm:$0xf0] }
 0x92e   :  { %v12775_v23 = vadd.f32 %v4822_v13, %v4821_v39  ;;  %v4809_v1 = vadd.f32 %v9140_v11, %v4808_v41  ;;  %v8128_v13 = vor.u32 %v8871_v4, %v8125_v48  ;;  %v8132_v41 = vor.u32 %v8874_v36, %v8131_v14  ;;  %v8872_v39 = vld [vmem:[%s13327_s5 + $0xac] sm:$0xf]  ;;  %5343 = vmatpush.bf16.msra.mxu0 %v8124_v61  ;;  %v8075_v19 = vld [vmem:[%s13327_s5 + $0x40] sm:$0xf]  ;;  %v8861_v30 = vld [vmem:[%s13327_s5 + $0x4c] sm:$0xf0] }
 0x92f   :  { %v8092_v54 = vor.u32 %v8865_v24, %v8091_v8  ;;  %v8096_v46 = vor.u32 %v8863_v3, %v8093_v56  ;;  %v8104_v2 = vor.u32 %v8864_v40, %v8101_v50  ;;  %v8859_v52 = vld [vmem:[%s13327_s5 + $0x44] sm:$0xf]  ;;  %v8076_v61 = vor.u32 %v8861_v30, %v8075_v19  ;;  %v8077_v48 = vld [vmem:[%s13327_s5 + $0x50] sm:$0xf0]  ;;  %v8083_v36 = vld [vmem:[%s13327_s5 + $0x48] sm:$0xf] }
 0x930   :  { %9143 = vtanh.f32 %v12775_v23  ;;  %v4813_v7 = vsel %vm4812_vm5, %v9140_v11, %v4809_v1  ;;  %v8144_v11 = vor.u32 %v8875_v0, %v8141_v37  ;;  %5368 = vmatpush.bf16.msrb.mxu2 %v8148_v10  ;;  %v8133_v1 = vld [vmem:[%s13327_s5 + $0xb8] sm:$0xf0]  ;;  %v8866_v0 = vld [vmem:[%s13327_s5 + $0x74] sm:$0xf0]  ;;  %v8080_v14 = vor.u32 %v8859_v52, %v8077_v48  ;;  %v8856_v26 = vld [vmem:[%s13327_s5 + $0x2c] sm:$0xf] }
 0x931   :  { %v4818_v58 = vsel %vm4815_vm6, %v4817_v49, %v4813_v7  ;;  %v8136_v16 = vor.u32 %v8872_v39, %v8133_v1  ;;  %v8869_v7 = vld [vmem:[%s13327_s5 + $0x8c] sm:$0xf0]  ;;  %v8867_v49 = vld [vmem:[%s13327_s5 + $0x84] sm:$0xf]  ;;  %v8100_v34 = vor.u32 %v8866_v0, %v8099_v6  ;;  %v8085_v1 = vld [vmem:[%s13327_s5 + $0x58] sm:$0xf0] }
 0x932   :  { %5355 = vmatpush.bf16.msra.mxu1 %v8144_v11  ;;  %v8858_v59 = vld [vmem:[%s13327_s5 + $0x34] sm:$0xf0]  ;;  %v8853_v56 = vld [vmem:[%s13327_s5 + $0xc] sm:$0xf0]  ;;  %v8851_v6 = vld [vmem:[%s13327_s5 + $0x4] sm:$0xf] }
 0x933   :  { %5382 = vmatpush.bf16.msrb.mxu3 %v8136_v16  ;;  %v8059_v16 = vld [vmem:[%s13327_s5 + $0x20] sm:$0xf]  ;;  %v8852_v50 = vld [vmem:[%s13327_s5 + $0xc] sm:$0xf] }
 0x934   :  { %5369 = vmatpush.bf16.msrb.mxu2 %v8132_v41  ;;  %v8860_v41 = vld [vmem:[%s13327_s5 + $0x4c] sm:$0xf] }
 0x936   :  { %v9144_v32 = vpop.eup %9143  ;;  %5356 = vmatpush.bf16.msra.mxu1 %v8128_v13  ;;  %v8862_v13 = vld [vmem:[%s13327_s5 + $0x54] sm:$0xf0] }
 0x937   :  { %v12778_v28 = vmul.f32 %v9144_v32, %v4818_v58  ;;  %v8108_v32 = vor.u32 %v8869_v7, %v8107_v29  ;;  %v8109_v58 = vld [vmem:[%s13327_s5 + $0x90] sm:$0xf0]  ;;  %5383 = vmatpush.bf16.msrb.mxu3 %v8120_v63  ;;  %v8084_v39 = vor.u32 %v8862_v13, %v8083_v36  ;;  %v8857_v29 = vld [vmem:[%s13327_s5 + $0x2c] sm:$0xf0]  ;;  %v3175_v7 = vadd.f32 %v11715_v17, %v11862_v27  ;;  %v8069_v63 = vld [vmem:[%s13327_s5 + $0x38] sm:$0xf0] }
 0x938   :  { %v8112_v60 = vor.u32 %v8867_v49, %v8109_v58  ;;  %v8088_v49 = vor.u32 %v8860_v41, %v8085_v1  ;;  %v8855_v58 = vld [vmem:[%s13327_s5 + $0x24] sm:$0xf] }
 0x939   :  { %v4831_v53 = vpack.c.bf16 %v12778_v28, %v12778_v28  ;;  %5344 = vmatpush.bf16.msra.mxu0 %v8108_v32  ;;  %v8060_v32 = vor.u32 %v8857_v29, %v8059_v16 }
 0x93a   :  { %5357 = vmatpush.bf16.msra.mxu1 %v8112_v60 }
 0x93b   :  { %5032 = vmatmul.bf16.vlgmr.msrb.gmra.mxu0 %v4831_v53  ;;  %5045 = vmatmul.bf16.vlgmr.msrb.gmra.mxu1 %v4831_v53 }
 0x93c   :  { %5058 = vmatmul.bf16.vlgmr.msra.gmra.mxu2 %v4831_v53  ;;  %5071 = vmatmul.bf16.vlgmr.msra.gmra.mxu3 %v4831_v53  ;;  %v8115_v53 = vld [vmem:[%s13327_s5 + $0x88] sm:$0xf] }
 0x93d   :  { %v8116_v9 = vor.u32 %v8870_v15, %v8115_v53  ;;  %5345 = vmatpush.bf16.msra.mxu0 %v8092_v54  ;;  %5384 = vmatpush.bf16.msrb.mxu3 %v8104_v2  ;;  %v8061_v53 = vld [vmem:[%s13327_s5 + $0x30] sm:$0xf0]  ;;  %v8067_v15 = vld [vmem:[%s13327_s5 + $0x28] sm:$0xf]  ;;  %v8043_v54 = vld [vmem:[%s13327_s5] sm:$0xf] }
 0x93e   :  { %5358 = vmatpush.bf16.msra.mxu1 %v8096_v46  ;;  %v8064_v17 = vor.u32 %v8855_v58, %v8061_v53  ;;  %v8044_v0 = vor.u32 %v8853_v56, %v8043_v54  ;;  %v8854_v46 = vld [vmem:[%s13327_s5 + $0x14] sm:$0xf0] }
 0x93f   :  { %5370 = vmatpush.bf16.msrb.mxu2 %v8116_v9 }
 0x941   :  { %5346 = vmatpush.bf16.msra.mxu0 %v8076_v61  ;;  %5385 = vmatpush.bf16.msrb.mxu3 %v8088_v49 }
 0x942   :  { %5359 = vmatpush.bf16.msra.mxu1 %v8080_v14  ;;  %v3204_v14 = vadd.f32 %v11717_v18, %v11939_v62 }
 0x943   :  { %5371 = vmatpush.bf16.msrb.mxu2 %v8100_v34 }
 0x945   :  { %5347 = vmatpush.bf16.msra.mxu0 %v8060_v32 }
 0x946   :  { %5360 = vmatpush.bf16.msra.mxu1 %v8064_v17 }
 0x947   :  { %5372 = vmatpush.bf16.msrb.mxu2 %v8084_v39 }
 0x949   :  { %5348 = vmatpush.bf16.msra.mxu0 %v8044_v0 }
 0x9b8   :  { %v5033_v42 = vpop.f32.mrf.mxu0  ;;  %v5046_v37 = vpop.f32.mrf.mxu1 }
 0x9b9   :  { %v5076_v11 = vadd.f32 %v5033_v42, %v3117_v43  ;;  %v5077_v10 = vadd.f32 %v5046_v37, %v3146_v33  ;;  %v8068_v43 = vor.u32 %v8858_v59, %v8067_v15  ;;  %v8072_v33 = vor.u32 %v8856_v26, %v8069_v63  ;;  %v8045_v42 = vld [vmem:[%s13327_s5 + $0x10] sm:$0xf0]  ;;  %v8051_v37 = vld [vmem:[%s13327_s5 + $0x8] sm:$0xf] }
 0x9ba   :  { %v8048_v40 = vor.u32 %v8851_v6, %v8045_v42  ;;  %v8052_v2 = vor.u32 %v8854_v46, %v8051_v37 }
 0x9bb   :  { %v8038_v57 = vmul.f32 -1.442695, %v5076_v11  ;;  %v8039_v4 = vmul.f32 -1.442695, %v5077_v10  ;;  %v8053_v11 = vld [vmem:[%s13327_s5 + $0x18] sm:$0xf0]  ;;  %5373 = vmatpush.bf16.msrb.mxu2 %v8068_v43  ;;  %5386 = vmatpush.bf16.msrb.mxu3 %v8072_v33 }
 0x9bc   :  { %v8056_v52 = vor.u32 %v8852_v50, %v8053_v11  ;;  %5361 = vmatpush.bf16.msra.mxu1 %v8048_v40 }
 0x9bd   :  { %9145 = vpow2.f32 %v8038_v57 }
 0x9be   :  { %9147 = vpow2.f32 %v8039_v4 }
 0x9bf   :  { %v5059_v60 = vpop.f32.mrf.mxu2  ;;  %v5072_v9 = vpop.f32.mrf.mxu3  ;;  %5374 = vmatpush.bf16.msrb.mxu2 %v8052_v2  ;;  %5387 = vmatpush.bf16.msrb.mxu3 %v8056_v52 }
 0x9c0   :  { %v5078_v8 = vadd.f32 %v5059_v60, %v3175_v7  ;;  %v5035_v24 = vpop.f32.mrf.mxu0  ;;  %v5048_v3 = vpop.f32.mrf.mxu1  ;;  %v5079_v41 = vadd.f32 %v5072_v9, %v3204_v14  ;;  %v8905_v14 = vld [vmem:[%s13327_s5 + $0xac] sm:$0xf0] }
 0x9c2   :  { %v8040_v34 = vmul.f32 -1.442695, %v5078_v8 }
 0x9c3   :  { %v9146_v10 = vpop.eup %9145 }
 0x9c4   :  { %v9148_v19 = vpop.eup %9147  ;;  %v5089_v30 = vadd.f32 1.0, %v9146_v10  ;;  %9149 = vpow2.f32 %v8040_v34 }
 0x9c5   :  { %v5090_v57 = vadd.f32 1.0, %v9148_v19  ;;  %v8286_v19 = vld [vmem:[%s13327_s5 + $0xe0] sm:$0xf] }
 0x9c6   :  { %9151 = vrcp.f32 %v5089_v30  ;;  %v5103_v49 = vand.u32 2147483648, %v5089_v30  ;;  %v5101_v53 = vand.u32 2147483647, %v5089_v30  ;;  %vm5097_vm9 = vweird.f32 %v5089_v30 }
 0x9c7   :  { %9153 = vrcp.f32 %v5090_v57  ;;  %v5061_v4 = vpop.f32.mrf.mxu2  ;;  %v5074_v61 = vpop.f32.mrf.mxu3  ;;  %v5118_v32 = vand.u32 2147483648, %v5090_v57  ;;  %v5116_v60 = vand.u32 2147483647, %v5090_v57  ;;  %vm5112_vm10 = vweird.f32 %v5090_v57 }
 0x9c8   :  { %v5104_v59 = vor.u32 1.1754944e-38, %v5103_v49  ;;  %vm5102_vm13 = vcmp.eq.f32.partialorder %v5101_v53, 8.507059e+37  ;;  %v8909_v4 = vld [vmem:[%s13327_s5 + $0xcc] sm:$0xf0]  ;;  %v8914_v49 = vld [vmem:[%s13327_s5 + $0xf4] sm:$0xf0] }
 0x9c9   :  { %v5119_v63 = vor.u32 1.1754944e-38, %v5118_v32  ;;  %vm5117_vm14 = vcmp.eq.f32.partialorder %v5116_v60, 8.507059e+37  ;;  %v8912_v32 = vld [vmem:[%s13327_s5 + $0xec] sm:$0xf]  ;;  %v8222_v60 = vld [vmem:[%s13327_s5 + $0x60] sm:$0xf] }
 0x9ca   :  { %v9150_v48 = vpop.eup %9149 }
 0x9cb   :  { %v5091_v36 = vadd.f32 1.0, %v9150_v48  ;;  %v8254_v48 = vld [vmem:[%s13327_s5 + $0xa0] sm:$0xf] }
 0x9cc   :  { %v9152_v13 = vpop.eup %9151 }
 0x9cd   :  { %v9154_v39 = vpop.eup %9153  ;;  %v5093_v1 = vmul.f32 %v9152_v13, %v5089_v30  ;;  %9155 = vrcp.f32 %v5091_v36  ;;  %vm5098_vm7 = vweird.f32 %v9152_v13  ;;  %v5133_v46 = vand.u32 2147483648, %v5091_v36  ;;  %v8913_v30 = vld [vmem:[%s13327_s5 + $0xec] sm:$0xf0] }
 0x9ce   :  { %v5108_v16 = vmul.f32 %v9154_v39, %v5090_v57  ;;  %9157 = vtanh.f32 %v5079_v41  ;;  %vm5113_vm8 = vweird.f32 %v9154_v39  ;;  %vm5099_vm11 = vmor %vm5097_vm9, %vm5098_vm7  ;;  %vm5127_vm1 = vweird.f32 %v5091_v36  ;;  %v8270_v57 = vld [vmem:[%s13327_s5 + $0xc0] sm:$0xf]  ;;  %v8901_v41 = vld [vmem:[%s13327_s5 + $0x8c] sm:$0xf0] }
 0x9cf   :  { %v5094_v29 = vsub.f32 1.0, %v5093_v1  ;;  %vm5114_vm12 = vmor %vm5112_vm10, %vm5113_vm8  ;;  %v5131_v34 = vand.u32 2147483647, %v5091_v36  ;;  %v5134_v50 = vor.u32 1.1754944e-38, %v5133_v46  ;;  %v8287_v52 = vor.u32 %v8913_v30, %v8286_v19  ;;  %v8911_v1 = vld [vmem:[%s13327_s5 + $0xe4] sm:$0xf] }
 0x9d0   :  { %v5109_v7 = vsub.f32 1.0, %v5108_v16  ;;  %v8271_v61 = vor.u32 %v8909_v4, %v8270_v57  ;;  %v8288_v16 = vld [vmem:[%s13327_s5 + $0xf0] sm:$0xf0]  ;;  %v8262_v46 = vld [vmem:[%s13327_s5 + $0xa8] sm:$0xf] }
 0x9d1   :  { %v5095_v58 = vmul.f32 %v9152_v13, %v5094_v29  ;;  %vm5132_vm3 = vcmp.eq.f32.partialorder %v5131_v34, 8.507059e+37  ;;  %5658 = vmatpush.bf16.msrb.mxu0 %v8287_v52  ;;  %v8294_v29 = vld [vmem:[%s13327_s5 + $0xe8] sm:$0xf]  ;;  %v8190_v19 = vld [vmem:[%s13327_s5 + $0x20] sm:$0xf] }
 0x9d2   :  { %v5110_v15 = vmul.f32 %v9154_v39, %v5109_v7  ;;  %v8291_v7 = vor.u32 %v8911_v1, %v8288_v16  ;;  %v8295_v53 = vor.u32 %v8914_v49, %v8294_v29  ;;  %v8889_v30 = vld [vmem:[%s13327_s5 + $0x2c] sm:$0xf0]  ;;  %v8899_v57 = vld [vmem:[%s13327_s5 + $0x84] sm:$0xf]  ;;  %v8240_v4 = vld [vmem:[%s13327_s5 + $0x90] sm:$0xf0] }
 0x9d3   :  { %v9156_v17 = vpop.eup %9155  ;;  %v5096_v18 = vadd.f32 %v9152_v13, %v5095_v58  ;;  %v8296_v58 = vld [vmem:[%s13327_s5 + $0xf8] sm:$0xf0]  ;;  %v8191_v52 = vor.u32 %v8889_v30, %v8190_v19  ;;  %v8174_v1 = vld [vmem:[%s13327_s5] sm:$0xf]  ;;  %v8885_v16 = vld [vmem:[%s13327_s5 + $0xc] sm:$0xf0] }
 0x9d4   :  { %v5123_v9 = vmul.f32 %v9156_v17, %v5091_v36  ;;  %v5111_v26 = vadd.f32 %v9154_v39, %v5110_v15  ;;  %v9158_v24 = vpop.eup %9157  ;;  %vm5128_vm15 = vweird.f32 %v9156_v17  ;;  %v8255_v36 = vor.u32 %v8905_v14, %v8254_v48  ;;  %5671 = vmatpush.bf16.msrb.mxu1 %v8291_v7  ;;  %5684 = vmatpush.bf16.msra.mxu2 %v8295_v53  ;;  %v8902_v14 = vld [vmem:[%s13327_s5 + $0x94] sm:$0xf0]  ;;  %v8895_v7 = vld [vmem:[%s13327_s5 + $0x64] sm:$0xf]  ;;  %v8224_v49 = vld [vmem:[%s13327_s5 + $0x70] sm:$0xf0] }
 0x9d5   :  { %v5100_v8 = vsel %vm5099_vm11, %v9152_v13, %v5096_v18  ;;  %vm5129_vm2 = vmor %vm5127_vm1, %vm5128_vm15  ;;  %5659 = vmatpush.bf16.msrb.mxu0 %v8271_v61  ;;  %v8238_v13 = vld [vmem:[%s13327_s5 + $0x80] sm:$0xf]  ;;  %v8299_v15 = vor.u32 %v8912_v32, %v8296_v58  ;;  %v8246_v61 = vld [vmem:[%s13327_s5 + $0x88] sm:$0xf]  ;;  %v8243_v48 = vor.u32 %v8899_v57, %v8240_v4  ;;  %v8175_v29 = vor.u32 %v8885_v16, %v8174_v1 }
 0x9d6   :  { %v5124_v3 = vsub.f32 1.0, %v5123_v9  ;;  %v5105_v43 = vsel %vm5102_vm13, %v5104_v59, %v5100_v8  ;;  %v5115_v33 = vsel %vm5114_vm12, %v9154_v39, %v5111_v26  ;;  %v8239_v39 = vor.u32 %v8901_v41, %v8238_v13  ;;  %v8907_v9 = vld [vmem:[%s13327_s5 + $0xc4] sm:$0xf]  ;;  %v8272_v59 = vld [vmem:[%s13327_s5 + $0xd0] sm:$0xf0] }
 0x9d7   :  { %v5120_v54 = vsel %vm5117_vm14, %v5119_v63, %v5115_v33  ;;  %v5139_v56 = vmul.f32 %v9158_v24, %v5105_v43  ;;  %5697 = vmatpush.bf16.msra.mxu3 %v8299_v15  ;;  %v8278_v26 = vld [vmem:[%s13327_s5 + $0xc8] sm:$0xf]  ;;  %v8275_v63 = vor.u32 %v8907_v9, %v8272_v59  ;;  %v8910_v8 = vld [vmem:[%s13327_s5 + $0xd4] sm:$0xf0]  ;;  %v8908_v24 = vld [vmem:[%s13327_s5 + $0xcc] sm:$0xf]  ;;  %v8247_v41 = vor.u32 %v8902_v14, %v8246_v61 }
 0x9d8   :  { %v5125_v6 = vmul.f32 %v9156_v17, %v5124_v3  ;;  %v5138_v0 = vmul.f32 %v5120_v54, %v12775_v23  ;;  %v8280_v3 = vld [vmem:[%s13327_s5 + $0xd8] sm:$0xf0]  ;;  %v8279_v43 = vor.u32 %v8910_v8, %v8278_v26  ;;  %v8206_v54 = vld [vmem:[%s13327_s5 + $0x40] sm:$0xf]  ;;  %v8230_v32 = vld [vmem:[%s13327_s5 + $0x68] sm:$0xf]  ;;  %v3120_v58 = vadd.f32 %v11728_v51, %v11800_v12 }
 0x9d9   :  { %5660 = vmatpush.bf16.msrb.mxu0 %v8255_v36  ;;  %v8283_v33 = vor.u32 %v8908_v24, %v8280_v3  ;;  %5672 = vmatpush.bf16.msrb.mxu1 %v8275_v63  ;;  %v8900_v36 = vld [vmem:[%s13327_s5 + $0x8c] sm:$0xf]  ;;  %v8248_v13 = vld [vmem:[%s13327_s5 + $0x98] sm:$0xf0]  ;;  %v3149_v53 = vadd.f32 %v11730_v22, %v11803_v21  ;;  %v8227_v15 = vor.u32 %v8895_v7, %v8224_v49  ;;  %v8891_v24 = vld [vmem:[%s13327_s5 + $0x44] sm:$0xf] }
 0x9da   :  { %v12983_v42 = vadd.f32 %v5139_v56, %v5138_v0  ;;  %v5126_v37 = vadd.f32 %v9156_v17, %v5125_v6  ;;  %v8893_v56 = vld [vmem:[%s13327_s5 + $0x4c] sm:$0xf0]  ;;  %5685 = vmatpush.bf16.msra.mxu2 %v8279_v43  ;;  %v8903_v0 = vld [vmem:[%s13327_s5 + $0xa4] sm:$0xf]  ;;  %v8926_v22 = vld [vmem:[%s13329_s8 + $0x38] sm:$0xff] }
 0x9db   :  { %5698 = vmatpush.bf16.msra.mxu3 %v8283_v33  ;;  %v8207_v6 = vor.u32 %v8893_v56, %v8206_v54  ;;  %v8208_v3 = vld [vmem:[%s13327_s5 + $0x50] sm:$0xf0]  ;;  %v8214_v43 = vld [vmem:[%s13327_s5 + $0x48] sm:$0xf]  ;;  %v8890_v30 = vld [vmem:[%s13327_s5 + $0x34] sm:$0xf0] }
 0x9dc   :  { %9159 = vtanh.f32 %v12983_v42  ;;  %v5130_v40 = vsel %vm5129_vm2, %v9156_v17, %v5126_v37  ;;  %v8897_v17 = vld [vmem:[%s13327_s5 + $0x6c] sm:$0xf0]  ;;  %v8256_v37 = vld [vmem:[%s13327_s5 + $0xb0] sm:$0xf0]  ;;  %v8211_v56 = vor.u32 %v8891_v24, %v8208_v3  ;;  %v8200_v57 = vld [vmem:[%s13327_s5 + $0x38] sm:$0xf0]  ;;  %v3207_v3 = vadd.f32 %v11778_v5, %v11939_v62 }
 0x9dd   :  { %v5135_v10 = vsel %vm5132_vm3, %v5134_v50, %v5130_v40  ;;  %5661 = vmatpush.bf16.msrb.mxu0 %v8239_v39  ;;  %v8223_v18 = vor.u32 %v8897_v17, %v8222_v60  ;;  %v8259_v34 = vor.u32 %v8903_v0, %v8256_v37  ;;  %v8906_v40 = vld [vmem:[%s13327_s5 + $0xb4] sm:$0xf0]  ;;  %v8904_v50 = vld [vmem:[%s13327_s5 + $0xac] sm:$0xf]  ;;  %v8251_v39 = vor.u32 %v8900_v36, %v8248_v13  ;;  %v8883_v36 = vld [vmem:[%s13327_s5 + $0x4] sm:$0xf] }
 0x9de   :  { %v8898_v60 = vld [vmem:[%s13327_s5 + $0x74] sm:$0xf0]  ;;  %v8896_v17 = vld [vmem:[%s13327_s5 + $0x6c] sm:$0xf]  ;;  %v8176_v13 = vld [vmem:[%s13327_s5 + $0x10] sm:$0xf0] }
 0x9df   :  { %5673 = vmatpush.bf16.msrb.mxu1 %v8259_v34  ;;  %v8231_v51 = vor.u32 %v8898_v60, %v8230_v32  ;;  %v8892_v37 = vld [vmem:[%s13327_s5 + $0x4c] sm:$0xf]  ;;  %v8925_v34 = vld [vmem:[%s13329_s8 + $0x30] sm:$0xff]  ;;  %v8182_v16 = vld [vmem:[%s13327_s5 + $0x8] sm:$0xf]  ;;  %v8179_v49 = vor.u32 %v8883_v36, %v8176_v13 }
 0x9e0   :  { %v8924_v14 = vld [vmem:[%s13329_s8 + $0x28] sm:$0xff]  ;;  %v8184_v32 = vld [vmem:[%s13327_s5 + $0x18] sm:$0xf0] }
 0x9e1   :  { %5662 = vmatpush.bf16.msrb.mxu0 %v8223_v18  ;;  %v8232_v18 = vld [vmem:[%s13327_s5 + $0x78] sm:$0xf0]  ;;  %v8884_v7 = vld [vmem:[%s13327_s5 + $0xc] sm:$0xf] }
 0x9e2   :  { %v9160_v11 = vpop.eup %9159  ;;  %v8235_v26 = vor.u32 %v8896_v17, %v8232_v18  ;;  %v8187_v60 = vor.u32 %v8884_v7, %v8184_v32  ;;  %v8923_v17 = vld [vmem:[%s13329_s8 + $0x20] sm:$0xff]  ;;  %v8920_v5 = vld [vmem:[%s13329_s8 + $0x8] sm:$0xff] }
 0x9e3   :  { %v12986_v2 = vmul.f32 %v9160_v11, %v5135_v10  ;;  %v8264_v11 = vld [vmem:[%s13327_s5 + $0xb8] sm:$0xf0]  ;;  %v8263_v10 = vor.u32 %v8906_v40, %v8262_v46  ;;  %5674 = vmatpush.bf16.msrb.mxu1 %v8243_v48 }
 0x9e4   :  { %v8216_v46 = vld [vmem:[%s13327_s5 + $0x58] sm:$0xf0] }
 0x9e5   :  { %v5148_v23 = vpack.c.bf16 %v12986_v2, %v12986_v2  ;;  %5663 = vmatpush.bf16.msrb.mxu0 %v8207_v6  ;;  %5686 = vmatpush.bf16.msra.mxu2 %v8263_v10  ;;  %v8894_v6 = vld [vmem:[%s13327_s5 + $0x54] sm:$0xf0]  ;;  %v8219_v40 = vor.u32 %v8892_v37, %v8216_v46  ;;  %v8198_v10 = vld [vmem:[%s13327_s5 + $0x28] sm:$0xf] }
 0x9e6   :  { %v8215_v0 = vor.u32 %v8894_v6, %v8214_v43  ;;  %v8916_v37 = vld [vmem:[%s13330_s7 + $0x8] sm:$0xff] }
 0x9e7   :  { %5349 = vmatmul.bf16.vlgmr.msra.gmra.mxu0 %v5148_v23  ;;  %5362 = vmatmul.bf16.vlgmr.msra.gmra.mxu1 %v5148_v23 }
 0x9e8   :  { %5375 = vmatmul.bf16.vlgmr.msrb.gmra.mxu2 %v5148_v23  ;;  %5388 = vmatmul.bf16.vlgmr.msrb.gmra.mxu3 %v5148_v23  ;;  %v8267_v23 = vor.u32 %v8904_v50, %v8264_v11  ;;  %v8887_v50 = vld [vmem:[%s13327_s5 + $0x24] sm:$0xf]  ;;  %v8192_v11 = vld [vmem:[%s13327_s5 + $0x30] sm:$0xf0] }
 0x9e9   :  { %5664 = vmatpush.bf16.msrb.mxu0 %v8191_v52  ;;  %5687 = vmatpush.bf16.msra.mxu2 %v8247_v41  ;;  %v8195_v19 = vor.u32 %v8887_v50, %v8192_v11  ;;  %v8888_v52 = vld [vmem:[%s13327_s5 + $0x2c] sm:$0xf] }
 0x9ea   :  { %5699 = vmatpush.bf16.msra.mxu3 %v8267_v23  ;;  %5675 = vmatpush.bf16.msrb.mxu1 %v8227_v15  ;;  %v3178_v23 = vadd.f32 %v11776_v47, %v11862_v27  ;;  %v8199_v47 = vor.u32 %v8890_v30, %v8198_v10  ;;  %v8203_v48 = vor.u32 %v8888_v52, %v8200_v57 }
 0x9ed   :  { %5665 = vmatpush.bf16.msrb.mxu0 %v8175_v29  ;;  %5688 = vmatpush.bf16.msra.mxu2 %v8231_v51  ;;  %v8886_v29 = vld [vmem:[%s13327_s5 + $0x14] sm:$0xf0] }
 0x9ee   :  { %5700 = vmatpush.bf16.msra.mxu3 %v8251_v39  ;;  %5676 = vmatpush.bf16.msrb.mxu1 %v8211_v56 }
 0x9f1   :  { %5874 = vmatpush.bf16.msra.mxu0 %v8926_v22  ;;  %5689 = vmatpush.bf16.msra.mxu2 %v8215_v0  ;;  %v8922_v22 = vld [vmem:[%s13329_s8 + $0x18] sm:$0xff] }
 0x9f2   :  { %5701 = vmatpush.bf16.msra.mxu3 %v8235_v26  ;;  %5677 = vmatpush.bf16.msrb.mxu1 %v8195_v19  ;;  %v8915_v19 = vld [vmem:[%s13330_s7] sm:$0xff] }
 0x9f5   :  { %5875 = vmatpush.bf16.msra.mxu0 %v8925_v34  ;;  %5690 = vmatpush.bf16.msra.mxu2 %v8199_v47 }
 0x9f6   :  { %5702 = vmatpush.bf16.msra.mxu3 %v8219_v40  ;;  %5678 = vmatpush.bf16.msrb.mxu1 %v8179_v49 }
 0x9f9   :  { %5876 = vmatpush.bf16.msra.mxu0 %v8924_v14 }
 0x9fa   :  { %5703 = vmatpush.bf16.msra.mxu3 %v8203_v48 }
 0x9fd   :  { %5877 = vmatpush.bf16.msra.mxu0 %v8923_v17 }
 0x9fe   :  { %5704 = vmatpush.bf16.msra.mxu3 %v8187_v60 }
 0xa01   :  { %5878 = vmatpush.bf16.msra.mxu0 %v8922_v22  ;;  %v5779_v22 = vld [vmem:[%s13323_s0 + $0x8] sm:$0xff] }
 0xa64   :  { %v5350_v9 = vpop.f32.mrf.mxu0  ;;  %v5363_v59 = vpop.f32.mrf.mxu1 }
 0xa65   :  { %v5393_v63 = vadd.f32 %v5350_v9, %v3120_v58  ;;  %v5394_v8 = vadd.f32 %v5363_v59, %v3149_v53  ;;  %v8183_v53 = vor.u32 %v8886_v29, %v8182_v16 }
 0xa67   :  { %v8169_v33 = vmul.f32 -1.442695, %v5393_v63  ;;  %v8170_v54 = vmul.f32 -1.442695, %v5394_v8  ;;  %5691 = vmatpush.bf16.msra.mxu2 %v8183_v53  ;;  %v8918_v63 = vld [vmem:[%s13330_s7 + $0x18] sm:$0xff]  ;;  %v8917_v8 = vld [vmem:[%s13330_s7 + $0x10] sm:$0xff] }
 0xa68   :  { %5943 = vmatpush.bf16.msra.mxu1 %v8918_v63 }
 0xa69   :  { %9161 = vpow2.f32 %v8169_v33  ;;  %v8921_v33 = vld [vmem:[%s13329_s8 + $0x10] sm:$0xff] }
 0xa6a   :  { %9163 = vpow2.f32 %v8170_v54  ;;  %5879 = vmatpush.bf16.msra.mxu0 %v8921_v33  ;;  %v5807_v33 = vpack.c.bf16 %v12570_v20, %v12362_v25  ;;  %v3122_v25 = vadd.f32 %v11789_v31, %v11800_v12  ;;  %v3151_v20 = vadd.f32 %v11791_v38, %v11803_v21 }
 0xa6b   :  { %v5376_v4 = vpop.f32.mrf.mxu2  ;;  %v5389_v61 = vpop.f32.mrf.mxu3  ;;  %v3180_v31 = vadd.f32 %v11842_v35, %v11862_v27  ;;  %v13277_v35 = vld [vmem:[%s13331_s9] ss:$0 sm:$0xff] }
 0xa6c   :  { %v5395_v41 = vadd.f32 %v5376_v4, %v3178_v23  ;;  %v5352_v39 = vpop.f32.mrf.mxu0  ;;  %v5365_v1 = vpop.f32.mrf.mxu1  ;;  %v5396_v56 = vadd.f32 %v5389_v61, %v3207_v3  ;;  %5944 = vmatpush.bf16.msra.mxu1 %v8917_v8  ;;  %v8919_v61 = vld [vmem:[%s13329_s8] sm:$0xff]  ;;  %v5806_v8 = vpack.c.bf16 %v12154_v44, %v11946_v55  ;;  %v5781_v3 = vld [vmem:[%s13323_s0 + $0x18] sm:$0xff]  ;;  %v5783_v44 = vld [vmem:[%s13323_s0 + $0x28] sm:$0xff] }
 0xa6d   :  { %v5782_v55 = vld [vmem:[%s13323_s0 + $0x20] sm:$0xff] }
 0xa6e   :  { %v8171_v58 = vmul.f32 -1.442695, %v5395_v41  ;;  %5880 = vmatpush.bf16.msra.mxu0 %v8920_v5 }
 0xa6f   :  { %v9162_v15 = vpop.eup %9161 }
 0xa70   :  { %v9164_v18 = vpop.eup %9163  ;;  %v5406_v9 = vadd.f32 1.0, %v9162_v15  ;;  %9165 = vpow2.f32 %v8171_v58  ;;  %5945 = vmatpush.bf16.msra.mxu1 %v8916_v37 }
 0xa71   :  { %v5407_v59 = vadd.f32 1.0, %v9164_v18 }
 0xa72   :  { %9167 = vrcp.f32 %v5406_v9  ;;  %v5420_v50 = vand.u32 2147483648, %v5406_v9  ;;  %v5418_v23 = vand.u32 2147483647, %v5406_v9  ;;  %vm5414_vm6 = vweird.f32 %v5406_v9  ;;  %5881 = vmatpush.bf16.msra.mxu0 %v8919_v61 }
 0xa73   :  { %9169 = vrcp.f32 %v5407_v59  ;;  %v5378_v51 = vpop.f32.mrf.mxu2  ;;  %v5391_v26 = vpop.f32.mrf.mxu3  ;;  %v5435_v11 = vand.u32 2147483648, %v5407_v59  ;;  %v5433_v52 = vand.u32 2147483647, %v5407_v59  ;;  %vm5429_vm7 = vweird.f32 %v5407_v59 }
 0xa74   :  { %v5421_v48 = vor.u32 1.1754944e-38, %v5420_v50  ;;  %vm5419_vm10 = vcmp.eq.f32.partialorder %v5418_v23, 8.507059e+37  ;;  %5946 = vmatpush.bf16.msra.mxu1 %v8915_v19  ;;  %v5778_v26 = vld [vmem:[%s13323_s0] sm:$0xff] }
 0xa75   :  { %v5436_v36 = vor.u32 1.1754944e-38, %v5435_v11  ;;  %vm5434_vm11 = vcmp.eq.f32.partialorder %v5433_v52, 8.507059e+37  ;;  %v5786_v63 = vpack.c.bf16 %v5779_v22, %v5778_v26 }
 0xa76   :  { %v9166_v24 = vpop.eup %9165 }
 0xa77   :  { %v5408_v43 = vadd.f32 1.0, %v9166_v24  ;;  %v5780_v24 = vld [vmem:[%s13323_s0 + $0x10] sm:$0xff] }
 0xa78   :  { %v9168_v54 = vpop.eup %9167 }
 0xa79   :  { %v9170_v6 = vpop.eup %9169  ;;  %v5410_v0 = vmul.f32 %v9168_v54, %v5406_v9  ;;  %9171 = vrcp.f32 %v5408_v43  ;;  %vm5415_vm4 = vweird.f32 %v9168_v54  ;;  %v5450_v15 = vand.u32 2147483648, %v5408_v43 }
 0xa7a   :  { %v5425_v46 = vmul.f32 %v9170_v6, %v5407_v59  ;;  %9173 = vtanh.f32 %v5396_v56  ;;  %vm5430_vm5 = vweird.f32 %v9170_v6  ;;  %vm5416_vm8 = vmor %vm5414_vm6, %vm5415_vm4  ;;  %vm5444_vm13 = vweird.f32 %v5408_v43 }
 0xa7b   :  { %v5411_v34 = vsub.f32 1.0, %v5410_v0  ;;  %vm5431_vm9 = vmor %vm5429_vm7, %vm5430_vm5  ;;  %v5448_v60 = vand.u32 2147483647, %v5408_v43  ;;  %v5451_v18 = vor.u32 1.1754944e-38, %v5450_v15  ;;  %v5808_v56 = vpack.c.bf16 %v12986_v2, %v12778_v28  ;;  %v5785_v28 = vld [vmem:[%s13323_s0 + $0x38] sm:$0xff] }
 0xa7c   :  { %v5426_v40 = vsub.f32 1.0, %v5425_v46 }
 0xa7d   :  { %v5412_v10 = vmul.f32 %v9168_v54, %v5411_v34  ;;  %vm5449_vm15 = vcmp.eq.f32.partialorder %v5448_v60, 8.507059e+37 }
 0xa7e   :  { %v5427_v30 = vmul.f32 %v9170_v6, %v5426_v40  ;;  %v5784_v40 = vld [vmem:[%s13323_s0 + $0x30] sm:$0xff] }
 0xa7f   :  { %v9172_v57 = vpop.eup %9171  ;;  %v5413_v4 = vadd.f32 %v9168_v54, %v5412_v10  ;;  %v5789_v2 = vpack.c.bf16 %v5785_v28, %v5784_v40 }
 0xa80   :  { %v5440_v47 = vmul.f32 %v9172_v57, %v5408_v43  ;;  %v5428_v14 = vadd.f32 %v9170_v6, %v5427_v30  ;;  %v9174_v41 = vpop.eup %9173  ;;  %vm5445_vm12 = vweird.f32 %v9172_v57  ;;  %v5787_v43 = vpack.c.bf16 %v5781_v3, %v5780_v24 }
 0xa81   :  { %v5417_v13 = vsel %vm5416_vm8, %v9168_v54, %v5413_v4  ;;  %vm5446_vm14 = vmor %vm5444_vm13, %vm5445_vm12  ;;  %v5788_v54 = vpack.c.bf16 %v5783_v44, %v5782_v55 }
 0xa82   :  { %v5441_v39 = vsub.f32 1.0, %v5440_v47  ;;  %v5422_v1 = vsel %vm5419_vm10, %v5421_v48, %v5417_v13  ;;  %v5432_v16 = vsel %vm5431_vm9, %v9170_v6, %v5428_v14  ;;  %v3209_v14 = vadd.f32 %v11844_v45, %v11939_v62 }
 0xa83   :  { %v5437_v29 = vsel %vm5434_vm11, %v5436_v36, %v5432_v16  ;;  %v5456_v7 = vmul.f32 %v9174_v41, %v5422_v1 }
 0xa84   :  { %v5442_v49 = vmul.f32 %v9172_v57, %v5441_v39  ;;  %v5455_v32 = vmul.f32 %v5437_v29, %v12983_v42 }
 0xa86   :  { %v13227_v58 = vadd.f32 %v5456_v7, %v5455_v32  ;;  %v5443_v53 = vadd.f32 %v9172_v57, %v5442_v49 }
 0xa88   :  { %9175 = vtanh.f32 %v13227_v58  ;;  %v5447_v17 = vsel %vm5446_vm14, %v9172_v57, %v5443_v53 }
 0xa89   :  { %v5452_v59 = vsel %vm5449_vm15, %v5451_v18, %v5447_v17 }
 0xa8e   :  { %v9176_v9 = vpop.eup %9175 }
 0xa8f   :  { %v13230_v51 = vmul.f32 %v9176_v9, %v5452_v59 }
 0xa91   :  { %v5465_v42 = vpack.c.bf16 %v13230_v51, %v13230_v51 }
 0xa93   :  { %5666 = vmatmul.bf16.vlgmr.msrb.gmra.mxu0 %v5465_v42  ;;  %5679 = vmatmul.bf16.vlgmr.msrb.gmra.mxu1 %v5465_v42 }
 0xa94   :  { %5692 = vmatmul.bf16.vlgmr.msra.gmra.mxu2 %v5465_v42  ;;  %5705 = vmatmul.bf16.vlgmr.msra.gmra.mxu3 %v5465_v42 }
 0xaa3   :  { %5882 = vmatmul.bf16.vlgmr.msra.gmra.mxu0 %v5806_v8  ;;  %8351 = vmatmul.msk.bf16.vlgmr.msra.gmra.mxu1 %vm154_vm0, %v5786_v63 }
 0xab3   :  { %5887 = vmatmul.bf16.gmra.mxu0 %v5807_v33  ;;  %8352 = vmatmul.msk.bf16.gmra.mxu1 %vm154_vm0, %v5787_v43 }
 0xac3   :  { %5892 = vmatmul.bf16.gmra.mxu0 %v5808_v56  ;;  %8353 = vmatmul.msk.bf16.gmra.mxu1 %vm154_vm0, %v5788_v54 }
 0xad3   :  { %8354 = vmatmul.msk.bf16.gmra.mxu1 %vm154_vm0, %v5789_v2 }
 0xb10   :  { %v5667_v6 = vpop.f32.mrf.mxu0  ;;  %v5680_v0 = vpop.f32.mrf.mxu1 }
 0xb11   :  { %v5710_v37 = vadd.f32 %v5667_v6, %v3122_v25  ;;  %v5711_v46 = vadd.f32 %v5680_v0, %v3151_v20 }
 0xb13   :  { %v8300_v34 = vmul.f32 -1.442695, %v5710_v37  ;;  %v8301_v5 = vmul.f32 -1.442695, %v5711_v46 }
 0xb15   :  { %9177 = vpow2.f32 %v8300_v34 }
 0xb16   :  { %9179 = vpow2.f32 %v8301_v5 }
 0xb17   :  { %v5693_v38 = vpop.f32.mrf.mxu2  ;;  %v5706_v12 = vpop.f32.mrf.mxu3 }
 0xb18   :  { %v5712_v21 = vadd.f32 %v5693_v38, %v3180_v31  ;;  %v5669_v50 = vpop.f32.mrf.mxu0  ;;  %v5682_v11 = vpop.f32.mrf.mxu1  ;;  %v5713_v39 = vadd.f32 %v5706_v12, %v3209_v14 }
 0xb1a   :  { %v8302_v10 = vmul.f32 -1.442695, %v5712_v21 }
 0xb1b   :  { %v9178_v23 = vpop.eup %9177 }
 0xb1c   :  { %v9180_v19 = vpop.eup %9179  ;;  %v5723_v30 = vadd.f32 1.0, %v9178_v23  ;;  %9181 = vpow2.f32 %v8302_v10 }
 0xb1d   :  { %v5724_v52 = vadd.f32 1.0, %v9180_v19 }
 0xb1e   :  { %9183 = vrcp.f32 %v5723_v30  ;;  %v5735_v32 = vand.u32 2147483647, %v5723_v30  ;;  %v5737_v53 = vand.u32 2147483648, %v5723_v30  ;;  %vm5731_vm2 = vweird.f32 %v5723_v30 }
 0xb1f   :  { %9185 = vrcp.f32 %v5724_v52  ;;  %v5695_v57 = vpop.f32.mrf.mxu2  ;;  %v5708_v4 = vpop.f32.mrf.mxu3  ;;  %v5752_v15 = vand.u32 2147483648, %v5724_v52  ;;  %v5750_v9 = vand.u32 2147483647, %v5724_v52  ;;  %vm5746_vm3 = vweird.f32 %v5724_v52 }
 0xb20   :  { %v5883_v27 = vpop.f32.mrf.mxu0  ;;  %v5948_v61 = vpop.f32.mrf.mxu1  ;;  %v5738_v63 = vor.u32 1.1754944e-38, %v5737_v53  ;;  %vm5736_vm6 = vcmp.eq.f32.partialorder %v5735_v32, 8.507059e+37 }
 0xb21   :  { %v5949_v47 = vadd.f32 %v5948_v61, %v5883_v27  ;;  %v5753_v24 = vor.u32 1.1754944e-38, %v5752_v15  ;;  %vm5751_vm7 = vcmp.eq.f32.partialorder %v5750_v9, 8.507059e+37 }
 0xb22   :  { %v9182_v48 = vpop.eup %9181 }
 0xb23   :  { %v13281_v36 = vadd.f32 1.0, %v9182_v48  ;;  %v5972_v13 = vadd.f32 %v13277_v35, %v5949_v47 }
 0xb24   :  { %v9184_v41 = vpop.eup %9183 }
 0xb25   :  { %v9186_v1 = vpop.eup %9185  ;;  %v5727_v16 = vmul.f32 %v9184_v41, %v5723_v30  ;;  %9187 = vrcp.f32 %v13281_v36  ;;  %5980 = vst [vmem:[%s13332_s10] sm:$0xff] %v5972_v13  ;;  %vm5732_vm0 = vweird.f32 %v9184_v41  ;;  %v5767_v40 = vand.u32 2147483648, %v13281_v36 }
 0xb26   :  { %v5742_v29 = vmul.f32 %v9186_v1, %v5724_v52  ;;  %9189 = vtanh.f32 %v5713_v39  ;;  %vm5747_vm1 = vweird.f32 %v9186_v1  ;;  %vm5733_vm4 = vmor %vm5731_vm2, %vm5732_vm0  ;;  %vm5761_vm9 = vweird.f32 %v13281_v36 }
 0xb27   :  { %v5728_v7 = vsub.f32 1.0, %v5727_v16  ;;  %vm5748_vm5 = vmor %vm5746_vm3, %vm5747_vm1  ;;  %v5768_v38 = vor.u32 1.1754944e-38, %v5767_v40 }
 0xb28   :  { %v5743_v49 = vsub.f32 1.0, %v5742_v29  ;;  %v5885_v45 = vpop.f32.mrf.mxu0  ;;  %v5950_v62 = vpop.f32.mrf.mxu1 }
 0xb29   :  { %v5729_v60 = vmul.f32 %v9184_v41, %v5728_v7  ;;  %v5951_v17 = vadd.f32 %v5950_v62, %v5885_v45 }
 0xb2a   :  { %v5744_v18 = vmul.f32 %v9186_v1, %v5743_v49 }
 0xb2b   :  { %v9188_v59 = vpop.eup %9187  ;;  %v5730_v42 = vadd.f32 %v9184_v41, %v5729_v60  ;;  %v5973_v26 = vadd.f32 %v13277_v35, %v5951_v17 }
 0xb2c   :  { %v5757_v22 = vmul.f32 %v9188_v59, %v13281_v36  ;;  %v5745_v8 = vadd.f32 %v9186_v1, %v5744_v18  ;;  %v9190_v43 = vpop.eup %9189  ;;  %vm5762_vm8 = vweird.f32 %v9188_v59 }
 0xb2d   :  { %v5734_v3 = vsel %vm5733_vm4, %v9184_v41, %v5730_v42  ;;  %5981 = vst [vmem:[%s13332_s10 + $0x8] sm:$0xff] %v5973_v26  ;;  %vm5763_vm10 = vmor %vm5761_vm9, %vm5762_vm8 }
 0xb2e   :  { %v5758_v33 = vsub.f32 1.0, %v5757_v22  ;;  %v5739_v55 = vsel %vm5736_vm6, %v5738_v63, %v5734_v3  ;;  %v5749_v44 = vsel %vm5748_vm5, %v9186_v1, %v5745_v8 }
 0xb2f   :  { %v5754_v54 = vsel %vm5751_vm7, %v5753_v24, %v5749_v44  ;;  %v5773_v56 = vmul.f32 %v9190_v43, %v5739_v55 }
 0xb30   :  { %v5772_v25 = vmul.f32 %v5754_v54, %v13227_v58  ;;  %v5888_v20 = vpop.f32.mrf.mxu0  ;;  %v5953_v6 = vpop.f32.mrf.mxu1  ;;  %v5759_v0 = vmul.f32 %v9188_v59, %v5758_v33  ;;  %v5765_v58 = vand.u32 2147483647, %v13281_v36 }
 0xb31   :  { %v5954_v37 = vadd.f32 %v5953_v6, %v5888_v20 }
 0xb32   :  { %v5774_v46 = vadd.f32 %v5773_v56, %v5772_v25  ;;  %v5760_v5 = vadd.f32 %v9188_v59, %v5759_v0  ;;  %vm5766_vm11 = vcmp.eq.f32.partialorder %v5765_v58, 8.507059e+37 }
 0xb33   :  { %v5974_v34 = vadd.f32 %v13277_v35, %v5954_v37 }
 0xb34   :  { %9191 = vtanh.f32 %v5774_v46  ;;  %v5764_v28 = vsel %vm5763_vm10, %v9188_v59, %v5760_v5 }
 0xb35   :  { %5982 = vst [vmem:[%s13332_s10 + $0x10] sm:$0xff] %v5974_v34  ;;  %v5769_v50 = vsel %vm5766_vm11, %v5768_v38, %v5764_v28 }
 0xb38   :  { %v5890_v2 = vpop.f32.mrf.mxu0  ;;  %v5955_v31 = vpop.f32.mrf.mxu1 }
 0xb39   :  { %v5956_v12 = vadd.f32 %v5955_v31, %v5890_v2 }
 0xb3a   :  { %v9192_v21 = vpop.eup %9191 }
 0xb3b   :  { %v5975_v11 = vadd.f32 %v13277_v35, %v5956_v12  ;;  %v5776_v10 = vmul.f32 %v9192_v21, %v5769_v50 }
 0xb3d   :  { %5983 = vst [vmem:[%s13332_s10 + $0x18] sm:$0xff] %v5975_v11  ;;  %v5809_v23 = vpack.c.bf16 %v5776_v10, %v13230_v51 }
 0xb3f   :  { %5897 = vmatmul.bf16.gmra.mxu0 %v5809_v23 }
 0xb40   :  { %v5893_v19 = vpop.f32.mrf.mxu0  ;;  %v5958_v30 = vpop.f32.mrf.mxu1 }
 0xb41   :  { %v5959_v52 = vadd.f32 %v5958_v30, %v5893_v19 }
 0xb43   :  { %v5976_v57 = vadd.f32 %v13277_v35, %v5959_v52 }
 0xb45   :  { %5984 = vst [vmem:[%s13332_s10 + $0x20] sm:$0xff] %v5976_v57 }
 0xb48   :  { %v5895_v4 = vpop.f32.mrf.mxu0  ;;  %v5960_v27 = vpop.f32.mrf.mxu1 }
 0xb49   :  { %v5961_v61 = vadd.f32 %v5960_v27, %v5895_v4 }
 0xb4b   :  { %v5977_v47 = vadd.f32 %v13277_v35, %v5961_v61 }
 0xb4d   :  { %5985 = vst [vmem:[%s13332_s10 + $0x28] sm:$0xff] %v5977_v47 }
 0xb50   :  { %v5963_v51 = vpop.f32.mrf.mxu1 }
 0xb58   :  { %v5965_v13 = vpop.f32.mrf.mxu1 }
 0xbbc   :  { %v5898_v48 = vpop.f32.mrf.mxu0 }
 0xbbd   :  { %v5964_v14 = vadd.f32 %v5963_v51, %v5898_v48 }
 0xbbf   :  { %v5978_v36 = vadd.f32 %v13277_v35, %v5964_v14 }
 0xbc1   :  { %5986 = vst [vmem:[%s13332_s10 + $0x30] sm:$0xff] %v5978_v36 }
 0xbc4   :  { %v5900_v41 = vpop.f32.mrf.mxu0 }
 0xbc5   :  { %v5966_v39 = vadd.f32 %v5965_v13, %v5900_v41 }
 0xbc7   :  { %v5979_v1 = vadd.f32 %v13277_v35, %v5966_v39 }
 0xbc9   :  { %5987 = vst [vmem:[%s13332_s10 + $0x38] sm:$0xff] %v5979_v1 }

</bundles_post_ra>
